<compile_context>
chip_gen: v5e
topology: v5e:2x2
jax: 0.10.0
libtpu: 0.0.40
codegen_flags: <defaults>
</compile_context>

<pallas_src>
import functools
import math

import jax
import jax.numpy as jnp
from jax.experimental import pallas as pl
from jax.experimental.pallas import tpu as pltpu

LN_EPS = 1e-6     # nn.LayerNorm eps (AdaLayerNormZero / norm2 / norm2_context)
RMS_EPS = 1e-6    # qk rms_norm eps


def _gelu_tanh(x):
    c = math.sqrt(2.0 / math.pi)
    return 0.5 * x * (1.0 + jnp.tanh(c * (x + 0.044715 * x * x * x)))


def _seq_tile(n, target=256):
    """Largest multiple-of-8 divisor of n that is <= target (falls back to n)."""
    best = n
    for t in range(8, min(n, target) + 1, 8):
        if n % t == 0:
            best = t
    return best


def _feat_tile(n, target=512):
    """Largest multiple-of-128 divisor of n that is <= target (falls back to n)."""
    best = n
    for t in range(128, min(n, target) + 1, 128):
        if n % t == 0:
            best = t
    return best


# ----------------------------- kernels ---------------------------------------


def _silu_linear_kernel(x_ref, w_ref, b_ref, o_ref):
    # AdaLayerNormZero temb path: silu(x) @ W + b (both streams' weights concatenated).
    x = x_ref[...]
    x = x * (1.0 / (1.0 + jnp.exp(-x)))                      # silu in f32 (VPU/EUP)
    o_ref[...] = (jnp.dot(x.astype(jnp.bfloat16), w_ref[...],
                          preferred_element_type=jnp.float32) + b_ref[...]
                  ).astype(o_ref.dtype)


def _adaln_qkv_kernel(x_ref, shift_ref, scale_ref, w_ref, b_ref, o_ref):
    # Fused LayerNorm(no affine) + (1+scale)*x + shift, then QKV projection (one fused weight).
    x = x_ref[0]                                             # (ts, D) f32
    mean = jnp.mean(x, axis=-1, keepdims=True)
    var = jnp.mean(jnp.square(x - mean), axis=-1, keepdims=True)
    xn = (x - mean) * jax.lax.rsqrt(var + LN_EPS)
    xm = xn * (1.0 + scale_ref[0]) + shift_ref[0]            # f32 modulation
    o_ref[0] = (jnp.dot(xm.astype(jnp.bfloat16), w_ref[...],
                        preferred_element_type=jnp.float32) + b_ref[...]
                ).astype(o_ref.dtype)


def _flash_attn_kernel(q_ref, k_ref, v_ref, qw_ref, kw_ref, aqw_ref, akw_ref, gate_ref,
                       o_ref, m_scr, l_scr, acc_scr, *, sc, scale, tq, tkv):
    # One (batch, head, q-tile) block; KV streamed over the last ("arbitrary") grid axis with
    # online softmax.  RMSNorm(q/k) weights selected per row: context rows (< sc) use the
    # "added" weights, image rows the regular ones.
    h = pl.program_id(1)
    qi = pl.program_id(2)
    ki = pl.program_id(3)

    @pl.when(ki == 0)
    def _init():
        m_scr[...] = jnp.full_like(m_scr, -jnp.inf)
        l_scr[...] = jnp.zeros_like(l_scr)
        acc_scr[...] = jnp.zeros_like(acc_scr)

    q = q_ref[0].astype(jnp.float32)                         # (tq, Dh)
    k = k_ref[0].astype(jnp.float32)                         # (tkv, Dh)

    q_rows = qi * tq + jax.lax.broadcasted_iota(jnp.int32, (tq, 1), 0)
    k_rows = ki * tkv + jax.lax.broadcasted_iota(jnp.int32, (tkv, 1), 0)
    qw = jnp.where(q_rows < sc, aqw_ref[...], qw_ref[...])   # (tq, Dh)
    kw = jnp.where(k_rows < sc, akw_ref[...], kw_ref[...])   # (tkv, Dh)

    q = q * jax.lax.rsqrt(jnp.mean(q * q, axis=-1, keepdims=True) + RMS_EPS) * qw
    k = k * jax.lax.rsqrt(jnp.mean(k * k, axis=-1, keepdims=True) + RMS_EPS) * kw

    s = jax.lax.dot_general(q.astype(jnp.bfloat16), k.astype(jnp.bfloat16),
                            (((1,), (1,)), ((), ())),
                            preferred_element_type=jnp.float32) * scale   # (tq, tkv)

    m_prev = m_scr[...]
    m_new = jnp.maximum(m_prev, jnp.max(s, axis=-1, keepdims=True))
    alpha = jnp.exp(m_prev - m_new)
    p = jnp.exp(s - m_new)
    l_scr[...] = alpha * l_scr[...] + jnp.sum(p, axis=-1, keepdims=True)
    acc_scr[...] = alpha * acc_scr[...] + jnp.dot(p.astype(jnp.bfloat16), v_ref[0],
                                                  preferred_element_type=jnp.float32)
    m_scr[...] = m_new

    @pl.when(ki == pl.num_programs(3) - 1)
    def _finish():
        inv_l = pl.reciprocal(l_scr[...], approx=True)
        # TODO(synk): exact PDM Gate parameterization unknown; modeled as a per-head
        # multiplicative gate (identity when the gate value is 1.0).
        o_ref[0] = (acc_scr[...] * inv_l * gate_ref[h]).astype(o_ref.dtype)


def _gated_linear_kernel(x_ref, w_ref, b_ref, res_ref, gate_ref, o_ref, acc_ref):
    # out = res + gate[:,None] * (x @ W + b), K accumulated on-chip, epilogue fused.
    k = pl.program_id(3)

    @pl.when(k == 0)
    def _init():
        acc_ref[...] = jnp.zeros_like(acc_ref)

    acc_ref[...] += jnp.dot(x_ref[0], w_ref[...], preferred_element_type=jnp.float32)

    @pl.when(k == pl.num_programs(3) - 1)
    def _finish():
        o_ref[0] = (res_ref[0] + gate_ref[0] * (acc_ref[...] + b_ref[...])
                    ).astype(o_ref.dtype)


def _gated_ffn_kernel(x_ref, shift_ref, scale_ref, w1_ref, b1_ref, fg_ref, w2_ref, b2_ref,
                      gate_ref, o_ref, acc_ref):
    # out = x + gate[:,None] * ( (gelu_tanh(mod(LN(x)) @ W1 + b1) * ff_gate) @ W2 + b2 )
    # The ff_inner axis is the last ("arbitrary") grid axis; the (ts, ff_inner) intermediate is
    # never materialized — only a (ts, tf) slab lives in VMEM per step.
    f = pl.program_id(2)

    @pl.when(f == 0)
    def _init():
        acc_ref[...] = jnp.zeros_like(acc_ref)

    x = x_ref[0]                                             # (ts, D) f32 (also the residual)
    mean = jnp.mean(x, axis=-1, keepdims=True)
    var = jnp.mean(jnp.square(x - mean), axis=-1, keepdims=True)
    xn = (x - mean) * jax.lax.rsqrt(var + LN_EPS)
    xm = xn * (1.0 + scale_ref[0]) + shift_ref[0]

    h = jnp.dot(xm.astype(jnp.bfloat16), w1_ref[...],
                preferred_element_type=jnp.float32) + b1_ref[...]          # (ts, tf) f32
    h = _gelu_tanh(h) * fg_ref[...]                                        # f32 elementwise
    acc_ref[...] += jnp.dot(h.astype(jnp.bfloat16), w2_ref[...],
                            preferred_element_type=jnp.float32)

    @pl.when(f == pl.num_programs(2) - 1)
    def _finish():
        o_ref[0] = (x + gate_ref[0] * (acc_ref[...] + b2_ref[...])).astype(o_ref.dtype)


# ----------------------------- wrappers ---------------------------------------


def silu_linear(x, w_bf16, b):
    B, D = x.shape
    N = w_bf16.shape[1]
    tn = _feat_tile(N)
    return pl.pallas_call(
        _silu_linear_kernel,
        out_shape=jax.ShapeDtypeStruct((B, N), jnp.float32),
        grid=(N // tn,),
        in_specs=[
            pl.BlockSpec((B, D), lambda n: (0, 0)),
            pl.BlockSpec((D, tn), lambda n: (0, n)),
            pl.BlockSpec((1, tn), lambda n: (0, n)),
        ],
        out_specs=pl.BlockSpec((B, tn), lambda n: (0, n)),
        compiler_params=pltpu.CompilerParams(dimension_semantics=("parallel",)),
    )(x, w_bf16, b)


def adaln_qkv(x, shift, scale, w_bf16, b):
    B, S, D = x.shape
    N = w_bf16.shape[1]
    ts = _seq_tile(S)
    tn = _feat_tile(N)
    return pl.pallas_call(
        _adaln_qkv_kernel,
        out_shape=jax.ShapeDtypeStruct((B, S, N), jnp.bfloat16),
        grid=(B, S // ts, N // tn),
        in_specs=[
            pl.BlockSpec((1, ts, D), lambda b, s, n: (b, s, 0)),
            pl.BlockSpec((1, 1, D), lambda b, s, n: (b, 0, 0)),
            pl.BlockSpec((1, 1, D), lambda b, s, n: (b, 0, 0)),
            pl.BlockSpec((D, tn), lambda b, s, n: (0, n)),
            pl.BlockSpec((1, tn), lambda b, s, n: (0, n)),
        ],
        out_specs=pl.BlockSpec((1, ts, tn), lambda b, s, n: (b, s, n)),
        compiler_params=pltpu.CompilerParams(
            dimension_semantics=("parallel", "parallel", "parallel")),
    )(x, shift[:, None, :], scale[:, None, :], w_bf16, b)


def flash_attention(qkv, qw, kw, aqw, akw, head_gate, *, sc, heads, head_dim):
    B, S_total, three_inner = qkv.shape
    inner = heads * head_dim
    assert three_inner == 3 * inner
    assert head_dim % 128 == 0, "head_dim must be lane-aligned (real Flux uses 128)"
    tq = _seq_tile(S_total, 256)
    tkv = _seq_tile(S_total, 128)
    scale = 1.0 / math.sqrt(head_dim)
    kern = functools.partial(_flash_attn_kernel, sc=sc, scale=scale, tq=tq, tkv=tkv)
    H = heads
    return pl.pallas_call(
        kern,
        out_shape=jax.ShapeDtypeStruct((B, S_total, inner), jnp.bfloat16),
        grid=(B, H, S_total // tq, S_total // tkv),
        in_specs=[
            # q / k / v are head-dim-sized slices of the fused (B, S_total, 3*inner) buffer
            pl.BlockSpec((1, tq, head_dim), lambda b, h, qi, ki: (b, qi, h)),
            pl.BlockSpec((1, tkv, head_dim), lambda b, h, qi, ki: (b, ki, H + h)),
            pl.BlockSpec((1, tkv, head_dim), lambda b, h, qi, ki: (b, ki, 2 * H + h)),
            pl.BlockSpec((1, head_dim), lambda b, h, qi, ki: (0, 0)),
            pl.BlockSpec((1, head_dim), lambda b, h, qi, ki: (0, 0)),
            pl.BlockSpec((1, head_dim), lambda b, h, qi, ki: (0, 0)),
            pl.BlockSpec((1, head_dim), lambda b, h, qi, ki: (0, 0)),
            pl.BlockSpec(memory_space=pltpu.MemorySpace.SMEM),   # per-head gate scalars
        ],
        out_specs=pl.BlockSpec((1, tq, head_dim), lambda b, h, qi, ki: (b, qi, h)),
        scratch_shapes=[
            pltpu.VMEM((tq, 1), jnp.float32),          # running max
            pltpu.VMEM((tq, 1), jnp.float32),          # running denom
            pltpu.VMEM((tq, head_dim), jnp.float32),   # output accumulator
        ],
        compiler_params=pltpu.CompilerParams(
            dimension_semantics=("parallel", "parallel", "parallel", "arbitrary")),
    )(qkv, qkv, qkv, qw, kw, aqw, akw, head_gate)


def gated_out_linear(x, w_bf16, b, res, gate, *, row_offset):
    # res + gate[:,None] * (x[:, row_offset:row_offset+S_res] @ W + b); the context / image
    # slice of the joint attention buffer is addressed via a static block offset (no HBM slice).
    B, S_res, D = res.shape
    inner = x.shape[-1]
    base = math.gcd(S_res, row_offset) if row_offset else S_res
    ts = _seq_tile(base)
    tn = _feat_tile(D)
    tk = _feat_tile(inner)
    off = row_offset // ts
    return pl.pallas_call(
        _gated_linear_kernel,
        out_shape=jax.ShapeDtypeStruct((B, S_res, D), jnp.float32),
        grid=(B, S_res // ts, D // tn, inner // tk),
        in_specs=[
            pl.BlockSpec((1, ts, tk), lambda b, s, n, k: (b, s + off, k)),
            pl.BlockSpec((tk, tn), lambda b, s, n, k: (k, n)),
            pl.BlockSpec((1, tn), lambda b, s, n, k: (0, n)),
            pl.BlockSpec((1, ts, tn), lambda b, s, n, k: (b, s, n)),
            pl.BlockSpec((1, 1, tn), lambda b, s, n, k: (b, 0, n)),
        ],
        out_specs=pl.BlockSpec((1, ts, tn), lambda b, s, n, k: (b, s, n)),
        scratch_shapes=[pltpu.VMEM((ts, tn), jnp.float32)],
        compiler_params=pltpu.CompilerParams(
            dimension_semantics=("parallel", "parallel", "parallel", "arbitrary")),
    )(x, w_bf16, b, res, gate[:, None, :])


def gated_ffn(x, shift, scale, gate, w1_bf16, b1, ff_gate, w2_bf16, b2):
    B, S, D = x.shape
    F = w1_bf16.shape[1]
    ts = _seq_tile(S)
    tf = _feat_tile(F)
    return pl.pallas_call(
        _gated_ffn_kernel,
        out_shape=jax.ShapeDtypeStruct((B, S, D), jnp.float32),
        grid=(B, S // ts, F // tf),
        in_specs=[
            pl.BlockSpec((1, ts, D), lambda b, s, f: (b, s, 0)),
            pl.BlockSpec((1, 1, D), lambda b, s, f: (b, 0, 0)),
            pl.BlockSpec((1, 1, D), lambda b, s, f: (b, 0, 0)),
            pl.BlockSpec((D, tf), lambda b, s, f: (0, f)),
            pl.BlockSpec((1, tf), lambda b, s, f: (0, f)),
            pl.BlockSpec((1, tf), lambda b, s, f: (0, f)),
            pl.BlockSpec((tf, D), lambda b, s, f: (f, 0)),
            pl.BlockSpec((1, D), lambda b, s, f: (0, 0)),
            pl.BlockSpec((1, 1, D), lambda b, s, f: (b, 0, 0)),
        ],
        out_specs=pl.BlockSpec((1, ts, D), lambda b, s, f: (b, s, 0)),
        scratch_shapes=[pltpu.VMEM((ts, D), jnp.float32)],
        compiler_params=pltpu.CompilerParams(
            dimension_semantics=("parallel", "parallel", "arbitrary")),
    )(x, shift[:, None, :], scale[:, None, :], w1_bf16, b1, ff_gate, w2_bf16, b2,
      gate[:, None, :])


# -------------------------- parameters & forward ------------------------------


def init_params(key, dim, heads, head_dim, ff_mult=4):
    inner = heads * head_dim
    ff_inner = ff_mult * dim
    keys = iter(jax.random.split(key, 64))

    def w(shape):
        return 0.02 * jax.random.normal(next(keys), shape, jnp.float32)

    def vec(n):
        return 0.02 * jax.random.normal(next(keys), (n,), jnp.float32)

    def nearone(n):  # identity-ish, but distinct values so the gated paths are actually tested
        return 1.0 + 0.1 * jax.random.normal(next(keys), (n,), jnp.float32)

    p = {}
    p["norm1_w"], p["norm1_b"] = w((dim, 6 * dim)), vec(6 * dim)
    p["norm1c_w"], p["norm1c_b"] = w((dim, 6 * dim)), vec(6 * dim)
    for n in ("q", "k", "v"):
        p[f"to_{n}_w"], p[f"to_{n}_b"] = w((dim, inner)), vec(inner)
        p[f"add_{n}_w"], p[f"add_{n}_b"] = w((dim, inner)), vec(inner)
    p["norm_q_w"], p["norm_k_w"] = nearone(head_dim), nearone(head_dim)
    p["norm_added_q_w"], p["norm_added_k_w"] = nearone(head_dim), nearone(head_dim)
    p["to_out_w"], p["to_out_b"] = w((inner, dim)), vec(dim)
    p["to_add_out_w"], p["to_add_out_b"] = w((inner, dim)), vec(dim)
    p["attn_head_gate"] = nearone(heads)
    for pre in ("ff", "ffc"):
        p[f"{pre}_w1"], p[f"{pre}_b1"] = w((dim, ff_inner)), vec(ff_inner)
        p[f"{pre}_gate"] = nearone(ff_inner)
        p[f"{pre}_w2"], p[f"{pre}_b2"] = w((ff_inner, dim)), vec(dim)
    return p


def prepare_params(p):
    """One-time weight fusion + bf16 cast (done outside the hot forward)."""
    bf = lambda a: a.astype(jnp.bfloat16)
    row = lambda a: a[None, :]
    prep = {
        "emb_w": bf(jnp.concatenate([p["norm1_w"], p["norm1c_w"]], axis=1)),
        "emb_b": row(jnp.concatenate([p["norm1_b"], p["norm1c_b"]])),
        "qkv_w": bf(jnp.concatenate([p["to_q_w"], p["to_k_w"], p["to_v_w"]], axis=1)),
        "qkv_b": row(jnp.concatenate([p["to_q_b"], p["to_k_b"], p["to_v_b"]])),
        "add_qkv_w": bf(jnp.concatenate([p["add_q_w"], p["add_k_w"], p["add_v_w"]], axis=1)),
        "add_qkv_b": row(jnp.concatenate([p["add_q_b"], p["add_k_b"], p["add_v_b"]])),
        "to_out_w": bf(p["to_out_w"]), "to_out_b": row(p["to_out_b"]),
        "to_add_out_w": bf(p["to_add_out_w"]), "to_add_out_b": row(p["to_add_out_b"]),
        "norm_q_w": row(p["norm_q_w"]), "norm_k_w": row(p["norm_k_w"]),
        "norm_added_q_w": row(p["norm_added_q_w"]), "norm_added_k_w": row(p["norm_added_k_w"]),
        "attn_head_gate": p["attn_head_gate"],
    }
    for pre in ("ff", "ffc"):
        prep[f"{pre}_w1"] = bf(p[f"{pre}_w1"])
        prep[f"{pre}_b1"] = row(p[f"{pre}_b1"])
        prep[f"{pre}_gate"] = row(p[f"{pre}_gate"])
        prep[f"{pre}_w2"] = bf(p[f"{pre}_w2"])
        prep[f"{pre}_b2"] = row(p[f"{pre}_b2"])
    return prep


def gated_flux_transformer_block(prep, hidden, encoder, temb, *, heads, head_dim):
    B, S, D = hidden.shape
    Sc = encoder.shape[1]

    # ---- fused AdaLayerNormZero(temb) for both streams: one SiLU + one (D, 12D) matmul ----
    emb = silu_linear(temb, prep["emb_w"], prep["emb_b"])
    (shift_msa, scale_msa, gate_msa, shift_mlp, scale_mlp, gate_mlp,
     c_shift_msa, c_scale_msa, c_gate_msa,
     c_shift_mlp, c_scale_mlp, c_gate_mlp) = jnp.split(emb, 12, axis=1)

    # ---- fused LayerNorm + modulate + QKV projection per stream (bf16, head-major inner) ----
    qkv_img = adaln_qkv(hidden, shift_msa, scale_msa, prep["qkv_w"], prep["qkv_b"])
    qkv_ctx = adaln_qkv(encoder, c_shift_msa, c_scale_msa, prep["add_qkv_w"], prep["add_qkv_b"])
    # TODO(synk): this single bf16 concat could also be removed by writing both projections
    # into one joint buffer via input_output_aliases; kept as the only remaining HBM join.
    qkv = jnp.concatenate([qkv_ctx, qkv_img], axis=1)        # context tokens first

    # ---- joint flash attention (qk-RMSNorm + online softmax + per-head gate) ----
    attn = flash_attention(qkv, prep["norm_q_w"], prep["norm_k_w"],
                           prep["norm_added_q_w"], prep["norm_added_k_w"],
                           prep["attn_head_gate"], sc=Sc, heads=heads, head_dim=head_dim)

    # ---- out projections with the gated residual fused into the matmul epilogue ----
    hidden = gated_out_linear(attn, prep["to_out_w"], prep["to_out_b"],
                              hidden, gate_msa, row_offset=Sc)
    encoder = gated_out_linear(attn, prep["to_add_out_w"], prep["to_add_out_b"],
                               encoder, c_gate_msa, row_offset=0)

    # ---- fused LayerNorm+modulate -> FFN -> gated residual, per stream ----
    hidden = gated_ffn(hidden, shift_mlp, scale_mlp, gate_mlp,
                       prep["ff_w1"], prep["ff_b1"], prep["ff_gate"],
                       prep["ff_w2"], prep["ff_b2"])
    encoder = gated_ffn(encoder, c_shift_mlp, c_scale_mlp, c_gate_mlp,
                        prep["ffc_w1"], prep["ffc_b1"], prep["ffc_gate"],
                        prep["ffc_w2"], prep["ffc_b2"])

    # TODO(synk): image_rotary_emb application omitted (None in this demo); the fp16 clamp
    # branch is skipped because residual streams are kept in float32.
    return encoder, hidden


# -------------------------- pure-JAX reference --------------------------------


def _reference_forward(p, hidden, encoder, temb, *, heads, head_dim):
    B, S, D = hidden.shape
    Sc = encoder.shape[1]
    inner = heads * head_dim

    def adaln(w, b):
        e = jax.nn.silu(temb) @ w + b
        return jnp.split(e, 6, axis=1)

    shift_msa, scale_msa, gate_msa, shift_mlp, scale_mlp, gate_mlp = adaln(p["norm1_w"], p["norm1_b"])
    (c_shift_msa, c_scale_msa, c_gate_msa,
     c_shift_mlp, c_scale_mlp, c_gate_mlp) = adaln(p["norm1c_w"], p["norm1c_b"])

    def ln_mod(x, sh, sc):
        m = jnp.mean(x, -1, keepdims=True)
        v = jnp.mean(jnp.square(x - m), -1, keepdims=True)
        return (x - m) * jax.lax.rsqrt(v + LN_EPS) * (1.0 + sc[:, None, :]) + sh[:, None, :]

    def split_heads(x):
        return x.reshape(B, -1, heads, head_dim).transpose(0, 2, 1, 3)

    def rms(x, w):
        return x * jax.lax.rsqrt(jnp.mean(x * x, -1, keepdims=True) + RMS_EPS) * w

    nh = ln_mod(hidden, shift_msa, scale_msa)
    ne = ln_mod(encoder, c_shift_msa, c_scale_msa)

    q = rms(split_heads(nh @ p["to_q_w"] + p["to_q_b"]), p["norm_q_w"])
    k = rms(split_heads(nh @ p["to_k_w"] + p["to_k_b"]), p["norm_k_w"])
    v = split_heads(nh @ p["to_v_w"] + p["to_v_b"])
    eq = rms(split_heads(ne @ p["add_q_w"] + p["add_q_b"]), p["norm_added_q_w"])
    ek = rms(split_heads(ne @ p["add_k_w"] + p["add_k_b"]), p["norm_added_k_w"])
    ev = split_heads(ne @ p["add_v_w"] + p["add_v_b"])

    q = jnp.concatenate([eq, q], axis=2)
    k = jnp.concatenate([ek, k], axis=2)
    v = jnp.concatenate([ev, v], axis=2)

    s = jnp.einsum("bhqd,bhkd->bhqk", q, k) / math.sqrt(head_dim)
    o = jnp.einsum("bhqk,bhkd->bhqd", jax.nn.softmax(s, axis=-1), v)
    o = o * p["attn_head_gate"][None, :, None, None]
    o = o.transpose(0, 2, 1, 3).reshape(B, Sc + S, inner)

    attn_out = o[:, Sc:] @ p["to_out_w"] + p["to_out_b"]
    ctx_attn_out = o[:, :Sc] @ p["to_add_out_w"] + p["to_add_out_b"]

    def ffn(x, pre):
        h = _gelu_tanh(x @ p[f"{pre}_w1"] + p[f"{pre}_b1"]) * p[f"{pre}_gate"]
        return h @ p[f"{pre}_w2"] + p[f"{pre}_b2"]

    hidden = hidden + gate_msa[:, None, :] * attn_out
    hidden = hidden + gate_mlp[:, None, :] * ffn(ln_mod(hidden, shift_mlp, scale_mlp), "ff")
    encoder = encoder + c_gate_msa[:, None, :] * ctx_attn_out
    encoder = encoder + c_gate_mlp[:, None, :] * ffn(ln_mod(encoder, c_shift_mlp, c_scale_mlp), "ffc")
    return encoder, hidden


# ----------------------------------- main --------------------------------------


if __name__ == "__main__":
    B, S_img, S_txt = 2, 16, 8
    heads, head_dim = 2, 128            # real Flux head_dim keeps the lane dim MXU/DMA aligned
    dim = heads * head_dim              # 256

    key = jax.random.PRNGKey(0)
    k1, k2, k3, kp = jax.random.split(key, 4)
    hidden_states = jax.random.normal(k1, (B, S_img, dim), jnp.float32)
    encoder_hidden_states = jax.random.normal(k2, (B, S_txt, dim), jnp.float32)
    temb = jax.random.normal(k3, (B, dim), jnp.float32)

    params = init_params(kp, dim, heads, head_dim)
    prep = prepare_params(params)

    fwd = jax.jit(functools.partial(gated_flux_transformer_block,
                                    heads=heads, head_dim=head_dim))
    enc_out, hid_out = fwd(prep, hidden_states, encoder_hidden_states, temb)
    jax.block_until_ready((enc_out, hid_out))

    assert enc_out.shape == (B, S_txt, dim)
    assert hid_out.shape == (B, S_img, dim)
    assert bool(jnp.all(jnp.isfinite(enc_out))) and bool(jnp.all(jnp.isfinite(hid_out)))

    enc_ref, hid_ref = _reference_forward(params, hidden_states, encoder_hidden_states, temb,
                                          heads=heads, head_dim=head_dim)
    err_e = float(jnp.max(jnp.abs(enc_out - enc_ref)))
    err_h = float(jnp.max(jnp.abs(hid_out - hid_ref)))
    assert err_e < 5e-2 and err_h < 5e-2, (err_e, err_h)   # bf16-operand tolerance

    print("KERNEL_OK")
</pallas_src>

<mosaic_0001>
module attributes {stable_mosaic.version = 11 : i64} {
  func.func @_silu_linear_kernel(%arg0: i32, %arg1: memref<2x256xf32, #tpu.memory_space<vmem>>, %arg2: memref<256x512xbf16, #tpu.memory_space<vmem>>, %arg3: memref<1x512xf32, #tpu.memory_space<vmem>>, %arg4: memref<2x512xf32, #tpu.memory_space<vmem>>) attributes {dimension_semantics = [#tpu.dimension_semantics<parallel>], iteration_bounds = array<i64: 6>, scalar_prefetch = 0 : i64, scratch_operands = 0 : i64, tpu.core_type = #tpu.core_type<tc>, window_params = [{pipeline_mode = #tpu.pipeline_mode<synchronous>, transform_indices = @transform_0, window_bounds = array<i64: 2, 256>}, {transform_indices = @transform_1, window_bounds = array<i64: 256, 512>}, {transform_indices = @transform_2, window_bounds = array<i64: 1, 512>}, {transform_indices = @transform_3, window_bounds = array<i64: 2, 512>}]} {
    %c0 = arith.constant 0 : index
    %c0_0 = arith.constant 0 : index
    %0 = vector.load %arg1[%c0, %c0_0] : memref<2x256xf32, #tpu.memory_space<vmem>>, vector<2x256xf32>
    %cst = arith.constant 0.000000e+00 : f32
    %1 = vector.broadcast %cst : f32 to vector<2x256xf32>
    %2 = arith.subf %1, %0 : vector<2x256xf32>
    %3 = math.exp %2 : vector<2x256xf32>
    %cst_1 = arith.constant 1.000000e+00 : f32
    %4 = vector.broadcast %cst_1 : f32 to vector<2x256xf32>
    %5 = arith.addf %4, %3 : vector<2x256xf32>
    %cst_2 = arith.constant 1.000000e+00 : f32
    %6 = vector.broadcast %cst_2 : f32 to vector<2x256xf32>
    %7 = arith.divf %6, %5 : vector<2x256xf32>
    %8 = arith.mulf %0, %7 : vector<2x256xf32>
    %9 = arith.truncf %8 : vector<2x256xf32> to vector<2x256xbf16>
    %c0_3 = arith.constant 0 : index
    %c0_4 = arith.constant 0 : index
    %10 = vector.load %arg2[%c0_3, %c0_4] : memref<256x512xbf16, #tpu.memory_space<vmem>>, vector<256x512xbf16>
    %cst_5 = arith.constant dense<0.000000e+00> : vector<2x512xf32>
    %11 = tpu.matmul %9, %10, %cst_5 {dimension_numbers = #tpu.dot_dimension_numbers<[1], [0], [0], [1], [0, 0, 1, 1], [], []>} : vector<2x256xbf16>, vector<256x512xbf16>, vector<2x512xf32> -> vector<2x512xf32>
    %c0_6 = arith.constant 0 : index
    %c0_7 = arith.constant 0 : index
    %12 = vector.load %arg3[%c0_6, %c0_7] : memref<1x512xf32, #tpu.memory_space<vmem>>, vector<1x512xf32>
    %13 = vector.broadcast %12 : vector<1x512xf32> to vector<2x512xf32>
    %14 = arith.addf %11, %13 : vector<2x512xf32>
    %c0_8 = arith.constant 0 : index
    %c0_9 = arith.constant 0 : index
    %15 = vector.load %arg4[%c0_8, %c0_9] : memref<2x512xf32, #tpu.memory_space<vmem>>, vector<2x512xf32>
    tpu.vector_store %arg4[%c0_8, %c0_9], %14 {strides = array<i32>} : memref<2x512xf32, #tpu.memory_space<vmem>>, vector<2x512xf32>,
    return
  }
  func.func @transform_0(%arg0: i32) -> (i32, i32) {
    %c0_i32 = arith.constant 0 : i32
    %c0_i32_0 = arith.constant 0 : i32
    %c0_i32_1 = arith.constant 0 : i32
    return %c0_i32, %c0_i32_0 : i32, i32
  }
  func.func @transform_1(%arg0: i32) -> (i32, i32) {
    %c0_i32 = arith.constant 0 : i32
    %c0_i32_0 = arith.constant 0 : i32
    return %c0_i32, %arg0 : i32, i32
  }
  func.func @transform_2(%arg0: i32) -> (i32, i32) {
    %c0_i32 = arith.constant 0 : i32
    %c0_i32_0 = arith.constant 0 : i32
    return %c0_i32, %arg0 : i32, i32
  }
  func.func @transform_3(%arg0: i32) -> (i32, i32) {
    %c0_i32 = arith.constant 0 : i32
    %c0_i32_0 = arith.constant 0 : i32
    return %c0_i32, %arg0 : i32, i32
  }
}

module attributes {stable_mosaic.version = 11 : i64} {
  func.func @_adaln_qkv_kernel(%arg0: i32, %arg1: i32, %arg2: i32, %arg3: memref<1x8x256xf32, #tpu.memory_space<vmem>>, %arg4: memref<1x1x256xf32, #tpu.memory_space<vmem>>, %arg5: memref<1x1x256xf32, #tpu.memory_space<vmem>>, %arg6: memref<256x384xbf16, #tpu.memory_space<vmem>>, %arg7: memref<1x384xf32, #tpu.memory_space<vmem>>, %arg8: memref<1x8x384xbf16, #tpu.memory_space<vmem>>) attributes {dimension_semantics = [#tpu.dimension_semantics<parallel>, #tpu.dimension_semantics<parallel>, #tpu.dimension_semantics<parallel>], iteration_bounds = array<i64: 2, 1, 2>, scalar_prefetch = 0 : i64, scratch_operands = 0 : i64, tpu.core_type = #tpu.core_type<tc>, window_params = [{transform_indices = @transform_0, window_bounds = array<i64: 1, 8, 256>}, {transform_indices = @transform_1, window_bounds = array<i64: 1, 1, 256>}, {transform_indices = @transform_2, window_bounds = array<i64: 1, 1, 256>}, {transform_indices = @transform_3, window_bounds = array<i64: 256, 384>}, {transform_indices = @transform_4, window_bounds = array<i64: 1, 384>}, {transform_indices = @transform_5, window_bounds = array<i64: 1, 8, 384>}]} {
    %c0 = arith.constant 0 : index
    %c0_0 = arith.constant 0 : index
    %c0_1 = arith.constant 0 : index
    %0 = vector.load %arg3[%c0, %c0_0, %c0_1] : memref<1x8x256xf32, #tpu.memory_space<vmem>>, vector<1x8x256xf32>
    %1 = vector.shape_cast %0 : vector<1x8x256xf32> to vector<8x256xf32>
    %cst = arith.constant dense<0.000000e+00> : vector<8xf32>
    %2 = vector.multi_reduction <add>, %1, %cst [1] : vector<8x256xf32> to vector<8xf32>
    %3 = vector.shape_cast %2 : vector<8xf32> to vector<8x1xf32>
    %cst_2 = arith.constant 2.560000e+02 : f32
    %4 = vector.broadcast %cst_2 : f32 to vector<8x1xf32>
    %5 = arith.divf %3, %4 : vector<8x1xf32>
    %6 = vector.broadcast %5 : vector<8x1xf32> to vector<8x256xf32>
    %7 = arith.subf %1, %6 : vector<8x256xf32>
    %8 = arith.mulf %7, %7 : vector<8x256xf32>
    %cst_3 = arith.constant dense<0.000000e+00> : vector<8xf32>
    %9 = vector.multi_reduction <add>, %8, %cst_3 [1] : vector<8x256xf32> to vector<8xf32>
    %10 = vector.shape_cast %9 : vector<8xf32> to vector<8x1xf32>
    %cst_4 = arith.constant 2.560000e+02 : f32
    %11 = vector.broadcast %cst_4 : f32 to vector<8x1xf32>
    %12 = arith.divf %10, %11 : vector<8x1xf32>
    %13 = vector.broadcast %5 : vector<8x1xf32> to vector<8x256xf32>
    %14 = arith.subf %1, %13 : vector<8x256xf32>
    %cst_5 = arith.constant 9.99999997E-7 : f32
    %15 = vector.broadcast %cst_5 : f32 to vector<8x1xf32>
    %16 = arith.addf %12, %15 : vector<8x1xf32>
    %17 = math.rsqrt %16 : vector<8x1xf32>
    %18 = vector.broadcast %17 : vector<8x1xf32> to vector<8x256xf32>
    %19 = arith.mulf %14, %18 : vector<8x256xf32>
    %c0_6 = arith.constant 0 : index
    %c0_7 = arith.constant 0 : index
    %c0_8 = arith.constant 0 : index
    %20 = vector.load %arg5[%c0_6, %c0_7, %c0_8] : memref<1x1x256xf32, #tpu.memory_space<vmem>>, vector<1x1x256xf32>
    %21 = vector.shape_cast %20 : vector<1x1x256xf32> to vector<1x256xf32>
    %cst_9 = arith.constant 1.000000e+00 : f32
    %22 = vector.broadcast %cst_9 : f32 to vector<1x256xf32>
    %23 = arith.addf %22, %21 : vector<1x256xf32>
    %24 = vector.broadcast %23 : vector<1x256xf32> to vector<8x256xf32>
    %25 = arith.mulf %19, %24 : vector<8x256xf32>
    %c0_10 = arith.constant 0 : index
    %c0_11 = arith.constant 0 : index
    %c0_12 = arith.constant 0 : index
    %26 = vector.load %arg4[%c0_10, %c0_11, %c0_12] : memref<1x1x256xf32, #tpu.memory_space<vmem>>, vector<1x1x256xf32>
    %27 = vector.shape_cast %26 : vector<1x1x256xf32> to vector<1x256xf32>
    %28 = vector.broadcast %27 : vector<1x256xf32> to vector<8x256xf32>
    %29 = arith.addf %25, %28 : vector<8x256xf32>
    %30 = arith.truncf %29 : vector<8x256xf32> to vector<8x256xbf16>
    %c0_13 = arith.constant 0 : index
    %c0_14 = arith.constant 0 : index
    %31 = vector.load %arg6[%c0_13, %c0_14] : memref<256x384xbf16, #tpu.memory_space<vmem>>, vector<256x384xbf16>
    %cst_15 = arith.constant dense<0.000000e+00> : vector<8x384xf32>
    %32 = tpu.matmul %30, %31, %cst_15 {dimension_numbers = #tpu.dot_dimension_numbers<[1], [0], [0], [1], [0, 0, 1, 1], [], []>} : vector<8x256xbf16>, vector<256x384xbf16>, vector<8x384xf32> -> vector<8x384xf32>
    %c0_16 = arith.constant 0 : index
    %c0_17 = arith.constant 0 : index
    %33 = vector.load %arg7[%c0_16, %c0_17] : memref<1x384xf32, #tpu.memory_space<vmem>>, vector<1x384xf32>
    %34 = vector.broadcast %33 : vector<1x384xf32> to vector<8x384xf32>
    %35 = arith.addf %32, %34 : vector<8x384xf32>
    %36 = arith.truncf %35 : vector<8x384xf32> to vector<8x384xbf16>
    %c0_18 = arith.constant 0 : index
    %c0_19 = arith.constant 0 : index
    %c0_20 = arith.constant 0 : index
    %37 = vector.load %arg8[%c0_18, %c0_19, %c0_20] : memref<1x8x384xbf16, #tpu.memory_space<vmem>>, vector<1x8x384xbf16>
    %38 = vector.shape_cast %37 : vector<1x8x384xbf16> to vector<8x384xbf16>
    %39 = vector.shape_cast %36 : vector<8x384xbf16> to vector<1x8x384xbf16>
    tpu.vector_store %arg8[%c0_18, %c0_19, %c0_20], %39 {strides = array<i32>} : memref<1x8x384xbf16, #tpu.memory_space<vmem>>, vector<1x8x384xbf16>,
    return
  }
  func.func @transform_0(%arg0: i32, %arg1: i32, %arg2: i32) -> (i32, i32, i32) {
    %c0_i32 = arith.constant 0 : i32
    %c0_i32_0 = arith.constant 0 : i32
    return %arg0, %arg1, %c0_i32 : i32, i32, i32
  }
  func.func @transform_1(%arg0: i32, %arg1: i32, %arg2: i32) -> (i32, i32, i32) {
    %c0_i32 = arith.constant 0 : i32
    %c0_i32_0 = arith.constant 0 : i32
    %c0_i32_1 = arith.constant 0 : i32
    return %arg0, %c0_i32, %c0_i32_0 : i32, i32, i32
  }
  func.func @transform_2(%arg0: i32, %arg1: i32, %arg2: i32) -> (i32, i32, i32) {
    %c0_i32 = arith.constant 0 : i32
    %c0_i32_0 = arith.constant 0 : i32
    %c0_i32_1 = arith.constant 0 : i32
    return %arg0, %c0_i32, %c0_i32_0 : i32, i32, i32
  }
  func.func @transform_3(%arg0: i32, %arg1: i32, %arg2: i32) -> (i32, i32) {
    %c0_i32 = arith.constant 0 : i32
    %c0_i32_0 = arith.constant 0 : i32
    return %c0_i32, %arg2 : i32, i32
  }
  func.func @transform_4(%arg0: i32, %arg1: i32, %arg2: i32) -> (i32, i32) {
    %c0_i32 = arith.constant 0 : i32
    %c0_i32_0 = arith.constant 0 : i32
    return %c0_i32, %arg2 : i32, i32
  }
  func.func @transform_5(%arg0: i32, %arg1: i32, %arg2: i32) -> (i32, i32, i32) {
    %c0_i32 = arith.constant 0 : i32
    return %arg0, %arg1, %arg2 : i32, i32, i32
  }
}

module attributes {stable_mosaic.version = 11 : i64} {
  func.func @_adaln_qkv_kernel(%arg0: i32, %arg1: i32, %arg2: i32, %arg3: memref<1x16x256xf32, #tpu.memory_space<vmem>>, %arg4: memref<1x1x256xf32, #tpu.memory_space<vmem>>, %arg5: memref<1x1x256xf32, #tpu.memory_space<vmem>>, %arg6: memref<256x384xbf16, #tpu.memory_space<vmem>>, %arg7: memref<1x384xf32, #tpu.memory_space<vmem>>, %arg8: memref<1x16x384xbf16, #tpu.memory_space<vmem>>) attributes {dimension_semantics = [#tpu.dimension_semantics<parallel>, #tpu.dimension_semantics<parallel>, #tpu.dimension_semantics<parallel>], iteration_bounds = array<i64: 2, 1, 2>, scalar_prefetch = 0 : i64, scratch_operands = 0 : i64, tpu.core_type = #tpu.core_type<tc>, window_params = [{transform_indices = @transform_0, window_bounds = array<i64: 1, 16, 256>}, {transform_indices = @transform_1, window_bounds = array<i64: 1, 1, 256>}, {transform_indices = @transform_2, window_bounds = array<i64: 1, 1, 256>}, {transform_indices = @transform_3, window_bounds = array<i64: 256, 384>}, {transform_indices = @transform_4, window_bounds = array<i64: 1, 384>}, {transform_indices = @transform_5, window_bounds = array<i64: 1, 16, 384>}]} {
    %c0 = arith.constant 0 : index
    %c0_0 = arith.constant 0 : index
    %c0_1 = arith.constant 0 : index
    %0 = vector.load %arg3[%c0, %c0_0, %c0_1] : memref<1x16x256xf32, #tpu.memory_space<vmem>>, vector<1x16x256xf32>
    %1 = vector.shape_cast %0 : vector<1x16x256xf32> to vector<16x256xf32>
    %cst = arith.constant dense<0.000000e+00> : vector<16xf32>
    %2 = vector.multi_reduction <add>, %1, %cst [1] : vector<16x256xf32> to vector<16xf32>
    %3 = vector.shape_cast %2 : vector<16xf32> to vector<16x1xf32>
    %cst_2 = arith.constant 2.560000e+02 : f32
    %4 = vector.broadcast %cst_2 : f32 to vector<16x1xf32>
    %5 = arith.divf %3, %4 : vector<16x1xf32>
    %6 = vector.broadcast %5 : vector<16x1xf32> to vector<16x256xf32>
    %7 = arith.subf %1, %6 : vector<16x256xf32>
    %8 = arith.mulf %7, %7 : vector<16x256xf32>
    %cst_3 = arith.constant dense<0.000000e+00> : vector<16xf32>
    %9 = vector.multi_reduction <add>, %8, %cst_3 [1] : vector<16x256xf32> to vector<16xf32>
    %10 = vector.shape_cast %9 : vector<16xf32> to vector<16x1xf32>
    %cst_4 = arith.constant 2.560000e+02 : f32
    %11 = vector.broadcast %cst_4 : f32 to vector<16x1xf32>
    %12 = arith.divf %10, %11 : vector<16x1xf32>
    %13 = vector.broadcast %5 : vector<16x1xf32> to vector<16x256xf32>
    %14 = arith.subf %1, %13 : vector<16x256xf32>
    %cst_5 = arith.constant 9.99999997E-7 : f32
    %15 = vector.broadcast %cst_5 : f32 to vector<16x1xf32>
    %16 = arith.addf %12, %15 : vector<16x1xf32>
    %17 = math.rsqrt %16 : vector<16x1xf32>
    %18 = vector.broadcast %17 : vector<16x1xf32> to vector<16x256xf32>
    %19 = arith.mulf %14, %18 : vector<16x256xf32>
    %c0_6 = arith.constant 0 : index
    %c0_7 = arith.constant 0 : index
    %c0_8 = arith.constant 0 : index
    %20 = vector.load %arg5[%c0_6, %c0_7, %c0_8] : memref<1x1x256xf32, #tpu.memory_space<vmem>>, vector<1x1x256xf32>
    %21 = vector.shape_cast %20 : vector<1x1x256xf32> to vector<1x256xf32>
    %cst_9 = arith.constant 1.000000e+00 : f32
    %22 = vector.broadcast %cst_9 : f32 to vector<1x256xf32>
    %23 = arith.addf %22, %21 : vector<1x256xf32>
    %24 = vector.broadcast %23 : vector<1x256xf32> to vector<16x256xf32>
    %25 = arith.mulf %19, %24 : vector<16x256xf32>
    %c0_10 = arith.constant 0 : index
    %c0_11 = arith.constant 0 : index
    %c0_12 = arith.constant 0 : index
    %26 = vector.load %arg4[%c0_10, %c0_11, %c0_12] : memref<1x1x256xf32, #tpu.memory_space<vmem>>, vector<1x1x256xf32>
    %27 = vector.shape_cast %26 : vector<1x1x256xf32> to vector<1x256xf32>
    %28 = vector.broadcast %27 : vector<1x256xf32> to vector<16x256xf32>
    %29 = arith.addf %25, %28 : vector<16x256xf32>
    %30 = arith.truncf %29 : vector<16x256xf32> to vector<16x256xbf16>
    %c0_13 = arith.constant 0 : index
    %c0_14 = arith.constant 0 : index
    %31 = vector.load %arg6[%c0_13, %c0_14] : memref<256x384xbf16, #tpu.memory_space<vmem>>, vector<256x384xbf16>
    %cst_15 = arith.constant dense<0.000000e+00> : vector<16x384xf32>
    %32 = tpu.matmul %30, %31, %cst_15 {dimension_numbers = #tpu.dot_dimension_numbers<[1], [0], [0], [1], [0, 0, 1, 1], [], []>} : vector<16x256xbf16>, vector<256x384xbf16>, vector<16x384xf32> -> vector<16x384xf32>
    %c0_16 = arith.constant 0 : index
    %c0_17 = arith.constant 0 : index
    %33 = vector.load %arg7[%c0_16, %c0_17] : memref<1x384xf32, #tpu.memory_space<vmem>>, vector<1x384xf32>
    %34 = vector.broadcast %33 : vector<1x384xf32> to vector<16x384xf32>
    %35 = arith.addf %32, %34 : vector<16x384xf32>
    %36 = arith.truncf %35 : vector<16x384xf32> to vector<16x384xbf16>
    %c0_18 = arith.constant 0 : index
    %c0_19 = arith.constant 0 : index
    %c0_20 = arith.constant 0 : index
    %37 = vector.load %arg8[%c0_18, %c0_19, %c0_20] : memref<1x16x384xbf16, #tpu.memory_space<vmem>>, vector<1x16x384xbf16>
    %38 = vector.shape_cast %37 : vector<1x16x384xbf16> to vector<16x384xbf16>
    %39 = vector.shape_cast %36 : vector<16x384xbf16> to vector<1x16x384xbf16>
    tpu.vector_store %arg8[%c0_18, %c0_19, %c0_20], %39 {strides = array<i32>} : memref<1x16x384xbf16, #tpu.memory_space<vmem>>, vector<1x16x384xbf16>,
    return
  }
  func.func @transform_0(%arg0: i32, %arg1: i32, %arg2: i32) -> (i32, i32, i32) {
    %c0_i32 = arith.constant 0 : i32
    %c0_i32_0 = arith.constant 0 : i32
    return %arg0, %arg1, %c0_i32 : i32, i32, i32
  }
  func.func @transform_1(%arg0: i32, %arg1: i32, %arg2: i32) -> (i32, i32, i32) {
    %c0_i32 = arith.constant 0 : i32
    %c0_i32_0 = arith.constant 0 : i32
    %c0_i32_1 = arith.constant 0 : i32
    return %arg0, %c0_i32, %c0_i32_0 : i32, i32, i32
  }
  func.func @transform_2(%arg0: i32, %arg1: i32, %arg2: i32) -> (i32, i32, i32) {
    %c0_i32 = arith.constant 0 : i32
    %c0_i32_0 = arith.constant 0 : i32
    %c0_i32_1 = arith.constant 0 : i32
    return %arg0, %c0_i32, %c0_i32_0 : i32, i32, i32
  }
  func.func @transform_3(%arg0: i32, %arg1: i32, %arg2: i32) -> (i32, i32) {
    %c0_i32 = arith.constant 0 : i32
    %c0_i32_0 = arith.constant 0 : i32
    return %c0_i32, %arg2 : i32, i32
  }
  func.func @transform_4(%arg0: i32, %arg1: i32, %arg2: i32) -> (i32, i32) {
    %c0_i32 = arith.constant 0 : i32
    %c0_i32_0 = arith.constant 0 : i32
    return %c0_i32, %arg2 : i32, i32
  }
  func.func @transform_5(%arg0: i32, %arg1: i32, %arg2: i32) -> (i32, i32, i32) {
    %c0_i32 = arith.constant 0 : i32
    return %arg0, %arg1, %arg2 : i32, i32, i32
  }
}

module attributes {stable_mosaic.version = 11 : i64} {
  func.func @_flash_attn_kernel(%arg0: i32, %arg1: i32, %arg2: i32, %arg3: i32, %arg4: memref<1x24x128xbf16, #tpu.memory_space<vmem>>, %arg5: memref<1x24x128xbf16, #tpu.memory_space<vmem>>, %arg6: memref<1x24x128xbf16, #tpu.memory_space<vmem>>, %arg7: memref<1x128xf32, #tpu.memory_space<vmem>>, %arg8: memref<1x128xf32, #tpu.memory_space<vmem>>, %arg9: memref<1x128xf32, #tpu.memory_space<vmem>>, %arg10: memref<1x128xf32, #tpu.memory_space<vmem>>, %arg11: memref<2xf32, #tpu.memory_space<smem>>, %arg12: memref<1x24x128xbf16, #tpu.memory_space<vmem>>, %arg13: memref<24x1xf32, #tpu.memory_space<vmem>>, %arg14: memref<24x1xf32, #tpu.memory_space<vmem>>, %arg15: memref<24x128xf32, #tpu.memory_space<vmem>>) attributes {dimension_semantics = [#tpu.dimension_semantics<parallel>, #tpu.dimension_semantics<parallel>, #tpu.dimension_semantics<parallel>, #tpu.dimension_semantics<arbitrary>], iteration_bounds = array<i64: 2, 2, 1, 1>, scalar_prefetch = 0 : i64, scratch_operands = 3 : i64, tpu.core_type = #tpu.core_type<tc>, window_params = [{transform_indices = @transform_0, window_bounds = array<i64: 1, 24, 128>}, {transform_indices = @transform_1, window_bounds = array<i64: 1, 24, 128>}, {transform_indices = @transform_2, window_bounds = array<i64: 1, 24, 128>}, {pipeline_mode = #tpu.pipeline_mode<synchronous>, transform_indices = @transform_3, window_bounds = array<i64: 1, 128>}, {pipeline_mode = #tpu.pipeline_mode<synchronous>, transform_indices = @transform_4, window_bounds = array<i64: 1, 128>}, {pipeline_mode = #tpu.pipeline_mode<synchronous>, transform_indices = @transform_5, window_bounds = array<i64: 1, 128>}, {pipeline_mode = #tpu.pipeline_mode<synchronous>, transform_indices = @transform_6, window_bounds = array<i64: 1, 128>}, {transform_indices = @transform_7, window_bounds = array<i64: 2>}, {transform_indices = @transform_8, window_bounds = array<i64: 1, 24, 128>}]} {
    %c0_i32 = arith.constant 0 : i32
    %0 = arith.cmpi eq, %arg3, %c0_i32 : i32
    %1 = arith.extui %0 : i1 to i32
    %c0_i32_0 = arith.constant 0 : i32
    %2 = arith.cmpi ne, %1, %c0_i32_0 : i32
    scf.if %2 {
      %cst_43 = arith.constant 0xFF800000 : f32
      %94 = vector.broadcast %cst_43 : f32 to vector<24x1xf32>
      %c0_44 = arith.constant 0 : index
      %c0_45 = arith.constant 0 : index
      %95 = vector.load %arg13[%c0_44, %c0_45] : memref<24x1xf32, #tpu.memory_space<vmem>>, vector<24x1xf32>
      tpu.vector_store %arg13[%c0_44, %c0_45], %94 {strides = array<i32>} : memref<24x1xf32, #tpu.memory_space<vmem>>, vector<24x1xf32>,
      %cst_46 = arith.constant 0.000000e+00 : f32
      %96 = vector.broadcast %cst_46 : f32 to vector<24x1xf32>
      %c0_47 = arith.constant 0 : index
      %c0_48 = arith.constant 0 : index
      %97 = vector.load %arg14[%c0_47, %c0_48] : memref<24x1xf32, #tpu.memory_space<vmem>>, vector<24x1xf32>
      tpu.vector_store %arg14[%c0_47, %c0_48], %96 {strides = array<i32>} : memref<24x1xf32, #tpu.memory_space<vmem>>, vector<24x1xf32>,
      %cst_49 = arith.constant 0.000000e+00 : f32
      %98 = vector.broadcast %cst_49 : f32 to vector<24x128xf32>
      %c0_50 = arith.constant 0 : index
      %c0_51 = arith.constant 0 : index
      %99 = vector.load %arg15[%c0_50, %c0_51] : memref<24x128xf32, #tpu.memory_space<vmem>>, vector<24x128xf32>
      tpu.vector_store %arg15[%c0_50, %c0_51], %98 {strides = array<i32>} : memref<24x128xf32, #tpu.memory_space<vmem>>, vector<24x128xf32>,
    } else {
    }
    %c0 = arith.constant 0 : index
    %c0_1 = arith.constant 0 : index
    %c0_2 = arith.constant 0 : index
    %3 = vector.load %arg4[%c0, %c0_1, %c0_2] : memref<1x24x128xbf16, #tpu.memory_space<vmem>>, vector<1x24x128xbf16>
    %4 = vector.shape_cast %3 : vector<1x24x128xbf16> to vector<24x128xbf16>
    %5 = arith.extf %4 : vector<24x128xbf16> to vector<24x128xf32>
    %c0_3 = arith.constant 0 : index
    %c0_4 = arith.constant 0 : index
    %c0_5 = arith.constant 0 : index
    %6 = vector.load %arg5[%c0_3, %c0_4, %c0_5] : memref<1x24x128xbf16, #tpu.memory_space<vmem>>, vector<1x24x128xbf16>
    %7 = vector.shape_cast %6 : vector<1x24x128xbf16> to vector<24x128xbf16>
    %8 = arith.extf %7 : vector<24x128xbf16> to vector<24x128xf32>
    %c24_i32 = arith.constant 24 : i32
    %9 = arith.muli %arg2, %c24_i32 : i32
    %10 = tpu.iota {dimensions = array<i32: 0>} : vector<24x1xi32>
    %11 = vector.broadcast %9 : i32 to vector<24x1xi32>
    %12 = arith.addi %11, %10 : vector<24x1xi32>
    %c24_i32_6 = arith.constant 24 : i32
    %13 = arith.muli %arg3, %c24_i32_6 : i32
    %14 = tpu.iota {dimensions = array<i32: 0>} : vector<24x1xi32>
    %15 = vector.broadcast %13 : i32 to vector<24x1xi32>
    %16 = arith.addi %15, %14 : vector<24x1xi32>
    %c8_i32 = arith.constant 8 : i32
    %17 = vector.broadcast %c8_i32 : i32 to vector<24x1xi32>
    %18 = arith.cmpi slt, %12, %17 : vector<24x1xi32>
    %c0_7 = arith.constant 0 : index
    %c0_8 = arith.constant 0 : index
    %19 = vector.load %arg9[%c0_7, %c0_8] : memref<1x128xf32, #tpu.memory_space<vmem>>, vector<1x128xf32>
    %c0_9 = arith.constant 0 : index
    %c0_10 = arith.constant 0 : index
    %20 = vector.load %arg7[%c0_9, %c0_10] : memref<1x128xf32, #tpu.memory_space<vmem>>, vector<1x128xf32>
    %21 = vector.shape_cast %18 : vector<24x1xi1> to vector<24x1xi1>
    %22 = vector.broadcast %21 : vector<24x1xi1> to vector<24x128xi1>
    %23 = vector.shape_cast %19 : vector<1x128xf32> to vector<1x128xf32>
    %24 = vector.broadcast %23 : vector<1x128xf32> to vector<24x128xf32>
    %25 = vector.shape_cast %20 : vector<1x128xf32> to vector<1x128xf32>
    %26 = vector.broadcast %25 : vector<1x128xf32> to vector<24x128xf32>
    %27 = arith.select %22, %24, %26 : vector<24x128xi1>, vector<24x128xf32>
    %c8_i32_11 = arith.constant 8 : i32
    %28 = vector.broadcast %c8_i32_11 : i32 to vector<24x1xi32>
    %29 = arith.cmpi slt, %16, %28 : vector<24x1xi32>
    %c0_12 = arith.constant 0 : index
    %c0_13 = arith.constant 0 : index
    %30 = vector.load %arg10[%c0_12, %c0_13] : memref<1x128xf32, #tpu.memory_space<vmem>>, vector<1x128xf32>
    %c0_14 = arith.constant 0 : index
    %c0_15 = arith.constant 0 : index
    %31 = vector.load %arg8[%c0_14, %c0_15] : memref<1x128xf32, #tpu.memory_space<vmem>>, vector<1x128xf32>
    %32 = vector.shape_cast %29 : vector<24x1xi1> to vector<24x1xi1>
    %33 = vector.broadcast %32 : vector<24x1xi1> to vector<24x128xi1>
    %34 = vector.shape_cast %30 : vector<1x128xf32> to vector<1x128xf32>
    %35 = vector.broadcast %34 : vector<1x128xf32> to vector<24x128xf32>
    %36 = vector.shape_cast %31 : vector<1x128xf32> to vector<1x128xf32>
    %37 = vector.broadcast %36 : vector<1x128xf32> to vector<24x128xf32>
    %38 = arith.select %33, %35, %37 : vector<24x128xi1>, vector<24x128xf32>
    %39 = arith.mulf %5, %5 : vector<24x128xf32>
    %cst = arith.constant dense<0.000000e+00> : vector<24xf32>
    %40 = vector.multi_reduction <add>, %39, %cst [1] : vector<24x128xf32> to vector<24xf32>
    %41 = vector.shape_cast %40 : vector<24xf32> to vector<24x1xf32>
    %cst_16 = arith.constant 1.280000e+02 : f32
    %42 = vector.broadcast %cst_16 : f32 to vector<24x1xf32>
    %43 = arith.divf %41, %42 : vector<24x1xf32>
    %cst_17 = arith.constant 9.99999997E-7 : f32
    %44 = vector.broadcast %cst_17 : f32 to vector<24x1xf32>
    %45 = arith.addf %43, %44 : vector<24x1xf32>
    %46 = math.rsqrt %45 : vector<24x1xf32>
    %47 = vector.broadcast %46 : vector<24x1xf32> to vector<24x128xf32>
    %48 = arith.mulf %5, %47 : vector<24x128xf32>
    %49 = arith.mulf %48, %27 : vector<24x128xf32>
    %50 = arith.mulf %8, %8 : vector<24x128xf32>
    %cst_18 = arith.constant dense<0.000000e+00> : vector<24xf32>
    %51 = vector.multi_reduction <add>, %50, %cst_18 [1] : vector<24x128xf32> to vector<24xf32>
    %52 = vector.shape_cast %51 : vector<24xf32> to vector<24x1xf32>
    %cst_19 = arith.constant 1.280000e+02 : f32
    %53 = vector.broadcast %cst_19 : f32 to vector<24x1xf32>
    %54 = arith.divf %52, %53 : vector<24x1xf32>
    %cst_20 = arith.constant 9.99999997E-7 : f32
    %55 = vector.broadcast %cst_20 : f32 to vector<24x1xf32>
    %56 = arith.addf %54, %55 : vector<24x1xf32>
    %57 = math.rsqrt %56 : vector<24x1xf32>
    %58 = vector.broadcast %57 : vector<24x1xf32> to vector<24x128xf32>
    %59 = arith.mulf %8, %58 : vector<24x128xf32>
    %60 = arith.mulf %59, %38 : vector<24x128xf32>
    %61 = arith.truncf %49 : vector<24x128xf32> to vector<24x128xbf16>
    %62 = arith.truncf %60 : vector<24x128xf32> to vector<24x128xbf16>
    %cst_21 = arith.constant dense<0.000000e+00> : vector<24x24xf32>
    %63 = tpu.matmul %61, %62, %cst_21 {dimension_numbers = #tpu.dot_dimension_numbers<[1], [1], [0], [0], [0, 0, 1, 0], [], []>} : vector<24x128xbf16>, vector<24x128xbf16>, vector<24x24xf32> -> vector<24x24xf32>
    %cst_22 = arith.constant 0.0883883461 : f32
    %64 = vector.broadcast %cst_22 : f32 to vector<24x24xf32>
    %65 = arith.mulf %63, %64 : vector<24x24xf32>
    %c0_23 = arith.constant 0 : index
    %c0_24 = arith.constant 0 : index
    %66 = vector.load %arg13[%c0_23, %c0_24] : memref<24x1xf32, #tpu.memory_space<vmem>>, vector<24x1xf32>
    %cst_25 = arith.constant dense<0xFF800000> : vector<24xf32>
    %67 = vector.multi_reduction <maximumf>, %65, %cst_25 [1] : vector<24x24xf32> to vector<24xf32>
    %68 = vector.shape_cast %67 : vector<24xf32> to vector<24x1xf32>
    %69 = arith.maximumf %66, %68 : vector<24x1xf32>
    %70 = arith.subf %66, %69 : vector<24x1xf32>
    %71 = math.exp %70 : vector<24x1xf32>
    %72 = vector.broadcast %69 : vector<24x1xf32> to vector<24x24xf32>
    %73 = arith.subf %65, %72 : vector<24x24xf32>
    %74 = math.exp %73 : vector<24x24xf32>
    %c0_26 = arith.constant 0 : index
    %c0_27 = arith.constant 0 : index
    %75 = vector.load %arg14[%c0_26, %c0_27] : memref<24x1xf32, #tpu.memory_space<vmem>>, vector<24x1xf32>
    %76 = arith.mulf %71, %75 : vector<24x1xf32>
    %cst_28 = arith.constant dense<0.000000e+00> : vector<24xf32>
    %77 = vector.multi_reduction <add>, %74, %cst_28 [1] : vector<24x24xf32> to vector<24xf32>
    %78 = vector.shape_cast %77 : vector<24xf32> to vector<24x1xf32>
    %79 = arith.addf %76, %78 : vector<24x1xf32>
    %c0_29 = arith.constant 0 : index
    %c0_30 = arith.constant 0 : index
    %80 = vector.load %arg14[%c0_29, %c0_30] : memref<24x1xf32, #tpu.memory_space<vmem>>, vector<24x1xf32>
    tpu.vector_store %arg14[%c0_29, %c0_30], %79 {strides = array<i32>} : memref<24x1xf32, #tpu.memory_space<vmem>>, vector<24x1xf32>,
    %c0_31 = arith.constant 0 : index
    %c0_32 = arith.constant 0 : index
    %81 = vector.load %arg15[%c0_31, %c0_32] : memref<24x128xf32, #tpu.memory_space<vmem>>, vector<24x128xf32>
    %82 = vector.broadcast %71 : vector<24x1xf32> to vector<24x128xf32>
    %83 = arith.mulf %82, %81 : vector<24x128xf32>
    %84 = arith.truncf %74 : vector<24x24xf32> to vector<24x24xbf16>
    %c0_33 = arith.constant 0 : index
    %c0_34 = arith.constant 0 : index
    %c0_35 = arith.constant 0 : index
    %85 = vector.load %arg6[%c0_33, %c0_34, %c0_35] : memref<1x24x128xbf16, #tpu.memory_space<vmem>>, vector<1x24x128xbf16>
    %86 = vector.shape_cast %85 : vector<1x24x128xbf16> to vector<24x128xbf16>
    %cst_36 = arith.constant dense<0.000000e+00> : vector<24x128xf32>
    %87 = tpu.matmul %84, %86, %cst_36 {dimension_numbers = #tpu.dot_dimension_numbers<[1], [0], [0], [1], [0, 0, 1, 1], [], []>} : vector<24x24xbf16>, vector<24x128xbf16>, vector<24x128xf32> -> vector<24x128xf32>
    %88 = arith.addf %83, %87 : vector<24x128xf32>
    %c0_37 = arith.constant 0 : index
    %c0_38 = arith.constant 0 : index
    %89 = vector.load %arg15[%c0_37, %c0_38] : memref<24x128xf32, #tpu.memory_space<vmem>>, vector<24x128xf32>
    tpu.vector_store %arg15[%c0_37, %c0_38], %88 {strides = array<i32>} : memref<24x128xf32, #tpu.memory_space<vmem>>, vector<24x128xf32>,
    %c0_39 = arith.constant 0 : index
    %c0_40 = arith.constant 0 : index
    %90 = vector.load %arg13[%c0_39, %c0_40] : memref<24x1xf32, #tpu.memory_space<vmem>>, vector<24x1xf32>
    tpu.vector_store %arg13[%c0_39, %c0_40], %69 {strides = array<i32>} : memref<24x1xf32, #tpu.memory_space<vmem>>, vector<24x1xf32>,
    %c0_i32_41 = arith.constant 0 : i32
    %91 = arith.cmpi eq, %arg3, %c0_i32_41 : i32
    %92 = arith.extui %91 : i1 to i32
    %c0_i32_42 = arith.constant 0 : i32
    %93 = arith.cmpi ne, %92, %c0_i32_42 : i32
    scf.if %93 {
      %c0_43 = arith.constant 0 : index
      %c0_44 = arith.constant 0 : index
      %94 = vector.load %arg14[%c0_43, %c0_44] : memref<24x1xf32, #tpu.memory_space<vmem>>, vector<24x1xf32>
      %95 = tpu.reciprocal %94 {approx = true} : vector<24x1xf32> -> vector<24x1xf32>
      %c0_45 = arith.constant 0 : index
      %c0_46 = arith.constant 0 : index
      %96 = vector.load %arg15[%c0_45, %c0_46] : memref<24x128xf32, #tpu.memory_space<vmem>>, vector<24x128xf32>
      %97 = vector.broadcast %95 : vector<24x1xf32> to vector<24x128xf32>
      %98 = arith.mulf %96, %97 : vector<24x128xf32>
      %99 = arith.index_cast %arg1 : i32 to index
      %100 = memref.load %arg11[%99] : memref<2xf32, #tpu.memory_space<smem>>
      %101 = vector.broadcast %100 : f32 to vector<24x128xf32>
      %102 = arith.mulf %98, %101 : vector<24x128xf32>
      %103 = arith.truncf %102 : vector<24x128xf32> to vector<24x128xbf16>
      %c0_47 = arith.constant 0 : index
      %c0_48 = arith.constant 0 : index
      %c0_49 = arith.constant 0 : index
      %104 = vector.load %arg12[%c0_47, %c0_48, %c0_49] : memref<1x24x128xbf16, #tpu.memory_space<vmem>>, vector<1x24x128xbf16>
      %105 = vector.shape_cast %104 : vector<1x24x128xbf16> to vector<24x128xbf16>
      %106 = vector.shape_cast %103 : vector<24x128xbf16> to vector<1x24x128xbf16>
      tpu.vector_store %arg12[%c0_47, %c0_48, %c0_49], %106 {strides = array<i32>} : memref<1x24x128xbf16, #tpu.memory_space<vmem>>, vector<1x24x128xbf16>,
    } else {
    }
    return
  }
  func.func @transform_0(%arg0: i32, %arg1: i32, %arg2: i32, %arg3: i32) -> (i32, i32, i32) {
    %c0_i32 = arith.constant 0 : i32
    return %arg0, %arg2, %arg1 : i32, i32, i32
  }
  func.func @transform_1(%arg0: i32, %arg1: i32, %arg2: i32, %arg3: i32) -> (i32, i32, i32) {
    %c2_i32 = arith.constant 2 : i32
    %0 = arith.addi %c2_i32, %arg1 : i32
    %c0_i32 = arith.constant 0 : i32
    return %arg0, %arg3, %0 : i32, i32, i32
  }
  func.func @transform_2(%arg0: i32, %arg1: i32, %arg2: i32, %arg3: i32) -> (i32, i32, i32) {
    %c4_i32 = arith.constant 4 : i32
    %0 = arith.addi %c4_i32, %arg1 : i32
    %c0_i32 = arith.constant 0 : i32
    return %arg0, %arg3, %0 : i32, i32, i32
  }
  func.func @transform_3(%arg0: i32, %arg1: i32, %arg2: i32, %arg3: i32) -> (i32, i32) {
    %c0_i32 = arith.constant 0 : i32
    %c0_i32_0 = arith.constant 0 : i32
    %c0_i32_1 = arith.constant 0 : i32
    return %c0_i32, %c0_i32_0 : i32, i32
  }
  func.func @transform_4(%arg0: i32, %arg1: i32, %arg2: i32, %arg3: i32) -> (i32, i32) {
    %c0_i32 = arith.constant 0 : i32
    %c0_i32_0 = arith.constant 0 : i32
    %c0_i32_1 = arith.constant 0 : i32
    return %c0_i32, %c0_i32_0 : i32, i32
  }
  func.func @transform_5(%arg0: i32, %arg1: i32, %arg2: i32, %arg3: i32) -> (i32, i32) {
    %c0_i32 = arith.constant 0 : i32
    %c0_i32_0 = arith.constant 0 : i32
    %c0_i32_1 = arith.constant 0 : i32
    return %c0_i32, %c0_i32_0 : i32, i32
  }
  func.func @transform_6(%arg0: i32, %arg1: i32, %arg2: i32, %arg3: i32) -> (i32, i32) {
    %c0_i32 = arith.constant 0 : i32
    %c0_i32_0 = arith.constant 0 : i32
    %c0_i32_1 = arith.constant 0 : i32
    return %c0_i32, %c0_i32_0 : i32, i32
  }
  func.func @transform_7(%arg0: i32, %arg1: i32, %arg2: i32, %arg3: i32) -> i32 {
    %c0_i32 = arith.constant 0 : i32
    %c0_i32_0 = arith.constant 0 : i32
    return %c0_i32 : i32
  }
  func.func @transform_8(%arg0: i32, %arg1: i32, %arg2: i32, %arg3: i32) -> (i32, i32, i32) {
    %c0_i32 = arith.constant 0 : i32
    return %arg0, %arg2, %arg1 : i32, i32, i32
  }
}

module attributes {stable_mosaic.version = 11 : i64} {
  func.func @_gated_linear_kernel(%arg0: i32, %arg1: i32, %arg2: i32, %arg3: i32, %arg4: memref<1x8x256xbf16, #tpu.memory_space<vmem>>, %arg5: memref<256x256xbf16, #tpu.memory_space<vmem>>, %arg6: memref<1x256xf32, #tpu.memory_space<vmem>>, %arg7: memref<1x8x256xf32, #tpu.memory_space<vmem>>, %arg8: memref<1x1x256xf32, #tpu.memory_space<vmem>>, %arg9: memref<1x8x256xf32, #tpu.memory_space<vmem>>, %arg10: memref<8x256xf32, #tpu.memory_space<vmem>>) attributes {dimension_semantics = [#tpu.dimension_semantics<parallel>, #tpu.dimension_semantics<parallel>, #tpu.dimension_semantics<parallel>, #tpu.dimension_semantics<arbitrary>], iteration_bounds = array<i64: 2, 1, 1, 1>, scalar_prefetch = 0 : i64, scratch_operands = 1 : i64, tpu.core_type = #tpu.core_type<tc>, window_params = [{transform_indices = @transform_0, window_bounds = array<i64: 1, 8, 256>}, {transform_indices = @transform_1, window_bounds = array<i64: 256, 256>}, {transform_indices = @transform_2, window_bounds = array<i64: 1, 256>}, {transform_indices = @transform_3, window_bounds = array<i64: 1, 8, 256>}, {transform_indices = @transform_4, window_bounds = array<i64: 1, 1, 256>}, {transform_indices = @transform_5, window_bounds = array<i64: 1, 8, 256>}]} {
    %c0_i32 = arith.constant 0 : i32
    %0 = arith.cmpi eq, %arg3, %c0_i32 : i32
    %1 = arith.extui %0 : i1 to i32
    %c0_i32_0 = arith.constant 0 : i32
    %2 = arith.cmpi ne, %1, %c0_i32_0 : i32
    scf.if %2 {
      %cst_11 = arith.constant 0.000000e+00 : f32
      %13 = vector.broadcast %cst_11 : f32 to vector<8x256xf32>
      %c0_12 = arith.constant 0 : index
      %c0_13 = arith.constant 0 : index
      %14 = vector.load %arg10[%c0_12, %c0_13] : memref<8x256xf32, #tpu.memory_space<vmem>>, vector<8x256xf32>
      tpu.vector_store %arg10[%c0_12, %c0_13], %13 {strides = array<i32>} : memref<8x256xf32, #tpu.memory_space<vmem>>, vector<8x256xf32>,
    } else {
    }
    %c0 = arith.constant 0 : index
    %c0_1 = arith.constant 0 : index
    %3 = vector.load %arg10[%c0, %c0_1] : memref<8x256xf32, #tpu.memory_space<vmem>>, vector<8x256xf32>
    %c0_2 = arith.constant 0 : index
    %c0_3 = arith.constant 0 : index
    %c0_4 = arith.constant 0 : index
    %4 = vector.load %arg4[%c0_2, %c0_3, %c0_4] : memref<1x8x256xbf16, #tpu.memory_space<vmem>>, vector<1x8x256xbf16>
    %5 = vector.shape_cast %4 : vector<1x8x256xbf16> to vector<8x256xbf16>
    %c0_5 = arith.constant 0 : index
    %c0_6 = arith.constant 0 : index
    %6 = vector.load %arg5[%c0_5, %c0_6] : memref<256x256xbf16, #tpu.memory_space<vmem>>, vector<256x256xbf16>
    %cst = arith.constant dense<0.000000e+00> : vector<8x256xf32>
    %7 = tpu.matmul %5, %6, %cst {dimension_numbers = #tpu.dot_dimension_numbers<[1], [0], [0], [1], [0, 0, 1, 1], [], []>} : vector<8x256xbf16>, vector<256x256xbf16>, vector<8x256xf32> -> vector<8x256xf32>
    %8 = arith.addf %3, %7 : vector<8x256xf32>
    %c0_7 = arith.constant 0 : index
    %c0_8 = arith.constant 0 : index
    %9 = vector.load %arg10[%c0_7, %c0_8] : memref<8x256xf32, #tpu.memory_space<vmem>>, vector<8x256xf32>
    tpu.vector_store %arg10[%c0_7, %c0_8], %8 {strides = array<i32>} : memref<8x256xf32, #tpu.memory_space<vmem>>, vector<8x256xf32>,
    %c0_i32_9 = arith.constant 0 : i32
    %10 = arith.cmpi eq, %arg3, %c0_i32_9 : i32
    %11 = arith.extui %10 : i1 to i32
    %c0_i32_10 = arith.constant 0 : i32
    %12 = arith.cmpi ne, %11, %c0_i32_10 : i32
    scf.if %12 {
      %c0_11 = arith.constant 0 : index
      %c0_12 = arith.constant 0 : index
      %c0_13 = arith.constant 0 : index
      %13 = vector.load %arg7[%c0_11, %c0_12, %c0_13] : memref<1x8x256xf32, #tpu.memory_space<vmem>>, vector<1x8x256xf32>
      %14 = vector.shape_cast %13 : vector<1x8x256xf32> to vector<8x256xf32>
      %c0_14 = arith.constant 0 : index
      %c0_15 = arith.constant 0 : index
      %c0_16 = arith.constant 0 : index
      %15 = vector.load %arg8[%c0_14, %c0_15, %c0_16] : memref<1x1x256xf32, #tpu.memory_space<vmem>>, vector<1x1x256xf32>
      %16 = vector.shape_cast %15 : vector<1x1x256xf32> to vector<1x256xf32>
      %c0_17 = arith.constant 0 : index
      %c0_18 = arith.constant 0 : index
      %17 = vector.load %arg10[%c0_17, %c0_18] : memref<8x256xf32, #tpu.memory_space<vmem>>, vector<8x256xf32>
      %c0_19 = arith.constant 0 : index
      %c0_20 = arith.constant 0 : index
      %18 = vector.load %arg6[%c0_19, %c0_20] : memref<1x256xf32, #tpu.memory_space<vmem>>, vector<1x256xf32>
      %19 = vector.broadcast %18 : vector<1x256xf32> to vector<8x256xf32>
      %20 = arith.addf %17, %19 : vector<8x256xf32>
      %21 = vector.broadcast %16 : vector<1x256xf32> to vector<8x256xf32>
      %22 = arith.mulf %21, %20 : vector<8x256xf32>
      %23 = arith.addf %14, %22 : vector<8x256xf32>
      %c0_21 = arith.constant 0 : index
      %c0_22 = arith.constant 0 : index
      %c0_23 = arith.constant 0 : index
      %24 = vector.load %arg9[%c0_21, %c0_22, %c0_23] : memref<1x8x256xf32, #tpu.memory_space<vmem>>, vector<1x8x256xf32>
      %25 = vector.shape_cast %24 : vector<1x8x256xf32> to vector<8x256xf32>
      %26 = vector.shape_cast %23 : vector<8x256xf32> to vector<1x8x256xf32>
      tpu.vector_store %arg9[%c0_21, %c0_22, %c0_23], %26 {strides = array<i32>} : memref<1x8x256xf32, #tpu.memory_space<vmem>>, vector<1x8x256xf32>,
    } else {
    }
    return
  }
  func.func @transform_0(%arg0: i32, %arg1: i32, %arg2: i32, %arg3: i32) -> (i32, i32, i32) {
    %c0_i32 = arith.constant 0 : i32
    %0 = arith.addi %arg1, %c0_i32 : i32
    %c0_i32_0 = arith.constant 0 : i32
    return %arg0, %0, %arg3 : i32, i32, i32
  }
  func.func @transform_1(%arg0: i32, %arg1: i32, %arg2: i32, %arg3: i32) -> (i32, i32) {
    %c0_i32 = arith.constant 0 : i32
    return %arg3, %arg2 : i32, i32
  }
  func.func @transform_2(%arg0: i32, %arg1: i32, %arg2: i32, %arg3: i32) -> (i32, i32) {
    %c0_i32 = arith.constant 0 : i32
    %c0_i32_0 = arith.constant 0 : i32
    return %c0_i32, %arg2 : i32, i32
  }
  func.func @transform_3(%arg0: i32, %arg1: i32, %arg2: i32, %arg3: i32) -> (i32, i32, i32) {
    %c0_i32 = arith.constant 0 : i32
    return %arg0, %arg1, %arg2 : i32, i32, i32
  }
  func.func @transform_4(%arg0: i32, %arg1: i32, %arg2: i32, %arg3: i32) -> (i32, i32, i32) {
    %c0_i32 = arith.constant 0 : i32
    %c0_i32_0 = arith.constant 0 : i32
    return %arg0, %c0_i32, %arg2 : i32, i32, i32
  }
  func.func @transform_5(%arg0: i32, %arg1: i32, %arg2: i32, %arg3: i32) -> (i32, i32, i32) {
    %c0_i32 = arith.constant 0 : i32
    return %arg0, %arg1, %arg2 : i32, i32, i32
  }
}

module attributes {stable_mosaic.version = 11 : i64} {
  func.func @_gated_ffn_kernel(%arg0: i32, %arg1: i32, %arg2: i32, %arg3: memref<1x8x256xf32, #tpu.memory_space<vmem>>, %arg4: memref<1x1x256xf32, #tpu.memory_space<vmem>>, %arg5: memref<1x1x256xf32, #tpu.memory_space<vmem>>, %arg6: memref<256x512xbf16, #tpu.memory_space<vmem>>, %arg7: memref<1x512xf32, #tpu.memory_space<vmem>>, %arg8: memref<1x512xf32, #tpu.memory_space<vmem>>, %arg9: memref<512x256xbf16, #tpu.memory_space<vmem>>, %arg10: memref<1x256xf32, #tpu.memory_space<vmem>>, %arg11: memref<1x1x256xf32, #tpu.memory_space<vmem>>, %arg12: memref<1x8x256xf32, #tpu.memory_space<vmem>>, %arg13: memref<8x256xf32, #tpu.memory_space<vmem>>) attributes {dimension_semantics = [#tpu.dimension_semantics<parallel>, #tpu.dimension_semantics<parallel>, #tpu.dimension_semantics<arbitrary>], iteration_bounds = array<i64: 2, 1, 2>, scalar_prefetch = 0 : i64, scratch_operands = 1 : i64, tpu.core_type = #tpu.core_type<tc>, window_params = [{transform_indices = @transform_0, window_bounds = array<i64: 1, 8, 256>}, {transform_indices = @transform_1, window_bounds = array<i64: 1, 1, 256>}, {transform_indices = @transform_2, window_bounds = array<i64: 1, 1, 256>}, {transform_indices = @transform_3, window_bounds = array<i64: 256, 512>}, {transform_indices = @transform_4, window_bounds = array<i64: 1, 512>}, {transform_indices = @transform_5, window_bounds = array<i64: 1, 512>}, {transform_indices = @transform_6, window_bounds = array<i64: 512, 256>}, {pipeline_mode = #tpu.pipeline_mode<synchronous>, transform_indices = @transform_7, window_bounds = array<i64: 1, 256>}, {transform_indices = @transform_8, window_bounds = array<i64: 1, 1, 256>}, {transform_indices = @transform_9, window_bounds = array<i64: 1, 8, 256>}]} {
    %c0_i32 = arith.constant 0 : i32
    %0 = arith.cmpi eq, %arg2, %c0_i32 : i32
    %1 = arith.extui %0 : i1 to i32
    %c0_i32_0 = arith.constant 0 : i32
    %2 = arith.cmpi ne, %1, %c0_i32_0 : i32
    scf.if %2 {
      %cst_33 = arith.constant 0.000000e+00 : f32
      %64 = vector.broadcast %cst_33 : f32 to vector<8x256xf32>
      %c0_34 = arith.constant 0 : index
      %c0_35 = arith.constant 0 : index
      %65 = vector.load %arg13[%c0_34, %c0_35] : memref<8x256xf32, #tpu.memory_space<vmem>>, vector<8x256xf32>
      tpu.vector_store %arg13[%c0_34, %c0_35], %64 {strides = array<i32>} : memref<8x256xf32, #tpu.memory_space<vmem>>, vector<8x256xf32>,
    } else {
    }
    %c0 = arith.constant 0 : index
    %c0_1 = arith.constant 0 : index
    %c0_2 = arith.constant 0 : index
    %3 = vector.load %arg3[%c0, %c0_1, %c0_2] : memref<1x8x256xf32, #tpu.memory_space<vmem>>, vector<1x8x256xf32>
    %4 = vector.shape_cast %3 : vector<1x8x256xf32> to vector<8x256xf32>
    %cst = arith.constant dense<0.000000e+00> : vector<8xf32>
    %5 = vector.multi_reduction <add>, %4, %cst [1] : vector<8x256xf32> to vector<8xf32>
    %6 = vector.shape_cast %5 : vector<8xf32> to vector<8x1xf32>
    %cst_3 = arith.constant 2.560000e+02 : f32
    %7 = vector.broadcast %cst_3 : f32 to vector<8x1xf32>
    %8 = arith.divf %6, %7 : vector<8x1xf32>
    %9 = vector.broadcast %8 : vector<8x1xf32> to vector<8x256xf32>
    %10 = arith.subf %4, %9 : vector<8x256xf32>
    %11 = arith.mulf %10, %10 : vector<8x256xf32>
    %cst_4 = arith.constant dense<0.000000e+00> : vector<8xf32>
    %12 = vector.multi_reduction <add>, %11, %cst_4 [1] : vector<8x256xf32> to vector<8xf32>
    %13 = vector.shape_cast %12 : vector<8xf32> to vector<8x1xf32>
    %cst_5 = arith.constant 2.560000e+02 : f32
    %14 = vector.broadcast %cst_5 : f32 to vector<8x1xf32>
    %15 = arith.divf %13, %14 : vector<8x1xf32>
    %16 = vector.broadcast %8 : vector<8x1xf32> to vector<8x256xf32>
    %17 = arith.subf %4, %16 : vector<8x256xf32>
    %cst_6 = arith.constant 9.99999997E-7 : f32
    %18 = vector.broadcast %cst_6 : f32 to vector<8x1xf32>
    %19 = arith.addf %15, %18 : vector<8x1xf32>
    %20 = math.rsqrt %19 : vector<8x1xf32>
    %21 = vector.broadcast %20 : vector<8x1xf32> to vector<8x256xf32>
    %22 = arith.mulf %17, %21 : vector<8x256xf32>
    %c0_7 = arith.constant 0 : index
    %c0_8 = arith.constant 0 : index
    %c0_9 = arith.constant 0 : index
    %23 = vector.load %arg5[%c0_7, %c0_8, %c0_9] : memref<1x1x256xf32, #tpu.memory_space<vmem>>, vector<1x1x256xf32>
    %24 = vector.shape_cast %23 : vector<1x1x256xf32> to vector<1x256xf32>
    %cst_10 = arith.constant 1.000000e+00 : f32
    %25 = vector.broadcast %cst_10 : f32 to vector<1x256xf32>
    %26 = arith.addf %25, %24 : vector<1x256xf32>
    %27 = vector.broadcast %26 : vector<1x256xf32> to vector<8x256xf32>
    %28 = arith.mulf %22, %27 : vector<8x256xf32>
    %c0_11 = arith.constant 0 : index
    %c0_12 = arith.constant 0 : index
    %c0_13 = arith.constant 0 : index
    %29 = vector.load %arg4[%c0_11, %c0_12, %c0_13] : memref<1x1x256xf32, #tpu.memory_space<vmem>>, vector<1x1x256xf32>
    %30 = vector.shape_cast %29 : vector<1x1x256xf32> to vector<1x256xf32>
    %31 = vector.broadcast %30 : vector<1x256xf32> to vector<8x256xf32>
    %32 = arith.addf %28, %31 : vector<8x256xf32>
    %33 = arith.truncf %32 : vector<8x256xf32> to vector<8x256xbf16>
    %c0_14 = arith.constant 0 : index
    %c0_15 = arith.constant 0 : index
    %34 = vector.load %arg6[%c0_14, %c0_15] : memref<256x512xbf16, #tpu.memory_space<vmem>>, vector<256x512xbf16>
    %cst_16 = arith.constant dense<0.000000e+00> : vector<8x512xf32>
    %35 = tpu.matmul %33, %34, %cst_16 {dimension_numbers = #tpu.dot_dimension_numbers<[1], [0], [0], [1], [0, 0, 1, 1], [], []>} : vector<8x256xbf16>, vector<256x512xbf16>, vector<8x512xf32> -> vector<8x512xf32>
    %c0_17 = arith.constant 0 : index
    %c0_18 = arith.constant 0 : index
    %36 = vector.load %arg7[%c0_17, %c0_18] : memref<1x512xf32, #tpu.memory_space<vmem>>, vector<1x512xf32>
    %37 = vector.broadcast %36 : vector<1x512xf32> to vector<8x512xf32>
    %38 = arith.addf %35, %37 : vector<8x512xf32>
    %cst_19 = arith.constant 5.000000e-01 : f32
    %39 = vector.broadcast %cst_19 : f32 to vector<8x512xf32>
    %40 = arith.mulf %39, %38 : vector<8x512xf32>
    %cst_20 = arith.constant 4.471500e-02 : f32
    %41 = vector.broadcast %cst_20 : f32 to vector<8x512xf32>
    %42 = arith.mulf %41, %38 : vector<8x512xf32>
    %43 = arith.mulf %42, %38 : vector<8x512xf32>
    %44 = arith.mulf %43, %38 : vector<8x512xf32>
    %45 = arith.addf %38, %44 : vector<8x512xf32>
    %cst_21 = arith.constant 0.797884583 : f32
    %46 = vector.broadcast %cst_21 : f32 to vector<8x512xf32>
    %47 = arith.mulf %46, %45 : vector<8x512xf32>
    %48 = math.tanh %47 : vector<8x512xf32>
    %cst_22 = arith.constant 1.000000e+00 : f32
    %49 = vector.broadcast %cst_22 : f32 to vector<8x512xf32>
    %50 = arith.addf %49, %48 : vector<8x512xf32>
    %51 = arith.mulf %40, %50 : vector<8x512xf32>
    %c0_23 = arith.constant 0 : index
    %c0_24 = arith.constant 0 : index
    %52 = vector.load %arg8[%c0_23, %c0_24] : memref<1x512xf32, #tpu.memory_space<vmem>>, vector<1x512xf32>
    %53 = vector.broadcast %52 : vector<1x512xf32> to vector<8x512xf32>
    %54 = arith.mulf %51, %53 : vector<8x512xf32>
    %c0_25 = arith.constant 0 : index
    %c0_26 = arith.constant 0 : index
    %55 = vector.load %arg13[%c0_25, %c0_26] : memref<8x256xf32, #tpu.memory_space<vmem>>, vector<8x256xf32>
    %56 = arith.truncf %54 : vector<8x512xf32> to vector<8x512xbf16>
    %c0_27 = arith.constant 0 : index
    %c0_28 = arith.constant 0 : index
    %57 = vector.load %arg9[%c0_27, %c0_28] : memref<512x256xbf16, #tpu.memory_space<vmem>>, vector<512x256xbf16>
    %cst_29 = arith.constant dense<0.000000e+00> : vector<8x256xf32>
    %58 = tpu.matmul %56, %57, %cst_29 {dimension_numbers = #tpu.dot_dimension_numbers<[1], [0], [0], [1], [0, 0, 1, 1], [], []>} : vector<8x512xbf16>, vector<512x256xbf16>, vector<8x256xf32> -> vector<8x256xf32>
    %59 = arith.addf %55, %58 : vector<8x256xf32>
    %c0_30 = arith.constant 0 : index
    %c0_31 = arith.constant 0 : index
    %60 = vector.load %arg13[%c0_30, %c0_31] : memref<8x256xf32, #tpu.memory_space<vmem>>, vector<8x256xf32>
    tpu.vector_store %arg13[%c0_30, %c0_31], %59 {strides = array<i32>} : memref<8x256xf32, #tpu.memory_space<vmem>>, vector<8x256xf32>,
    %c1_i32 = arith.constant 1 : i32
    %61 = arith.cmpi eq, %arg2, %c1_i32 : i32
    %62 = arith.extui %61 : i1 to i32
    %c0_i32_32 = arith.constant 0 : i32
    %63 = arith.cmpi ne, %62, %c0_i32_32 : i32
    scf.if %63 {
      %c0_33 = arith.constant 0 : index
      %c0_34 = arith.constant 0 : index
      %c0_35 = arith.constant 0 : index
      %64 = vector.load %arg11[%c0_33, %c0_34, %c0_35] : memref<1x1x256xf32, #tpu.memory_space<vmem>>, vector<1x1x256xf32>
      %65 = vector.shape_cast %64 : vector<1x1x256xf32> to vector<1x256xf32>
      %c0_36 = arith.constant 0 : index
      %c0_37 = arith.constant 0 : index
      %66 = vector.load %arg13[%c0_36, %c0_37] : memref<8x256xf32, #tpu.memory_space<vmem>>, vector<8x256xf32>
      %c0_38 = arith.constant 0 : index
      %c0_39 = arith.constant 0 : index
      %67 = vector.load %arg10[%c0_38, %c0_39] : memref<1x256xf32, #tpu.memory_space<vmem>>, vector<1x256xf32>
      %68 = vector.broadcast %67 : vector<1x256xf32> to vector<8x256xf32>
      %69 = arith.addf %66, %68 : vector<8x256xf32>
      %70 = vector.broadcast %65 : vector<1x256xf32> to vector<8x256xf32>
      %71 = arith.mulf %70, %69 : vector<8x256xf32>
      %72 = arith.addf %4, %71 : vector<8x256xf32>
      %c0_40 = arith.constant 0 : index
      %c0_41 = arith.constant 0 : index
      %c0_42 = arith.constant 0 : index
      %73 = vector.load %arg12[%c0_40, %c0_41, %c0_42] : memref<1x8x256xf32, #tpu.memory_space<vmem>>, vector<1x8x256xf32>
      %74 = vector.shape_cast %73 : vector<1x8x256xf32> to vector<8x256xf32>
      %75 = vector.shape_cast %72 : vector<8x256xf32> to vector<1x8x256xf32>
      tpu.vector_store %arg12[%c0_40, %c0_41, %c0_42], %75 {strides = array<i32>} : memref<1x8x256xf32, #tpu.memory_space<vmem>>, vector<1x8x256xf32>,
    } else {
    }
    return
  }
  func.func @transform_0(%arg0: i32, %arg1: i32, %arg2: i32) -> (i32, i32, i32) {
    %c0_i32 = arith.constant 0 : i32
    %c0_i32_0 = arith.constant 0 : i32
    return %arg0, %arg1, %c0_i32 : i32, i32, i32
  }
  func.func @transform_1(%arg0: i32, %arg1: i32, %arg2: i32) -> (i32, i32, i32) {
    %c0_i32 = arith.constant 0 : i32
    %c0_i32_0 = arith.constant 0 : i32
    %c0_i32_1 = arith.constant 0 : i32
    return %arg0, %c0_i32, %c0_i32_0 : i32, i32, i32
  }
  func.func @transform_2(%arg0: i32, %arg1: i32, %arg2: i32) -> (i32, i32, i32) {
    %c0_i32 = arith.constant 0 : i32
    %c0_i32_0 = arith.constant 0 : i32
    %c0_i32_1 = arith.constant 0 : i32
    return %arg0, %c0_i32, %c0_i32_0 : i32, i32, i32
  }
  func.func @transform_3(%arg0: i32, %arg1: i32, %arg2: i32) -> (i32, i32) {
    %c0_i32 = arith.constant 0 : i32
    %c0_i32_0 = arith.constant 0 : i32
    return %c0_i32, %arg2 : i32, i32
  }
  func.func @transform_4(%arg0: i32, %arg1: i32, %arg2: i32) -> (i32, i32) {
    %c0_i32 = arith.constant 0 : i32
    %c0_i32_0 = arith.constant 0 : i32
    return %c0_i32, %arg2 : i32, i32
  }
  func.func @transform_5(%arg0: i32, %arg1: i32, %arg2: i32) -> (i32, i32) {
    %c0_i32 = arith.constant 0 : i32
    %c0_i32_0 = arith.constant 0 : i32
    return %c0_i32, %arg2 : i32, i32
  }
  func.func @transform_6(%arg0: i32, %arg1: i32, %arg2: i32) -> (i32, i32) {
    %c0_i32 = arith.constant 0 : i32
    %c0_i32_0 = arith.constant 0 : i32
    return %arg2, %c0_i32 : i32, i32
  }
  func.func @transform_7(%arg0: i32, %arg1: i32, %arg2: i32) -> (i32, i32) {
    %c0_i32 = arith.constant 0 : i32
    %c0_i32_0 = arith.constant 0 : i32
    %c0_i32_1 = arith.constant 0 : i32
    return %c0_i32, %c0_i32_0 : i32, i32
  }
  func.func @transform_8(%arg0: i32, %arg1: i32, %arg2: i32) -> (i32, i32, i32) {
    %c0_i32 = arith.constant 0 : i32
    %c0_i32_0 = arith.constant 0 : i32
    %c0_i32_1 = arith.constant 0 : i32
    return %arg0, %c0_i32, %c0_i32_0 : i32, i32, i32
  }
  func.func @transform_9(%arg0: i32, %arg1: i32, %arg2: i32) -> (i32, i32, i32) {
    %c0_i32 = arith.constant 0 : i32
    %c0_i32_0 = arith.constant 0 : i32
    return %arg0, %arg1, %c0_i32 : i32, i32, i32
  }
}

module attributes {stable_mosaic.version = 11 : i64} {
  func.func @_gated_linear_kernel(%arg0: i32, %arg1: i32, %arg2: i32, %arg3: i32, %arg4: memref<1x8x256xbf16, #tpu.memory_space<vmem>>, %arg5: memref<256x256xbf16, #tpu.memory_space<vmem>>, %arg6: memref<1x256xf32, #tpu.memory_space<vmem>>, %arg7: memref<1x8x256xf32, #tpu.memory_space<vmem>>, %arg8: memref<1x1x256xf32, #tpu.memory_space<vmem>>, %arg9: memref<1x8x256xf32, #tpu.memory_space<vmem>>, %arg10: memref<8x256xf32, #tpu.memory_space<vmem>>) attributes {dimension_semantics = [#tpu.dimension_semantics<parallel>, #tpu.dimension_semantics<parallel>, #tpu.dimension_semantics<parallel>, #tpu.dimension_semantics<arbitrary>], iteration_bounds = array<i64: 2, 2, 1, 1>, scalar_prefetch = 0 : i64, scratch_operands = 1 : i64, tpu.core_type = #tpu.core_type<tc>, window_params = [{transform_indices = @transform_0, window_bounds = array<i64: 1, 8, 256>}, {transform_indices = @transform_1, window_bounds = array<i64: 256, 256>}, {transform_indices = @transform_2, window_bounds = array<i64: 1, 256>}, {transform_indices = @transform_3, window_bounds = array<i64: 1, 8, 256>}, {transform_indices = @transform_4, window_bounds = array<i64: 1, 1, 256>}, {transform_indices = @transform_5, window_bounds = array<i64: 1, 8, 256>}]} {
    %c0_i32 = arith.constant 0 : i32
    %0 = arith.cmpi eq, %arg3, %c0_i32 : i32
    %1 = arith.extui %0 : i1 to i32
    %c0_i32_0 = arith.constant 0 : i32
    %2 = arith.cmpi ne, %1, %c0_i32_0 : i32
    scf.if %2 {
      %cst_11 = arith.constant 0.000000e+00 : f32
      %13 = vector.broadcast %cst_11 : f32 to vector<8x256xf32>
      %c0_12 = arith.constant 0 : index
      %c0_13 = arith.constant 0 : index
      %14 = vector.load %arg10[%c0_12, %c0_13] : memref<8x256xf32, #tpu.memory_space<vmem>>, vector<8x256xf32>
      tpu.vector_store %arg10[%c0_12, %c0_13], %13 {strides = array<i32>} : memref<8x256xf32, #tpu.memory_space<vmem>>, vector<8x256xf32>,
    } else {
    }
    %c0 = arith.constant 0 : index
    %c0_1 = arith.constant 0 : index
    %3 = vector.load %arg10[%c0, %c0_1] : memref<8x256xf32, #tpu.memory_space<vmem>>, vector<8x256xf32>
    %c0_2 = arith.constant 0 : index
    %c0_3 = arith.constant 0 : index
    %c0_4 = arith.constant 0 : index
    %4 = vector.load %arg4[%c0_2, %c0_3, %c0_4] : memref<1x8x256xbf16, #tpu.memory_space<vmem>>, vector<1x8x256xbf16>
    %5 = vector.shape_cast %4 : vector<1x8x256xbf16> to vector<8x256xbf16>
    %c0_5 = arith.constant 0 : index
    %c0_6 = arith.constant 0 : index
    %6 = vector.load %arg5[%c0_5, %c0_6] : memref<256x256xbf16, #tpu.memory_space<vmem>>, vector<256x256xbf16>
    %cst = arith.constant dense<0.000000e+00> : vector<8x256xf32>
    %7 = tpu.matmul %5, %6, %cst {dimension_numbers = #tpu.dot_dimension_numbers<[1], [0], [0], [1], [0, 0, 1, 1], [], []>} : vector<8x256xbf16>, vector<256x256xbf16>, vector<8x256xf32> -> vector<8x256xf32>
    %8 = arith.addf %3, %7 : vector<8x256xf32>
    %c0_7 = arith.constant 0 : index
    %c0_8 = arith.constant 0 : index
    %9 = vector.load %arg10[%c0_7, %c0_8] : memref<8x256xf32, #tpu.memory_space<vmem>>, vector<8x256xf32>
    tpu.vector_store %arg10[%c0_7, %c0_8], %8 {strides = array<i32>} : memref<8x256xf32, #tpu.memory_space<vmem>>, vector<8x256xf32>,
    %c0_i32_9 = arith.constant 0 : i32
    %10 = arith.cmpi eq, %arg3, %c0_i32_9 : i32
    %11 = arith.extui %10 : i1 to i32
    %c0_i32_10 = arith.constant 0 : i32
    %12 = arith.cmpi ne, %11, %c0_i32_10 : i32
    scf.if %12 {
      %c0_11 = arith.constant 0 : index
      %c0_12 = arith.constant 0 : index
      %c0_13 = arith.constant 0 : index
      %13 = vector.load %arg7[%c0_11, %c0_12, %c0_13] : memref<1x8x256xf32, #tpu.memory_space<vmem>>, vector<1x8x256xf32>
      %14 = vector.shape_cast %13 : vector<1x8x256xf32> to vector<8x256xf32>
      %c0_14 = arith.constant 0 : index
      %c0_15 = arith.constant 0 : index
      %c0_16 = arith.constant 0 : index
      %15 = vector.load %arg8[%c0_14, %c0_15, %c0_16] : memref<1x1x256xf32, #tpu.memory_space<vmem>>, vector<1x1x256xf32>
      %16 = vector.shape_cast %15 : vector<1x1x256xf32> to vector<1x256xf32>
      %c0_17 = arith.constant 0 : index
      %c0_18 = arith.constant 0 : index
      %17 = vector.load %arg10[%c0_17, %c0_18] : memref<8x256xf32, #tpu.memory_space<vmem>>, vector<8x256xf32>
      %c0_19 = arith.constant 0 : index
      %c0_20 = arith.constant 0 : index
      %18 = vector.load %arg6[%c0_19, %c0_20] : memref<1x256xf32, #tpu.memory_space<vmem>>, vector<1x256xf32>
      %19 = vector.broadcast %18 : vector<1x256xf32> to vector<8x256xf32>
      %20 = arith.addf %17, %19 : vector<8x256xf32>
      %21 = vector.broadcast %16 : vector<1x256xf32> to vector<8x256xf32>
      %22 = arith.mulf %21, %20 : vector<8x256xf32>
      %23 = arith.addf %14, %22 : vector<8x256xf32>
      %c0_21 = arith.constant 0 : index
      %c0_22 = arith.constant 0 : index
      %c0_23 = arith.constant 0 : index
      %24 = vector.load %arg9[%c0_21, %c0_22, %c0_23] : memref<1x8x256xf32, #tpu.memory_space<vmem>>, vector<1x8x256xf32>
      %25 = vector.shape_cast %24 : vector<1x8x256xf32> to vector<8x256xf32>
      %26 = vector.shape_cast %23 : vector<8x256xf32> to vector<1x8x256xf32>
      tpu.vector_store %arg9[%c0_21, %c0_22, %c0_23], %26 {strides = array<i32>} : memref<1x8x256xf32, #tpu.memory_space<vmem>>, vector<1x8x256xf32>,
    } else {
    }
    return
  }
  func.func @transform_0(%arg0: i32, %arg1: i32, %arg2: i32, %arg3: i32) -> (i32, i32, i32) {
    %c1_i32 = arith.constant 1 : i32
    %0 = arith.addi %arg1, %c1_i32 : i32
    %c0_i32 = arith.constant 0 : i32
    return %arg0, %0, %arg3 : i32, i32, i32
  }
  func.func @transform_1(%arg0: i32, %arg1: i32, %arg2: i32, %arg3: i32) -> (i32, i32) {
    %c0_i32 = arith.constant 0 : i32
    return %arg3, %arg2 : i32, i32
  }
  func.func @transform_2(%arg0: i32, %arg1: i32, %arg2: i32, %arg3: i32) -> (i32, i32) {
    %c0_i32 = arith.constant 0 : i32
    %c0_i32_0 = arith.constant 0 : i32
    return %c0_i32, %arg2 : i32, i32
  }
  func.func @transform_3(%arg0: i32, %arg1: i32, %arg2: i32, %arg3: i32) -> (i32, i32, i32) {
    %c0_i32 = arith.constant 0 : i32
    return %arg0, %arg1, %arg2 : i32, i32, i32
  }
  func.func @transform_4(%arg0: i32, %arg1: i32, %arg2: i32, %arg3: i32) -> (i32, i32, i32) {
    %c0_i32 = arith.constant 0 : i32
    %c0_i32_0 = arith.constant 0 : i32
    return %arg0, %c0_i32, %arg2 : i32, i32, i32
  }
  func.func @transform_5(%arg0: i32, %arg1: i32, %arg2: i32, %arg3: i32) -> (i32, i32, i32) {
    %c0_i32 = arith.constant 0 : i32
    return %arg0, %arg1, %arg2 : i32, i32, i32
  }
}

module attributes {stable_mosaic.version = 11 : i64} {
  func.func @_gated_ffn_kernel(%arg0: i32, %arg1: i32, %arg2: i32, %arg3: memref<1x16x256xf32, #tpu.memory_space<vmem>>, %arg4: memref<1x1x256xf32, #tpu.memory_space<vmem>>, %arg5: memref<1x1x256xf32, #tpu.memory_space<vmem>>, %arg6: memref<256x512xbf16, #tpu.memory_space<vmem>>, %arg7: memref<1x512xf32, #tpu.memory_space<vmem>>, %arg8: memref<1x512xf32, #tpu.memory_space<vmem>>, %arg9: memref<512x256xbf16, #tpu.memory_space<vmem>>, %arg10: memref<1x256xf32, #tpu.memory_space<vmem>>, %arg11: memref<1x1x256xf32, #tpu.memory_space<vmem>>, %arg12: memref<1x16x256xf32, #tpu.memory_space<vmem>>, %arg13: memref<16x256xf32, #tpu.memory_space<vmem>>) attributes {dimension_semantics = [#tpu.dimension_semantics<parallel>, #tpu.dimension_semantics<parallel>, #tpu.dimension_semantics<arbitrary>], iteration_bounds = array<i64: 2, 1, 2>, scalar_prefetch = 0 : i64, scratch_operands = 1 : i64, tpu.core_type = #tpu.core_type<tc>, window_params = [{transform_indices = @transform_0, window_bounds = array<i64: 1, 16, 256>}, {transform_indices = @transform_1, window_bounds = array<i64: 1, 1, 256>}, {transform_indices = @transform_2, window_bounds = array<i64: 1, 1, 256>}, {transform_indices = @transform_3, window_bounds = array<i64: 256, 512>}, {transform_indices = @transform_4, window_bounds = array<i64: 1, 512>}, {transform_indices = @transform_5, window_bounds = array<i64: 1, 512>}, {transform_indices = @transform_6, window_bounds = array<i64: 512, 256>}, {pipeline_mode = #tpu.pipeline_mode<synchronous>, transform_indices = @transform_7, window_bounds = array<i64: 1, 256>}, {transform_indices = @transform_8, window_bounds = array<i64: 1, 1, 256>}, {transform_indices = @transform_9, window_bounds = array<i64: 1, 16, 256>}]} {
    %c0_i32 = arith.constant 0 : i32
    %0 = arith.cmpi eq, %arg2, %c0_i32 : i32
    %1 = arith.extui %0 : i1 to i32
    %c0_i32_0 = arith.constant 0 : i32
    %2 = arith.cmpi ne, %1, %c0_i32_0 : i32
    scf.if %2 {
      %cst_33 = arith.constant 0.000000e+00 : f32
      %64 = vector.broadcast %cst_33 : f32 to vector<16x256xf32>
      %c0_34 = arith.constant 0 : index
      %c0_35 = arith.constant 0 : index
      %65 = vector.load %arg13[%c0_34, %c0_35] : memref<16x256xf32, #tpu.memory_space<vmem>>, vector<16x256xf32>
      tpu.vector_store %arg13[%c0_34, %c0_35], %64 {strides = array<i32>} : memref<16x256xf32, #tpu.memory_space<vmem>>, vector<16x256xf32>,
    } else {
    }
    %c0 = arith.constant 0 : index
    %c0_1 = arith.constant 0 : index
    %c0_2 = arith.constant 0 : index
    %3 = vector.load %arg3[%c0, %c0_1, %c0_2] : memref<1x16x256xf32, #tpu.memory_space<vmem>>, vector<1x16x256xf32>
    %4 = vector.shape_cast %3 : vector<1x16x256xf32> to vector<16x256xf32>
    %cst = arith.constant dense<0.000000e+00> : vector<16xf32>
    %5 = vector.multi_reduction <add>, %4, %cst [1] : vector<16x256xf32> to vector<16xf32>
    %6 = vector.shape_cast %5 : vector<16xf32> to vector<16x1xf32>
    %cst_3 = arith.constant 2.560000e+02 : f32
    %7 = vector.broadcast %cst_3 : f32 to vector<16x1xf32>
    %8 = arith.divf %6, %7 : vector<16x1xf32>
    %9 = vector.broadcast %8 : vector<16x1xf32> to vector<16x256xf32>
    %10 = arith.subf %4, %9 : vector<16x256xf32>
    %11 = arith.mulf %10, %10 : vector<16x256xf32>
    %cst_4 = arith.constant dense<0.000000e+00> : vector<16xf32>
    %12 = vector.multi_reduction <add>, %11, %cst_4 [1] : vector<16x256xf32> to vector<16xf32>
    %13 = vector.shape_cast %12 : vector<16xf32> to vector<16x1xf32>
    %cst_5 = arith.constant 2.560000e+02 : f32
    %14 = vector.broadcast %cst_5 : f32 to vector<16x1xf32>
    %15 = arith.divf %13, %14 : vector<16x1xf32>
    %16 = vector.broadcast %8 : vector<16x1xf32> to vector<16x256xf32>
    %17 = arith.subf %4, %16 : vector<16x256xf32>
    %cst_6 = arith.constant 9.99999997E-7 : f32
    %18 = vector.broadcast %cst_6 : f32 to vector<16x1xf32>
    %19 = arith.addf %15, %18 : vector<16x1xf32>
    %20 = math.rsqrt %19 : vector<16x1xf32>
    %21 = vector.broadcast %20 : vector<16x1xf32> to vector<16x256xf32>
    %22 = arith.mulf %17, %21 : vector<16x256xf32>
    %c0_7 = arith.constant 0 : index
    %c0_8 = arith.constant 0 : index
    %c0_9 = arith.constant 0 : index
    %23 = vector.load %arg5[%c0_7, %c0_8, %c0_9] : memref<1x1x256xf32, #tpu.memory_space<vmem>>, vector<1x1x256xf32>
    %24 = vector.shape_cast %23 : vector<1x1x256xf32> to vector<1x256xf32>
    %cst_10 = arith.constant 1.000000e+00 : f32
    %25 = vector.broadcast %cst_10 : f32 to vector<1x256xf32>
    %26 = arith.addf %25, %24 : vector<1x256xf32>
    %27 = vector.broadcast %26 : vector<1x256xf32> to vector<16x256xf32>
    %28 = arith.mulf %22, %27 : vector<16x256xf32>
    %c0_11 = arith.constant 0 : index
    %c0_12 = arith.constant 0 : index
    %c0_13 = arith.constant 0 : index
    %29 = vector.load %arg4[%c0_11, %c0_12, %c0_13] : memref<1x1x256xf32, #tpu.memory_space<vmem>>, vector<1x1x256xf32>
    %30 = vector.shape_cast %29 : vector<1x1x256xf32> to vector<1x256xf32>
    %31 = vector.broadcast %30 : vector<1x256xf32> to vector<16x256xf32>
    %32 = arith.addf %28, %31 : vector<16x256xf32>
    %33 = arith.truncf %32 : vector<16x256xf32> to vector<16x256xbf16>
    %c0_14 = arith.constant 0 : index
    %c0_15 = arith.constant 0 : index
    %34 = vector.load %arg6[%c0_14, %c0_15] : memref<256x512xbf16, #tpu.memory_space<vmem>>, vector<256x512xbf16>
    %cst_16 = arith.constant dense<0.000000e+00> : vector<16x512xf32>
    %35 = tpu.matmul %33, %34, %cst_16 {dimension_numbers = #tpu.dot_dimension_numbers<[1], [0], [0], [1], [0, 0, 1, 1], [], []>} : vector<16x256xbf16>, vector<256x512xbf16>, vector<16x512xf32> -> vector<16x512xf32>
    %c0_17 = arith.constant 0 : index
    %c0_18 = arith.constant 0 : index
    %36 = vector.load %arg7[%c0_17, %c0_18] : memref<1x512xf32, #tpu.memory_space<vmem>>, vector<1x512xf32>
    %37 = vector.broadcast %36 : vector<1x512xf32> to vector<16x512xf32>
    %38 = arith.addf %35, %37 : vector<16x512xf32>
    %cst_19 = arith.constant 5.000000e-01 : f32
    %39 = vector.broadcast %cst_19 : f32 to vector<16x512xf32>
    %40 = arith.mulf %39, %38 : vector<16x512xf32>
    %cst_20 = arith.constant 4.471500e-02 : f32
    %41 = vector.broadcast %cst_20 : f32 to vector<16x512xf32>
    %42 = arith.mulf %41, %38 : vector<16x512xf32>
    %43 = arith.mulf %42, %38 : vector<16x512xf32>
    %44 = arith.mulf %43, %38 : vector<16x512xf32>
    %45 = arith.addf %38, %44 : vector<16x512xf32>
    %cst_21 = arith.constant 0.797884583 : f32
    %46 = vector.broadcast %cst_21 : f32 to vector<16x512xf32>
    %47 = arith.mulf %46, %45 : vector<16x512xf32>
    %48 = math.tanh %47 : vector<16x512xf32>
    %cst_22 = arith.constant 1.000000e+00 : f32
    %49 = vector.broadcast %cst_22 : f32 to vector<16x512xf32>
    %50 = arith.addf %49, %48 : vector<16x512xf32>
    %51 = arith.mulf %40, %50 : vector<16x512xf32>
    %c0_23 = arith.constant 0 : index
    %c0_24 = arith.constant 0 : index
    %52 = vector.load %arg8[%c0_23, %c0_24] : memref<1x512xf32, #tpu.memory_space<vmem>>, vector<1x512xf32>
    %53 = vector.broadcast %52 : vector<1x512xf32> to vector<16x512xf32>
    %54 = arith.mulf %51, %53 : vector<16x512xf32>
    %c0_25 = arith.constant 0 : index
    %c0_26 = arith.constant 0 : index
    %55 = vector.load %arg13[%c0_25, %c0_26] : memref<16x256xf32, #tpu.memory_space<vmem>>, vector<16x256xf32>
    %56 = arith.truncf %54 : vector<16x512xf32> to vector<16x512xbf16>
    %c0_27 = arith.constant 0 : index
    %c0_28 = arith.constant 0 : index
    %57 = vector.load %arg9[%c0_27, %c0_28] : memref<512x256xbf16, #tpu.memory_space<vmem>>, vector<512x256xbf16>
    %cst_29 = arith.constant dense<0.000000e+00> : vector<16x256xf32>
    %58 = tpu.matmul %56, %57, %cst_29 {dimension_numbers = #tpu.dot_dimension_numbers<[1], [0], [0], [1], [0, 0, 1, 1], [], []>} : vector<16x512xbf16>, vector<512x256xbf16>, vector<16x256xf32> -> vector<16x256xf32>
    %59 = arith.addf %55, %58 : vector<16x256xf32>
    %c0_30 = arith.constant 0 : index
    %c0_31 = arith.constant 0 : index
    %60 = vector.load %arg13[%c0_30, %c0_31] : memref<16x256xf32, #tpu.memory_space<vmem>>, vector<16x256xf32>
    tpu.vector_store %arg13[%c0_30, %c0_31], %59 {strides = array<i32>} : memref<16x256xf32, #tpu.memory_space<vmem>>, vector<16x256xf32>,
    %c1_i32 = arith.constant 1 : i32
    %61 = arith.cmpi eq, %arg2, %c1_i32 : i32
    %62 = arith.extui %61 : i1 to i32
    %c0_i32_32 = arith.constant 0 : i32
    %63 = arith.cmpi ne, %62, %c0_i32_32 : i32
    scf.if %63 {
      %c0_33 = arith.constant 0 : index
      %c0_34 = arith.constant 0 : index
      %c0_35 = arith.constant 0 : index
      %64 = vector.load %arg11[%c0_33, %c0_34, %c0_35] : memref<1x1x256xf32, #tpu.memory_space<vmem>>, vector<1x1x256xf32>
      %65 = vector.shape_cast %64 : vector<1x1x256xf32> to vector<1x256xf32>
      %c0_36 = arith.constant 0 : index
      %c0_37 = arith.constant 0 : index
      %66 = vector.load %arg13[%c0_36, %c0_37] : memref<16x256xf32, #tpu.memory_space<vmem>>, vector<16x256xf32>
      %c0_38 = arith.constant 0 : index
      %c0_39 = arith.constant 0 : index
      %67 = vector.load %arg10[%c0_38, %c0_39] : memref<1x256xf32, #tpu.memory_space<vmem>>, vector<1x256xf32>
      %68 = vector.broadcast %67 : vector<1x256xf32> to vector<16x256xf32>
      %69 = arith.addf %66, %68 : vector<16x256xf32>
      %70 = vector.broadcast %65 : vector<1x256xf32> to vector<16x256xf32>
      %71 = arith.mulf %70, %69 : vector<16x256xf32>
      %72 = arith.addf %4, %71 : vector<16x256xf32>
      %c0_40 = arith.constant 0 : index
      %c0_41 = arith.constant 0 : index
      %c0_42 = arith.constant 0 : index
      %73 = vector.load %arg12[%c0_40, %c0_41, %c0_42] : memref<1x16x256xf32, #tpu.memory_space<vmem>>, vector<1x16x256xf32>
      %74 = vector.shape_cast %73 : vector<1x16x256xf32> to vector<16x256xf32>
      %75 = vector.shape_cast %72 : vector<16x256xf32> to vector<1x16x256xf32>
      tpu.vector_store %arg12[%c0_40, %c0_41, %c0_42], %75 {strides = array<i32>} : memref<1x16x256xf32, #tpu.memory_space<vmem>>, vector<1x16x256xf32>,
    } else {
    }
    return
  }
  func.func @transform_0(%arg0: i32, %arg1: i32, %arg2: i32) -> (i32, i32, i32) {
    %c0_i32 = arith.constant 0 : i32
    %c0_i32_0 = arith.constant 0 : i32
    return %arg0, %arg1, %c0_i32 : i32, i32, i32
  }
  func.func @transform_1(%arg0: i32, %arg1: i32, %arg2: i32) -> (i32, i32, i32) {
    %c0_i32 = arith.constant 0 : i32
    %c0_i32_0 = arith.constant 0 : i32
    %c0_i32_1 = arith.constant 0 : i32
    return %arg0, %c0_i32, %c0_i32_0 : i32, i32, i32
  }
  func.func @transform_2(%arg0: i32, %arg1: i32, %arg2: i32) -> (i32, i32, i32) {
    %c0_i32 = arith.constant 0 : i32
    %c0_i32_0 = arith.constant 0 : i32
    %c0_i32_1 = arith.constant 0 : i32
    return %arg0, %c0_i32, %c0_i32_0 : i32, i32, i32
  }
  func.func @transform_3(%arg0: i32, %arg1: i32, %arg2: i32) -> (i32, i32) {
    %c0_i32 = arith.constant 0 : i32
    %c0_i32_0 = arith.constant 0 : i32
    return %c0_i32, %arg2 : i32, i32
  }
  func.func @transform_4(%arg0: i32, %arg1: i32, %arg2: i32) -> (i32, i32) {
    %c0_i32 = arith.constant 0 : i32
    %c0_i32_0 = arith.constant 0 : i32
    return %c0_i32, %arg2 : i32, i32
  }
  func.func @transform_5(%arg0: i32, %arg1: i32, %arg2: i32) -> (i32, i32) {
    %c0_i32 = arith.constant 0 : i32
    %c0_i32_0 = arith.constant 0 : i32
    return %c0_i32, %arg2 : i32, i32
  }
  func.func @transform_6(%arg0: i32, %arg1: i32, %arg2: i32) -> (i32, i32) {
    %c0_i32 = arith.constant 0 : i32
    %c0_i32_0 = arith.constant 0 : i32
    return %arg2, %c0_i32 : i32, i32
  }
  func.func @transform_7(%arg0: i32, %arg1: i32, %arg2: i32) -> (i32, i32) {
    %c0_i32 = arith.constant 0 : i32
    %c0_i32_0 = arith.constant 0 : i32
    %c0_i32_1 = arith.constant 0 : i32
    return %c0_i32, %c0_i32_0 : i32, i32
  }
  func.func @transform_8(%arg0: i32, %arg1: i32, %arg2: i32) -> (i32, i32, i32) {
    %c0_i32 = arith.constant 0 : i32
    %c0_i32_0 = arith.constant 0 : i32
    %c0_i32_1 = arith.constant 0 : i32
    return %arg0, %c0_i32, %c0_i32_0 : i32, i32, i32
  }
  func.func @transform_9(%arg0: i32, %arg1: i32, %arg2: i32) -> (i32, i32, i32) {
    %c0_i32 = arith.constant 0 : i32
    %c0_i32_0 = arith.constant 0 : i32
    return %arg0, %arg1, %c0_i32 : i32, i32, i32
  }
}

</mosaic_0001>

<bundles_post_ra>
// kernel: gated_flux_transformer_block.10
= control target key start
LH: loop header
LB: loop body
LE: loop exit
PB: predicated region body
PF: predicated region fallthrough
CT: control target
= control target key end

     0   :  { %s1974_s0 = inlined_call_operand.hbm [shape: f32[2,8,256], index: 0, kind: input, shape index: {}]   ;;  %s1975_s1 = inlined_call_operand.vmem [shape: f32[2,1,256], index: 1, kind: input, shape index: {}]   ;;  %s1976_s2 = inlined_call_operand.vmem [shape: f32[2,1,256], index: 2, kind: input, shape index: {}]   ;;  %s1977_s3 = inlined_call_operand.hbm [shape: bf16[256,768], index: 3, kind: input, shape index: {}]   ;;  %s1978_s4 = inlined_call_operand.hbm [shape: f32[1,768], index: 4, kind: input, shape index: {}]   ;;  %s1979_s5 = inlined_call_operand.vmem [shape: bf16[2,8,768], index: 5, kind: output, shape index: {}]  }
   0x1   :  { %1986 = sst [smem:[#allocation16_spill]] %s1977_s3 }
   0x2   :  { %1987 = sst [smem:[#allocation17_spill]] %s1979_s5 }
   0x3   :  { %10 = vsyncpa [#allocation3], 0 }
   0x4   :  { %12 = vsyncpa [#allocation3 + $0x1], 0 }
   0x5   :  { %13 = vsyncpa [#allocation5], 0 }
   0x6   :  { %15 = vsyncpa [#allocation5 + $0x1], 0  ;;  %s1645_s18 = smov 0   ;;  %s1647_s19 = smov 0  }
   0x7   :  { %s1649_s20 = smov 0   ;;  %s1651_s21 = smov 0  }
   0x8   :  { %s1653_s22 = smov 0   ;;  %s1655_s23 = smov 0  }
   0x9   :  { %s1657_s24 = smov 0   ;;  %s1659_s25 = smov 0  }
   0xa   :  { %s1661_s26 = smov 0   ;;  %s1663_s27 = smov 0  }
   0xb   :  { %s1665_s28 = smov 0  }
   0xc LB: > { %1988 = sst [smem:[#allocation9_spill]] %s1589_s23  ;;  %p57_p0 = scmp.eq.s32.totalorder %s1609_s28, 0  ;;  %s1609_s28 = sphi %s1665_s28, %s21_s28   ;;  %s1605_s27 = sphi %s1663_s27, %s2010_s27   ;;  %s1601_s26 = sphi %s1661_s26, %s2018_s26   ;;  %s1597_s25 = sphi %s1659_s25, %s2017_s25   ;;  %s1593_s24 = sphi %s1657_s24, %s2016_s24   ;;  %s1589_s23 = sphi %s1655_s23, %s2007_s23   ;;  %s1585_s22 = sphi %s1653_s22, %s2015_s22   ;;  %s1581_s21 = sphi %s1651_s21, %s2014_s21   ;;  %s1577_s20 = sphi %s1649_s20, %s2013_s20   ;;  %s1573_s19 = sphi %s1647_s19, %s2012_s19   ;;  %s1569_s18 = sphi %s1645_s18, %s2011_s18  }
   0xd   : > { %1989 = sst [smem:[#allocation10_spill]] %s1593_s24  ;;  %s127_s29 = sadd.s32 1, %s1577_s20 }
   0xe   : > { %1990 = sst [smem:[#allocation11_spill]] %s1605_s27  ;;  %p134_p1 = scmp.ne.s32.totalorder %s1577_s20, %s1573_s19 }
   0xf   : > { %p1328_p2 = scmp.lt.s32.totalorder %s1609_s28, 4  ;;  %s256_s30 = sand.u32 1, %s1609_s28  }
  0x10   : > { %p136_p3 = por %p134_p1, %p57_p0  ;;  %s1981_s6 = sand.u32 1, %s1577_s20  }
  0x11   : > { %s1258_s7 = smul.u32 12, %s1601_s26  ;;  %s1992_s3 = sld [smem:[#allocation16_spill]] }
  0x12   : > { %s1307_s8 = smul.u32 384, %s1981_s6  ;;  %p1714_p4 = pnand %p1328_p2, %p136_p3 }
  0x13   : > { %s1721_s16 = scalar_lea.sflag [#allocation5], %s256_s30  ;;  %s1611_s17 = smov 384  }
  0x14   : > { %s260_s14 = scalar_lea.vmem [#allocation4], %s1307_s8  ;;  %s1612_s10 = smov 192  }
  0x15   : > { %s268_s15 = sshll.u32 %s260_s14, 4  ;;  %p1058_p5 = scmp.ge.s32.totalorder %s1609_s28, 1  ;;  %s269_s15 = int_to_ptr.vmem [resolvable:$true] %s268_s15 }
  0x16   : > { %p295_p6 = scmp.lt.s32.totalorder %s1609_s28, 5  ;;  %s1980_s11 = sadd.s32 4294967295, %s1609_s28  }
  0x17   : > { %s265_s12 = scalar_lea.hbm %s1992_s3, %s1258_s7  ;;  %s1613_s7 = smov 12  }
  0x18   : > { %s266_s13 = sshll.u32 %s265_s12, 4  ;;  %p1728_p7 = pnand %p1058_p5, %p295_p6  ;;  %s267_s13 = int_to_ptr.hbm [resolvable:$true] %s266_s13 }
  0x19   : > { %1324 = dma.hbm_to_vmem [thread:$0]  (!%p1714_p4), %s267_s13, 6144, %s269_s15, %s1721_s16, %s1611_s17, %s1612_s10, %s1613_s7  }
  0x1a   : > { %s33_s30 = sadd.s32 1, %s1601_s26  ;;  %s40_s12 = sadd.s32 1, %s1605_s27 }
  0x1b   : > { %p34_p8 = scmp.ge.s32.totalorder %s33_s30, 2  ;;  %s49_s14 = sadd.s32 1, %s1589_s23 }
  0x1c   : > { %p56_p9 = scmp.ne.s32.totalorder %s1589_s23, %s1585_s22  ;;  %p62_p10 = scmp.ne.s32.totalorder %s1585_s22, %s1581_s21 }
  0x1d   : > { %s2020_s30 = smov (%p34_p8, %s33_s30), 0  ;;  %s2022_s12 = smov (!%p34_p8, %s40_s12), %s1605_s27 }
  0x1e   : > { %1994 = sst [smem:[#allocation12_spill]] %s2020_s30  ;;  %p1745_p11 = por %p57_p0, %p56_p9 }
  0x1f   : > { %p63_p12 = scmp.eq.s32.totalorder %s1980_s11, 0  ;;  %p42_p13 = scmp.ge.s32.totalorder %s2022_s12, 2 }
  0x20   : > { %s124_s15 = ssub.s32 %s1601_s26, %s2020_s30  ;;  %p140_p0 = scmp.ne.s32.totalorder %s1573_s19, %s1569_s18 }
  0x21   : > { %p1753_p1 = por %p63_p12, %p62_p10  ;;  %p125_p3 = scmp.eq.s32.totalorder %s124_s15, 0 }
  0x22   : > { %s2024_s12 = smov (%p42_p13, %s2022_s12), 0  ;;  %s220_s7 = sand.u32 1, %s1589_s23  }
  0x23   : > { %1997 = sst [smem:[#allocation13_spill]] %s2024_s12  ;;  %s44_s10 = ssub.s32 %s1605_s27, %s2024_s12 }
  0x24   : > { %s1762_s21 = scalar_select %p125_p3, %s1577_s20, %s127_s29  }
  0x25   : > { %p47_p5 = scmp.eq.s32.totalorder %s44_s10, 0  ;;  %p1769_p6 = por %p140_p0, %p63_p12 }
  0x26   : > { %1998 = sst [smem:[#allocation14_spill]] %s1762_s21  ;;  %s1054_s15 = sshll.u32 %s220_s7, 4 }
  0x27   : > { %s1774_s6 = scalar_select %p47_p5, %s1589_s23, %s49_s14  }
  0x28   : > { %s1257_s3 = sshll.u32 %s1605_s27, 4  ;;  %s224_s12 = scalar_lea.vmem [#allocation2], %s1054_s15 }
  0x29   : > { %2000 = sst [smem:[#allocation15_spill]] %s1774_s6  ;;  %s231_s24 = scalar_lea.hbm %s1974_s0, %s1257_s3 }
  0x2a   : > { %s233_s29 = sshll.u32 %s231_s24, 4  ;;  %s235_s21 = sshll.u32 %s224_s12, 4  ;;  %s234_s29 = int_to_ptr.hbm [resolvable:$true] %s233_s29  ;;  %s236_s21 = int_to_ptr.vmem [resolvable:$true] %s235_s21 }
  0x2b   : > { %p1319_p8 = pnand %p1328_p2, %p1745_p11  ;;  %s2001_s18 = sand.u32 1, %s1577_s20  }
  0x2c   : > { %s1308_s10 = smul.u32 3, %s2001_s18  ;;  %s221_s6 = scalar_lea.sflag [#allocation3], %s220_s7 }
  0x2d   : > { %s283_s14 = smul.u32 3, %s1601_s26  ;;  %s301_s12 = sand.u32 (!%p1728_p7), 1, %s1585_s22  }
  0x2e   : > { %1321 = dma.hbm_to_vmem [thread:$0]  (!%p1319_p8), %s234_s29, 256, %s236_s21, %s221_s6  }
  0x2f   : > { %s286_s5 = scalar_lea.hbm %s1978_s4, %s283_s14  ;;  %s282_s3 = scalar_lea.vmem [#allocation6], %s1308_s10 }
  0x30   : > { %s290_s24 = sshll.u32 %s282_s3, 4  ;;  %s288_s30 = sshll.u32 %s286_s5, 4  ;;  %s291_s24 = int_to_ptr.vmem [resolvable:$true] %s290_s24  ;;  %s289_s30 = int_to_ptr.hbm [resolvable:$true] %s288_s30 }
  0x31   : > { %1327 = dma.hbm_to_vmem [thread:$0]  (!%p1714_p4), %s289_s30, 48, %s291_s24, %s1721_s16  }
  0x32   : > { %299 = sbr.rel (%p1728_p7) target bundleno = 484 (0x1e4), region = 40  ;;  %s1059_s13 = sshll.u32 (!%p1728_p7), %s301_s12, 4 }
  0x33   : > { %s302_s7 = scalar_lea.sflag (!%p1728_p7), [#allocation3], %s301_s12  ;;  %s305_s6 = scalar_lea.vmem (!%p1728_p7), [#allocation2], %s1059_s13 }
  0x37   : > { %1560 = dma.done.wait (%p1753_p1), %s302_s7, 256  }
  0x38   : > { %1562 = vsyncadd (%p1753_p1), %s302_s7, 4294967040  ;;  %s2002_s23 = sadd.s32 4294967295, %s1609_s28   ;;  %s313_s9 = sand.u32 1, %s1573_s19  }
  0x39   : > { %s311_s27 = sand.u32 1, %s2002_s23   ;;  %s1309_s16 = smul.u32 384, %s313_s9 }
  0x3a   : > { %s312_s8 = scalar_lea.sflag [#allocation5], %s311_s27 }
  0x3b   : > { %s1805_s21 = scalar_lea.vmem [#allocation4], %s1309_s16 }
  0x3c   : > { %1564 = dma.done.wait (%p1769_p6), %s312_s8, 6192  }
  0x3d   : > { %1566 = vsyncadd (%p1769_p6), %s312_s8, 4294961104  ;;  %v403_v0 = vld [vmem:[%s305_s6] sm:$0xff]  ;;  %v404_v1 = vld [vmem:[%s305_s6 + $0x8] sm:$0xff]  ;;  %v1614_v3 = vmov 256.0   ;;  %p379_p2 = scmp.lt.s32.totalorder %s1597_s25, 1  ;;  %s2003_s5 = sld [smem:[#allocation10_spill]] }
  0x3e   : > { %v405_v2 = vadd.f32 %v404_v1, %v403_v0  ;;  %1421 = vrcp.f32 %v1614_v3  ;;  %v1149_v5 = vld [vmem:[%s1805_s21 + $0xa8] sm:$0xf]  ;;  %v1281_v6 = vld [vmem:[%s1805_s21 + $0xb0] sm:$0xf0]  ;;  %v1137_v10 = vld [vmem:[%s1805_s21 + $0x90] sm:$0xf] }
  0x3f   : > { %v1245_v7 = vld [vmem:[%s1805_s21 + $0x168] sm:$0xf]  ;;  %v1150_v8 = vor.u32 %v1281_v6, %v1149_v5  ;;  %v1305_v9 = vld [vmem:[%s1805_s21 + $0x170] sm:$0xf0]  ;;  %v1278_v11 = vld [vmem:[%s1805_s21 + $0x98] sm:$0xf0] }
  0x40   : > { %406 = vadd.xlane.f32.xlu0 %v405_v2  ;;  %v1246_v12 = vor.u32 %v1305_v9, %v1245_v7  ;;  %v1233_v13 = vld [vmem:[%s1805_s21 + $0x150] sm:$0xf]  ;;  %v1302_v14 = vld [vmem:[%s1805_s21 + $0x158] sm:$0xf0]  ;;  %v1138_v16 = vor.u32 %v1278_v11, %v1137_v10  ;;  %v1125_v18 = vld [vmem:[%s1805_s21 + $0x78] sm:$0xf] }
  0x41   : > { %784 = vmatpush.bf16.msra.mxu0 %v1150_v8  ;;  %v1234_v17 = vor.u32 %v1302_v14, %v1233_v13  ;;  %v1275_v19 = vld [vmem:[%s1805_s21 + $0x80] sm:$0xf0]  ;;  %v1221_v20 = vld [vmem:[%s1805_s21 + $0x138] sm:$0xf]  ;;  %v1280_v22 = vld [vmem:[%s1805_s21 + $0xac] sm:$0xf] }
  0x42   : > { %797 = vmatpush.bf16.msra.mxu1 %v1246_v12  ;;  %v1299_v21 = vld [vmem:[%s1805_s21 + $0x140] sm:$0xf0]  ;;  %v1151_v23 = vld [vmem:[%s1805_s21 + $0xb4] sm:$0xf0]  ;;  %v1304_v25 = vld [vmem:[%s1805_s21 + $0x16c] sm:$0xf]  ;;  %v1126_v27 = vor.u32 %v1275_v19, %v1125_v18 }
  0x43   : > { %v1154_v24 = vor.u32 %v1280_v22, %v1151_v23  ;;  %v1247_v26 = vld [vmem:[%s1805_s21 + $0x174] sm:$0xf0]  ;;  %v1222_v29 = vor.u32 %v1299_v21, %v1221_v20  ;;  %v1113_v30 = vld [vmem:[%s1805_s21 + $0x60] sm:$0xf]  ;;  %v1272_v31 = vld [vmem:[%s1805_s21 + $0x68] sm:$0xf0] }
  0x44   : > { %v1422_v4 = vpop.eup %1421  ;;  %v1250_v28 = vor.u32 %v1304_v25, %v1247_v26  ;;  %v1209_v33 = vld [vmem:[%s1805_s21 + $0x120] sm:$0xf]  ;;  %v1296_v34 = vld [vmem:[%s1805_s21 + $0x128] sm:$0xf0]  ;;  %v1114_v35 = vor.u32 %v1272_v31, %v1113_v30  ;;  %v1101_v47 = vld [vmem:[%s1805_s21 + $0x48] sm:$0xf] }
  0x45   : > { %v409_v15 = vmul.f32 256.0, %v1422_v4  ;;  %785 = vmatpush.bf16.msra.mxu0 %v1138_v16  ;;  %810 = vmatpush.bf16.msra.mxu2 %v1154_v24  ;;  %v1210_v36 = vor.u32 %v1296_v34, %v1209_v33  ;;  %vm413_vm0 = vweird.f32 %v1422_v4  ;;  %v1269_v48 = vld [vmem:[%s1805_s21 + $0x50] sm:$0xf0]  ;;  %v1197_v49 = vld [vmem:[%s1805_s21 + $0x108] sm:$0xf]  ;;  %s2026_s25 = smov (!%p379_p2, %s1597_s25), 1 }
  0x46   : > { %798 = vmatpush.bf16.msra.mxu1 %v1234_v17  ;;  %823 = vmatpush.bf16.msra.mxu3 %v1250_v28  ;;  %v1102_v50 = vor.u32 %v1269_v48, %v1101_v47  ;;  %v1293_v51 = vld [vmem:[%s1805_s21 + $0x110] sm:$0xf0]  ;;  %v1139_v53 = vld [vmem:[%s1805_s21 + $0x9c] sm:$0xf0]  ;;  %v1089_v59 = vld [vmem:[%s1805_s21 + $0x30] sm:$0xf] }
  0x47   : > { %v410_v32 = vsub.f32 1.0, %v409_v15  ;;  %v1277_v52 = vld [vmem:[%s1805_s21 + $0x94] sm:$0xf]  ;;  %v1198_v54 = vor.u32 %v1293_v51, %v1197_v49  ;;  %v1235_v57 = vld [vmem:[%s1805_s21 + $0x15c] sm:$0xf0]  ;;  %s1060_s11 = sshll.u32 %s2026_s25, 1 }
  0x48   : > { %v1142_v55 = vor.u32 %v1277_v52, %v1139_v53  ;;  %v1301_v56 = vld [vmem:[%s1805_s21 + $0x154] sm:$0xf]  ;;  %v1266_v60 = vld [vmem:[%s1805_s21 + $0x38] sm:$0xf0]  ;;  %v1185_v61 = vld [vmem:[%s1805_s21 + $0xf0] sm:$0xf]  ;;  %s386_s29 = scalar_lea.vmem %s1976_s2, %s1060_s11  ;;  %s382_s14 = scalar_lea.vmem %s1975_s1, %s1060_s11 }
  0x49   : > { %786 = vmatpush.bf16.msra.mxu0 %v1126_v27  ;;  %v411_v37 = vmul.f32 %v1422_v4, %v410_v32  ;;  %v1238_v58 = vor.u32 %v1301_v56, %v1235_v57  ;;  %v1090_v62 = vor.u32 %v1266_v60, %v1089_v59  ;;  %v1290_v63 = vld [vmem:[%s1805_s21 + $0xf8] sm:$0xf0]  ;;  %v1223_v5 = vld [vmem:[%s1805_s21 + $0x144] sm:$0xf0]  ;;  %v1077_v7 = vld [vmem:[%s1805_s21 + $0x18] sm:$0xf] }
  0x4a   : > { %799 = vmatpush.bf16.msra.mxu1 %v1222_v29  ;;  %811 = vmatpush.bf16.msra.mxu2 %v1142_v55  ;;  %v1186_v2 = vor.u32 %v1290_v63, %v1185_v61  ;;  %v1263_v8 = vld [vmem:[%s1805_s21 + $0x20] sm:$0xf0]  ;;  %v1173_v9 = vld [vmem:[%s1805_s21 + $0xd8] sm:$0xf]  ;;  %v1115_v13 = vld [vmem:[%s1805_s21 + $0x6c] sm:$0xf0] }
  0x4b   : > { %v412_v38 = vadd.f32 %v1422_v4, %v411_v37  ;;  %824 = vmatpush.bf16.msra.mxu3 %v1238_v58  ;;  %v1078_v10 = vor.u32 %v1263_v8, %v1077_v7  ;;  %v1287_v11 = vld [vmem:[%s1805_s21 + $0xe0] sm:$0xf0]  ;;  %v1211_v17 = vld [vmem:[%s1805_s21 + $0x12c] sm:$0xf0]  ;;  %v1065_v19 = vld [vmem:[%s1805_s21] sm:$0xf] }
  0x4c   : > { %v1271_v12 = vld [vmem:[%s1805_s21 + $0x64] sm:$0xf]  ;;  %v1174_v14 = vor.u32 %v1287_v11, %v1173_v9  ;;  %v1260_v20 = vld [vmem:[%s1805_s21 + $0x8] sm:$0xf0]  ;;  %v1161_v21 = vld [vmem:[%s1805_s21 + $0xc0] sm:$0xf] }
  0x4d   : > { %787 = vmatpush.bf16.msra.mxu0 %v1114_v35  ;;  %v1831_v39 = vsel %vm413_vm0, %v1422_v4, %v412_v38  ;;  %v1298_v4 = vld [vmem:[%s1805_s21 + $0x13c] sm:$0xf]  ;;  %v1118_v15 = vor.u32 %v1271_v12, %v1115_v13  ;;  %v1295_v16 = vld [vmem:[%s1805_s21 + $0x124] sm:$0xf]  ;;  %v1066_v22 = vor.u32 %v1260_v20, %v1065_v19  ;;  %v1284_v23 = vld [vmem:[%s1805_s21 + $0xc8] sm:$0xf0] }
  0x4e   : > { %800 = vmatpush.bf16.msra.mxu1 %v1210_v36  ;;  %v1226_v6 = vor.u32 %v1298_v4, %v1223_v5  ;;  %v1214_v18 = vor.u32 %v1295_v16, %v1211_v17  ;;  %v1268_v24 = vld [vmem:[%s1805_s21 + $0x4c] sm:$0xf]  ;;  %v1103_v25 = vld [vmem:[%s1805_s21 + $0x54] sm:$0xf0]  ;;  %v1162_v26 = vor.u32 %v1284_v23, %v1161_v21  ;;  %v1157_v30 = vld [vmem:[%s1805_s21 + $0xb0] sm:$0xf] }
  0x4f   : > { %v1106_v27 = vor.u32 %v1268_v24, %v1103_v25  ;;  %v1292_v28 = vld [vmem:[%s1805_s21 + $0x10c] sm:$0xf]  ;;  %v1199_v29 = vld [vmem:[%s1805_s21 + $0x114] sm:$0xf0]  ;;  %v1282_v32 = vld [vmem:[%s1805_s21 + $0xb8] sm:$0xf0] }
  0x50   : > { %825 = vmatpush.bf16.msra.mxu3 %v1226_v6  ;;  %v1202_v31 = vor.u32 %v1292_v28, %v1199_v29  ;;  %v1253_v33 = vld [vmem:[%s1805_s21 + $0x170] sm:$0xf]  ;;  %v1306_v34 = vld [vmem:[%s1805_s21 + $0x178] sm:$0xf0]  ;;  %v1158_v35 = vor.u32 %v1282_v32, %v1157_v30  ;;  %v1265_v37 = vld [vmem:[%s1805_s21 + $0x34] sm:$0xf] }
  0x51   : > { %788 = vmatpush.bf16.msra.mxu0 %v1102_v50  ;;  %v1254_v36 = vor.u32 %v1306_v34, %v1253_v33  ;;  %v1091_v38 = vld [vmem:[%s1805_s21 + $0x3c] sm:$0xf0]  ;;  %v1241_v49 = vld [vmem:[%s1805_s21 + $0x158] sm:$0xf]  ;;  %v1303_v50 = vld [vmem:[%s1805_s21 + $0x160] sm:$0xf0] }
  0x52   : > { %801 = vmatpush.bf16.msra.mxu1 %v1198_v54  ;;  %v1242_v51 = vor.u32 %v1303_v50, %v1241_v49  ;;  %v1262_v52 = vld [vmem:[%s1805_s21 + $0x1c] sm:$0xf]  ;;  %v1079_v53 = vld [vmem:[%s1805_s21 + $0x24] sm:$0xf0]  ;;  %v1133_v57 = vld [vmem:[%s1805_s21 + $0x80] sm:$0xf] }
  0x53   : > { %v1286_v54 = vld [vmem:[%s1805_s21 + $0xdc] sm:$0xf]  ;;  %v1082_v55 = vor.u32 %v1262_v52, %v1079_v53  ;;  %v1175_v56 = vld [vmem:[%s1805_s21 + $0xe4] sm:$0xf0]  ;;  %v1276_v58 = vld [vmem:[%s1805_s21 + $0x88] sm:$0xf0] }
  0x54   : > { %826 = vmatpush.bf16.msra.mxu3 %v1214_v18  ;;  %v1178_v59 = vor.u32 %v1286_v54, %v1175_v56  ;;  %v1134_v60 = vor.u32 %v1276_v58, %v1133_v57  ;;  %v1229_v61 = vld [vmem:[%s1805_s21 + $0x140] sm:$0xf]  ;;  %v1259_v63 = vld [vmem:[%s1805_s21 + $0x4] sm:$0xf]  ;;  %v1121_v6 = vld [vmem:[%s1805_s21 + $0x68] sm:$0xf] }
  0x55   : > { %789 = vmatpush.bf16.msra.mxu0 %v1090_v62  ;;  %v1300_v62 = vld [vmem:[%s1805_s21 + $0x148] sm:$0xf0]  ;;  %v1273_v7 = vld [vmem:[%s1805_s21 + $0x70] sm:$0xf0]  ;;  %v1217_v8 = vld [vmem:[%s1805_s21 + $0x128] sm:$0xf] }
  0x56   : > { %802 = vmatpush.bf16.msra.mxu1 %v1186_v2  ;;  %v1283_v2 = vld [vmem:[%s1805_s21 + $0xc4] sm:$0xf]  ;;  %v1122_v9 = vor.u32 %v1273_v7, %v1121_v6  ;;  %v1109_v12 = vld [vmem:[%s1805_s21 + $0x50] sm:$0xf]  ;;  %v1270_v13 = vld [vmem:[%s1805_s21 + $0x58] sm:$0xf0] }
  0x57   : > { %v1294_v16 = vld [vmem:[%s1805_s21 + $0x118] sm:$0xf0]  ;;  %v1097_v19 = vld [vmem:[%s1805_s21 + $0x38] sm:$0xf]  ;;  %v1267_v20 = vld [vmem:[%s1805_s21 + $0x40] sm:$0xf0] }
  0x58   : > { %827 = vmatpush.bf16.msra.mxu3 %v1202_v31  ;;  %v1193_v21 = vld [vmem:[%s1805_s21 + $0xf8] sm:$0xf]  ;;  %v1291_v23 = vld [vmem:[%s1805_s21 + $0x100] sm:$0xf0]  ;;  %v1098_v24 = vor.u32 %v1267_v20, %v1097_v19  ;;  %v1181_v29 = vld [vmem:[%s1805_s21 + $0xe0] sm:$0xf] }
  0x59   : > { %790 = vmatpush.bf16.msra.mxu0 %v1078_v10  ;;  %v1297_v10 = vld [vmem:[%s1805_s21 + $0x130] sm:$0xf0]  ;;  %v1194_v25 = vor.u32 %v1291_v23, %v1193_v21  ;;  %v1288_v30 = vld [vmem:[%s1805_s21 + $0xe8] sm:$0xf0]  ;;  %v1073_v32 = vld [vmem:[%s1805_s21 + $0x8] sm:$0xf] }
  0x5a   : > { %803 = vmatpush.bf16.msra.mxu1 %v1174_v14  ;;  %v1218_v11 = vor.u32 %v1297_v10, %v1217_v8  ;;  %v1205_v14 = vld [vmem:[%s1805_s21 + $0x110] sm:$0xf]  ;;  %v1182_v31 = vor.u32 %v1288_v30, %v1181_v29  ;;  %v1261_v33 = vld [vmem:[%s1805_s21 + $0x10] sm:$0xf0]  ;;  %v1169_v34 = vld [vmem:[%s1805_s21 + $0xc8] sm:$0xf] }
  0x5b   : > { %v1206_v18 = vor.u32 %v1294_v16, %v1205_v14  ;;  %v446_v49 = vld [vmem:[%s382_s14] sm:$0x3]  ;;  %s1310_s3 = smul.u32 3, %s313_s9  ;;  %s2004_s27 = sld [smem:[#allocation17_spill]] }
  0x5c   : > { %v448_v54 = vperm.slane %v446_v49, 0  ;;  %v449_v56 = vperm.slane %v446_v49, 1  ;;  %s389_s24 = smul.u32 3, %s2003_s5 }
  0x5d   : > { %791 = vmatpush.bf16.msra.mxu0 %v1066_v22  ;;  %s325_s30 = scalar_lea.vmem [#allocation6], %s1310_s3  ;;  %s1311_s12 = smul.u32 6, %s2026_s25 }
  0x5e   : > { %804 = vmatpush.bf16.msra.mxu1 %v1162_v26  ;;  %v1085_v26 = vld [vmem:[%s1805_s21 + $0x20] sm:$0xf]  ;;  %p394_p4 = scmp.lt.s32.totalorder %s389_s24, 5 }
  0x60   : > { %s2028_s24 = smov (!%p394_p4, %s389_s24), 5 }
  0x61   : > { %836 = vmatpush.bf16.msrb.mxu0 %v1158_v35  ;;  %v1285_v35 = vld [vmem:[%s1805_s21 + $0xd0] sm:$0xf0]  ;;  %s399_s13 = sadd.s32 %s1311_s12, %s2028_s24 }
  0x62   : > { %849 = vmatpush.bf16.msrb.mxu1 %v1254_v36  ;;  %v1074_v36 = vor.u32 %v1261_v33, %v1073_v32  ;;  %s1062_s7 = sshll.u32 %s399_s13, 2 }
  0x63   : > { %s401_s9 = scalar_lea.vmem %s2004_s27, %s1062_s7 }
  0x66   : > { %850 = vmatpush.bf16.msrb.mxu1 %v1242_v51 }
  0xb3   : > { %v407_v40 = vpop.xlane.xlu0 %406 }
  0xb4   : > { %v415_v41 = vmul.f32 %v1831_v39, %v407_v40  ;;  %v1289_v40 = vld [vmem:[%s1805_s21 + $0xf4] sm:$0xf] }
  0xb6   : > { %v1834_v42 = vsub.f32 %v403_v0, %v415_v41  ;;  %v1836_v43 = vsub.f32 %v404_v1, %v415_v41  ;;  %v1274_v0 = vld [vmem:[%s1805_s21 + $0x7c] sm:$0xf]  ;;  %v1127_v1 = vld [vmem:[%s1805_s21 + $0x84] sm:$0xf0]  ;;  %v1094_v41 = vor.u32 %v1265_v37, %v1091_v38  ;;  %v1170_v37 = vor.u32 %v1285_v35, %v1169_v34 }
  0xb7   : > { %v1130_v3 = vor.u32 %v1274_v0, %v1127_v1  ;;  %v1230_v0 = vor.u32 %v1300_v62, %v1229_v61  ;;  %v1067_v1 = vld [vmem:[%s1805_s21 + $0xc] sm:$0xf0] }
  0xb8   : > { %v418_v44 = vmul.f32 %v1834_v42, %v1834_v42  ;;  %v419_v45 = vmul.f32 %v1836_v43, %v1836_v43  ;;  %v1070_v4 = vor.u32 %v1259_v63, %v1067_v1 }
  0xb9   : > { %812 = vmatpush.bf16.msra.mxu2 %v1130_v3  ;;  %v1163_v3 = vld [vmem:[%s1805_s21 + $0xcc] sm:$0xf0]  ;;  %851 = vmatpush.bf16.msrb.mxu1 %v1230_v0 }
  0xba   : > { %v420_v46 = vadd.f32 %v419_v45, %v418_v44  ;;  %v1187_v44 = vld [vmem:[%s1805_s21 + $0xfc] sm:$0xf0]  ;;  %v1145_v45 = vld [vmem:[%s1805_s21 + $0x98] sm:$0xf]  ;;  %v1166_v5 = vor.u32 %v1283_v2, %v1163_v3 }
  0xbb   : > { %v1190_v47 = vor.u32 %v1289_v40, %v1187_v44  ;;  %v437_v44 = vld [vmem:[%s386_s29] sm:$0x3] }
  0xbc   : > { %421 = vadd.xlane.f32.xlu0 %v420_v46  ;;  %v1279_v46 = vld [vmem:[%s1805_s21 + $0xa0] sm:$0xf0] }
  0xbd   : > { %813 = vmatpush.bf16.msra.mxu2 %v1118_v15  ;;  %v1146_v48 = vor.u32 %v1279_v46, %v1145_v45  ;;  %828 = vmatpush.bf16.msra.mxu3 %v1190_v47  ;;  %v1110_v15 = vor.u32 %v1270_v13, %v1109_v12  ;;  %v438_v46 = vadd.f32 1.0, %v437_v44 }
  0xbe   : > { %852 = vmatpush.bf16.msrb.mxu1 %v1218_v11 }
  0xbf   : > { %837 = vmatpush.bf16.msrb.mxu0 %v1146_v48  ;;  %v440_v50 = vperm.slane %v438_v46, 0  ;;  %v441_v51 = vperm.slane %v438_v46, 1 }
  0xc1   : > { %814 = vmatpush.bf16.msra.mxu2 %v1106_v27  ;;  %829 = vmatpush.bf16.msra.mxu3 %v1178_v59  ;;  %v1264_v27 = vld [vmem:[%s1805_s21 + $0x28] sm:$0xf0] }
  0xc2   : > { %853 = vmatpush.bf16.msrb.mxu1 %v1206_v18 }
  0xc3   : > { %838 = vmatpush.bf16.msrb.mxu0 %v1134_v60 }
  0xc5   : > { %815 = vmatpush.bf16.msra.mxu2 %v1094_v41  ;;  %830 = vmatpush.bf16.msra.mxu3 %v1166_v5 }
  0xc6   : > { %854 = vmatpush.bf16.msrb.mxu1 %v1194_v25 }
  0xc7   : > { %839 = vmatpush.bf16.msrb.mxu0 %v1122_v9 }
  0xc9   : > { %816 = vmatpush.bf16.msra.mxu2 %v1082_v55 }
  0xca   : > { %855 = vmatpush.bf16.msrb.mxu1 %v1182_v31 }
  0xcb   : > { %840 = vmatpush.bf16.msrb.mxu0 %v1110_v15 }
  0xcd   : > { %817 = vmatpush.bf16.msra.mxu2 %v1070_v4 }
  0xce   : > { %856 = vmatpush.bf16.msrb.mxu1 %v1170_v37 }
  0xcf   : > { %841 = vmatpush.bf16.msrb.mxu0 %v1098_v24 }
 0x12f   : > { %v422_v17 = vpop.xlane.xlu0 %421 }
 0x130   : > { %v423_v22 = vmul.f32 %v422_v17, %v1831_v39  ;;  %v1086_v39 = vor.u32 %v1264_v27, %v1085_v26 }
 0x132   : > { %v424_v28 = vadd.f32 1e-06, %v423_v22  ;;  %842 = vmatpush.bf16.msrb.mxu0 %v1086_v39 }
 0x134   : > { %1423 = vrsqrt.f32 %v424_v28  ;;  %vm431_vm2 = vweird.f32 %v424_v28 }
 0x136   : > { %843 = vmatpush.bf16.msrb.mxu0 %v1074_v36 }
 0x13a   : > { %v1424_v38 = vpop.eup %1423 }
 0x13b   : > { %v426_v40 = vmul.f32 %v1424_v38, %v424_v28  ;;  %vm432_vm1 = vweird.f32 %v1424_v38 }
 0x13c   : > { %vm433_vm3 = vmor %vm431_vm2, %vm432_vm1 }
 0x13d   : > { %v427_v41 = vmul.f32 %v1424_v38, %v426_v40 }
 0x13f   : > { %v428_v45 = vmul.f32 0.5, %v427_v41 }
 0x141   : > { %v429_v47 = vsub.f32 1.5, %v428_v45 }
 0x143   : > { %v430_v48 = vmul.f32 %v1424_v38, %v429_v47 }
 0x145   : > { %v434_v52 = vsel %vm433_vm3, %v1424_v38, %v430_v48 }
 0x146   : > { %v435_v53 = vmul.f32 %v434_v52, %v1834_v42  ;;  %v436_v55 = vmul.f32 %v434_v52, %v1836_v43  ;;  %v520_v42 = vld [vmem:[%s325_s30] sm:$0x7] }
 0x147   : > { %v522_v0 = vperm.slane %v520_v42, 0  ;;  %v523_v1 = vperm.slane %v520_v42, 1  ;;  %v524_v11 = vperm.slane %v520_v42, 2 }
 0x148   : > { %v444_v57 = vmul.f32 %v440_v50, %v435_v53  ;;  %v445_v58 = vmul.f32 %v441_v51, %v436_v55 }
 0x14a   : > { %v452_v59 = vadd.f32 %v448_v54, %v444_v57  ;;  %v453_v60 = vadd.f32 %v449_v56, %v445_v58 }
 0x14c   : > { %v454_v61 = vpack.c.bf16 %v452_v59, %v452_v59  ;;  %v455_v62 = vpack.c.bf16 %v453_v60, %v453_v60 }
 0x14e   : > { %792 = vmatmul.bf16.vlgmr.msra.gmra.mxu0 %v454_v61  ;;  %805 = vmatmul.bf16.vlgmr.msra.gmra.mxu1 %v455_v62 }
 0x14f   : > { %818 = vmatmul.bf16.vlgmr.msra.gmra.mxu2 %v454_v61  ;;  %831 = vmatmul.bf16.vlgmr.msra.gmra.mxu3 %v455_v62 }
 0x15e   : > { %844 = vmatmul.bf16.vlgmr.msrb.gmra.mxu0 %v454_v61  ;;  %857 = vmatmul.bf16.vlgmr.msrb.gmra.mxu1 %v455_v62 }
 0x1cb   : > { %v793_v43 = vpop.f32.mrf.mxu0  ;;  %v806_v63 = vpop.f32.mrf.mxu1 }
 0x1cc   : > { %v794_v2 = vadd.f32 %v793_v43, %v522_v0 }
 0x1ce   : > { %v807_v8 = vadd.f32 %v806_v63, %v794_v2 }
 0x1d2   : > { %v819_v3 = vpop.f32.mrf.mxu2  ;;  %v832_v4 = vpop.f32.mrf.mxu3 }
 0x1d3   : > { %v820_v5 = vadd.f32 %v819_v3, %v523_v1  ;;  %v795_v6 = vpop.f32.mrf.mxu0  ;;  %v808_v7 = vpop.f32.mrf.mxu1 }
 0x1d5   : > { %v833_v9 = vadd.f32 %v832_v4, %v820_v5 }
 0x1d7   : > { %v862_v10 = vpack.c.bf16 %v833_v9, %v807_v8 }
 0x1d9   : > { %864 = vst [vmem:[%s401_s9] sm:$0xff] %v862_v10 }
 0x1da   : > { %v821_v12 = vpop.f32.mrf.mxu2  ;;  %v834_v13 = vpop.f32.mrf.mxu3 }
 0x1db   : > { %v845_v14 = vpop.f32.mrf.mxu0  ;;  %v858_v15 = vpop.f32.mrf.mxu1 }
 0x1dc   : > { %v846_v16 = vadd.f32 %v845_v14, %v524_v11 }
 0x1de   : > { %v859_v17 = vadd.f32 %v858_v15, %v846_v16 }
 0x1e0   : > { %v863_v18 = vpack.c.bf16 %v859_v17, %v859_v17 }
 0x1e2   : > { %865 = vst [vmem:[%s401_s9 + $0x8] sm:$0xf] %v863_v18 }
 0x1e3   : > { %v847_v19 = vpop.f32.mrf.mxu0  ;;  %v860_v20 = vpop.f32.mrf.mxu1 }
 0x1e4 PF: > { %s21_s28 = sadd.s32 1, %s1609_s28   ;;  %s2005_s25 = sld [smem:[#allocation14_spill]] }
 0x1e5   : > { %p18_p7 = scmp.ge.s32.totalorder %s21_s28, 6   ;;  %s2006_s16 = sld [smem:[#allocation9_spill]] }
 0x1e6   : > { %s2007_s23 = sld [smem:[#allocation15_spill]]  ;;  %s2011_s18 = smov %s1573_s19 }
 0x1e7   : > { %s2008_s8 = sld [smem:[#allocation11_spill]]  ;;  %s2012_s19 = smov %s1577_s20 }
 0x1e8   : > { %s2009_s11 = sld [smem:[#allocation12_spill]]  ;;  %s2014_s21 = smov %s1585_s22 }
 0x1e9   : > { %s2010_s27 = sld [smem:[#allocation13_spill]]  ;;  %s2016_s24 = smov %s1601_s26 }
 0x1ea   : > { %s2013_s20 = smov %s2005_s25  ;;  %20 = sbr.rel (!%p18_p7) target bundleno = 12 (0xc), region = 110 }
 0x1eb   : > { %s2015_s22 = smov %s2006_s16 }
 0x1ed   : > { %s2017_s25 = smov %s2008_s8 }
 0x1ee   : > { %s2018_s26 = smov %s2009_s11 }
 0x1ef   :  { %904 = vsyncpa [#allocation3], 1 }
 0x1f0   :  { %906 = vsyncpa [#allocation3 + $0x1], 1 }
 0x1f1   :  { %907 = vsyncpa [#allocation5], 1 }
 0x1f2   :  { %909 = vsyncpa [#allocation5 + $0x1], 1 }

// kernel: gated_flux_transformer_block.8
= control target key start
LH: loop header
LB: loop body
LE: loop exit
PB: predicated region body
PF: predicated region fallthrough
CT: control target
= control target key end

     0   :  { %8 = vsyncpa [#allocation3], 0  ;;  %s1729_s0 = inlined_call_operand.hbm [shape: f32[2,256], index: 0, kind: input, shape index: {}]   ;;  %s1730_s1 = inlined_call_operand.hbm [shape: bf16[256,3072], index: 1, kind: input, shape index: {}]   ;;  %s1731_s2 = inlined_call_operand.hbm [shape: f32[1,3072], index: 2, kind: input, shape index: {}]   ;;  %s1732_s3 = inlined_call_operand.vmem [shape: f32[2,3072], index: 3, kind: output, shape index: {}]  }
   0x1   :  { %9 = vsyncpa [#allocation5], 0 }
   0x2   :  { %11 = vsyncpa [#allocation5 + $0x1], 0  ;;  %s1443_s12 = smov 0   ;;  %s1445_s13 = smov 0  }
   0x3   :  { %s1447_s14 = smov 0   ;;  %s1449_s15 = smov 0  }
   0x4 LB: > { %s1464_s16 = sadd.s32 1, %s1417_s15   ;;  %s45_s17 = sadd.s32 1, %s1413_s14  ;;  %s1417_s15 = sphi %s1449_s15, %s1741_s15   ;;  %s1413_s14 = sphi %s1447_s14, %s1740_s14   ;;  %s1409_s13 = sphi %s1445_s13, %s1739_s13   ;;  %s1405_s12 = sphi %s1443_s12, %s1738_s12  }
   0x5   : > { %s42_s18 = ssub.s32 %s1417_s15, %s1464_s16  ;;  %p52_p0 = scmp.ne.s32.totalorder %s1413_s14, %s1409_s13 }
   0x6   : > { %p43_p1 = scmp.eq.s32.totalorder %s42_s18, 0  ;;  %p53_p2 = scmp.eq.s32.totalorder %s1417_s15, 0 }
   0x7   : > { %p1247_p3 = scmp.lt.s32.totalorder %s1417_s15, 6  ;;  %s146_s20 = sand.u32 1, %s1417_s15  }
   0x8   : > { %s1474_s19 = scalar_select %p43_p1, %s1413_s14, %s45_s17  }
   0x9   : > { %p54_p4 = por %p53_p2, %p52_p0  ;;  %s148_s21 = sand.u32 1, %s1413_s14  }
   0xa   : > { %s893_s22 = sshll.u32 %s148_s21, 9  ;;  %s1162_s23 = sshll.u32 %s1417_s15, 4 }
   0xb   : > { %s155_s26 = scalar_lea.hbm %s1730_s1, %s1162_s23  ;;  %s150_s28 = scalar_lea.vmem [#allocation4], %s893_s22 }
   0xc   : > { %s156_s27 = sshll.u32 %s155_s26, 4  ;;  %s158_s29 = sshll.u32 %s150_s28, 4  ;;  %s157_s27 = int_to_ptr.hbm [resolvable:$true] %s156_s27  ;;  %s159_s29 = int_to_ptr.vmem [resolvable:$true] %s158_s29 }
   0xd   : > { %p1486_p5 = pnand %p1247_p3, %p54_p4  ;;  %s1490_s4 = scalar_lea.sflag [#allocation5], %s146_s20 }
   0xe   : > { %s1289_s5 = sshra.s32 %s157_s27, 4  ;;  %s1296_s9 = scalar_lea.hbm %s1730_s1, 3072  ;;  %s1290_s5 = int_to_ptr.hbm [resolvable:$true] %s1289_s5 }
   0xf   : > { %s1291_s6 = scalar_lea.hbm %s1290_s5, 512  ;;  %p1293_p7 = pneg %p1486_p5 }
  0x10   : > { %p1292_p6 = scmp.ne.s32.totalorder %s1290_s5, %s1291_s6  ;;  %p1297_p10 = scmp.lt.s32.totalorder %s1290_s5, %s1730_s1 }
  0x11   : > { %p1298_p11 = scmp.lt.s32.totalorder %s1296_s9, %s1291_s6 }
  0x12   : > { %p1294_p8 = pnand %p1293_p7, %p1292_p6 }
  0x13   : > { %p1299_p12 = por %p1298_p11, %p1297_p10 }
  0x14   : > { %p1295_p9 = pneg %p1294_p8 }
  0x16   : > { %p1300_p13 = pnand %p1299_p12, %p1295_p9 }
  0x18   : > { %1303 = shalt.err (!%p1300_p13)
}
  0x19   : > { %s1419_s17 = smov 1536   ;;  %s1420_s18 = smov 256  }
  0x1a   : > { %s1421_s20 = smov 16   ;;  %s1507_s22 = sadd.s32 4294967295, %s1417_s15  }
  0x1b   : > { %1242 = dma.hbm_to_vmem [thread:$0]  (!%p1486_p5), %s157_s27, 8192, %s159_s29, %s1490_s4, %s1419_s17, %s1420_s18, %s1421_s20  }
  0x1c   : > { %p58_p0 = scmp.ne.s32.totalorder %s1409_s13, %s1405_s12  ;;  %p59_p1 = scmp.eq.s32.totalorder %s1507_s22, 0 }
  0x1d   : > { %p890_p2 = scmp.ge.s32.totalorder %s1417_s15, 1  ;;  %p121_p3 = scmp.lt.s32.totalorder %s1417_s15, 7 }
  0x1e   : > { %p1516_p4 = por %p59_p1, %p58_p0  ;;  %s133_s27 = sshll.u32 %s1729_s0, 4  ;;  %s134_s27 = int_to_ptr.hbm [resolvable:$true] %s133_s27 }
  0x1f   : > { %p1520_p6 = pnand %p890_p2, %p121_p3  ;;  %s1422_s12 = smov [#allocation2]  }
  0x20   : > { %s135_s28 = sshll.u32 %s1422_s12, 4  ;;  %s896_s29 = sshll.u32 %s148_s21, 2  ;;  %s136_s28 = int_to_ptr.vmem [resolvable:$true] %s135_s28 }
  0x21   : > { %p1235_p8 = pneg %p1520_p6  ;;  %s897_s5 = sshll.u32 %s1417_s15, 2 }
  0x22   : > { %s172_s6 = scalar_lea.vmem [#allocation6], %s896_s29  ;;  %s176_s10 = scalar_lea.hbm %s1731_s2, %s897_s5 }
  0x23   : > { %p1236_p9 = pnand %p1235_p8, %p59_p1  ;;  %s180_s7 = sshll.u32 %s172_s6, 4  ;;  %s181_s7 = int_to_ptr.vmem [resolvable:$true] %s180_s7 }
  0x24   : > { %s178_s11 = sshll.u32 %s176_s10, 4  ;;  %s1356_s20 = scalar_lea.hbm %s1731_s2, 24  ;;  %s179_s11 = int_to_ptr.hbm [resolvable:$true] %s178_s11 }
  0x25   : > { %1238 = dma.hbm_to_vmem [thread:$0]  (!%p1236_p9), %s134_s27, 64, %s136_s28, [#allocation3]  }
  0x26   : > { %s1349_s17 = sshra.s32 %s179_s11, 4  ;;  %s1350_s17 = int_to_ptr.hbm [resolvable:$true] %s1349_s17 }
  0x27   : > { %s1351_s18 = scalar_lea.hbm %s1350_s17, 4  ;;  %p1357_p13 = scmp.lt.s32.totalorder %s1350_s17, %s1731_s2 }
  0x28   : > { %p1352_p10 = scmp.ne.s32.totalorder %s1350_s17, %s1351_s18  ;;  %p1358_p0 = scmp.lt.s32.totalorder %s1356_s20, %s1351_s18 }
  0x2a   : > { %p1354_p11 = pnand %p1352_p10, %p1293_p7  ;;  %p1359_p2 = por %p1358_p0, %p1357_p13 }
  0x2c   : > { %p1355_p12 = pneg %p1354_p11 }
  0x2e   : > { %p1360_p3 = pnand %p1359_p2, %p1355_p12 }
  0x30   : > { %1363 = shalt.err (!%p1360_p3)
}
  0x31   : > { %1245 = dma.hbm_to_vmem [thread:$0]  (!%p1486_p5), %s179_s11, 64, %s181_s7, %s1490_s4  }
  0x32   : > { %189 = sbr.rel (%p1520_p6) target bundleno = 285 (0x11d), region = 32 }
  0x37   : > { %1396 = dma.done.wait (%p59_p1), [#allocation3], 64  }
  0x38   : > { %1398 = vsyncadd (%p59_p1), [#allocation3], 4294967232  ;;  %s196_s27 = sand.u32 1, %s1507_s22   ;;  %s198_s12 = sand.u32 1, %s1409_s13  }
  0x39   : > { %s900_s28 = sshll.u32 %s198_s12, 9  ;;  %s197_s30 = scalar_lea.sflag [#allocation5], %s196_s27 }
  0x3a   : > { %s1559_s29 = scalar_lea.vmem [#allocation4], %s900_s28 }
  0x3b   : > { %1400 = dma.done.wait (%p1516_p4), %s197_s30, 8256  }
  0x3c   : > { %1402 = vsyncadd (%p1516_p4), %s197_s30, 4294959040  ;;  %v1018_v0 = vld [vmem:[%s1559_s29 + $0xe0] sm:$0xf]  ;;  %v1193_v1 = vld [vmem:[%s1559_s29 + $0xec] sm:$0xf0]  ;;  %s901_s4 = sshll.u32 %s198_s12, 2 }
  0x3d   : > { %v1146_v2 = vld [vmem:[%s1559_s29 + $0x1e0] sm:$0xf]  ;;  %v1019_v3 = vor.u32 %v1193_v1, %v1018_v0  ;;  %v1225_v4 = vld [vmem:[%s1559_s29 + $0x1ec] sm:$0xf0]  ;;  %v1191_v5 = vld [vmem:[%s1559_s29 + $0xe4] sm:$0xf] }
  0x3e   : > { %v1020_v6 = vld [vmem:[%s1559_s29 + $0xf0] sm:$0xf0]  ;;  %v1147_v7 = vor.u32 %v1225_v4, %v1146_v2  ;;  %v1223_v9 = vld [vmem:[%s1559_s29 + $0x1e4] sm:$0xf]  ;;  %v1002_v11 = vld [vmem:[%s1559_s29 + $0xc0] sm:$0xf] }
  0x3f   : > { %v1023_v8 = vor.u32 %v1191_v5, %v1020_v6  ;;  %v1148_v10 = vld [vmem:[%s1559_s29 + $0x1f0] sm:$0xf0]  ;;  %670 = vmatpush.bf16.msra.mxu0 %v1019_v3  ;;  %v1189_v13 = vld [vmem:[%s1559_s29 + $0xcc] sm:$0xf0]  ;;  %v1130_v14 = vld [vmem:[%s1559_s29 + $0x1c0] sm:$0xf] }
  0x40   : > { %v1151_v12 = vor.u32 %v1223_v9, %v1148_v10  ;;  %v1221_v15 = vld [vmem:[%s1559_s29 + $0x1cc] sm:$0xf0]  ;;  %683 = vmatpush.bf16.msra.mxu1 %v1147_v7  ;;  %v1003_v16 = vor.u32 %v1189_v13, %v1002_v11  ;;  %v1187_v18 = vld [vmem:[%s1559_s29 + $0xc4] sm:$0xf]  ;;  %v1004_v19 = vld [vmem:[%s1559_s29 + $0xd0] sm:$0xf0] }
  0x41   : > { %696 = vmatpush.bf16.msra.mxu2 %v1023_v8  ;;  %v1131_v17 = vor.u32 %v1221_v15, %v1130_v14  ;;  %v1219_v20 = vld [vmem:[%s1559_s29 + $0x1c4] sm:$0xf]  ;;  %v1007_v21 = vor.u32 %v1187_v18, %v1004_v19  ;;  %v1132_v22 = vld [vmem:[%s1559_s29 + $0x1d0] sm:$0xf0]  ;;  %v986_v23 = vld [vmem:[%s1559_s29 + $0xa0] sm:$0xf] }
  0x42   : > { %709 = vmatpush.bf16.msra.mxu3 %v1151_v12  ;;  %v1185_v24 = vld [vmem:[%s1559_s29 + $0xac] sm:$0xf0]  ;;  %v1135_v25 = vor.u32 %v1219_v20, %v1132_v22  ;;  %v1114_v26 = vld [vmem:[%s1559_s29 + $0x1a0] sm:$0xf]  ;;  %v1183_v28 = vld [vmem:[%s1559_s29 + $0xa4] sm:$0xf] }
  0x43   : > { %v1217_v27 = vld [vmem:[%s1559_s29 + $0x1ac] sm:$0xf0]  ;;  %671 = vmatpush.bf16.msra.mxu0 %v1003_v16  ;;  %v987_v29 = vor.u32 %v1185_v24, %v986_v23  ;;  %v988_v30 = vld [vmem:[%s1559_s29 + $0xb0] sm:$0xf0]  ;;  %v1215_v31 = vld [vmem:[%s1559_s29 + $0x1a4] sm:$0xf] }
  0x44   : > { %v1116_v32 = vld [vmem:[%s1559_s29 + $0x1b0] sm:$0xf0]  ;;  %684 = vmatpush.bf16.msra.mxu1 %v1131_v17  ;;  %v1115_v33 = vor.u32 %v1217_v27, %v1114_v26  ;;  %v991_v34 = vor.u32 %v1183_v28, %v988_v30  ;;  %v970_v35 = vld [vmem:[%s1559_s29 + $0x80] sm:$0xf]  ;;  %v1181_v36 = vld [vmem:[%s1559_s29 + $0x8c] sm:$0xf0] }
  0x45   : > { %697 = vmatpush.bf16.msra.mxu2 %v1007_v21  ;;  %v1098_v37 = vld [vmem:[%s1559_s29 + $0x180] sm:$0xf]  ;;  %v1119_v38 = vor.u32 %v1215_v31, %v1116_v32  ;;  %v1213_v39 = vld [vmem:[%s1559_s29 + $0x18c] sm:$0xf0]  ;;  %v1179_v40 = vld [vmem:[%s1559_s29 + $0x84] sm:$0xf]  ;;  %v971_v44 = vor.u32 %v1181_v36, %v970_v35 }
  0x46   : > { %710 = vmatpush.bf16.msra.mxu3 %v1135_v25  ;;  %v972_v41 = vld [vmem:[%s1559_s29 + $0x90] sm:$0xf0]  ;;  %v1211_v42 = vld [vmem:[%s1559_s29 + $0x184] sm:$0xf]  ;;  %v1099_v45 = vor.u32 %v1213_v39, %v1098_v37  ;;  %v954_v47 = vld [vmem:[%s1559_s29 + $0x60] sm:$0xf] }
  0x47   : > { %v1100_v43 = vld [vmem:[%s1559_s29 + $0x190] sm:$0xf0]  ;;  %672 = vmatpush.bf16.msra.mxu0 %v987_v29  ;;  %v975_v46 = vor.u32 %v1179_v40, %v972_v41  ;;  %v1177_v48 = vld [vmem:[%s1559_s29 + $0x6c] sm:$0xf0]  ;;  %v1082_v49 = vld [vmem:[%s1559_s29 + $0x160] sm:$0xf] }
  0x48   : > { %685 = vmatpush.bf16.msra.mxu1 %v1115_v33  ;;  %v1103_v50 = vor.u32 %v1211_v42, %v1100_v43  ;;  %v1209_v51 = vld [vmem:[%s1559_s29 + $0x16c] sm:$0xf0]  ;;  %v1175_v52 = vld [vmem:[%s1559_s29 + $0x64] sm:$0xf]  ;;  %v956_v53 = vld [vmem:[%s1559_s29 + $0x70] sm:$0xf0]  ;;  %v955_v56 = vor.u32 %v1177_v48, %v954_v47 }
  0x49   : > { %698 = vmatpush.bf16.msra.mxu2 %v991_v34  ;;  %v1207_v54 = vld [vmem:[%s1559_s29 + $0x164] sm:$0xf]  ;;  %v1084_v55 = vld [vmem:[%s1559_s29 + $0x170] sm:$0xf0]  ;;  %v1083_v57 = vor.u32 %v1209_v51, %v1082_v49  ;;  %v959_v58 = vor.u32 %v1175_v52, %v956_v53  ;;  %v938_v59 = vld [vmem:[%s1559_s29 + $0x40] sm:$0xf] }
  0x4a   : > { %711 = vmatpush.bf16.msra.mxu3 %v1119_v38  ;;  %v1173_v60 = vld [vmem:[%s1559_s29 + $0x4c] sm:$0xf0]  ;;  %v1066_v61 = vld [vmem:[%s1559_s29 + $0x140] sm:$0xf]  ;;  %v1087_v62 = vor.u32 %v1207_v54, %v1084_v55  ;;  %v1171_v0 = vld [vmem:[%s1559_s29 + $0x44] sm:$0xf] }
  0x4b   : > { %673 = vmatpush.bf16.msra.mxu0 %v971_v44  ;;  %v1205_v63 = vld [vmem:[%s1559_s29 + $0x14c] sm:$0xf0]  ;;  %v940_v1 = vld [vmem:[%s1559_s29 + $0x50] sm:$0xf0]  ;;  %v1203_v2 = vld [vmem:[%s1559_s29 + $0x144] sm:$0xf]  ;;  %v939_v4 = vor.u32 %v1173_v60, %v938_v59 }
  0x4c   : > { %686 = vmatpush.bf16.msra.mxu1 %v1099_v45  ;;  %v1068_v3 = vld [vmem:[%s1559_s29 + $0x150] sm:$0xf0]  ;;  %v1067_v5 = vor.u32 %v1205_v63, %v1066_v61  ;;  %v943_v6 = vor.u32 %v1171_v0, %v940_v1  ;;  %v922_v7 = vld [vmem:[%s1559_s29 + $0x20] sm:$0xf]  ;;  %v1169_v8 = vld [vmem:[%s1559_s29 + $0x2c] sm:$0xf0] }
  0x4d   : > { %699 = vmatpush.bf16.msra.mxu2 %v975_v46  ;;  %v1050_v9 = vld [vmem:[%s1559_s29 + $0x120] sm:$0xf]  ;;  %v1071_v10 = vor.u32 %v1203_v2, %v1068_v3  ;;  %v1201_v11 = vld [vmem:[%s1559_s29 + $0x12c] sm:$0xf0]  ;;  %v1167_v12 = vld [vmem:[%s1559_s29 + $0x24] sm:$0xf]  ;;  %v923_v16 = vor.u32 %v1169_v8, %v922_v7 }
  0x4e   : > { %712 = vmatpush.bf16.msra.mxu3 %v1103_v50  ;;  %v924_v13 = vld [vmem:[%s1559_s29 + $0x30] sm:$0xf0]  ;;  %v1199_v14 = vld [vmem:[%s1559_s29 + $0x124] sm:$0xf]  ;;  %v906_v17 = vld [vmem:[%s1559_s29] sm:$0xf]  ;;  %v1051_v19 = vor.u32 %v1201_v11, %v1050_v9 }
  0x4f   : > { %674 = vmatpush.bf16.msra.mxu0 %v955_v56  ;;  %v1052_v15 = vld [vmem:[%s1559_s29 + $0x130] sm:$0xf0]  ;;  %v1165_v18 = vld [vmem:[%s1559_s29 + $0xc] sm:$0xf0]  ;;  %v927_v20 = vor.u32 %v1167_v12, %v924_v13  ;;  %v1034_v21 = vld [vmem:[%s1559_s29 + $0x100] sm:$0xf] }
  0x50   : > { %687 = vmatpush.bf16.msra.mxu1 %v1083_v57  ;;  %v1197_v22 = vld [vmem:[%s1559_s29 + $0x10c] sm:$0xf0]  ;;  %v1163_v23 = vld [vmem:[%s1559_s29 + $0x4] sm:$0xf]  ;;  %v1055_v24 = vor.u32 %v1199_v14, %v1052_v15  ;;  %v908_v25 = vld [vmem:[%s1559_s29 + $0x10] sm:$0xf0]  ;;  %v907_v31 = vor.u32 %v1165_v18, %v906_v17 }
  0x51   : > { %700 = vmatpush.bf16.msra.mxu2 %v959_v58  ;;  %v1195_v26 = vld [vmem:[%s1559_s29 + $0x104] sm:$0xf]  ;;  %v1036_v27 = vld [vmem:[%s1559_s29 + $0x110] sm:$0xf0]  ;;  %v1026_v28 = vld [vmem:[%s1559_s29 + $0xe8] sm:$0xf]  ;;  %v1035_v35 = vor.u32 %v1197_v22, %v1034_v21  ;;  %v911_v36 = vor.u32 %v1163_v23, %v908_v25 }
  0x52   : > { %713 = vmatpush.bf16.msra.mxu3 %v1087_v62  ;;  %v1194_v29 = vld [vmem:[%s1559_s29 + $0xf4] sm:$0xf0]  ;;  %v1154_v30 = vld [vmem:[%s1559_s29 + $0x1e8] sm:$0xf]  ;;  %v1192_v33 = vld [vmem:[%s1559_s29 + $0xec] sm:$0xf]  ;;  %v1039_v39 = vor.u32 %v1195_v26, %v1036_v27 }
  0x53   : > { %675 = vmatpush.bf16.msra.mxu0 %v939_v4  ;;  %v1226_v32 = vld [vmem:[%s1559_s29 + $0x1f4] sm:$0xf0]  ;;  %v1028_v34 = vld [vmem:[%s1559_s29 + $0xf8] sm:$0xf0]  ;;  %v1224_v37 = vld [vmem:[%s1559_s29 + $0x1ec] sm:$0xf]  ;;  %v1027_v40 = vor.u32 %v1194_v29, %v1026_v28 }
  0x54   : > { %688 = vmatpush.bf16.msra.mxu1 %v1067_v5  ;;  %v1156_v38 = vld [vmem:[%s1559_s29 + $0x1f8] sm:$0xf0]  ;;  %v1010_v41 = vld [vmem:[%s1559_s29 + $0xc8] sm:$0xf]  ;;  %v1155_v43 = vor.u32 %v1226_v32, %v1154_v30  ;;  %v1031_v44 = vor.u32 %v1192_v33, %v1028_v34  ;;  %v1190_v45 = vld [vmem:[%s1559_s29 + $0xd4] sm:$0xf0] }
  0x55   : > { %701 = vmatpush.bf16.msra.mxu2 %v943_v6  ;;  %v1638_v42 = vld [vmem:[#allocation2] sm:$0xf]  ;;  %v1138_v46 = vld [vmem:[%s1559_s29 + $0x1c8] sm:$0xf]  ;;  %v1159_v48 = vor.u32 %v1224_v37, %v1156_v38  ;;  %v1222_v49 = vld [vmem:[%s1559_s29 + $0x1d4] sm:$0xf0]  ;;  %v1011_v55 = vor.u32 %v1190_v45, %v1010_v41 }
  0x56   : > { %714 = vmatpush.bf16.msra.mxu3 %v1071_v10  ;;  %v248_v47 = vsub.f32 0.0, %v1638_v42  ;;  %v1188_v50 = vld [vmem:[%s1559_s29 + $0xcc] sm:$0xf]  ;;  %v1012_v51 = vld [vmem:[%s1559_s29 + $0xd8] sm:$0xf0]  ;;  %v1139_v56 = vor.u32 %v1222_v49, %v1138_v46  ;;  %s210_s23 = scalar_lea.vmem [#allocation6], %s901_s4 }
  0x57   : > { %676 = vmatpush.bf16.msra.mxu0 %v923_v16  ;;  %v1220_v52 = vld [vmem:[%s1559_s29 + $0x1cc] sm:$0xf]  ;;  %v1140_v53 = vld [vmem:[%s1559_s29 + $0x1d8] sm:$0xf0]  ;;  %v1015_v57 = vor.u32 %v1188_v50, %v1012_v51  ;;  %v994_v58 = vld [vmem:[%s1559_s29 + $0xa8] sm:$0xf] }
  0x58   : > { %689 = vmatpush.bf16.msra.mxu1 %v1051_v19  ;;  %v249_v54 = vmul.f32 1.442695, %v248_v47  ;;  %v1186_v59 = vld [vmem:[%s1559_s29 + $0xb4] sm:$0xf0]  ;;  %v1122_v60 = vld [vmem:[%s1559_s29 + $0x1a8] sm:$0xf]  ;;  %v1143_v61 = vor.u32 %v1220_v52, %v1140_v53 }
  0x59   : > { %702 = vmatpush.bf16.msra.mxu2 %v927_v20  ;;  %v1218_v62 = vld [vmem:[%s1559_s29 + $0x1b4] sm:$0xf0]  ;;  %v1184_v63 = vld [vmem:[%s1559_s29 + $0xac] sm:$0xf]  ;;  %v996_v0 = vld [vmem:[%s1559_s29 + $0xb8] sm:$0xf0]  ;;  %v995_v3 = vor.u32 %v1186_v59, %v994_v58 }
  0x5a   : > { %715 = vmatpush.bf16.msra.mxu3 %v1055_v24  ;;  %1285 = vpow2.f32 %v249_v54  ;;  %v1216_v1 = vld [vmem:[%s1559_s29 + $0x1ac] sm:$0xf]  ;;  %v1124_v2 = vld [vmem:[%s1559_s29 + $0x1b8] sm:$0xf0]  ;;  %v1123_v4 = vor.u32 %v1218_v62, %v1122_v60  ;;  %v999_v5 = vor.u32 %v1184_v63, %v996_v0  ;;  %v978_v6 = vld [vmem:[%s1559_s29 + $0x88] sm:$0xf] }
  0x5b   : > { %677 = vmatpush.bf16.msra.mxu0 %v907_v31  ;;  %v1182_v7 = vld [vmem:[%s1559_s29 + $0x94] sm:$0xf0]  ;;  %v1106_v8 = vld [vmem:[%s1559_s29 + $0x188] sm:$0xf]  ;;  %v1127_v9 = vor.u32 %v1216_v1, %v1124_v2  ;;  %v1180_v11 = vld [vmem:[%s1559_s29 + $0x8c] sm:$0xf] }
  0x5c   : > { %690 = vmatpush.bf16.msra.mxu1 %v1035_v35  ;;  %v1214_v10 = vld [vmem:[%s1559_s29 + $0x194] sm:$0xf0]  ;;  %v980_v12 = vld [vmem:[%s1559_s29 + $0x98] sm:$0xf0]  ;;  %v1212_v14 = vld [vmem:[%s1559_s29 + $0x18c] sm:$0xf]  ;;  %v979_v17 = vor.u32 %v1182_v7, %v978_v6 }
  0x5d   : > { %703 = vmatpush.bf16.msra.mxu2 %v911_v36  ;;  %v1108_v15 = vld [vmem:[%s1559_s29 + $0x198] sm:$0xf0]  ;;  %v1107_v18 = vor.u32 %v1214_v10, %v1106_v8  ;;  %v983_v19 = vor.u32 %v1180_v11, %v980_v12  ;;  %v962_v20 = vld [vmem:[%s1559_s29 + $0x68] sm:$0xf]  ;;  %v1178_v21 = vld [vmem:[%s1559_s29 + $0x74] sm:$0xf0] }
  0x5e   : > { %716 = vmatpush.bf16.msra.mxu3 %v1039_v39  ;;  %v1090_v22 = vld [vmem:[%s1559_s29 + $0x168] sm:$0xf]  ;;  %v1111_v23 = vor.u32 %v1212_v14, %v1108_v15  ;;  %v1210_v24 = vld [vmem:[%s1559_s29 + $0x174] sm:$0xf0]  ;;  %v1176_v25 = vld [vmem:[%s1559_s29 + $0x6c] sm:$0xf]  ;;  %v963_v29 = vor.u32 %v1178_v21, %v962_v20 }
  0x5f   : > { %722 = vmatpush.bf16.msrb.mxu0 %v1027_v40  ;;  %v964_v26 = vld [vmem:[%s1559_s29 + $0x78] sm:$0xf0]  ;;  %v1208_v27 = vld [vmem:[%s1559_s29 + $0x16c] sm:$0xf]  ;;  %v1091_v30 = vor.u32 %v1210_v24, %v1090_v22  ;;  %v946_v32 = vld [vmem:[%s1559_s29 + $0x48] sm:$0xf] }
  0x60   : > { %735 = vmatpush.bf16.msrb.mxu1 %v1155_v43  ;;  %v1286_v13 = vpop.eup %1285  ;;  %v1092_v28 = vld [vmem:[%s1559_s29 + $0x178] sm:$0xf0]  ;;  %v967_v31 = vor.u32 %v1176_v25, %v964_v26  ;;  %v1174_v33 = vld [vmem:[%s1559_s29 + $0x54] sm:$0xf0]  ;;  %v1074_v34 = vld [vmem:[%s1559_s29 + $0x148] sm:$0xf] }
  0x61   : > { %748 = vmatpush.bf16.msrb.mxu2 %v1031_v44  ;;  %v1664_v16 = vadd.f32 1.0, %v1286_v13  ;;  %v1095_v35 = vor.u32 %v1208_v27, %v1092_v28  ;;  %v1206_v36 = vld [vmem:[%s1559_s29 + $0x154] sm:$0xf0]  ;;  %v1172_v37 = vld [vmem:[%s1559_s29 + $0x4c] sm:$0xf]  ;;  %v947_v45 = vor.u32 %v1174_v33, %v946_v32  ;;  %s902_s24 = sshll.u32 %s1507_s22, 2 }
  0x62   : > { %761 = vmatpush.bf16.msrb.mxu3 %v1159_v48  ;;  %v948_v38 = vld [vmem:[%s1559_s29 + $0x58] sm:$0xf0]  ;;  %v1204_v39 = vld [vmem:[%s1559_s29 + $0x14c] sm:$0xf]  ;;  %v1075_v47 = vor.u32 %v1206_v36, %v1074_v34  ;;  %v930_v49 = vld [vmem:[%s1559_s29 + $0x28] sm:$0xf] }
  0x63   : > { %723 = vmatpush.bf16.msrb.mxu0 %v1011_v55  ;;  %1287 = vrcp.f32 %v1664_v16  ;;  %v1076_v40 = vld [vmem:[%s1559_s29 + $0x158] sm:$0xf0]  ;;  %v261_v43 = vand.u32 2147483647, %v1664_v16  ;;  %v263_v44 = vand.u32 2147483648, %v1664_v16  ;;  %v951_v48 = vor.u32 %v1172_v37, %v948_v38  ;;  %p242_p5 = scmp.lt.s32.totalorder %s902_s24, 23 }
  0x64   : > { %736 = vmatpush.bf16.msrb.mxu1 %v1139_v56  ;;  %v1170_v50 = vld [vmem:[%s1559_s29 + $0x34] sm:$0xf0]  ;;  %v1058_v51 = vld [vmem:[%s1559_s29 + $0x128] sm:$0xf]  ;;  %vm257_vm0 = vweird.f32 %v1664_v16  ;;  %v1079_v52 = vor.u32 %v1204_v39, %v1076_v40  ;;  %v1168_v54 = vld [vmem:[%s1559_s29 + $0x2c] sm:$0xf] }
  0x65   : > { %749 = vmatpush.bf16.msrb.mxu2 %v1015_v57  ;;  %v1202_v53 = vld [vmem:[%s1559_s29 + $0x134] sm:$0xf0]  ;;  %v932_v55 = vld [vmem:[%s1559_s29 + $0x38] sm:$0xf0]  ;;  %v1200_v57 = vld [vmem:[%s1559_s29 + $0x12c] sm:$0xf]  ;;  %v931_v59 = vor.u32 %v1170_v50, %v930_v49 }
  0x66   : > { %762 = vmatpush.bf16.msrb.mxu3 %v1143_v61  ;;  %v1060_v58 = vld [vmem:[%s1559_s29 + $0x138] sm:$0xf0]  ;;  %v914_v60 = vld [vmem:[%s1559_s29 + $0x8] sm:$0xf]  ;;  %v264_v63 = vor.u32 1.1754944e-38, %v263_v44  ;;  %v1059_v0 = vor.u32 %v1202_v53, %v1058_v51  ;;  %v935_v1 = vor.u32 %v1168_v54, %v932_v55  ;;  %vm262_vm3 = vcmp.eq.f32.partialorder %v261_v43, 8.507059e+37 }
  0x67   : > { %724 = vmatpush.bf16.msrb.mxu0 %v995_v3  ;;  %v1166_v2 = vld [vmem:[%s1559_s29 + $0x14] sm:$0xf0]  ;;  %v1042_v3 = vld [vmem:[%s1559_s29 + $0x108] sm:$0xf]  ;;  %v1164_v6 = vld [vmem:[%s1559_s29 + $0xc] sm:$0xf] }
  0x68   : > { %737 = vmatpush.bf16.msrb.mxu1 %v1123_v4  ;;  %v1063_v4 = vor.u32 %v1200_v57, %v1060_v58  ;;  %v916_v7 = vld [vmem:[%s1559_s29 + $0x18] sm:$0xf0]  ;;  %v915_v11 = vor.u32 %v1166_v2, %v914_v60  ;;  %v340_v27 = vld [vmem:[%s210_s23] sm:$0xf]  ;;  %s1743_s24 = smov (!%p242_p5, %s902_s24), 23  ;;  %vm781_vm4 = vcmask 1041408  }
  0x69   : > { %750 = vmatpush.bf16.msrb.mxu2 %v999_v5  ;;  %v1288_v41 = vpop.eup %1287  ;;  %v1198_v5 = vld [vmem:[%s1559_s29 + $0x114] sm:$0xf0]  ;;  %v1044_v10 = vld [vmem:[%s1559_s29 + $0x118] sm:$0xf0]  ;;  %v919_v14 = vor.u32 %v1164_v6, %v916_v7  ;;  %v343_v28 = vperm.slane %v340_v27, 1  ;;  %v342_v32 = vperm.slane %v340_v27, 0 }
  0x6a   : > { %763 = vmatpush.bf16.msrb.mxu3 %v1127_v9  ;;  %v253_v46 = vmul.f32 %v1288_v41, %v1664_v16  ;;  %vm258_vm1 = vweird.f32 %v1288_v41  ;;  %v1196_v9 = vld [vmem:[%s1559_s29 + $0x10c] sm:$0xf]  ;;  %v1043_v13 = vor.u32 %v1198_v5, %v1042_v3  ;;  %v345_v37 = vperm.slane %v340_v27, 3  ;;  %s903_s5 = sshll.u32 %s1743_s24, 1 }
  0x6b   : > { %725 = vmatpush.bf16.msrb.mxu0 %v979_v17  ;;  %vm1696_vm2 = vmor %vm257_vm0, %vm258_vm1  ;;  %v1047_v16 = vor.u32 %v1196_v9, %v1044_v10  ;;  %vm783_vm5 = vcmask 1045508   ;;  %vm785_vm6 = vcmask 1043456   ;;  %s245_s7 = scalar_lea.vmem %s1732_s3, %s903_s5 }
  0x6c   : > { %738 = vmatpush.bf16.msrb.mxu1 %v1107_v18  ;;  %v254_v56 = vsub.f32 1.0, %v253_v46 }
  0x6d   : > { %751 = vmatpush.bf16.msrb.mxu2 %v983_v19 }
  0x6e   : > { %764 = vmatpush.bf16.msrb.mxu3 %v1111_v23  ;;  %v255_v61 = vmul.f32 %v1288_v41, %v254_v56 }
  0x6f   : > { %726 = vmatpush.bf16.msrb.mxu0 %v963_v29 }
  0x70   : > { %739 = vmatpush.bf16.msrb.mxu1 %v1091_v30  ;;  %v256_v8 = vadd.f32 %v1288_v41, %v255_v61 }
  0x71   : > { %752 = vmatpush.bf16.msrb.mxu2 %v967_v31  ;;  %v344_v31 = vperm.slane %v340_v27, 2 }
  0x72   : > { %765 = vmatpush.bf16.msrb.mxu3 %v1095_v35  ;;  %v260_v12 = vsel %vm1696_vm2, %v1288_v41, %v256_v8 }
  0x73   : > { %727 = vmatpush.bf16.msrb.mxu0 %v947_v45  ;;  %v265_v15 = vsel %vm262_vm3, %v264_v63, %v260_v12 }
  0x74   : > { %740 = vmatpush.bf16.msrb.mxu1 %v1075_v47  ;;  %v267_v17 = vmul.f32 %v265_v15, %v1638_v42 }
  0x75   : > { %753 = vmatpush.bf16.msrb.mxu2 %v951_v48 }
  0x76   : > { %766 = vmatpush.bf16.msrb.mxu3 %v1079_v52  ;;  %269 = vst [vmem:[#allocation1] ss:$4 sm:$0xff] %v267_v17 }
  0x77   : > { %728 = vmatpush.bf16.msrb.mxu0 %v931_v59 }
  0x78   : > { %741 = vmatpush.bf16.msrb.mxu1 %v1059_v0 }
  0x79   : > { %754 = vmatpush.bf16.msrb.mxu2 %v935_v1 }
  0x7a   : > { %767 = vmatpush.bf16.msrb.mxu3 %v1063_v4 }
  0x7b   : > { %729 = vmatpush.bf16.msrb.mxu0 %v915_v11 }
  0x7c   : > { %742 = vmatpush.bf16.msrb.mxu1 %v1043_v13 }
  0x7d   : > { %755 = vmatpush.bf16.msrb.mxu2 %v919_v14  ;;  %v270_v18 = vld.sshfl [vmem:[#allocation1] sm:$0xff pattern:$0x73625140]  ;;  %v271_v19 = vld.sshfl [vmem:[#allocation1 + $0x8] sm:$0xff pattern:$0x73625140] }
  0x7e   : > { %768 = vmatpush.bf16.msrb.mxu3 %v1047_v16  ;;  %v274_v20 = vpack.c.bf16 %v270_v18, %v270_v18  ;;  %v275_v21 = vpack.c.bf16 %v271_v19, %v271_v19 }
  0x80   : > { %704 = vmatmul.bf16.vlgmr.msra.gmra.mxu2 %v274_v20  ;;  %717 = vmatmul.bf16.vlgmr.msra.gmra.mxu3 %v275_v21 }
  0x81   : > { %678 = vmatmul.bf16.vlgmr.msra.gmra.mxu0 %v274_v20  ;;  %691 = vmatmul.bf16.vlgmr.msra.gmra.mxu1 %v275_v21 }
  0x90   : > { %756 = vmatmul.bf16.vlgmr.msrb.gmra.mxu2 %v274_v20  ;;  %769 = vmatmul.bf16.vlgmr.msrb.gmra.mxu3 %v275_v21 }
  0x91   : > { %730 = vmatmul.bf16.vlgmr.msrb.gmra.mxu0 %v274_v20  ;;  %743 = vmatmul.bf16.vlgmr.msrb.gmra.mxu1 %v275_v21 }
  0xfe   : > { %v679_v42 = vpop.f32.mrf.mxu0  ;;  %v692_v22 = vpop.f32.mrf.mxu1 }
  0xff   : > { %v680_v38 = vadd.f32 %v679_v42, %v342_v32 }
 0x101   : > { %v693_v45 = vadd.f32 %v692_v22, %v680_v38 }
 0x103   : > { %v705_v23 = vpop.f32.mrf.mxu2  ;;  %v718_v24 = vpop.f32.mrf.mxu3 }
 0x104   : > { %v706_v33 = vadd.f32 %v705_v23, %v343_v28 }
 0x106   : > { %v681_v25 = vpop.f32.mrf.mxu0  ;;  %v694_v26 = vpop.f32.mrf.mxu1  ;;  %v719_v39 = vadd.f32 %v718_v24, %v706_v33 }
 0x108   : > { %v778_v46 = vrot.slane %v719_v39, 6 }
 0x10a   : > { %v782_v52 = vsel %vm781_vm4, %v693_v45, %v778_v46 }
 0x10b   : > { %v707_v29 = vpop.f32.mrf.mxu2  ;;  %v720_v30 = vpop.f32.mrf.mxu3 }
 0x10e   : > { %v731_v34 = vpop.f32.mrf.mxu0  ;;  %v744_v35 = vpop.f32.mrf.mxu1 }
 0x10f   : > { %v732_v36 = vadd.f32 %v731_v34, %v344_v31 }
 0x111   : > { %v745_v40 = vadd.f32 %v744_v35, %v732_v36 }
 0x113   : > { %v757_v41 = vpop.f32.mrf.mxu2  ;;  %v770_v43 = vpop.f32.mrf.mxu3  ;;  %v779_v47 = vrot.slane %v745_v40, 4 }
 0x114   : > { %v758_v44 = vadd.f32 %v757_v41, %v345_v37 }
 0x116   : > { %v771_v48 = vadd.f32 %v770_v43, %v758_v44  ;;  %v733_v49 = vpop.f32.mrf.mxu0  ;;  %v746_v50 = vpop.f32.mrf.mxu1 }
 0x118   : > { %v780_v51 = vrot.slane %v771_v48, 2 }
 0x11a   : > { %v784_v53 = vsel %vm783_vm5, %v779_v47, %v780_v51 }
 0x11b   : > { %v786_v54 = vsel %vm785_vm6, %v782_v52, %v784_v53  ;;  %v759_v55 = vpop.f32.mrf.mxu2  ;;  %v772_v56 = vpop.f32.mrf.mxu3 }
 0x11c   : > { %788 = vst [vmem:[%s245_s7] sm:$0xff] %v786_v54 }
 0x11d PF: > { %p14_p7 = scmp.ge.s32.totalorder %s1464_s16, 8   ;;  %s1738_s12 = smov %s1409_s13 }
 0x11e   : > { %s1739_s13 = smov %s1413_s14  ;;  %s1740_s14 = smov %s1474_s19 }
 0x11f   : > { %s1741_s15 = smov %s1464_s16  ;;  %16 = sbr.rel (!%p14_p7) target bundleno = 4 (0x4), region = 88 }
 0x124   :  { %811 = vsyncpa [#allocation3], 1 }
 0x125   :  { %813 = vsyncpa [#allocation3 + $0x1], 1 }
 0x126   :  { %814 = vsyncpa [#allocation5], 1 }
 0x127   :  { %816 = vsyncpa [#allocation5 + $0x1], 1 }

// kernel: gated_flux_transformer_block.9
= control target key start
LH: loop header
LB: loop body
LE: loop exit
PB: predicated region body
PF: predicated region fallthrough
CT: control target
= control target key end

     0   :  { %s2129_s0 = inlined_call_operand.hbm [shape: f32[2,16,256], index: 0, kind: input, shape index: {}]   ;;  %s2130_s1 = inlined_call_operand.vmem [shape: f32[2,1,256], index: 1, kind: input, shape index: {}]   ;;  %s2131_s2 = inlined_call_operand.vmem [shape: f32[2,1,256], index: 2, kind: input, shape index: {}]   ;;  %s2132_s3 = inlined_call_operand.hbm [shape: bf16[256,768], index: 3, kind: input, shape index: {}]   ;;  %s2133_s4 = inlined_call_operand.hbm [shape: f32[1,768], index: 4, kind: input, shape index: {}]   ;;  %s2134_s5 = inlined_call_operand.vmem [shape: bf16[2,16,768], index: 5, kind: output, shape index: {}]  }
   0x1   :  { %2143 = sst [smem:[#allocation21_spill]] %s2130_s1 }
   0x2   :  { %2144 = sst [smem:[#allocation22_spill]] %s2131_s2 }
   0x3   :  { %2145 = sst [smem:[#allocation23_spill]] %s2132_s3 }
   0x4   :  { %2146 = sst [smem:[#allocation24_spill]] %s2134_s5 }
   0x5   :  { %10 = vsyncpa [#allocation3], 0 }
   0x6   :  { %12 = vsyncpa [#allocation3 + $0x1], 0 }
   0x7   :  { %13 = vsyncpa [#allocation5], 0 }
   0x8   :  { %15 = vsyncpa [#allocation5 + $0x1], 0  ;;  %s1731_s18 = smov 0   ;;  %s1733_s19 = smov 0  }
   0x9   :  { %s1735_s20 = smov 0   ;;  %s1737_s21 = smov 0  }
   0xa   :  { %s1739_s22 = smov 0   ;;  %s1741_s23 = smov 0  }
   0xb   :  { %s1743_s24 = smov 0   ;;  %s1745_s25 = smov 0  }
   0xc   :  { %s1747_s26 = smov 0   ;;  %s1749_s27 = smov 0  }
   0xd   :  { %s1751_s28 = smov 0   ;;  %s1753_s29 = smov 0  }
   0xe   :  { %s1755_s30 = smov 0  }
   0xf LB: > { %2147 = sst [smem:[#allocation10_spill]] %s1649_s19  ;;  %s33_s6 = sadd.s32 1, %s1685_s28  ;;  %s1693_s30 = sphi %s1755_s30, %s21_s30   ;;  %s1689_s29 = sphi %s1753_s29, %s2182_s29   ;;  %s1685_s28 = sphi %s1751_s28, %s2189_s28   ;;  %s1681_s27 = sphi %s1749_s27, %s2180_s27   ;;  %s1677_s26 = sphi %s1747_s26, %s2188_s26   ;;  %s1673_s25 = sphi %s1745_s25, %s2179_s25   ;;  %s1669_s24 = sphi %s1743_s24, %s2187_s24   ;;  %s1665_s23 = sphi %s1741_s23, %s2186_s23   ;;  %s1661_s22 = sphi %s1739_s22, %s2185_s22   ;;  %s1657_s21 = sphi %s1737_s21, %s2184_s21   ;;  %s1653_s20 = sphi %s1735_s20, %s2183_s20   ;;  %s1649_s19 = sphi %s1733_s19, %s2176_s19   ;;  %s1645_s18 = sphi %s1731_s18, %s2175_s18  }
  0x10   : > { %2148 = sst [smem:[#allocation11_spill]] %s1673_s25  ;;  %p57_p0 = scmp.eq.s32.totalorder %s1693_s30, 0 }
  0x11   : > { %2149 = sst [smem:[#allocation12_spill]] %s1677_s26  ;;  %p134_p1 = scmp.ne.s32.totalorder %s1661_s22, %s1657_s21 }
  0x12   : > { %2150 = sst [smem:[#allocation13_spill]] %s1681_s27  ;;  %p140_p2 = scmp.ne.s32.totalorder %s1657_s21, %s1653_s20 }
  0x13   : > { %2151 = sst [smem:[#allocation14_spill]] %s1689_s29  ;;  %p136_p3 = por %p134_p1, %p57_p0 }
  0x14   : > { %p1376_p4 = scmp.lt.s32.totalorder %s1693_s30, 4  ;;  %s259_s8 = sand.u32 1, %s1693_s30  }
  0x15   : > { %s2135_s9 = sand.u32 1, %s1661_s22   ;;  %s1305_s11 = smul.u32 12, %s1685_s28 }
  0x16   : > { %s1354_s10 = smul.u32 384, %s2135_s9  ;;  %p1813_p5 = pnand %p1376_p4, %p136_p3 }
  0x17   : > { %s2153_s3 = sld [smem:[#allocation23_spill]]  ;;  %s1820_s7 = scalar_lea.sflag [#allocation5], %s259_s8 }
  0x18   : > { %s263_s16 = scalar_lea.vmem [#allocation4], %s1354_s10  ;;  %s1695_s13 = smov 384  }
  0x19   : > { %s271_s17 = sshll.u32 %s263_s16, 4  ;;  %s1696_s14 = smov 192   ;;  %s272_s17 = int_to_ptr.vmem [resolvable:$true] %s271_s17 }
  0x1a   : > { %p1101_p6 = scmp.ge.s32.totalorder %s1693_s30, 1  ;;  %p298_p7 = scmp.lt.s32.totalorder %s1693_s30, 5 }
  0x1b   : > { %p34_p9 = scmp.ge.s32.totalorder %s33_s6, 2  ;;  %s40_s8 = sadd.s32 1, %s1689_s29 }
  0x1c   : > { %p1827_p8 = pnand %p1101_p6, %p298_p7  ;;  %s49_s16 = sadd.s32 1, %s1673_s25 }
  0x1d   : > { %s268_s15 = scalar_lea.hbm %s2153_s3, %s1305_s11  ;;  %s1697_s11 = smov 12  }
  0x1e   : > { %s269_s9 = sshll.u32 %s268_s15, 4  ;;  %s1832_s15 = sadd.s32 4294967295, %s1693_s30   ;;  %s270_s9 = int_to_ptr.hbm [resolvable:$true] %s269_s9 }
  0x1f   : > { %1372 = dma.hbm_to_vmem [thread:$0]  (!%p1813_p5), %s270_s9, 6144, %s272_s17, %s1820_s7, %s1695_s13, %s1696_s14, %s1697_s11  }
  0x20   : > { %p56_p10 = scmp.ne.s32.totalorder %s1673_s25, %s1669_s24  ;;  %s2191_s6 = smov (%p34_p9, %s33_s6), 0 }
  0x21   : > { %2155 = sst [smem:[#allocation15_spill]] %s2191_s6  ;;  %s2193_s8 = smov (!%p34_p9, %s40_s8), %s1689_s29 }
  0x22   : > { %p1847_p11 = por %p57_p0, %p56_p10  ;;  %p62_p12 = scmp.ne.s32.totalorder %s1669_s24, %s1665_s23 }
  0x23   : > { %p42_p13 = scmp.ge.s32.totalorder %s2193_s8, 2  ;;  %p63_p1 = scmp.eq.s32.totalorder %s1832_s15, 0 }
  0x24   : > { %s124_s17 = ssub.s32 %s1685_s28, %s2191_s6  ;;  %s183_s13 = sadd.s32 1, %s1649_s19 }
  0x25   : > { %s2195_s8 = smov (%p42_p13, %s2193_s8), 0  ;;  %p1859_p3 = por %p63_p1, %p62_p12 }
  0x26   : > { %2157 = sst [smem:[#allocation16_spill]] %s2195_s8  ;;  %p125_p0 = scmp.eq.s32.totalorder %s124_s17, 0 }
  0x27   : > { %s44_s11 = ssub.s32 %s1689_s29, %s2195_s8  ;;  %p1868_p6 = por %p140_p2, %p63_p1 }
  0x28   : > { %p47_p7 = scmp.eq.s32.totalorder %s44_s11, 0  ;;  %s180_s3 = sor.u32 %s124_s17, %s44_s11 }
  0x29   : > { %s2160_s5 = sadd.s32 1, %s1661_s22  ;;  %p181_p9 = scmp.eq.s32.totalorder %s180_s3, 0 }
  0x2a   : > { %s1875_s6 = scalar_select %p125_p0, %s1661_s22, %s2160_s5  }
  0x2b   : > { %s1878_s26 = scalar_select %p47_p7, %s1673_s25, %s49_s16  }
  0x2c   : > { %2161 = sst [smem:[#allocation17_spill]] %s1875_s6  ;;  %p193_p10 = scmp.ne.s32.totalorder %s1649_s19, %s1645_s18 }
  0x2d   : > { %2162 = sst [smem:[#allocation18_spill]] %s1878_s26  ;;  %p194_p12 = scmp.eq.s32.totalorder %s1832_s15, 3 }
  0x2e   : > { %s220_s8 = sand.u32 1, %s1673_s25   ;;  %s1304_s11 = sshll.u32 %s1689_s29, 5 }
  0x2f   : > { %s1885_s20 = scalar_select %p181_p9, %s1649_s19, %s183_s13  }
  0x30   : > { %p1887_p2 = por %p194_p12, %p193_p10  ;;  %s1097_s17 = sshll.u32 %s220_s8, 5 }
  0x31   : > { %2163 = sst [smem:[#allocation19_spill]] %s1885_s20  ;;  %s232_s2 = scalar_lea.hbm %s2129_s0, %s1304_s11 }
  0x32   : > { %s2164_s1 = scalar_select %p1887_p2, 1, 0 }
  0x33   : > { %s233_s16 = sshll.u32 %s232_s2, 4  ;;  %s224_s26 = scalar_lea.vmem [#allocation2], %s1097_s17  ;;  %s234_s16 = int_to_ptr.hbm [resolvable:$true] %s233_s16 }
  0x34   : > { %2165 = sst [smem:[#allocation20_spill]] %s2164_s1  ;;  %s235_s27 = sshll.u32 %s224_s26, 4  ;;  %s236_s27 = int_to_ptr.vmem [resolvable:$true] %s235_s27 }
  0x35   : > { %p1367_p13 = pnand %p1376_p4, %p1847_p11  ;;  %s2166_s3 = sand.u32 1, %s1661_s22  }
  0x36   : > { %s1355_s13 = smul.u32 3, %s2166_s3  ;;  %s221_s20 = scalar_lea.sflag [#allocation3], %s220_s8 }
  0x37   : > { %s286_s25 = smul.u32 3, %s1685_s28  ;;  %s1698_s19 = smov 256  }
  0x38   : > { %s1699_s29 = smov 16   ;;  %s285_s26 = scalar_lea.vmem [#allocation6], %s1355_s13 }
  0x39   : > { %1369 = dma.hbm_to_vmem [thread:$0]  (!%p1367_p13), %s234_s16, 512, %s236_s27, %s221_s20, %s1698_s19, %s1698_s19, %s1699_s29  }
  0x3a   : > { %s289_s2 = scalar_lea.hbm %s2133_s4, %s286_s25  ;;  %s293_s11 = sshll.u32 %s285_s26, 4  ;;  %s294_s11 = int_to_ptr.vmem [resolvable:$true] %s293_s11 }
  0x3b   : > { %s291_s17 = sshll.u32 %s289_s2, 4  ;;  %302 = sbr.rel (%p1827_p8) target bundleno = 516 (0x204), region = 40  ;;  %s292_s17 = int_to_ptr.hbm [resolvable:$true] %s291_s17 }
  0x3c   : > { %1375 = dma.hbm_to_vmem [thread:$0]  (!%p1813_p5), %s292_s17, 48, %s294_s11, %s1820_s7  }
  0x3d   : > { %s304_s8 = sand.u32 (!%p1827_p8), 1, %s1669_s24  }
  0x3e   : > { %s1102_s9 = sshll.u32 (!%p1827_p8), %s304_s8, 5  ;;  %s305_s5 = scalar_lea.sflag (!%p1827_p8), [#allocation3], %s304_s8 }
  0x3f   : > { %s308_s19 = scalar_lea.vmem (!%p1827_p8), [#allocation2], %s1102_s9 }
  0x40   : > { %1636 = dma.done.wait (%p1859_p3), %s305_s5, 512  }
  0x41   : > { %1638 = vsyncadd (%p1859_p3), %s305_s5, 4294966784  ;;  %s314_s1 = sand.u32 1, %s1832_s15   ;;  %s316_s25 = sand.u32 1, %s1657_s21  }
  0x42   : > { %s1356_s27 = smul.u32 384, %s316_s25  ;;  %s315_s29 = scalar_lea.sflag [#allocation5], %s314_s1 }
  0x44   : > { %s1919_s7 = scalar_lea.vmem [#allocation4], %s1356_s27 }
  0x45   : > { %1640 = dma.done.wait (%p1868_p6), %s315_s29, 6192  }
  0x46   : > { %1642 = vsyncadd (%p1868_p6), %s315_s29, 4294961104  ;;  %v386_v0 = vld [vmem:[%s308_s19] sm:$0xff]  ;;  %v387_v1 = vld [vmem:[%s308_s19 + $0x8] sm:$0xff]  ;;  %v1700_v6 = vmov 256.0   ;;  %s2167_s12 = sld [smem:[#allocation13_spill]]  ;;  %s1357_s2 = smul.u32 3, %s316_s25 }
  0x47   : > { %v390_v2 = vadd.f32 %v387_v1, %v386_v0  ;;  %v388_v3 = vld [vmem:[%s308_s19 + $0x10] sm:$0xff]  ;;  %v389_v4 = vld [vmem:[%s308_s19 + $0x18] sm:$0xff]  ;;  %1487 = vrcp.f32 %v1700_v6  ;;  %v1191_v10 = vld [vmem:[%s1919_s7 + $0xa8] sm:$0xf]  ;;  %s2168_s23 = sld [smem:[#allocation22_spill]]  ;;  %s370_s26 = sand.u32 1, %s1645_s18  }
  0x48   : > { %v393_v5 = vadd.f32 %v389_v4, %v388_v3  ;;  %v1328_v11 = vld [vmem:[%s1919_s7 + $0xb0] sm:$0xf0]  ;;  %v1287_v12 = vld [vmem:[%s1919_s7 + $0x168] sm:$0xf]  ;;  %v1179_v15 = vld [vmem:[%s1919_s7 + $0x90] sm:$0xf] }
  0x49   : > { %391 = vadd.xlane.f32.xlu0 %v390_v2  ;;  %v1192_v13 = vor.u32 %v1328_v11, %v1191_v10  ;;  %v1352_v14 = vld [vmem:[%s1919_s7 + $0x170] sm:$0xf0]  ;;  %v1325_v16 = vld [vmem:[%s1919_s7 + $0x98] sm:$0xf0]  ;;  %v1275_v18 = vld [vmem:[%s1919_s7 + $0x150] sm:$0xf] }
  0x4a   : > { %v1288_v17 = vor.u32 %v1352_v14, %v1287_v12  ;;  %v1349_v19 = vld [vmem:[%s1919_s7 + $0x158] sm:$0xf0]  ;;  %v1180_v20 = vor.u32 %v1325_v16, %v1179_v15  ;;  %v1167_v39 = vld [vmem:[%s1919_s7 + $0x78] sm:$0xf]  ;;  %v1322_v40 = vld [vmem:[%s1919_s7 + $0x80] sm:$0xf0] }
  0x4b   : > { %798 = vmatpush.bf16.msra.mxu0 %v1192_v13  ;;  %v1276_v21 = vor.u32 %v1349_v19, %v1275_v18  ;;  %v1263_v41 = vld [vmem:[%s1919_s7 + $0x138] sm:$0xf]  ;;  %v1168_v42 = vor.u32 %v1322_v40, %v1167_v39  ;;  %v1346_v43 = vld [vmem:[%s1919_s7 + $0x140] sm:$0xf0]  ;;  %v1155_v45 = vld [vmem:[%s1919_s7 + $0x60] sm:$0xf] }
  0x4c   : > { %812 = vmatpush.bf16.msra.mxu1 %v1288_v17  ;;  %v1264_v44 = vor.u32 %v1346_v43, %v1263_v41  ;;  %v1319_v46 = vld [vmem:[%s1919_s7 + $0x68] sm:$0xf0]  ;;  %v1251_v47 = vld [vmem:[%s1919_s7 + $0x120] sm:$0xf]  ;;  %v1193_v51 = vld [vmem:[%s1919_s7 + $0xb4] sm:$0xf0] }
  0x4d   : > { %v1488_v7 = vpop.eup %1487  ;;  %v1156_v48 = vor.u32 %v1319_v46, %v1155_v45  ;;  %v1343_v49 = vld [vmem:[%s1919_s7 + $0x128] sm:$0xf0]  ;;  %v1289_v55 = vld [vmem:[%s1919_s7 + $0x174] sm:$0xf0]  ;;  %v1143_v57 = vld [vmem:[%s1919_s7 + $0x48] sm:$0xf] }
  0x4e   : > { %v397_v8 = vmul.f32 256.0, %v1488_v7  ;;  %vm401_vm0 = vweird.f32 %v1488_v7  ;;  %v1327_v50 = vld [vmem:[%s1919_s7 + $0xac] sm:$0xf]  ;;  %v1252_v52 = vor.u32 %v1343_v49, %v1251_v47  ;;  %v1316_v58 = vld [vmem:[%s1919_s7 + $0x50] sm:$0xf0]  ;;  %p374_p4 = scmp.lt.s32.totalorder %s2167_s12, 1 }
  0x4f   : > { %799 = vmatpush.bf16.msra.mxu0 %v1180_v20  ;;  %v1196_v53 = vor.u32 %v1327_v50, %v1193_v51  ;;  %v1351_v54 = vld [vmem:[%s1919_s7 + $0x16c] sm:$0xf]  ;;  %v1239_v59 = vld [vmem:[%s1919_s7 + $0x108] sm:$0xf]  ;;  %v1144_v60 = vor.u32 %v1316_v58, %v1143_v57  ;;  %v1340_v61 = vld [vmem:[%s1919_s7 + $0x110] sm:$0xf0] }
  0x50   : > { %v398_v9 = vsub.f32 1.0, %v397_v8  ;;  %813 = vmatpush.bf16.msra.mxu1 %v1276_v21  ;;  %v1292_v56 = vor.u32 %v1351_v54, %v1289_v55  ;;  %v1324_v62 = vld [vmem:[%s1919_s7 + $0x94] sm:$0xf]  ;;  %v1181_v63 = vld [vmem:[%s1919_s7 + $0x9c] sm:$0xf0]  ;;  %s2197_s12 = smov (!%p374_p4, %s2167_s12), 1 }
  0x51   : > { %394 = vadd.xlane.f32.xlu0 %v393_v5  ;;  %826 = vmatpush.bf16.msra.mxu2 %v1196_v53  ;;  %v1348_v2 = vld [vmem:[%s1919_s7 + $0x154] sm:$0xf]  ;;  %v1131_v5 = vld [vmem:[%s1919_s7 + $0x30] sm:$0xf]  ;;  %v1313_v6 = vld [vmem:[%s1919_s7 + $0x38] sm:$0xf0] }
  0x52   : > { %v399_v22 = vmul.f32 %v1488_v7, %v398_v9  ;;  %840 = vmatpush.bf16.msra.mxu3 %v1292_v56  ;;  %v1132_v8 = vor.u32 %v1313_v6, %v1131_v5  ;;  %v1337_v9 = vld [vmem:[%s1919_s7 + $0xf8] sm:$0xf0]  ;;  %v1169_v11 = vld [vmem:[%s1919_s7 + $0x84] sm:$0xf0]  ;;  %v1119_v17 = vld [vmem:[%s1919_s7 + $0x18] sm:$0xf] }
  0x53   : > { %800 = vmatpush.bf16.msra.mxu0 %v1168_v42  ;;  %v1321_v10 = vld [vmem:[%s1919_s7 + $0x7c] sm:$0xf]  ;;  %v1265_v15 = vld [vmem:[%s1919_s7 + $0x144] sm:$0xf0]  ;;  %v1310_v18 = vld [vmem:[%s1919_s7 + $0x20] sm:$0xf0] }
  0x54   : > { %v400_v23 = vadd.f32 %v1488_v7, %v399_v22  ;;  %814 = vmatpush.bf16.msra.mxu1 %v1264_v44  ;;  %v1172_v13 = vor.u32 %v1321_v10, %v1169_v11  ;;  %v1345_v14 = vld [vmem:[%s1919_s7 + $0x13c] sm:$0xf]  ;;  %v1215_v19 = vld [vmem:[%s1919_s7 + $0xd8] sm:$0xf]  ;;  %v1120_v20 = vor.u32 %v1310_v18, %v1119_v17  ;;  %v1334_v21 = vld [vmem:[%s1919_s7 + $0xe0] sm:$0xf0] }
  0x55   : > { %v1268_v16 = vor.u32 %v1345_v14, %v1265_v15  ;;  %v1318_v22 = vld [vmem:[%s1919_s7 + $0x64] sm:$0xf]  ;;  %v1315_v39 = vld [vmem:[%s1919_s7 + $0x4c] sm:$0xf]  ;;  %v1145_v40 = vld [vmem:[%s1919_s7 + $0x54] sm:$0xf0] }
  0x56   : > { %v1933_v24 = vsel %vm401_vm0, %v1488_v7, %v400_v23  ;;  %v1227_v7 = vld [vmem:[%s1919_s7 + $0xf0] sm:$0xf]  ;;  %v1148_v42 = vor.u32 %v1315_v39, %v1145_v40  ;;  %v1339_v43 = vld [vmem:[%s1919_s7 + $0x10c] sm:$0xf]  ;;  %v1241_v44 = vld [vmem:[%s1919_s7 + $0x114] sm:$0xf0] }
  0x57   : > { %801 = vmatpush.bf16.msra.mxu0 %v1156_v48  ;;  %v1228_v12 = vor.u32 %v1337_v9, %v1227_v7  ;;  %v1157_v23 = vld [vmem:[%s1919_s7 + $0x6c] sm:$0xf0]  ;;  %v1244_v46 = vor.u32 %v1339_v43, %v1241_v44  ;;  %v1329_v47 = vld [vmem:[%s1919_s7 + $0xb8] sm:$0xf0]  ;;  %v1133_v53 = vld [vmem:[%s1919_s7 + $0x3c] sm:$0xf0] }
  0x58   : > { %815 = vmatpush.bf16.msra.mxu1 %v1252_v52  ;;  %v1199_v45 = vld [vmem:[%s1919_s7 + $0xb0] sm:$0xf]  ;;  %v1353_v49 = vld [vmem:[%s1919_s7 + $0x178] sm:$0xf0]  ;;  %v1312_v52 = vld [vmem:[%s1919_s7 + $0x34] sm:$0xf] }
  0x59   : > { %v1295_v48 = vld [vmem:[%s1919_s7 + $0x170] sm:$0xf]  ;;  %v1200_v50 = vor.u32 %v1329_v47, %v1199_v45  ;;  %v1336_v54 = vld [vmem:[%s1919_s7 + $0xf4] sm:$0xf]  ;;  %v1136_v55 = vor.u32 %v1312_v52, %v1133_v53  ;;  %v1229_v56 = vld [vmem:[%s1919_s7 + $0xfc] sm:$0xf0] }
  0x5a   : > { %v1296_v51 = vor.u32 %v1353_v49, %v1295_v48  ;;  %v1187_v57 = vld [vmem:[%s1919_s7 + $0x98] sm:$0xf]  ;;  %v1326_v58 = vld [vmem:[%s1919_s7 + $0xa0] sm:$0xf0]  ;;  %v1175_v5 = vld [vmem:[%s1919_s7 + $0x80] sm:$0xf] }
  0x5b   : > { %802 = vmatpush.bf16.msra.mxu0 %v1144_v60  ;;  %v1188_v60 = vor.u32 %v1326_v58, %v1187_v57  ;;  %v1323_v6 = vld [vmem:[%s1919_s7 + $0x88] sm:$0xf0]  ;;  %v1271_v9 = vld [vmem:[%s1919_s7 + $0x140] sm:$0xf]  ;;  %v1306_v11 = vld [vmem:[%s1919_s7 + $0x4] sm:$0xf] }
  0x5c   : > { %v1347_v10 = vld [vmem:[%s1919_s7 + $0x148] sm:$0xf0]  ;;  %v1109_v14 = vld [vmem:[%s1919_s7 + $0xc] sm:$0xf0]  ;;  %v1330_v15 = vld [vmem:[%s1919_s7 + $0xc4] sm:$0xf] }
  0x5d   : > { %v1112_v18 = vor.u32 %v1306_v11, %v1109_v14  ;;  %v1139_v39 = vld [vmem:[%s1919_s7 + $0x38] sm:$0xf]  ;;  %v1314_v40 = vld [vmem:[%s1919_s7 + $0x40] sm:$0xf0]  ;;  %v1311_v47 = vld [vmem:[%s1919_s7 + $0x28] sm:$0xf0] }
  0x5e   : > { %v1338_v43 = vld [vmem:[%s1919_s7 + $0x100] sm:$0xf0]  ;;  %v1140_v44 = vor.u32 %v1314_v40, %v1139_v39  ;;  %s1103_s10 = sshll.u32 %s2197_s12, 1  ;;  %v1211_v57 = vld [vmem:[%s1919_s7 + $0xc8] sm:$0xf]  ;;  %s2169_s13 = sld [smem:[#allocation21_spill]] }
  0x5f   : > { %803 = vmatpush.bf16.msra.mxu0 %v1132_v8  ;;  %v1176_v8 = vor.u32 %v1323_v6, %v1175_v5  ;;  %v1332_v58 = vld [vmem:[%s1919_s7 + $0xd0] sm:$0xf0]  ;;  %s381_s20 = scalar_lea.vmem %s2168_s23, %s1103_s10  ;;  %s328_s17 = scalar_lea.vmem [#allocation6], %s1357_s2 }
  0x60   : > { %s1358_s11 = smul.u32 24, %s370_s26  ;;  %s2171_s9 = sld [smem:[#allocation12_spill]] (%p1887_p2) }
  0x61   : > { %s2172_s5 = sld [smem:[#allocation13_spill]] (%p1887_p2) }
  0x62   : > { %s2067_s8 = scalar_lea.vmem [#allocation7], %s1358_s11  ;;  %s2173_s12 = sld [smem:[#allocation24_spill]] (%p1887_p2) }
  0x63   : > { %804 = vmatpush.bf16.msra.mxu0 %v1120_v20  ;;  %v1163_v20 = vld [vmem:[%s1919_s7 + $0x68] sm:$0xf] }
  0x64   : > { %s377_s6 = scalar_lea.vmem %s2169_s13, %s1103_s10 }
  0x65   : > { %v458_v11 = vld [vmem:[%s377_s6] sm:$0x3] }
  0x66   : > { %s898_s19 = smul.u32 (%p1887_p2), 3, %s2171_s9 }
  0x67   : > { %s1359_s1 = smul.u32 (%p1887_p2), 12, %s2172_s5 }
  0x69   : > { %s902_s25 = sadd.s32 (%p1887_p2), %s1359_s1, %s898_s19 }
  0x6a   : > { %s1297_s27 = sshll.u32 (%p1887_p2), %s902_s25, 2 }
  0x6b   : > { %s904_s10 = scalar_lea.vmem (%p1887_p2), %s2173_s12, %s1297_s27 }
  0xbc   : > { %v392_v25 = vpop.xlane.xlu0 %391 }
  0xbd   : > { %v403_v26 = vmul.f32 %v1933_v24, %v392_v25  ;;  %v1216_v25 = vor.u32 %v1334_v21, %v1215_v19  ;;  %v1320_v21 = vld [vmem:[%s1919_s7 + $0x70] sm:$0xf0] }
  0xbf   : > { %v1936_v27 = vsub.f32 %v386_v0, %v403_v26  ;;  %v1938_v28 = vsub.f32 %v387_v1, %v403_v26  ;;  %v1240_v0 = vor.u32 %v1340_v61, %v1239_v59  ;;  %v1184_v1 = vor.u32 %v1324_v62, %v1181_v63  ;;  %v1283_v61 = vld [vmem:[%s1919_s7 + $0x158] sm:$0xf]  ;;  %v1350_v62 = vld [vmem:[%s1919_s7 + $0x160] sm:$0xf0] }
  0xc0   : > { %v1160_v26 = vor.u32 %v1318_v22, %v1157_v23  ;;  %v1232_v59 = vor.u32 %v1336_v54, %v1229_v56  ;;  %v1284_v63 = vor.u32 %v1350_v62, %v1283_v61  ;;  %v1259_v22 = vld [vmem:[%s1919_s7 + $0x128] sm:$0xf]  ;;  %v1164_v23 = vor.u32 %v1320_v21, %v1163_v20  ;;  %v1308_v56 = vld [vmem:[%s1919_s7 + $0x10] sm:$0xf0] }
  0xc1   : > { %v409_v29 = vmul.f32 %v1936_v27, %v1936_v27  ;;  %v410_v30 = vmul.f32 %v1938_v28, %v1938_v28  ;;  %816 = vmatpush.bf16.msra.mxu1 %v1240_v0  ;;  %827 = vmatpush.bf16.msra.mxu2 %v1184_v1  ;;  %v1309_v0 = vld [vmem:[%s1919_s7 + $0x1c] sm:$0xf]  ;;  %v1121_v1 = vld [vmem:[%s1919_s7 + $0x24] sm:$0xf0]  ;;  %v1212_v62 = vor.u32 %v1332_v58, %v1211_v57 }
  0xc3   : > { %v413_v31 = vadd.f32 %v410_v30, %v409_v29  ;;  %v1342_v29 = vld [vmem:[%s1919_s7 + $0x124] sm:$0xf]  ;;  %v1253_v30 = vld [vmem:[%s1919_s7 + $0x12c] sm:$0xf0] }
  0xc4   : > { %v395_v32 = vpop.xlane.xlu0 %394 }
  0xc5   : > { %v404_v33 = vmul.f32 %v1933_v24, %v395_v32  ;;  %414 = vadd.xlane.f32.xlu1 %v413_v31  ;;  %817 = vmatpush.bf16.msra.mxu1 %v1228_v12  ;;  %v1256_v31 = vor.u32 %v1342_v29, %v1253_v30  ;;  %v1107_v32 = vld [vmem:[%s1919_s7] sm:$0xf]  ;;  %v1151_v30 = vld [vmem:[%s1919_s7 + $0x50] sm:$0xf] }
  0xc6   : > { %828 = vmatpush.bf16.msra.mxu2 %v1172_v13  ;;  %v1272_v13 = vor.u32 %v1347_v10, %v1271_v9 }
  0xc7   : > { %v1945_v34 = vsub.f32 %v388_v3, %v404_v33  ;;  %v1947_v35 = vsub.f32 %v389_v4, %v404_v33  ;;  %v1277_v3 = vld [vmem:[%s1919_s7 + $0x15c] sm:$0xf0]  ;;  %v1307_v33 = vld [vmem:[%s1919_s7 + $0x8] sm:$0xf0] }
  0xc8   : > { %v1280_v4 = vor.u32 %v1348_v2, %v1277_v3  ;;  %v1333_v2 = vld [vmem:[%s1919_s7 + $0xdc] sm:$0xf]  ;;  %v1124_v3 = vor.u32 %v1309_v0, %v1121_v1 }
  0xc9   : > { %v411_v36 = vmul.f32 %v1945_v34, %v1945_v34  ;;  %v412_v37 = vmul.f32 %v1947_v35, %v1947_v35  ;;  %818 = vmatpush.bf16.msra.mxu1 %v1216_v25  ;;  %v1344_v25 = vld [vmem:[%s1919_s7 + $0x130] sm:$0xf0] }
  0xca   : > { %841 = vmatpush.bf16.msra.mxu3 %v1280_v4  ;;  %829 = vmatpush.bf16.msra.mxu2 %v1160_v26  ;;  %v1217_v4 = vld [vmem:[%s1919_s7 + $0xe4] sm:$0xf0]  ;;  %v1260_v29 = vor.u32 %v1344_v25, %v1259_v22 }
  0xcb   : > { %v416_v38 = vadd.f32 %v412_v37, %v411_v36  ;;  %v1203_v36 = vld [vmem:[%s1919_s7 + $0xc0] sm:$0xf]  ;;  %v1108_v37 = vor.u32 %v1307_v33, %v1107_v32  ;;  %v1220_v7 = vor.u32 %v1333_v2, %v1217_v4  ;;  %v1247_v32 = vld [vmem:[%s1919_s7 + $0x110] sm:$0xf] }
  0xcc   : > { %v447_v2 = vld [vmem:[%s381_s20] sm:$0x3] }
  0xcd   : > { %417 = vadd.xlane.f32.xlu1 %v416_v38  ;;  %v1331_v38 = vld [vmem:[%s1919_s7 + $0xc8] sm:$0xf0]  ;;  %805 = vmatpush.bf16.msra.mxu0 %v1108_v37  ;;  %v448_v4 = vadd.f32 1.0, %v447_v2 }
  0xce   : > { %842 = vmatpush.bf16.msra.mxu3 %v1268_v16  ;;  %v1204_v41 = vor.u32 %v1331_v38, %v1203_v36  ;;  %830 = vmatpush.bf16.msra.mxu2 %v1148_v42  ;;  %v1205_v16 = vld [vmem:[%s1919_s7 + $0xcc] sm:$0xf0]  ;;  %v1341_v36 = vld [vmem:[%s1919_s7 + $0x118] sm:$0xf0] }
  0xcf   : > { %v1208_v19 = vor.u32 %v1330_v15, %v1205_v16  ;;  %v1248_v38 = vor.u32 %v1341_v36, %v1247_v32  ;;  %v450_v10 = vperm.slane %v448_v4, 0  ;;  %v460_v15 = vperm.slane %v458_v11, 0 }
  0xd0   : > { %819 = vmatpush.bf16.msra.mxu1 %v1204_v41  ;;  %v1235_v41 = vld [vmem:[%s1919_s7 + $0xf8] sm:$0xf]  ;;  %v461_v16 = vperm.slane %v458_v11, 1 }
  0xd1   : > { %854 = vmatpush.bf16.msrb.mxu0 %v1200_v50  ;;  %v1236_v45 = vor.u32 %v1338_v43, %v1235_v41  ;;  %v1223_v50 = vld [vmem:[%s1919_s7 + $0xe0] sm:$0xf] }
  0xd2   : > { %843 = vmatpush.bf16.msra.mxu3 %v1256_v31  ;;  %831 = vmatpush.bf16.msra.mxu2 %v1136_v55  ;;  %v1317_v31 = vld [vmem:[%s1919_s7 + $0x58] sm:$0xf0]  ;;  %v1115_v55 = vld [vmem:[%s1919_s7 + $0x8] sm:$0xf] }
  0xd3   : > { %v1152_v33 = vor.u32 %v1317_v31, %v1151_v30  ;;  %v1116_v61 = vor.u32 %v1308_v56, %v1115_v55 }
  0xd4   : > { %868 = vmatpush.bf16.msrb.mxu1 %v1296_v51 }
  0xd5   : > { %855 = vmatpush.bf16.msrb.mxu0 %v1188_v60 }
  0xd6   : > { %844 = vmatpush.bf16.msra.mxu3 %v1244_v46  ;;  %832 = vmatpush.bf16.msra.mxu2 %v1124_v3  ;;  %v1127_v46 = vld [vmem:[%s1919_s7 + $0x20] sm:$0xf] }
  0xd7   : > { %v1128_v53 = vor.u32 %v1311_v47, %v1127_v46 }
  0xd8   : > { %869 = vmatpush.bf16.msrb.mxu1 %v1284_v63 }
  0xd9   : > { %856 = vmatpush.bf16.msrb.mxu0 %v1176_v8 }
  0xda   : > { %845 = vmatpush.bf16.msra.mxu3 %v1232_v59  ;;  %833 = vmatpush.bf16.msra.mxu2 %v1112_v18 }
  0xdc   : > { %870 = vmatpush.bf16.msrb.mxu1 %v1272_v13 }
  0xdd   : > { %857 = vmatpush.bf16.msrb.mxu0 %v1164_v23 }
  0xde   : > { %846 = vmatpush.bf16.msra.mxu3 %v1220_v7 }
  0xe0   : > { %871 = vmatpush.bf16.msrb.mxu1 %v1260_v29 }
  0xe1   : > { %858 = vmatpush.bf16.msrb.mxu0 %v1152_v33 }
  0xe2   : > { %847 = vmatpush.bf16.msra.mxu3 %v1208_v19 }
  0xe4   : > { %872 = vmatpush.bf16.msrb.mxu1 %v1248_v38 }
  0xe5   : > { %859 = vmatpush.bf16.msrb.mxu0 %v1140_v44 }
  0xe8   : > { %873 = vmatpush.bf16.msrb.mxu1 %v1236_v45 }
  0xe9   : > { %860 = vmatpush.bf16.msrb.mxu0 %v1128_v53 }
  0xed   : > { %861 = vmatpush.bf16.msrb.mxu0 %v1116_v61 }
 0x138   : > { %v415_v12 = vpop.xlane.xlu1 %414 }
 0x139   : > { %v419_v17 = vmul.f32 %v415_v12, %v1933_v24  ;;  %v451_v12 = vperm.slane %v448_v4, 1 }
 0x13b   : > { %v421_v26 = vadd.f32 1e-06, %v419_v17 }
 0x13d   : > { %1489 = vrsqrt.f32 %v421_v26  ;;  %vm429_vm2 = vweird.f32 %v421_v26 }
 0x140   : > { %v418_v37 = vpop.xlane.xlu1 %417 }
 0x141   : > { %v420_v42 = vmul.f32 %v418_v37, %v1933_v24  ;;  %v1335_v24 = vld [vmem:[%s1919_s7 + $0xe8] sm:$0xf0] }
 0x142   : > { %v1224_v54 = vor.u32 %v1335_v24, %v1223_v50 }
 0x143   : > { %v1490_v48 = vpop.eup %1489  ;;  %v422_v49 = vadd.f32 1e-06, %v420_v42 }
 0x144   : > { %v424_v51 = vmul.f32 %v1490_v48, %v421_v26  ;;  %874 = vmatpush.bf16.msrb.mxu1 %v1224_v54  ;;  %vm430_vm1 = vweird.f32 %v1490_v48 }
 0x145   : > { %1491 = vrsqrt.f32 %v422_v49  ;;  %vm431_vm3 = vmor %vm429_vm2, %vm430_vm1  ;;  %vm439_vm5 = vweird.f32 %v422_v49 }
 0x146   : > { %v425_v52 = vmul.f32 %v1490_v48, %v424_v51 }
 0x148   : > { %v426_v59 = vmul.f32 0.5, %v425_v52  ;;  %875 = vmatpush.bf16.msrb.mxu1 %v1212_v62 }
 0x14a   : > { %v427_v60 = vsub.f32 1.5, %v426_v59 }
 0x14b   : > { %v1492_v63 = vpop.eup %1491 }
 0x14c   : > { %v428_v0 = vmul.f32 %v1490_v48, %v427_v60  ;;  %v434_v1 = vmul.f32 %v1492_v63, %v422_v49  ;;  %vm440_vm4 = vweird.f32 %v1492_v63 }
 0x14d   : > { %vm441_vm6 = vmor %vm439_vm5, %vm440_vm4 }
 0x14e   : > { %v435_v3 = vmul.f32 %v1492_v63, %v434_v1  ;;  %v432_v5 = vsel %vm431_vm3, %v1490_v48, %v428_v0 }
 0x14f   : > { %v443_v8 = vmul.f32 %v432_v5, %v1936_v27  ;;  %v444_v9 = vmul.f32 %v432_v5, %v1938_v28 }
 0x150   : > { %v436_v6 = vmul.f32 0.5, %v435_v3 }
 0x151   : > { %v454_v19 = vmul.f32 %v450_v10, %v443_v8  ;;  %v455_v20 = vmul.f32 %v451_v12, %v444_v9 }
 0x152   : > { %v437_v7 = vsub.f32 1.5, %v436_v6 }
 0x153   : > { %v464_v22 = vadd.f32 %v460_v15, %v454_v19  ;;  %v465_v23 = vadd.f32 %v461_v16, %v455_v20 }
 0x154   : > { %v438_v13 = vmul.f32 %v1492_v63, %v437_v7 }
 0x156   : > { %v442_v14 = vsel %vm441_vm6, %v1492_v63, %v438_v13 }
 0x157   : > { %v445_v17 = vmul.f32 %v442_v14, %v1945_v34  ;;  %v446_v18 = vmul.f32 %v442_v14, %v1947_v35  ;;  %v534_v34 = vld [vmem:[%s328_s17] sm:$0x7] }
 0x158   : > { %v536_v31 = vperm.slane %v534_v34, 0  ;;  %v537_v32 = vperm.slane %v534_v34, 1  ;;  %v538_v44 = vperm.slane %v534_v34, 2 }
 0x159   : > { %v456_v21 = vmul.f32 %v450_v10, %v445_v17  ;;  %v457_v27 = vmul.f32 %v451_v12, %v446_v18 }
 0x15b   : > { %v466_v28 = vadd.f32 %v460_v15, %v456_v21  ;;  %v467_v25 = vadd.f32 %v461_v16, %v457_v27 }
 0x15d   : > { %v468_v26 = vpack.c.bf16 %v466_v28, %v464_v22  ;;  %v469_v29 = vpack.c.bf16 %v467_v25, %v465_v23 }
 0x15f   : > { %806 = vmatmul.bf16.vlgmr.msra.gmra.mxu0 %v468_v26  ;;  %820 = vmatmul.bf16.vlgmr.msra.gmra.mxu1 %v469_v29 }
 0x160   : > { %834 = vmatmul.bf16.vlgmr.msra.gmra.mxu2 %v468_v26  ;;  %848 = vmatmul.bf16.vlgmr.msra.gmra.mxu3 %v469_v29 }
 0x16f   : > { %862 = vmatmul.bf16.vlgmr.msrb.gmra.mxu0 %v468_v26  ;;  %876 = vmatmul.bf16.vlgmr.msrb.gmra.mxu1 %v469_v29 }
 0x1dc   : > { %v807_v35 = vpop.f32.mrf.mxu0  ;;  %v821_v30 = vpop.f32.mrf.mxu1 }
 0x1dd   : > { %v808_v33 = vadd.f32 %v807_v35, %v536_v31 }
 0x1df   : > { %v822_v41 = vadd.f32 %v821_v30, %v808_v33 }
 0x1e3   : > { %v835_v36 = vpop.f32.mrf.mxu2  ;;  %v849_v37 = vpop.f32.mrf.mxu3 }
 0x1e4   : > { %v836_v38 = vadd.f32 %v835_v36, %v537_v32  ;;  %v809_v39 = vpop.f32.mrf.mxu0  ;;  %v823_v40 = vpop.f32.mrf.mxu1 }
 0x1e5   : > { %v810_v45 = vadd.f32 %v809_v39, %v536_v31 }
 0x1e6   : > { %v850_v42 = vadd.f32 %v849_v37, %v836_v38 }
 0x1e7   : > { %v824_v51 = vadd.f32 %v823_v40, %v810_v45 }
 0x1e8   : > { %v882_v43 = vpack.c.bf16 %v850_v42, %v822_v41 }
 0x1ea   : > { %886 = vst [vmem:[%s2067_s8] sm:$0xff] %v882_v43 }
 0x1eb   : > { %v837_v46 = vpop.f32.mrf.mxu2  ;;  %v851_v50 = vpop.f32.mrf.mxu3 }
 0x1ec   : > { %v838_v47 = vadd.f32 %v837_v46, %v537_v32  ;;  %v863_v48 = vpop.f32.mrf.mxu0  ;;  %v877_v49 = vpop.f32.mrf.mxu1 }
 0x1ed   : > { %v864_v24 = vadd.f32 %v863_v48, %v538_v44 }
 0x1ee   : > { %v852_v52 = vadd.f32 %v851_v50, %v838_v47 }
 0x1ef   : > { %v878_v53 = vadd.f32 %v877_v49, %v864_v24 }
 0x1f0   : > { %v884_v54 = vpack.c.bf16 %v852_v52, %v824_v51 }
 0x1f1   : > { %v883_v55 = vpack.c.bf16 %v878_v53, %v878_v53  ;;  %v919_v61 = vld [vmem:[%s2067_s8] sm:$0xff] (%p1887_p2) }
 0x1f2   : > { %888 = vst [vmem:[%s2067_s8 + $0xc] sm:$0xff] %v884_v54 }
 0x1f3   : > { %887 = vst [vmem:[%s2067_s8 + $0x8] sm:$0xf] %v883_v55 }
 0x1f4   : > { %v865_v56 = vpop.f32.mrf.mxu0  ;;  %v879_v58 = vpop.f32.mrf.mxu1  ;;  %920 = vst [vmem:[%s904_s10] sm:$0xff] (%p1887_p2), %v919_v61 }
 0x1f5   : > { %v866_v57 = vadd.f32 %v865_v56, %v538_v44 }
 0x1f7   : > { %v880_v59 = vadd.f32 %v879_v58, %v866_v57  ;;  %896 = sbr.rel (!%p1887_p2) target bundleno = 516 (0x204), region = 56 }
 0x1f9   : > { %v885_v60 = vpack.c.bf16 %v880_v59, %v880_v59  ;;  %v921_v62 = vld [vmem:[%s2067_s8 + $0xc] sm:$0xff] (%p1887_p2) }
 0x1fa   : > { %v1298_v63 = vld [vmem:[%s2067_s8 + $0x8] sm:$0xf] (%p1887_p2)  ;;  %922 = vst [vmem:[%s904_s10 + $0x18] sm:$0xff] (%p1887_p2), %v921_v62 }
 0x1fb   : > { %889 = vst [vmem:[%s2067_s8 + $0x14] sm:$0xf] %v885_v60 }
 0x1fc   : > { %1299 = vst [vmem:[%s904_s10 + $0x8] sm:$0xf] %v1298_v63 }
 0x202   : > { %v1300_v0 = vld [vmem:[%s2067_s8 + $0x14] sm:$0xf] }
 0x203   : > { %1301 = vst [vmem:[%s904_s10 + $0x20] sm:$0xf] %v1300_v0 }
 0x204 PF: > { %s21_s30 = sadd.s32 1, %s1693_s30   ;;  %s2175_s18 = sld [smem:[#allocation10_spill]] }
 0x205   : > { %p2085_p5 = scmp.ge.s32.totalorder %s21_s30, 6   ;;  %s2176_s19 = sld [smem:[#allocation19_spill]] }
 0x206   : > { %s2177_s14 = sld [smem:[#allocation17_spill]]  ;;  %s2183_s20 = smov %s1657_s21 }
 0x207   : > { %s2178_s16 = sld [smem:[#allocation11_spill]]  ;;  %s2184_s21 = smov %s1661_s22 }
 0x208   : > { %s2179_s25 = sld [smem:[#allocation18_spill]]  ;;  %s2186_s23 = smov %s1669_s24 }
 0x209   : > { %s2180_s27 = sld [smem:[#allocation14_spill]]  ;;  %s2188_s26 = smov %s1685_s28 }
 0x20a   : > { %s2181_s3 = sld [smem:[#allocation15_spill]] }
 0x20b   : > { %s2182_s29 = sld [smem:[#allocation16_spill]] }
 0x20c   : > { %s2185_s22 = smov %s2177_s14  ;;  %20 = sbr.rel (!%p2085_p5) target bundleno = 15 (0xf), region = 142 }
 0x20d   : > { %s2187_s24 = smov %s2178_s16 }
 0x210   : > { %s2189_s28 = smov %s2181_s3 }
 0x211   :  { %950 = vsyncpa [#allocation3], 1 }
 0x212   :  { %952 = vsyncpa [#allocation3 + $0x1], 1 }
 0x213   :  { %953 = vsyncpa [#allocation5], 1 }
 0x214   :  { %955 = vsyncpa [#allocation5 + $0x1], 1 }

// kernel: gated_flux_transformer_block.11
= control target key start
LH: loop header
LB: loop body
LE: loop exit
PB: predicated region body
PF: predicated region fallthrough
CT: control target
= control target key end

     0   :  { %s2175_s0 = inlined_call_operand.vmem [shape: bf16[2,24,768], index: 0, kind: input, shape index: {}, may-alias: {0,1,2}]   ;;  %s2176_s1 = inlined_call_operand.vmem [shape: bf16[2,24,768], index: 1, kind: input, shape index: {}, may-alias: {0,1,2}]   ;;  %s2177_s2 = inlined_call_operand.vmem [shape: bf16[2,24,768], index: 2, kind: input, shape index: {}, may-alias: {0,1,2}]   ;;  %s2178_s3 = inlined_call_operand.hbm [shape: f32[1,128], index: 3, kind: input, shape index: {}]   ;;  %s2179_s4 = inlined_call_operand.hbm [shape: f32[1,128], index: 4, kind: input, shape index: {}]   ;;  %s2180_s5 = inlined_call_operand.hbm [shape: f32[1,128], index: 5, kind: input, shape index: {}]   ;;  %s2181_s6 = inlined_call_operand.hbm [shape: f32[1,128], index: 6, kind: input, shape index: {}]   ;;  %s2182_s7 = inlined_call_operand.hbm [shape: f32[2], index: 7, kind: input, shape index: {}]   ;;  %s2183_s8 = inlined_call_operand.vmem [shape: bf16[2,24,256], index: 8, kind: output, shape index: {}]  }
   0x1   :  { %2190 = sst [smem:[#allocation32_spill]] %s2177_s2 }
   0x2   :  { %2191 = sst [smem:[#allocation33_spill]] %s2178_s3 }
   0x3   :  { %2192 = sst [smem:[#allocation34_spill]] %s2179_s4 }
   0x4   :  { %2193 = sst [smem:[#allocation35_spill]] %s2183_s8 }
   0x5   :  { %13 = vsyncpa [#allocation9], 0 }
   0x6   :  { %14 = vsyncpa [#allocation12], 0 }
   0x7   :  { %15 = vsyncpa [#allocation15], 0 }
   0x8   :  { %16 = vsyncpa [#allocation10], 0  ;;  %s1812_s27 = smov 0   ;;  %s1814_s28 = smov 0  }
   0x9   :  { %s1816_s29 = smov 0   ;;  %s1818_s30 = smov 0  }
   0xa   :  { %s1820_s9 = smov 0   ;;  %s1822_s10 = smov 0  }
   0xb   :  { %s1824_s11 = smov 0   ;;  %s1826_s12 = smov 0  }
   0xc   :  { %s1828_s13 = smov 0   ;;  %s1830_s14 = smov 0  }
   0xd   :  { %s1832_s15 = smov 0  }
   0xe LB: > { %2194 = sst [smem:[#allocation22_spill]] %s1724_s29  ;;  %s44_s17 = sadd.s32 1, %s1748_s13  ;;  %s1756_s15 = sphi %s1832_s15, %s22_s15   ;;  %s1752_s14 = sphi %s1830_s14, %s2243_s14   ;;  %s1748_s13 = sphi %s1828_s13, %s2242_s13   ;;  %s1744_s12 = sphi %s1826_s12, %s2241_s12   ;;  %s1740_s11 = sphi %s1824_s11, %s2240_s11   ;;  %s1736_s10 = sphi %s1822_s10, %s2239_s10   ;;  %s1732_s9 = sphi %s1820_s9, %s2238_s9   ;;  %s1728_s30 = sphi %s1818_s30, %s2237_s30   ;;  %s1724_s29 = sphi %s1816_s29, %s2236_s29   ;;  %s1720_s28 = sphi %s1814_s28, %s2235_s28   ;;  %s1716_s27 = sphi %s1812_s27, %s2234_s27  }
   0xf   : > { %2195 = sst [smem:[#allocation23_spill]] %s1740_s11  ;;  %p46_p0 = scmp.ge.s32.totalorder %s44_s17, 2 }
  0x10   : > { %2196 = sst [smem:[#allocation24_spill]] %s1744_s12  ;;  %s48_s18 = sadd.s32 1, %s1752_s14 }
  0x11   : > { %s59_s19 = sadd.s32 1, %s1736_s10  ;;  %p66_p1 = scmp.ne.s32.totalorder %s1736_s10, %s1732_s9 }
  0x12   : > { %s2245_s17 = smov (%p46_p0, %s44_s17), 0  ;;  %s2247_s18 = smov (!%p46_p0, %s48_s18), %s1752_s14 }
  0x13   : > { %2197 = sst [smem:[#allocation25_spill]] %s2245_s17  ;;  %s55_s20 = ssub.s32 %s1748_s13, %s2245_s17 }
  0x14   : > { %p67_p2 = scmp.eq.s32.totalorder %s1756_s15, 0  ;;  %p50_p3 = scmp.ge.s32.totalorder %s2247_s18, 2 }
  0x15   : > { %s82_s21 = sadd.s32 2, %s1748_s13  ;;  %s83_s23 = sadd.s32 2, %s2245_s17 }
  0x16   : > { %p1885_p4 = por %p67_p2, %p66_p1  ;;  %s2249_s18 = smov (%p50_p3, %s2247_s18), 0 }
  0x17   : > { %2199 = sst [smem:[#allocation26_spill]] %s2249_s18  ;;  %s87_s24 = ssub.s32 %s82_s21, %s83_s23 }
  0x18   : > { %s91_s25 = sadd.s32 1, %s1728_s30  ;;  %s52_s26 = ssub.s32 %s1752_s14, %s2249_s18 }
  0x19   : > { %p98_p5 = scmp.ne.s32.totalorder %s1728_s30, %s1724_s29  ;;  %s56_s16 = sor.u32 %s55_s20, %s52_s26 }
  0x1a   : > { %s88_s8 = sor.u32 %s87_s24, %s52_s26  ;;  %p57_p6 = scmp.eq.s32.totalorder %s56_s16, 0 }
  0x1b   : > { %p89_p7 = scmp.eq.s32.totalorder %s88_s8, 0  ;;  %p1899_p8 = por %p98_p5, %p67_p2 }
  0x1c   : > { %s114_s21 = sadd.s32 4, %s1748_s13  ;;  %s115_s20 = sadd.s32 4, %s2245_s17 }
  0x1d   : > { %s1905_s23 = scalar_select %p57_p6, %s1736_s10, %s59_s19  }
  0x1e   : > { %s1908_s18 = scalar_select %p89_p7, %s1728_s30, %s91_s25  }
  0x1f   : > { %2201 = sst [smem:[#allocation27_spill]] %s1905_s23  ;;  %s123_s11 = sadd.s32 1, %s1720_s28 }
  0x20   : > { %2202 = sst [smem:[#allocation28_spill]] %s1908_s18  ;;  %s119_s29 = ssub.s32 %s114_s21, %s115_s20 }
  0x21   : > { %p130_p9 = scmp.ne.s32.totalorder %s1720_s28, %s1716_s27  ;;  %s120_s24 = sor.u32 %s119_s29, %s52_s26 }
  0x22   : > { %s2203_s16 = sadd.s32 4294967295, %s1756_s15   ;;  %p121_p11 = scmp.eq.s32.totalorder %s120_s24, 0 }
  0x23   : > { %p269_p10 = scmp.eq.s32.totalorder %s2203_s16, 3  ;;  %p1918_p12 = por %p130_p9, %p67_p2 }
  0x24   : > { %p1280_p0 = scmp.ge.s32.totalorder %s1756_s15, 1  ;;  %p282_p3 = scmp.lt.s32.totalorder %s1756_s15, 5 }
  0x25   : > { %p1925_p13 = por %p269_p10, %p66_p1  ;;  %s2208_s25 = smov %s2203_s16 }
  0x26   : > { %s1931_s19 = scalar_select %p121_p11, %s1720_s28, %s123_s11  }
  0x27   : > { %s2205_s2 = scalar_select %p1925_p13, 1, 0 }
  0x28   : > { %2207 = sst [smem:[#allocation30_spill]] %s1931_s19  ;;  %p1936_p5 = scmp.eq.s32.totalorder %s2208_s25, 0 }
  0x29   : > { %2206 = sst [smem:[#allocation29_spill]] %s2205_s2  ;;  %p1943_p2 = pnand %p1280_p0, %p282_p3 }
  0x2a   : > { %s2209_s29 = scalar_select %p1936_p5, 1, 0 }
  0x2b   : > { %s2211_s4 = sld [smem:[#allocation34_spill]]  ;;  %p1357_p1 = pneg %p1943_p2 }
  0x2c   : > { %2210 = sst [smem:[#allocation31_spill]] %s2209_s29  ;;  %s1758_s11 = smov [#allocation11]  }
  0x2d   : > { %s308_s16 = sshll.u32 %s1758_s11, 4  ;;  %p1951_p6 = pnand %p1936_p5, %p1357_p1  ;;  %s309_s16 = int_to_ptr.vmem [resolvable:$true] %s308_s16 }
  0x2e   : > { %s2214_s3 = sld [smem:[#allocation33_spill]]  ;;  %s318_s11 = sshll.u32 %s2180_s5, 4  ;;  %s319_s11 = int_to_ptr.hbm [resolvable:$true] %s318_s11 }
  0x2f   : > { %s1759_s18 = smov [#allocation8]   ;;  %s1760_s17 = smov [#allocation13]  }
  0x30   : > { %s296_s19 = sshll.u32 %s1759_s18, 4  ;;  %s320_s26 = sshll.u32 %s1760_s17, 4  ;;  %s297_s19 = int_to_ptr.vmem [resolvable:$true] %s296_s19  ;;  %s321_s26 = int_to_ptr.vmem [resolvable:$true] %s320_s26 }
  0x31   : > { %s306_s20 = sshll.u32 %s2211_s4, 4  ;;  %s1761_s18 = smov [#allocation14]   ;;  %s307_s20 = int_to_ptr.hbm [resolvable:$true] %s306_s20 }
  0x32   : > { %1363 = dma.hbm_to_vmem [thread:$0]  (!%p1951_p6), %s307_s20, 16, %s309_s16, [#allocation12]  }
  0x33   : > { %1366 = dma.hbm_to_vmem [thread:$0]  (!%p1951_p6), %s319_s11, 16, %s321_s26, [#allocation12]  }
  0x34   : > { %s294_s21 = sshll.u32 %s2214_s3, 4  ;;  %s330_s3 = sshll.u32 %s2181_s6, 4  ;;  %s295_s21 = int_to_ptr.hbm [resolvable:$true] %s294_s21  ;;  %s331_s3 = int_to_ptr.hbm [resolvable:$true] %s330_s3 }
  0x35   : > { %1360 = dma.hbm_to_vmem [thread:$0]  (!%p1951_p6), %s295_s21, 16, %s297_s19, [#allocation9]  }
  0x36   : > { %s342_s20 = sshll.u32 %s2182_s7, 4  ;;  %s332_s16 = sshll.u32 %s1761_s18, 4  ;;  %s343_s20 = int_to_ptr.hbm [resolvable:$true] %s342_s20  ;;  %s333_s16 = int_to_ptr.vmem [resolvable:$true] %s332_s16 }
  0x37   : > { %1369 = dma.hbm_to_vmem [thread:$0]  (!%p1951_p6), %s331_s3, 16, %s333_s16, [#allocation15]  }
  0x38   : > { %s1762_s19 = smov [#allocation16]   ;;  %p1286_p7 = scmp.ge.s32.totalorder %s1756_s15, 4 }
  0x39   : > { %1372 = dma.hbm_to_smem (!%p1951_p6), %s343_s20, 16, %s1762_s19, [#allocation10]  }
  0x3a   : > { %349 = sbr.rel (%p1286_p7) target bundleno = 95 (0x5f), region = 36 }
  0x3f   : > { %352 = sbr.rel (!%p1885_p4) target bundleno = 73 (0x49), region = 40  ;;  %s354_s2 = sand.u32 (%p1885_p4), 1, %s1736_s10  }
  0x40   : > { %s1330_s29 = smul.u32 (%p1885_p4), 18, %s1752_s14 }
  0x41   : > { %s1329_s21 = smul.u32 (%p1885_p4), 12, %s354_s2 }
  0x42   : > { %s361_s11 = sadd.s32 (%p1885_p4), %s1748_s13, %s1330_s29 }
  0x43   : > { %s1287_s17 = sshll.u32 (%p1885_p4), %s361_s11, 2  ;;  %s356_s25 = scalar_lea.vmem (%p1885_p4), [#allocation5], %s1329_s21 }
  0x44   : > { %s363_s3 = scalar_lea.vmem %s2175_s0, %s1287_s17 }
  0x45   : > { %v380_v0 = vld [vmem:[%s363_s3] sm:$0xf]  ;;  %v382_v1 = vld [vmem:[%s363_s3 + $0x18] sm:$0xf]  ;;  %v384_v2 = vld [vmem:[%s363_s3 + $0x30] sm:$0xf] }
  0x46   : > { %381 = vst [vmem:[%s356_s25] sm:$0xf] %v380_v0 }
  0x47   : > { %383 = vst [vmem:[%s356_s25 + $0x4] sm:$0xf] %v382_v1 }
  0x48   : > { %385 = vst [vmem:[%s356_s25 + $0x8] sm:$0xf] %v384_v2 }
  0x49 PF: > { %415 = sbr.rel (!%p1899_p8) target bundleno = 83 (0x53), region = 81  ;;  %s417_s22 = sand.u32 (%p1899_p8), 1, %s1728_s30  }
  0x4a   : > { %s1129_s23 = smul.u32 (%p1899_p8), 18, %s1752_s14 }
  0x4b   : > { %s1331_s20 = smul.u32 (%p1899_p8), 12, %s417_s22 }
  0x4c   : > { %s1130_s18 = sadd.s32 (%p1899_p8), %s1748_s13, %s1129_s23 }
  0x4d   : > { %s1288_s16 = sshll.u32 (%p1899_p8), %s1130_s18, 2  ;;  %s419_s21 = scalar_lea.vmem (%p1899_p8), [#allocation6], %s1331_s20 }
  0x4e   : > { %s1132_s29 = scalar_lea.vmem %s2176_s1, %s1288_s16 }
  0x4f   : > { %v1289_v3 = vld [vmem:[%s1132_s29 + $0x8] sm:$0xf]  ;;  %v1290_v4 = vld [vmem:[%s1132_s29 + $0x20] sm:$0xf]  ;;  %v1291_v5 = vld [vmem:[%s1132_s29 + $0x38] sm:$0xf] }
  0x50   : > { %445 = vst [vmem:[%s419_s21] sm:$0xf] %v1289_v3 }
  0x51   : > { %447 = vst [vmem:[%s419_s21 + $0x4] sm:$0xf] %v1290_v4 }
  0x52   : > { %449 = vst [vmem:[%s419_s21 + $0x8] sm:$0xf] %v1291_v5 }
  0x53 PF: > { %479 = sbr.rel (!%p1918_p12) target bundleno = 95 (0x5f), region = 122  ;;  %s481_s12 = sand.u32 (%p1918_p12), 1, %s1720_s28  }
  0x54   : > { %s1138_s11 = smul.u32 (%p1918_p12), 18, %s1752_s14  ;;  %s2215_s22 = sld [smem:[#allocation32_spill]] (%p1918_p12) }
  0x55   : > { %s1332_s17 = smul.u32 (%p1918_p12), 12, %s481_s12 }
  0x56   : > { %s1139_s26 = sadd.s32 (%p1918_p12), %s1748_s13, %s1138_s11 }
  0x57   : > { %s1292_s4 = sshll.u32 (%p1918_p12), %s1139_s26, 2  ;;  %s483_s20 = scalar_lea.vmem (%p1918_p12), [#allocation7], %s1332_s17 }
  0x5a   : > { %s1141_s23 = scalar_lea.vmem %s2215_s22, %s1292_s4 }
  0x5b   : > { %v1293_v6 = vld [vmem:[%s1141_s23 + $0x10] sm:$0xf]  ;;  %v1294_v7 = vld [vmem:[%s1141_s23 + $0x28] sm:$0xf]  ;;  %v1295_v8 = vld [vmem:[%s1141_s23 + $0x40] sm:$0xf] }
  0x5c   : > { %509 = vst [vmem:[%s483_s20] sm:$0xf] %v1293_v6 }
  0x5d   : > { %511 = vst [vmem:[%s483_s20 + $0x4] sm:$0xf] %v1294_v7 }
  0x5e   : > { %513 = vst [vmem:[%s483_s20 + $0x8] sm:$0xf] %v1295_v8 }
  0x5f PF: > { %546 = sbr.rel (%p1943_p2) target bundleno = 924 (0x39c), region = 163  ;;  %s2216_s8 = sld [smem:[#allocation22_spill]] (!%p1943_p2) }
  0x60   : > { %s549_s16 = sand.u32 (!%p1943_p2), 1, %s1732_s9   ;;  %s563_s29 = sand.u32 (!%p1943_p2), 1, %s1716_s27  }
  0x61   : > { %s2006_s2 = smul.u32 (!%p1943_p2), 12, %s549_s16 }
  0x62   : > { %s2009_s12 = smul.u32 (!%p1943_p2), 12, %s563_s29 }
  0x63   : > { %s551_s11 = scalar_lea.vmem (!%p1943_p2), [#allocation5], %s2006_s2 }
  0x64   : > { %s565_s26 = scalar_lea.vmem [#allocation7], %s2009_s12 }
  0x65   : > { %s556_s19 = sand.u32 1, %s2216_s8  }
  0x66   : > { %s1334_s21 = smul.u32 12, %s556_s19 }
  0x68   : > { %s558_s17 = scalar_lea.vmem [#allocation6], %s1334_s21 }
  0x69   : > { %1699 = dma.done.wait (%p1936_p5), [#allocation9], 16  }
  0x6a   : > { %1701 = vsyncadd (%p1936_p5), [#allocation9], 4294967280 }
  0x6b   : > { %1703 = dma.done.wait (%p1936_p5), [#allocation12], 32  }
  0x6c   : > { %1705 = vsyncadd (%p1936_p5), [#allocation12], 4294967264 }
  0x6d   : > { %1707 = dma.done.wait (%p1936_p5), [#allocation15], 16  }
  0x6e   : > { %1709 = vsyncadd (%p1936_p5), [#allocation15], 4294967280 }
  0x6f   : > { %1711 = dma.done.wait (%p1936_p5), [#allocation10], 16  }
  0x70   : > { %1713 = vsyncadd (%p1936_p5), [#allocation10], 4294967280 }
  0x71   : > { %594 = sfence }
  0x72   : > { %v658_v9 = vld [vmem:[%s558_s17 + $0x8] sm:$0xf]  ;;  %v1317_v10 = vld [vmem:[%s558_s17] sm:$0xff]   ;;  %v652_v18 = vld [vmem:[%s551_s11 + $0x8] sm:$0xf]  ;;  %v1763_v25 = vmov 128.0  }
  0x73   : > { %v1313_v11 = vld [vmem:[%s551_s11] sm:$0xff]   ;;  %v2029_v12 = vunpack.c.l.bf16 %v658_v9  ;;  %v2031_v13 = vunpack.c.h.bf16 %v1317_v10  ;;  %v2041_v19 = vunpack.c.l.bf16 %v1317_v10  ;;  %v2045_v21 = vunpack.c.l.bf16 %v652_v18  ;;  %v1483_v9 = vld [vmem:[#allocation11] ss:$0 sm:$0xff]  ;;  %s2224_s27 = sld [smem:[#allocation23_spill]]  ;;  %s628_s24 = scalar_lea.vmem [#allocation17], %s2006_s2 }
  0x74   : > { %v2033_v14 = vunpack.c.h.bf16 %v1313_v11  ;;  %v2043_v20 = vunpack.c.l.bf16 %v1313_v11  ;;  %1487 = vrcp.f32 %v1763_v25  ;;  %s2226_s3 = sld [smem:[#allocation24_spill]] (%p1925_p13) }
  0x75   : > { %v776_v15 = vmul.f32 %v2029_v12, %v2029_v12  ;;  %v775_v16 = vmul.f32 %v2031_v13, %v2031_v13  ;;  %v774_v22 = vmul.f32 %v2041_v19, %v2041_v19  ;;  %v718_v24 = vmul.f32 %v2045_v21, %v2045_v21  ;;  %s2227_s25 = sld [smem:[#allocation23_spill]] (%p1925_p13) }
  0x76   : > { %v717_v17 = vmul.f32 %v2033_v14, %v2033_v14  ;;  %v716_v23 = vmul.f32 %v2043_v20, %v2043_v20  ;;  %s2228_s16 = sld [smem:[#allocation35_spill]] (%p1925_p13) }
  0x77   : > { %781 = vadd.xlane.f32.xlu0 %v776_v15  ;;  %779 = vadd.xlane.f32.xlu1 %v775_v16 }
  0x78   : > { %721 = vadd.xlane.f32.xlu2 %v717_v17 }
  0x79   : > { %s1023_s9 = sld [smem:[#allocation16 + %s2224_s27]] }
  0x7a   : > { %v1488_v26 = vpop.eup %1487  ;;  %s1336_s22 = smul.u32 (%p1925_p13), 6, %s2226_s3 }
  0x7b   : > { %v726_v27 = vmul.f32 128.0, %v1488_v26  ;;  %vm730_vm0 = vweird.f32 %v1488_v26 }
  0x7c   : > { %s1045_s23 = sadd.s32 (%p1925_p13), %s2227_s25, %s1336_s22 }
  0x7d   : > { %v727_v28 = vsub.f32 1.0, %v726_v27  ;;  %s1308_s20 = sshll.u32 (%p1925_p13), %s1045_s23, 2 }
  0x7e   : > { %s1047_s19 = scalar_lea.vmem (%p1925_p13), %s2228_s16, %s1308_s20 }
  0x7f   : > { %777 = vadd.xlane.f32.xlu0 %v774_v22  ;;  %719 = vadd.xlane.f32.xlu1 %v716_v23  ;;  %v728_v29 = vmul.f32 %v1488_v26, %v727_v28 }
  0x80   : > { %723 = vadd.xlane.f32.xlu2 %v718_v24 }
  0x81   : > { %v729_v30 = vadd.f32 %v1488_v26, %v728_v29 }
  0x83   : > { %v731_v31 = vsel %vm730_vm0, %v1488_v26, %v729_v30 }
  0xea   : > { %v782_v32 = vpop.xlane.xlu0 %781  ;;  %v780_v33 = vpop.xlane.xlu1 %779 }
  0xeb   : > { %v785_v34 = vmul.f32 %v782_v32, %v731_v31  ;;  %v784_v35 = vmul.f32 %v780_v33, %v731_v31  ;;  %v722_v36 = vpop.xlane.xlu2 %721  ;;  %v1484_v33 = vld [vmem:[#allocation14] ss:$0 sm:$0xff] }
  0xec   : > { %v733_v37 = vmul.f32 %v731_v31, %v722_v36 }
  0xed   : > { %v788_v38 = vadd.f32 1e-06, %v785_v34  ;;  %v787_v39 = vadd.f32 1e-06, %v784_v35 }
  0xee   : > { %v2053_v40 = vadd.f32 1e-06, %v733_v37 }
  0xef   : > { %1489 = vrsqrt.f32 %v788_v38  ;;  %vm815_vm2 = vweird.f32 %v788_v38  ;;  %vm805_vm3 = vweird.f32 %v787_v39 }
  0xf0   : > { %1491 = vrsqrt.f32 %v787_v39  ;;  %vm754_vm6 = vweird.f32 %v2053_v40 }
  0xf1   : > { %1493 = vrsqrt.f32 %v2053_v40 }
  0xf2   : > { %v778_v41 = vpop.xlane.xlu0 %777  ;;  %v720_v42 = vpop.xlane.xlu1 %719 }
  0xf3   : > { %v783_v43 = vmul.f32 %v778_v41, %v731_v31  ;;  %v732_v44 = vmul.f32 %v731_v31, %v720_v42  ;;  %v724_v45 = vpop.xlane.xlu2 %723 }
  0xf4   : > { %v734_v46 = vmul.f32 %v731_v31, %v724_v45 }
  0xf5   : > { %v1490_v47 = vpop.eup %1489  ;;  %v786_v48 = vadd.f32 1e-06, %v783_v43  ;;  %v2056_v49 = vadd.f32 1e-06, %v732_v44 }
  0xf6   : > { %v1492_v50 = vpop.eup %1491  ;;  %v810_v51 = vmul.f32 %v1490_v47, %v788_v38  ;;  %v737_v52 = vadd.f32 1e-06, %v734_v46  ;;  %vm816_vm1 = vweird.f32 %v1490_v47  ;;  %v1485_v46 = vld [vmem:[#allocation13] ss:$0 sm:$0xff] }
  0xf7   : > { %v2058_v53 = vpop.eup %1493  ;;  %v800_v54 = vmul.f32 %v1492_v50, %v787_v39  ;;  %1495 = vrsqrt.f32 %v786_v48  ;;  %vm817_vm4 = vmor %vm815_vm2, %vm816_vm1  ;;  %vm806_vm5 = vweird.f32 %v1492_v50  ;;  %vm795_vm12 = vweird.f32 %v786_v48 }
  0xf8   : > { %v811_v55 = vmul.f32 %v1490_v47, %v810_v51  ;;  %v749_v56 = vmul.f32 %v2058_v53, %v2053_v40  ;;  %1497 = vrsqrt.f32 %v2056_v49  ;;  %vm764_vm7 = vweird.f32 %v737_v52  ;;  %vm2068_vm8 = vmor %vm805_vm3, %vm806_vm5 }
  0xf9   : > { %v801_v57 = vmul.f32 %v1492_v50, %v800_v54  ;;  %1499 = vrsqrt.f32 %v737_v52  ;;  %vm755_vm11 = vweird.f32 %v2058_v53  ;;  %vm744_vm13 = vweird.f32 %v2056_v49 }
  0xfa   : > { %v812_v58 = vmul.f32 0.5, %v811_v55  ;;  %v750_v60 = vmul.f32 %v2058_v53, %v749_v56  ;;  %vm2086_vm1 = vmor %vm754_vm6, %vm755_vm11  ;;  %vm853_vm3 = vcmask 195584   ;;  %vm962_vm5 = vcmask 1043456  }
  0xfb   : > { %v802_v59 = vmul.f32 0.5, %v801_v57 }
  0xfc   : > { %v813_v61 = vsub.f32 1.5, %v812_v58  ;;  %v751_v4 = vmul.f32 0.5, %v750_v60 }
  0xfd   : > { %v1496_v62 = vpop.eup %1495  ;;  %v803_v63 = vsub.f32 1.5, %v802_v59 }
  0xfe   : > { %v1498_v0 = vpop.eup %1497  ;;  %v790_v1 = vmul.f32 %v1496_v62, %v786_v48  ;;  %v814_v2 = vmul.f32 %v1490_v47, %v813_v61  ;;  %v752_v22 = vsub.f32 1.5, %v751_v4  ;;  %vm796_vm9 = vweird.f32 %v1496_v62 }
  0xff   : > { %v1500_v3 = vpop.eup %1499  ;;  %v739_v5 = vmul.f32 %v1498_v0, %v2056_v49  ;;  %v804_v6 = vmul.f32 %v1492_v50, %v803_v63  ;;  %vm2076_vm14 = vmor %vm795_vm12, %vm796_vm9  ;;  %vm745_vm15 = vweird.f32 %v1498_v0  ;;  %v1764_v61 = vmov -inf  }
 0x100   : > { %v791_v7 = vmul.f32 %v1496_v62, %v790_v1  ;;  %v759_v8 = vmul.f32 %v1500_v3, %v737_v52  ;;  %v818_v11 = vsel %vm817_vm4, %v1490_v47, %v814_v2  ;;  %vm765_vm10 = vweird.f32 %v1500_v3  ;;  %vm746_vm2 = vmor %vm744_vm13, %vm745_vm15  ;;  %v1486_v47 = vld [vmem:[#allocation8] ss:$0 sm:$0xff] }
 0x101   : > { %v740_v10 = vmul.f32 %v1498_v0, %v739_v5  ;;  %v821_v17 = vmul.f32 %v818_v11, %v2029_v12  ;;  %v808_v27 = vsel %vm2068_vm8, %v1492_v50, %v804_v6  ;;  %vm766_vm0 = vmor %vm764_vm7, %vm765_vm10  ;;  %v753_v35 = vmul.f32 %v2058_v53, %v752_v22  ;;  %v1311_v22 = vld [vmem:[%s565_s26] sm:$0xff] }
 0x102   : > { %v792_v15 = vmul.f32 0.5, %v791_v7  ;;  %v760_v16 = vmul.f32 %v1500_v3, %v759_v8  ;;  %v820_v34 = vmul.f32 %v2031_v13, %v808_v27  ;;  %vm640_vm4 = vcmask 7168  }
 0x103   : > { %v741_v23 = vmul.f32 0.5, %v740_v10  ;;  %v824_v26 = vmul.f32 %v1483_v9, %v821_v17  ;;  %v757_v44 = vsel %vm2086_vm1, %v2058_v53, %v753_v35  ;;  %641 = vst.msk [vmem:[#allocation2] sm:$0xff] %vm640_vm4, %v1764_v61  ;;  %v1766_v63 = vmov 0.0  }
 0x104   : > { %v793_v24 = vsub.f32 1.5, %v792_v15  ;;  %v761_v25 = vmul.f32 0.5, %v760_v16  ;;  %v823_v43 = vmul.f32 %v1483_v9, %v820_v34  ;;  %v769_v49 = vmul.f32 %v2033_v14, %v757_v44  ;;  %642 = vst.msk [vmem:[#allocation2 + $0x8] sm:$0xff] %vm640_vm4, %v1764_v61  ;;  %v946_v15 = vld [vmem:[%s565_s26 + $0x8] sm:$0xf] }
 0x105   : > { %v742_v28 = vsub.f32 1.5, %v741_v23  ;;  %v828_v31 = vpack.c.bf16 %v824_v26, %v824_v26  ;;  %643 = vst.msk [vmem:[#allocation2 + $0x10] sm:$0xff] %vm640_vm4, %v1764_v61  ;;  %v952_v16 = vunpack.c.l.b16 %v946_v15 }
 0x106   : > { %v794_v12 = vmul.f32 %v1496_v62, %v793_v24  ;;  %v762_v30 = vsub.f32 1.5, %v761_v25  ;;  %v772_v51 = vmul.f32 %v1486_v47, %v769_v49  ;;  %646 = vst.msk [vmem:[#allocation3 + $0x10] sm:$0xff] %vm640_vm4, %v1766_v63 }
 0x107   : > { %v743_v32 = vmul.f32 %v1498_v0, %v742_v28  ;;  %835 = vmatpush.bf16.xpose.msra.mxu0 %v828_v31  ;;  %1325 = vmatpush.bf16.xpose.msra.mxu2 %v828_v31  ;;  %644 = vst.msk [vmem:[#allocation3] sm:$0xff] %vm640_vm4, %v1766_v63  ;;  %v954_v17 = vpack.c.b16 %v952_v16, %v952_v16 }
 0x108   : > { %v798_v37 = vsel %vm2076_vm14, %v1496_v62, %v794_v12  ;;  %v763_v38 = vmul.f32 %v1500_v3, %v762_v30  ;;  %v1765_v62 = vmov 0   ;;  %645 = vst.msk [vmem:[#allocation3 + $0x8] sm:$0xff] %vm640_vm4, %v1766_v63 }
 0x109   : > { %v819_v39 = vmul.f32 %v2041_v19, %v798_v37  ;;  %v747_v13 = vsel %vm746_vm2, %v1498_v0, %v743_v32  ;;  %1480 = vset.pattern.permute.xlu0 %v1765_v62  ;;  %1482 = vset.pattern.permute.xlu2 %v1765_v62  ;;  %v964_v18 = vsel %vm962_vm5, %v954_v17, 0 }
 0x10a   : > { %v767_v41 = vsel %vm766_vm0, %v1500_v3, %v763_v38  ;;  %v768_v48 = vmul.f32 %v2043_v20, %v747_v13  ;;  %1481 = vset.pattern.permute.xlu1 %v1765_v62  ;;  %v850_v0 = vld [vmem:[#allocation2] sm:$0xff]  ;;  %1327 = vmatpush.bf16.msra.mxu3 %v964_v18 }
 0x10b   : > { %v822_v42 = vmul.f32 %v1484_v33, %v819_v39  ;;  %v770_v40 = vmul.f32 %v767_v41, %v2045_v21  ;;  %v851_v6 = vld [vmem:[#allocation2 + $0x8] sm:$0xff]  ;;  %972 = vmatpush.bf16.msra.mxu1 %v964_v18 }
 0x10c   : > { %v771_v19 = vmul.f32 %v1485_v46, %v768_v48  ;;  %v852_v4 = vld [vmem:[#allocation2 + $0x10] sm:$0xff] }
 0x10d   : > { %v827_v45 = vpack.c.bf16 %v823_v43, %v822_v42  ;;  %v773_v50 = vmul.f32 %v1486_v47, %v770_v40  ;;  %v901_v44 = vld [vmem:[#allocation3 + $0x10] sm:$0xff] }
 0x10e   : > { %v825_v54 = vpack.c.bf16 %v772_v51, %v771_v19  ;;  %1328 = vmatpush.bf16.msra.mxu3 %v1311_v22  ;;  %v899_v48 = vld [vmem:[#allocation3] sm:$0xff] }
 0x10f   : > { %836 = vmatpush.bf16.xpose.msra.mxu0 %v827_v45  ;;  %1326 = vmatpush.bf16.xpose.msra.mxu2 %v827_v45  ;;  %v826_v52 = vpack.c.bf16 %v773_v50, %v773_v50 }
 0x110   : > { %973 = vmatpush.bf16.msra.mxu1 %v1311_v22 }
 0x116   : > { %837 = vmatmul.bf16.vlgmr.msra.gmra.mxu0 %v825_v54  ;;  %842 = vmatmul.bf16.vlgmr.msra.gmra.mxu2 %v826_v52  ;;  %v900_v52 = vld [vmem:[#allocation3 + $0x8] sm:$0xff] }
 0x193   : > { %v838_v21 = vpop.f32.mrf.mxu0 }
 0x194   : > { %v2101_v55 = vmul.f32 0.088388346, %v838_v21 }
 0x196   : > { %v854_v53 = vsel %vm853_vm3, %v2101_v55, -inf }
 0x197   : > { %855 = vmax.xlane.f32.xlu0 %v854_v53 }
 0x199   : > { %v843_v20 = vpop.f32.mrf.mxu2 }
 0x19a   : > { %v849_v56 = vmul.f32 0.088388346, %v843_v20 }
 0x19b   : > { %v840_v14 = vpop.f32.mrf.mxu0 }
 0x19c   : > { %v2105_v57 = vmul.f32 0.088388346, %v840_v14  ;;  %v860_v58 = vsel %vm853_vm3, %v849_v56, -inf }
 0x19d   : > { %861 = vmax.xlane.f32.xlu2 %v860_v58 }
 0x19e   : > { %v857_v59 = vsel %vm853_vm3, %v2105_v57, -inf }
 0x19f   : > { %858 = vmax.xlane.f32.xlu1 %v857_v59 }
 0x1a1   : > { %v845_v60 = vpop.f32.mrf.mxu2 }
 0x20a   : > { %v856_v1 = vpop.xlane.xlu0 %855 }
 0x20b   : > { %v863_v2 = vmax.f32 %v850_v0, %v856_v1 }
 0x20d   : > { %v866_v3 = vsub.f32 %v850_v0, %v863_v2  ;;  %990 = vst.msk [vmem:[#allocation2] sm:$0xff] %vm640_vm4, %v863_v2  ;;  %877 = vperm.xlu0 %1480, %v863_v2  }
 0x20f   : > { %v869_v41 = vmul.f32 1.442695, %v866_v3  ;;  %v1024_v3 = vstv %s1023_s9 }
 0x210   : > { %v862_v5 = vpop.xlane.xlu2 %861 }
 0x211   : > { %v865_v7 = vmax.f32 %v852_v4, %v862_v5 }
 0x212   : > { %v859_v8 = vpop.xlane.xlu1 %858 }
 0x213   : > { %v868_v9 = vsub.f32 %v852_v4, %v865_v7  ;;  %992 = vst.msk [vmem:[#allocation2 + $0x10] sm:$0xff] %vm640_vm4, %v865_v7  ;;  %v864_v10 = vmax.f32 %v851_v6, %v859_v8  ;;  %887 = vperm.xlu2 %1482, %v865_v7  }
 0x215   : > { %v867_v11 = vsub.f32 %v851_v6, %v864_v10  ;;  %991 = vst.msk [vmem:[#allocation2 + $0x8] sm:$0xff] %vm640_vm4, %v864_v10  ;;  %882 = vperm.xlu1 %1481, %v864_v10   ;;  %v873_v31 = vmul.f32 1.442695, %v868_v9 }
 0x217   : > { %v871_v42 = vmul.f32 1.442695, %v867_v11 }
 0x26d   : > { %v888_v23 = vpop.permute.xlu2 %887 }
 0x26e   : > { %v892_v24 = vsub.f32 %v849_v56, %v888_v23 }
 0x270   : > { %v897_v25 = vmul.f32 1.442695, %v892_v24 }
 0x272   : > { %1501 = vpow2.f32 %v897_v25 }
 0x278   : > { %v1502_v26 = vpop.eup %1501 }
 0x279   : > { %v911_v27 = vsel %vm853_vm3, %v1502_v26, 0.0  ;;  %v943_v28 = vpack.c.bf16 %v1502_v26, %v1502_v26 }
 0x27a   : > { %912 = vadd.xlane.f32.xlu0 %v911_v27 }
 0x27b   : > { %1307 = vmatmul.msk.bf16.vlgmr.msra.gmra.mxu3 %vm853_vm3, %v943_v28 }
 0x27f   : > { %v878_v12 = vpop.permute.xlu0 %877 }
 0x280   : > { %v890_v29 = vsub.f32 %v2101_v55, %v878_v12 }
 0x282   : > { %v893_v30 = vmul.f32 1.442695, %v890_v29 }
 0x284   : > { %1503 = vpow2.f32 %v893_v30 }
 0x285   : > { %1505 = vpow2.f32 %v873_v31 }
 0x287   : > { %v883_v32 = vpop.permute.xlu1 %882 }
 0x288   : > { %v891_v33 = vsub.f32 %v2105_v57, %v883_v32 }
 0x28a   : > { %v1504_v34 = vpop.eup %1503  ;;  %v895_v35 = vmul.f32 1.442695, %v891_v33 }
 0x28b   : > { %v905_v36 = vsel %vm853_vm3, %v1504_v34, 0.0  ;;  %v1506_v37 = vpop.eup %1505 }
 0x28c   : > { %1507 = vpow2.f32 %v895_v35  ;;  %906 = vadd.xlane.f32.xlu2 %v905_v36  ;;  %v904_v45 = vmul.f32 %v1506_v37, %v901_v44 }
 0x28d   : > { %1509 = vpow2.f32 %v869_v41 }
 0x28e   : > { %936 = vperm.xlu0 %1480, %v1506_v37   ;;  %1511 = vpow2.f32 %v871_v42 }
 0x292   : > { %v1508_v38 = vpop.eup %1507 }
 0x293   : > { %v908_v39 = vsel %vm853_vm3, %v1508_v38, 0.0  ;;  %v942_v13 = vpack.c.bf16 %v1508_v38, %v1504_v34  ;;  %v1510_v43 = vpop.eup %1509 }
 0x294   : > { %909 = vadd.xlane.f32.xlu1 %v908_v39  ;;  %v1512_v40 = vpop.eup %1511  ;;  %v902_v50 = vmul.f32 %v1510_v43, %v899_v48 }
 0x295   : > { %1306 = vmatmul.msk.bf16.vlgmr.msra.gmra.mxu1 %vm853_vm3, %v942_v13  ;;  %v903_v21 = vmul.f32 %v1512_v40, %v900_v52 }
 0x2a4   : > { %926 = vperm.xlu2 %1482, %v1510_v43  }
 0x2ad   : > { %931 = vperm.xlu1 %1481, %v1512_v40  }
 0x2ed   : > { %v913_v46 = vpop.xlane.xlu0 %912 }
 0x2ee   : > { %v916_v47 = vadd.f32 %v913_v46, %v904_v45 }
 0x2f0   : > { %920 = vst.msk [vmem:[#allocation3 + $0x10] sm:$0xff] %vm640_vm4, %v916_v47 }
 0x2f7   : > { %v998_v56 = vld [vmem:[#allocation3 + $0x10] sm:$0xff] }
 0x2fe   : > { %v980_v49 = vpop.f32.mrf.mxu3 }
 0x2ff   : > { %v907_v19 = vpop.xlane.xlu2 %906 }
 0x300   : > { %v914_v51 = vadd.f32 %v907_v19, %v902_v50  ;;  %v937_v61 = vpop.permute.xlu0 %936 }
 0x301   : > { %v941_v63 = vmul.f32 0.0, %v937_v61 }
 0x302   : > { %918 = vst.msk [vmem:[#allocation3] sm:$0xff] %vm640_vm4, %v914_v51 }
 0x303   : > { %v986_v0 = vadd.f32 %v980_v49, %v941_v63 }
 0x306   : > { %v982_v54 = vpop.f32.mrf.mxu3 }
 0x307   : > { %v910_v55 = vpop.xlane.xlu1 %909  ;;  %v927_v60 = vpop.permute.xlu2 %926 }
 0x308   : > { %v915_v53 = vadd.f32 %v910_v55, %v903_v21  ;;  %v939_v8 = vmul.f32 0.0, %v927_v60 }
 0x309   : > { %v996_v20 = vld [vmem:[#allocation3] sm:$0xff] }
 0x30a   : > { %919 = vst.msk [vmem:[#allocation3 + $0x8] sm:$0xff] %vm640_vm4, %v915_v53  ;;  %1513 = vrcp.f32 %v996_v20 }
 0x30b   : > { %1515 = vrcp.f32 %v998_v56 }
 0x310   : > { %v1514_v14 = vpop.eup %1513 }
 0x311   : > { %1007 = vperm.xlu2 %1482, %v1514_v14   ;;  %v997_v57 = vld [vmem:[#allocation3 + $0x8] sm:$0xff]  ;;  %v1516_v58 = vpop.eup %1515 }
 0x312   : > { %1517 = vrcp.f32 %v997_v57  ;;  %v975_v6 = vpop.f32.mrf.mxu1 }
 0x313   : > { %v984_v10 = vadd.f32 %v975_v6, %v939_v8 }
 0x318   : > { %v1518_v59 = vpop.eup %1517 }
 0x319   : > { %1012 = vperm.xlu1 %1481, %v1518_v59   ;;  %1017 = vperm.xlu2 %1482, %v1516_v58  }
 0x31a   : > { %v977_v11 = vpop.f32.mrf.mxu1 }
 0x31f   : > { %v932_v7 = vpop.permute.xlu1 %931 }
 0x320   : > { %v940_v9 = vmul.f32 0.0, %v932_v7 }
 0x322   : > { %v985_v16 = vadd.f32 %v977_v11, %v940_v9 }
 0x36b   : > { %v1008_v62 = vpop.permute.xlu2 %1007 }
 0x36c   : > { %v1020_v15 = vmul.f32 %v1008_v62, %v984_v10 }
 0x36e   : > { %v1025_v22 = vmul.f32 %v1024_v3, %v1020_v15 }
 0x373   : > { %v1018_v1 = vpop.permute.xlu2 %1017 }
 0x374   : > { %v1022_v2 = vmul.f32 %v1018_v1, %v986_v0 }
 0x376   : > { %v1027_v4 = vmul.f32 %v1024_v3, %v1022_v2 }
 0x378   : > { %v1030_v5 = vpack.c.bf16 %v1027_v4, %v1027_v4 }
 0x37a   : > { %1033 = vst [vmem:[%s628_s24 + $0x8] sm:$0xf] %v1030_v5 }
 0x381   : > { %v1068_v27 = vld [vmem:[%s628_s24 + $0x8] sm:$0xf] (%p1925_p13) }
 0x382   : > { %1069 = vst [vmem:[%s1047_s19 + $0x10] sm:$0xf] (%p1925_p13), %v1068_v27 }
 0x38b   : > { %v1013_v17 = vpop.permute.xlu1 %1012 }
 0x38c   : > { %v1021_v18 = vmul.f32 %v1013_v17, %v985_v16 }
 0x38e   : > { %v1026_v23 = vmul.f32 %v1024_v3, %v1021_v18  ;;  %1040 = sbr.rel (!%p1925_p13) target bundleno = 924 (0x39c), region = 207 }
 0x390   : > { %v1323_v24 = vpack.c.bf16 %v1026_v23, %v1025_v22 }
 0x392   : > { %1324 = vst [vmem:[%s628_s24] sm:$0xff] %v1323_v24  }
 0x399   : > { %v1064_v25 = vld [vmem:[%s628_s24] sm:$0xf]  ;;  %v1066_v26 = vld [vmem:[%s628_s24 + $0x4] sm:$0xf] }
 0x39a   : > { %1065 = vst [vmem:[%s1047_s19] sm:$0xf] %v1064_v25 }
 0x39b   : > { %1067 = vst [vmem:[%s1047_s19 + $0x8] sm:$0xf] %v1066_v26 }
 0x39c PF: > { %s22_s15 = sadd.s32 1, %s1756_s15   ;;  %s2229_s2 = sld [smem:[#allocation30_spill]] }
 0x39d   : > { %p19_p4 = scmp.ge.s32.totalorder %s22_s15, 6   ;;  %s2230_s21 = sld [smem:[#allocation28_spill]] }
 0x39e   : > { %s2231_s12 = sld [smem:[#allocation27_spill]]  ;;  %s2234_s27 = smov %s1720_s28 }
 0x39f   : > { %s2232_s17 = sld [smem:[#allocation25_spill]]  ;;  %s2236_s29 = smov %s1728_s30 }
 0x3a0   : > { %s2233_s26 = sld [smem:[#allocation26_spill]]  ;;  %s2238_s9 = smov %s1736_s10 }
 0x3a1   : > { %s2240_s11 = smov %s1748_s13 }
 0x3a2   : > { %s2235_s28 = smov %s2229_s2  ;;  %21 = sbr.rel (!%p19_p4) target bundleno = 14 (0xe), region = 297 }
 0x3a3   : > { %s2237_s30 = smov %s2230_s21 }
 0x3a4   : > { %s2239_s10 = smov %s2231_s12  ;;  %s2241_s12 = smov %s1752_s14 }
 0x3a5   : > { %s2242_s13 = smov %s2232_s17 }
 0x3a6   : > { %s2243_s14 = smov %s2233_s26 }
 0x3a7   :  { %1109 = vsyncpa [#allocation9], 1 }
 0x3a8   :  { %1111 = vsyncpa [#allocation9 + $0x1], 1 }
 0x3a9   :  { %1112 = vsyncpa [#allocation12], 1 }
 0x3aa   :  { %1113 = vsyncpa [#allocation15], 1 }
 0x3ab   :  { %1114 = vsyncpa [#allocation10], 1 }
 0x3ac   :  { %1116 = vsyncpa [#allocation10 + $0x1], 1 }

// kernel: gated_flux_transformer_block.13
= control target key start
LH: loop header
LB: loop body
LE: loop exit
PB: predicated region body
PF: predicated region fallthrough
CT: control target
= control target key end

     0   :  { %10 = vsyncpa [#allocation4], 0  ;;  %s1501_s0 = inlined_call_operand.vmem [shape: bf16[2,24,256], index: 0, kind: input, shape index: {}]   ;;  %s1502_s1 = inlined_call_operand.hbm [shape: bf16[256,256], index: 1, kind: input, shape index: {}]   ;;  %s1503_s2 = inlined_call_operand.hbm [shape: f32[1,256], index: 2, kind: input, shape index: {}]   ;;  %s1504_s3 = inlined_call_operand.hbm [shape: f32[2,8,256], index: 3, kind: input, shape index: {}]   ;;  %s1505_s4 = inlined_call_operand.vmem [shape: f32[2,1,256], index: 4, kind: input, shape index: {}]   ;;  %s1506_s5 = inlined_call_operand.vmem [shape: f32[2,8,256], index: 5, kind: output, shape index: {}]  }
   0x1   :  { %11 = vsyncpa [#allocation6], 0  ;;  %s1355_s18 = smov 0   ;;  %s1357_s19 = smov 0  }
   0x2   :  { %s1359_s20 = smov 0   ;;  %s1361_s21 = smov 0  }
   0x3   :  { %s1363_s22 = smov 0   ;;  %s1365_s23 = smov 0  }
   0x4 LB: > { %s911_s24 = sadd.s32 4294967295, %s1319_s23   ;;  %p913_p0 = scmp.ge.s32.totalorder %s1319_s23, 1  ;;  %s1319_s23 = sphi %s1365_s23, %s17_s23   ;;  %s1315_s22 = sphi %s1363_s22, %s1516_s22   ;;  %s1311_s21 = sphi %s1361_s21, %s1515_s21   ;;  %s1307_s20 = sphi %s1359_s20, %s1514_s20   ;;  %s1303_s19 = sphi %s1357_s19, %s1513_s19   ;;  %s1299_s18 = sphi %s1355_s18, %s1512_s18  }
   0x5   : > { %p1389_p1 = scmp.eq.s32.totalorder %s911_s24, 0  ;;  %p220_p2 = scmp.lt.s32.totalorder %s1319_s23, 3 }
   0x6   : > { %s237_s28 = sshll.u32 %s1502_s1, 4  ;;  %s1321_s30 = smov [#allocation3]   ;;  %s238_s28 = int_to_ptr.hbm [resolvable:$true] %s237_s28 }
   0x7   : > { %p1397_p3 = pnand %p913_p0, %p220_p2  ;;  %s239_s6 = sshll.u32 %s1321_s30, 4  ;;  %s240_s6 = int_to_ptr.vmem [resolvable:$true] %s239_s6 }
   0x8   : > { %s254_s9 = sshll.u32 %s1503_s2, 4  ;;  %s1322_s10 = smov 128   ;;  %s255_s9 = int_to_ptr.hbm [resolvable:$true] %s254_s9 }
   0x9   : > { %p1103_p4 = pneg %p1397_p3  ;;  %s1323_s11 = smov 8  }
   0xa   : > { %s1324_s12 = smov [#allocation5]   ;;  %s43_s14 = sadd.s32 1, %s1315_s22 }
   0xb   : > { %p1104_p5 = pnand %p1103_p4, %p1389_p1  ;;  %s256_s13 = sshll.u32 %s1324_s12, 4  ;;  %s257_s13 = int_to_ptr.vmem [resolvable:$true] %s256_s13 }
   0xc   : > { %p45_p6 = scmp.ge.s32.totalorder %s43_s14, 2  ;;  %p145_p7 = scmp.ne.s32.totalorder %s1307_s20, %s1303_s19 }
   0xd   : > { %1106 = dma.hbm_to_vmem [thread:$0]  (!%p1104_p5), %s238_s28, 4096, %s240_s6, [#allocation4], %s1322_s10, %s1322_s10, %s1323_s11  }
   0xe   : > { %1109 = dma.hbm_to_vmem [thread:$0]  (!%p1104_p5), %s255_s9, 32, %s257_s13, [#allocation6]  }
   0xf   : > { %p146_p8 = scmp.eq.s32.totalorder %s1319_s23, 0  ;;  %p151_p9 = scmp.ne.s32.totalorder %s1303_s19, %s1299_s18 }
  0x10   : > { %s1518_s14 = smov (%p45_p6, %s43_s14), 0  ;;  %s138_s15 = sadd.s32 1, %s1307_s20 }
  0x11   : > { %p1419_p10 = por %p1389_p1, %p151_p9  ;;  %s131_s17 = ssub.s32 %s1315_s22, %s1518_s14 }
  0x12   : > { %p1425_p11 = por %p146_p8, %p145_p7  ;;  %p136_p12 = scmp.eq.s32.totalorder %s131_s17, 0 }
  0x13   : > { %p1116_p13 = scmp.lt.s32.totalorder %s1319_s23, 2  ;;  %s284_s27 = sand.u32 1, %s1319_s23  }
  0x14   : > { %s286_s28 = sand.u32 1, %s1307_s20   ;;  %s1058_s6 = sshll.u32 %s1315_s22, 4 }
  0x15   : > { %s1433_s18 = scalar_select %p136_p12, %s1307_s20, %s138_s15  }
  0x16   : > { %s917_s30 = sshll.u32 %s286_s28, 4  ;;  %s297_s9 = scalar_lea.hbm %s1504_s3, %s1058_s6 }
  0x17   : > { %s299_s10 = sshll.u32 %s297_s9, 4  ;;  %s288_s11 = scalar_lea.vmem [#allocation7], %s917_s30  ;;  %s300_s10 = int_to_ptr.hbm [resolvable:$true] %s299_s10 }
  0x18   : > { %s301_s12 = sshll.u32 %s288_s11, 4  ;;  %p1111_p0 = pnand %p1116_p13, %p1425_p11  ;;  %s302_s12 = int_to_ptr.vmem [resolvable:$true] %s301_s12 }
  0x19   : > { %s285_s13 = scalar_lea.sflag [#allocation4], %s284_s27  ;;  %322 = sbr.rel (%p1397_p3) target bundleno = 215 (0xd7), region = 40 }
  0x1a   : > { %1113 = dma.hbm_to_vmem [thread:$0]  (!%p1111_p0), %s300_s10, 256, %s302_s12, %s285_s13  }
  0x1e   : > { %1286 = dma.done.wait (%p1389_p1), [#allocation4], 4096  }
  0x1f   : > { %1288 = vsyncadd (%p1389_p1), [#allocation4], 4294963200 }
  0x20   : > { %1290 = dma.done.wait (%p1389_p1), [#allocation6], 32  }
  0x21   : > { %1292 = vsyncadd (%p1389_p1), [#allocation6], 4294967264  ;;  %s334_s15 = sand.u32 1, %s911_s24   ;;  %s336_s17 = sand.u32 1, %s1303_s19  }
  0x22   : > { %s1454_s29 = sshll.u32 %s336_s17, 4  ;;  %s335_s26 = scalar_lea.sflag [#allocation4], %s334_s15 }
  0x23   : > { %s338_s27 = scalar_lea.vmem [#allocation7], %s1454_s29 }
  0x24   : > { %1294 = dma.done.wait (%p1419_p10), %s335_s26, 256  }
  0x25   : > { %1296 = vsyncadd (%p1419_p10), %s335_s26, 4294967040  ;;  %p396_p2 = scmp.lt.s32.totalorder %s1311_s21, 1  ;;  %v986_v0 = vld [vmem:[#allocation3 + $0x70] sm:$0xf]  ;;  %v1075_v1 = vld [vmem:[#allocation3 + $0x74] sm:$0xf0] }
  0x26   : > { %v1050_v2 = vld [vmem:[#allocation3 + $0xf0] sm:$0xf]  ;;  %v987_v3 = vor.u32 %v1075_v1, %v986_v0  ;;  %v1091_v4 = vld [vmem:[#allocation3 + $0xf4] sm:$0xf0]  ;;  %v1074_v5 = vld [vmem:[#allocation3 + $0x74] sm:$0xf] }
  0x27   : > { %v988_v6 = vld [vmem:[#allocation3 + $0x78] sm:$0xf0]  ;;  %v1051_v7 = vor.u32 %v1091_v4, %v1050_v2  ;;  %v1090_v9 = vld [vmem:[#allocation3 + $0xf4] sm:$0xf]  ;;  %v978_v11 = vld [vmem:[#allocation3 + $0x60] sm:$0xf] }
  0x28   : > { %v991_v8 = vor.u32 %v1074_v5, %v988_v6  ;;  %v1052_v10 = vld [vmem:[#allocation3 + $0xf8] sm:$0xf0]  ;;  %644 = vmatpush.bf16.msra.mxu0 %v987_v3  ;;  %v1073_v13 = vld [vmem:[#allocation3 + $0x64] sm:$0xf0]  ;;  %v1042_v14 = vld [vmem:[#allocation3 + $0xe0] sm:$0xf] }
  0x29   : > { %v1055_v12 = vor.u32 %v1090_v9, %v1052_v10  ;;  %v1089_v15 = vld [vmem:[#allocation3 + $0xe4] sm:$0xf0]  ;;  %657 = vmatpush.bf16.msra.mxu1 %v1051_v7  ;;  %v979_v16 = vor.u32 %v1073_v13, %v978_v11  ;;  %v1072_v18 = vld [vmem:[#allocation3 + $0x64] sm:$0xf]  ;;  %v980_v19 = vld [vmem:[#allocation3 + $0x68] sm:$0xf0] }
  0x2a   : > { %670 = vmatpush.bf16.msra.mxu2 %v991_v8  ;;  %v1043_v17 = vor.u32 %v1089_v15, %v1042_v14  ;;  %v1088_v20 = vld [vmem:[#allocation3 + $0xe4] sm:$0xf]  ;;  %v983_v21 = vor.u32 %v1072_v18, %v980_v19  ;;  %v1044_v22 = vld [vmem:[#allocation3 + $0xe8] sm:$0xf0]  ;;  %v970_v23 = vld [vmem:[#allocation3 + $0x50] sm:$0xf] }
  0x2b   : > { %683 = vmatpush.bf16.msra.mxu3 %v1055_v12  ;;  %v1071_v24 = vld [vmem:[#allocation3 + $0x54] sm:$0xf0]  ;;  %v1047_v25 = vor.u32 %v1088_v20, %v1044_v22  ;;  %v1034_v26 = vld [vmem:[#allocation3 + $0xd0] sm:$0xf]  ;;  %v1070_v28 = vld [vmem:[#allocation3 + $0x54] sm:$0xf] }
  0x2c   : > { %v1087_v27 = vld [vmem:[#allocation3 + $0xd4] sm:$0xf0]  ;;  %645 = vmatpush.bf16.msra.mxu0 %v979_v16  ;;  %v971_v29 = vor.u32 %v1071_v24, %v970_v23  ;;  %v972_v30 = vld [vmem:[#allocation3 + $0x58] sm:$0xf0]  ;;  %v1086_v31 = vld [vmem:[#allocation3 + $0xd4] sm:$0xf] }
  0x2d   : > { %v1036_v32 = vld [vmem:[#allocation3 + $0xd8] sm:$0xf0]  ;;  %658 = vmatpush.bf16.msra.mxu1 %v1043_v17  ;;  %v1035_v33 = vor.u32 %v1087_v27, %v1034_v26  ;;  %v975_v34 = vor.u32 %v1070_v28, %v972_v30  ;;  %v962_v35 = vld [vmem:[#allocation3 + $0x40] sm:$0xf]  ;;  %v1069_v36 = vld [vmem:[#allocation3 + $0x44] sm:$0xf0] }
  0x2e   : > { %671 = vmatpush.bf16.msra.mxu2 %v983_v21  ;;  %v1026_v37 = vld [vmem:[#allocation3 + $0xc0] sm:$0xf]  ;;  %v1039_v38 = vor.u32 %v1086_v31, %v1036_v32  ;;  %v1085_v39 = vld [vmem:[#allocation3 + $0xc4] sm:$0xf0]  ;;  %v1068_v40 = vld [vmem:[#allocation3 + $0x44] sm:$0xf]  ;;  %v963_v44 = vor.u32 %v1069_v36, %v962_v35 }
  0x2f   : > { %684 = vmatpush.bf16.msra.mxu3 %v1047_v25  ;;  %v964_v41 = vld [vmem:[#allocation3 + $0x48] sm:$0xf0]  ;;  %v1084_v42 = vld [vmem:[#allocation3 + $0xc4] sm:$0xf]  ;;  %s1520_s21 = smov (!%p396_p2, %s1311_s21), 1  ;;  %v1027_v45 = vor.u32 %v1085_v39, %v1026_v37 }
  0x30   : > { %v1028_v43 = vld [vmem:[#allocation3 + $0xc8] sm:$0xf0]  ;;  %646 = vmatpush.bf16.msra.mxu0 %v971_v29  ;;  %v967_v46 = vor.u32 %v1068_v40, %v964_v41  ;;  %v954_v47 = vld [vmem:[#allocation3 + $0x30] sm:$0xf]  ;;  %v1067_v48 = vld [vmem:[#allocation3 + $0x34] sm:$0xf0] }
  0x31   : > { %659 = vmatpush.bf16.msra.mxu1 %v1035_v33  ;;  %v1018_v49 = vld [vmem:[#allocation3 + $0xb0] sm:$0xf]  ;;  %v1031_v50 = vor.u32 %v1084_v42, %v1028_v43  ;;  %v1083_v51 = vld [vmem:[#allocation3 + $0xb4] sm:$0xf0]  ;;  %v1066_v52 = vld [vmem:[#allocation3 + $0x34] sm:$0xf]  ;;  %v955_v56 = vor.u32 %v1067_v48, %v954_v47 }
  0x32   : > { %672 = vmatpush.bf16.msra.mxu2 %v975_v34  ;;  %v956_v53 = vld [vmem:[#allocation3 + $0x38] sm:$0xf0]  ;;  %v1082_v54 = vld [vmem:[#allocation3 + $0xb4] sm:$0xf]  ;;  %s1092_s24 = smul.u32 24, %s1520_s21  ;;  %v1019_v57 = vor.u32 %v1083_v51, %v1018_v49  ;;  %s925_s30 = sshll.u32 %s1520_s21, 1 }
  0x33   : > { %685 = vmatpush.bf16.msra.mxu3 %v1039_v38  ;;  %v1020_v55 = vld [vmem:[#allocation3 + $0xb8] sm:$0xf0]  ;;  %v959_v58 = vor.u32 %v1066_v52, %v956_v53  ;;  %v946_v59 = vld [vmem:[#allocation3 + $0x20] sm:$0xf]  ;;  %v1065_v60 = vld [vmem:[#allocation3 + $0x24] sm:$0xf0]  ;;  %s420_s8 = scalar_lea.vmem %s1505_s4, %s925_s30 }
  0x34   : > { %647 = vmatpush.bf16.msra.mxu0 %v963_v44  ;;  %v1010_v61 = vld [vmem:[#allocation3 + $0xa0] sm:$0xf]  ;;  %v1023_v62 = vor.u32 %v1082_v54, %v1020_v55  ;;  %v1081_v63 = vld [vmem:[#allocation3 + $0xa4] sm:$0xf0]  ;;  %v1064_v0 = vld [vmem:[#allocation3 + $0x24] sm:$0xf]  ;;  %v947_v4 = vor.u32 %v1065_v60, %v946_v59  ;;  %s407_s28 = scalar_lea.vmem %s1501_s0, %s1092_s24 }
  0x35   : > { %660 = vmatpush.bf16.msra.mxu1 %v1027_v45  ;;  %v948_v1 = vld [vmem:[#allocation3 + $0x28] sm:$0xf0]  ;;  %v1080_v2 = vld [vmem:[#allocation3 + $0xa4] sm:$0xf]  ;;  %v1011_v5 = vor.u32 %v1081_v63, %v1010_v61  ;;  %v938_v7 = vld [vmem:[#allocation3 + $0x10] sm:$0xf] }
  0x36   : > { %673 = vmatpush.bf16.msra.mxu2 %v967_v46  ;;  %v1012_v3 = vld [vmem:[#allocation3 + $0xa8] sm:$0xf0]  ;;  %v951_v6 = vor.u32 %v1064_v0, %v948_v1  ;;  %v1063_v8 = vld [vmem:[#allocation3 + $0x14] sm:$0xf0]  ;;  %v1002_v9 = vld [vmem:[#allocation3 + $0x90] sm:$0xf] }
  0x37   : > { %686 = vmatpush.bf16.msra.mxu3 %v1031_v50  ;;  %v1015_v10 = vor.u32 %v1080_v2, %v1012_v3  ;;  %v1079_v11 = vld [vmem:[#allocation3 + $0x94] sm:$0xf0]  ;;  %v1062_v12 = vld [vmem:[#allocation3 + $0x14] sm:$0xf]  ;;  %v940_v13 = vld [vmem:[#allocation3 + $0x18] sm:$0xf0]  ;;  %v939_v16 = vor.u32 %v1063_v8, %v938_v7 }
  0x38   : > { %648 = vmatpush.bf16.msra.mxu0 %v955_v56  ;;  %v1078_v14 = vld [vmem:[#allocation3 + $0x94] sm:$0xf]  ;;  %v1004_v15 = vld [vmem:[#allocation3 + $0x98] sm:$0xf0]  ;;  %v444_v17 = vld [vmem:[%s407_s28] sm:$0xff]  ;;  %v1003_v18 = vor.u32 %v1079_v11, %v1002_v9  ;;  %v943_v19 = vor.u32 %v1062_v12, %v940_v13  ;;  %s1059_s9 = sshll.u32 %s1520_s21, 4 }
  0x39   : > { %661 = vmatpush.bf16.msra.mxu1 %v1019_v57  ;;  %v930_v20 = vld [vmem:[#allocation3] sm:$0xf]  ;;  %v1061_v21 = vld [vmem:[#allocation3 + $0x4] sm:$0xf0]  ;;  %v1007_v23 = vor.u32 %v1078_v14, %v1004_v15  ;;  %v1060_v25 = vld [vmem:[#allocation3 + $0x4] sm:$0xf]  ;;  %v478_v29 = vunpack.c.l.b16 %v444_v17  ;;  %v479_v31 = vunpack.c.h.b16 %v444_v17  ;;  %s434_s12 = scalar_lea.vmem %s1506_s5, %s1059_s9 }
  0x3a   : > { %674 = vmatpush.bf16.msra.mxu2 %v959_v58  ;;  %v994_v22 = vld [vmem:[#allocation3 + $0x80] sm:$0xf]  ;;  %v1077_v24 = vld [vmem:[#allocation3 + $0x84] sm:$0xf0]  ;;  %v932_v26 = vld [vmem:[#allocation3 + $0x8] sm:$0xf0]  ;;  %v931_v30 = vor.u32 %v1061_v21, %v930_v20 }
  0x3b   : > { %687 = vmatpush.bf16.msra.mxu3 %v1023_v62  ;;  %v1076_v27 = vld [vmem:[#allocation3 + $0x84] sm:$0xf]  ;;  %v996_v28 = vld [vmem:[#allocation3 + $0x88] sm:$0xf0]  ;;  %v995_v32 = vor.u32 %v1077_v24, %v994_v22  ;;  %v935_v33 = vor.u32 %v1060_v25, %v932_v26  ;;  %v480_v35 = vpack.c.b16 %v478_v29, %v478_v29  ;;  %v481_v36 = vpack.c.b16 %v479_v31, %v479_v31  ;;  %v708_v37 = vld [vmem:[#allocation5] sm:$0x3] }
  0x3c   : > { %649 = vmatpush.bf16.msra.mxu0 %v947_v4  ;;  %v999_v34 = vor.u32 %v1076_v27, %v996_v28  ;;  %v705_v38 = vld [vmem:[%s420_s8] sm:$0x3]  ;;  %v710_v40 = vperm.slane %v708_v37, 0  ;;  %v703_v45 = vld [vmem:[%s338_s27] sm:$0xff]  ;;  %v711_v48 = vperm.slane %v708_v37, 1 }
  0x3d   : > { %662 = vmatpush.bf16.msra.mxu1 %v1011_v5  ;;  %v717_v43 = vperm.slane %v705_v38, 0  ;;  %v718_v53 = vperm.slane %v705_v38, 1  ;;  %v704_v56 = vld [vmem:[%s338_s27 + $0x8] sm:$0xff] }
  0x3e   : > { %675 = vmatpush.bf16.msra.mxu2 %v951_v6 }
  0x3f   : > { %688 = vmatpush.bf16.msra.mxu3 %v1015_v10 }
  0x40   : > { %650 = vmatpush.bf16.msra.mxu0 %v939_v16 }
  0x41   : > { %663 = vmatpush.bf16.msra.mxu1 %v1003_v18 }
  0x42   : > { %676 = vmatpush.bf16.msra.mxu2 %v943_v19 }
  0x43   : > { %689 = vmatpush.bf16.msra.mxu3 %v1007_v23 }
  0x44   : > { %651 = vmatpush.bf16.msra.mxu0 %v931_v30 }
  0x45   : > { %664 = vmatpush.bf16.msra.mxu1 %v995_v32 }
  0x46   : > { %677 = vmatpush.bf16.msra.mxu2 %v935_v33 }
  0x47   : > { %690 = vmatpush.bf16.msra.mxu3 %v999_v34  ;;  %652 = vmatmul.bf16.vlgmr.msra.gmra.mxu0 %v480_v35 }
  0x48   : > { %665 = vmatmul.bf16.vlgmr.msra.gmra.mxu1 %v481_v36 }
  0x49   : > { %678 = vmatmul.bf16.vlgmr.msra.gmra.mxu2 %v480_v35 }
  0x4a   : > { %691 = vmatmul.bf16.vlgmr.msra.gmra.mxu3 %v481_v36 }
  0xc4   : > { %v653_v39 = vpop.f32.mrf.mxu0 }
  0xc5   : > { %v666_v41 = vpop.f32.mrf.mxu1 }
  0xc6   : > { %v667_v42 = vadd.f32 %v666_v41, %v653_v39 }
  0xc8   : > { %v714_v44 = vadd.f32 %v710_v40, %v667_v42 }
  0xca   : > { %v721_v46 = vmul.f32 %v717_v43, %v714_v44 }
  0xcc   : > { %v679_v47 = vpop.f32.mrf.mxu2  ;;  %v723_v49 = vadd.f32 %v721_v46, %v703_v45  ;;  %v655_v51 = vpop.f32.mrf.mxu0 }
  0xcd   : > { %v692_v50 = vpop.f32.mrf.mxu3  ;;  %v668_v54 = vpop.f32.mrf.mxu1 }
  0xce   : > { %v693_v52 = vadd.f32 %v692_v50, %v679_v47  ;;  %725 = vst [vmem:[%s434_s12] sm:$0xff] %v723_v49 }
  0xd0   : > { %v715_v55 = vadd.f32 %v711_v48, %v693_v52 }
  0xd2   : > { %v722_v57 = vmul.f32 %v718_v53, %v715_v55 }
  0xd4   : > { %v724_v58 = vadd.f32 %v722_v57, %v704_v56  ;;  %v681_v59 = vpop.f32.mrf.mxu2 }
  0xd5   : > { %v694_v60 = vpop.f32.mrf.mxu3 }
  0xd6   : > { %726 = vst [vmem:[%s434_s12 + $0x8] sm:$0xff] %v724_v58 }
  0xd7 PF: > { %s17_s23 = sadd.s32 1, %s1319_s23   ;;  %s1511_s21 = smov %s1433_s18 }
  0xd8   : > { %p14_p1 = scmp.ge.s32.totalorder %s17_s23, 4   ;;  %s1512_s18 = smov %s1303_s19 }
  0xd9   : > { %s1513_s19 = smov %s1307_s20  ;;  %s1514_s20 = smov %s1511_s21 }
  0xda   : > { %s1515_s21 = smov %s1315_s22  ;;  %s1516_s22 = smov %s1518_s14 }
  0xdb   :  { %16 = sbr.rel (!%p14_p1) target bundleno = 4 (0x4), region = 103 }
  0xe0   :  { %765 = vsyncpa [#allocation4], 1 }
  0xe1   :  { %767 = vsyncpa [#allocation4 + $0x1], 1 }
  0xe2   :  { %768 = vsyncpa [#allocation6], 1 }

// kernel: gated_flux_transformer_block.12
= control target key start
LH: loop header
LB: loop body
LE: loop exit
PB: predicated region body
PF: predicated region fallthrough
CT: control target
= control target key end

     0   :  { %s1585_s0 = inlined_call_operand.vmem [shape: bf16[2,24,256], index: 0, kind: input, shape index: {}]   ;;  %s1586_s1 = inlined_call_operand.hbm [shape: bf16[256,256], index: 1, kind: input, shape index: {}]   ;;  %s1587_s2 = inlined_call_operand.hbm [shape: f32[1,256], index: 2, kind: input, shape index: {}]   ;;  %s1588_s3 = inlined_call_operand.hbm [shape: f32[2,16,256], index: 3, kind: input, shape index: {}]   ;;  %s1589_s4 = inlined_call_operand.vmem [shape: f32[2,1,256], index: 4, kind: input, shape index: {}]   ;;  %s1590_s5 = inlined_call_operand.vmem [shape: f32[2,16,256], index: 5, kind: output, shape index: {}]  }
   0x1   :  { %1594 = sst [smem:[#allocation13_spill]] %s1586_s1 }
   0x2   :  { %1595 = sst [smem:[#allocation14_spill]] %s1587_s2 }
   0x3   :  { %1596 = sst [smem:[#allocation15_spill]] %s1589_s4 }
   0x4   :  { %1597 = sst [smem:[#allocation16_spill]] %s1590_s5 }
   0x5   :  { %10 = vsyncpa [#allocation4], 0 }
   0x6   :  { %11 = vsyncpa [#allocation6], 0  ;;  %s1398_s18 = smov 0   ;;  %s1400_s19 = smov 0  }
   0x7   :  { %s1402_s20 = smov 0   ;;  %s1404_s21 = smov 0  }
   0x8   :  { %s1406_s22 = smov 0   ;;  %s1408_s23 = smov 0  }
   0x9   :  { %s1410_s24 = smov 0   ;;  %s1412_s25 = smov 0  }
   0xa LB: > { %s1591_s26 = sadd.s32 4294967295, %s1362_s25   ;;  %p923_p0 = scmp.ge.s32.totalorder %s1362_s25, 1  ;;  %s1362_s25 = sphi %s1412_s25, %s17_s25   ;;  %s1358_s24 = sphi %s1410_s24, %s1619_s24   ;;  %s1354_s23 = sphi %s1408_s23, %s1618_s23   ;;  %s1350_s22 = sphi %s1406_s22, %s1617_s22   ;;  %s1346_s21 = sphi %s1404_s21, %s1616_s21   ;;  %s1342_s20 = sphi %s1402_s20, %s1615_s20   ;;  %s1338_s19 = sphi %s1400_s19, %s1614_s19   ;;  %s1334_s18 = sphi %s1398_s18, %s1613_s18  }
   0xb   : > { %p1442_p1 = scmp.eq.s32.totalorder %s1591_s26, 0  ;;  %p222_p2 = scmp.lt.s32.totalorder %s1362_s25, 5 }
   0xc   : > { %s1599_s1 = sld [smem:[#allocation13_spill]]  ;;  %s1364_s7 = smov [#allocation3]  }
   0xd   : > { %p1450_p3 = pnand %p923_p0, %p222_p2  ;;  %s241_s8 = sshll.u32 %s1364_s7, 4  ;;  %s242_s8 = int_to_ptr.vmem [resolvable:$true] %s241_s8 }
   0xe   : > { %s1601_s2 = sld [smem:[#allocation14_spill]]  ;;  %s1365_s12 = smov 128  }
   0xf   : > { %p1114_p4 = pneg %p1450_p3  ;;  %s1366_s13 = smov 8  }
  0x10   : > { %s1367_s14 = smov [#allocation5]   ;;  %s39_s16 = sadd.s32 1, %s1354_s23 }
  0x11   : > { %p1115_p5 = pnand %p1114_p4, %p1442_p1  ;;  %s258_s15 = sshll.u32 %s1367_s14, 4  ;;  %s259_s15 = int_to_ptr.vmem [resolvable:$true] %s258_s15 }
  0x12   : > { %s239_s30 = sshll.u32 %s1599_s1, 4  ;;  %s43_s17 = sadd.s32 1, %s1358_s24  ;;  %s240_s30 = int_to_ptr.hbm [resolvable:$true] %s239_s30 }
  0x13   : > { %1117 = dma.hbm_to_vmem [thread:$0]  (!%p1115_p5), %s240_s30, 4096, %s242_s8, [#allocation4], %s1365_s12, %s1365_s12, %s1366_s13  }
  0x14   : > { %s256_s11 = sshll.u32 %s1601_s2, 4  ;;  %p41_p6 = scmp.ge.s32.totalorder %s39_s16, 2  ;;  %s257_s11 = int_to_ptr.hbm [resolvable:$true] %s256_s11 }
  0x15   : > { %1120 = dma.hbm_to_vmem [thread:$0]  (!%p1115_p5), %s257_s11, 32, %s259_s15, [#allocation6]  }
  0x16   : > { %s140_s28 = sadd.s32 1, %s1342_s20  ;;  %p147_p7 = scmp.ne.s32.totalorder %s1342_s20, %s1338_s19 }
  0x17   : > { %p148_p8 = scmp.eq.s32.totalorder %s1362_s25, 0  ;;  %s1621_s16 = smov (%p41_p6, %s39_s16), 0 }
  0x18   : > { %1602 = sst [smem:[#allocation11_spill]] %s1621_s16  ;;  %s1623_s17 = smov (!%p41_p6, %s43_s17), %s1358_s24 }
  0x19   : > { %s134_s29 = ssub.s32 %s1354_s23, %s1621_s16  ;;  %p1472_p9 = por %p148_p8, %p147_p7 }
  0x1a   : > { %p45_p10 = scmp.ge.s32.totalorder %s1623_s17, 2  ;;  %p153_p11 = scmp.ne.s32.totalorder %s1338_s19, %s1334_s18 }
  0x1b   : > { %p1127_p12 = scmp.lt.s32.totalorder %s1362_s25, 4  ;;  %s288_s7 = sand.u32 1, %s1362_s25  }
  0x1c   : > { %s1625_s17 = smov (%p45_p10, %s1623_s17), 0  ;;  %p1484_p13 = por %p1442_p1, %p153_p11 }
  0x1d   : > { %1604 = sst [smem:[#allocation12_spill]] %s1625_s17  ;;  %s133_s9 = ssub.s32 %s1358_s24, %s1625_s17 }
  0x1e   : > { %s290_s10 = sand.u32 1, %s1342_s20   ;;  %s135_s11 = sor.u32 %s134_s29, %s133_s9 }
  0x1f   : > { %s927_s12 = sshll.u32 %s290_s10, 4  ;;  %p138_p0 = scmp.eq.s32.totalorder %s135_s11, 0 }
  0x20   : > { %s928_s13 = sshll.u32 %s1354_s23, 1  ;;  %s929_s14 = sshll.u32 %s1358_s24, 2 }
  0x21   : > { %s1494_s18 = scalar_select %p138_p0, %s1342_s20, %s140_s28  }
  0x22   : > { %s299_s15 = sadd.s32 %s929_s14, %s928_s13  ;;  %s292_s26 = scalar_lea.vmem [#allocation7], %s927_s12 }
  0x23   : > { %s305_s1 = sshll.u32 %s292_s26, 4  ;;  %s930_s2 = sshll.u32 %s299_s15, 3  ;;  %s306_s1 = int_to_ptr.vmem [resolvable:$true] %s305_s1 }
  0x24   : > { %s301_s4 = scalar_lea.hbm %s1588_s3, %s930_s2  ;;  %p1122_p2 = pnand %p1127_p12, %p1472_p9 }
  0x25   : > { %s303_s17 = sshll.u32 %s301_s4, 4  ;;  %s289_s29 = scalar_lea.sflag [#allocation4], %s288_s7  ;;  %s304_s17 = int_to_ptr.hbm [resolvable:$true] %s303_s17 }
  0x26   : > { %1124 = dma.hbm_to_vmem [thread:$0]  (!%p1122_p2), %s304_s17, 256, %s306_s1, %s289_s29  }
  0x27   : > { %326 = sbr.rel (%p1450_p3) target bundleno = 229 (0xe5), region = 40 }
  0x2c   : > { %1321 = dma.done.wait (%p1442_p1), [#allocation4], 4096  }
  0x2d   : > { %1323 = vsyncadd (%p1442_p1), [#allocation4], 4294963200 }
  0x2e   : > { %1325 = dma.done.wait (%p1442_p1), [#allocation6], 32  }
  0x2f   : > { %1327 = vsyncadd (%p1442_p1), [#allocation6], 4294967264  ;;  %s1606_s2 = sadd.s32 4294967295, %s1362_s25   ;;  %s340_s4 = sand.u32 1, %s1338_s19  }
  0x30   : > { %s338_s1 = sand.u32 1, %s1606_s2   ;;  %s1516_s5 = sshll.u32 %s340_s4, 4 }
  0x31   : > { %s339_s26 = scalar_lea.sflag [#allocation4], %s338_s1  ;;  %s342_s6 = scalar_lea.vmem [#allocation7], %s1516_s5 }
  0x32   : > { %1329 = dma.done.wait (%p1484_p13), %s339_s26, 256  }
  0x33   : > { %1331 = vsyncadd (%p1484_p13), %s339_s26, 4294967040  ;;  %s400_s27 = sadd.s32 1, %s1346_s21  ;;  %p402_p1 = scmp.lt.s32.totalorder %s1350_s22, 1  ;;  %v999_v0 = vld [vmem:[#allocation3 + $0x70] sm:$0xf] }
  0x34   : > { %p1527_p3 = scmp.lt.s32.totalorder %s400_s27, 2  ;;  %v1086_v1 = vld [vmem:[#allocation3 + $0x74] sm:$0xf0]  ;;  %v1063_v2 = vld [vmem:[#allocation3 + $0xf0] sm:$0xf]  ;;  %p432_p4 = scmp.lt.s32.totalorder %s1346_s21, 1 }
  0x35   : > { %v1000_v3 = vor.u32 %v1086_v1, %v999_v0  ;;  %v1102_v4 = vld [vmem:[#allocation3 + $0xf4] sm:$0xf0]  ;;  %v1085_v5 = vld [vmem:[#allocation3 + $0x74] sm:$0xf]  ;;  %v1001_v6 = vld [vmem:[#allocation3 + $0x78] sm:$0xf0] }
  0x36   : > { %v1064_v7 = vor.u32 %v1102_v4, %v1063_v2  ;;  %v1004_v8 = vor.u32 %v1085_v5, %v1001_v6  ;;  %v1101_v9 = vld [vmem:[#allocation3 + $0xf4] sm:$0xf]  ;;  %v1065_v10 = vld [vmem:[#allocation3 + $0xf8] sm:$0xf0]  ;;  %v991_v11 = vld [vmem:[#allocation3 + $0x60] sm:$0xf] }
  0x37   : > { %651 = vmatpush.bf16.msra.mxu0 %v1000_v3  ;;  %v1068_v12 = vor.u32 %v1101_v9, %v1065_v10  ;;  %v1084_v13 = vld [vmem:[#allocation3 + $0x64] sm:$0xf0]  ;;  %v1055_v14 = vld [vmem:[#allocation3 + $0xe0] sm:$0xf]  ;;  %v1083_v18 = vld [vmem:[#allocation3 + $0x64] sm:$0xf] }
  0x38   : > { %v1100_v15 = vld [vmem:[#allocation3 + $0xe4] sm:$0xf0]  ;;  %664 = vmatpush.bf16.msra.mxu1 %v1064_v7  ;;  %677 = vmatpush.bf16.msra.mxu2 %v1004_v8  ;;  %v992_v16 = vor.u32 %v1084_v13, %v991_v11  ;;  %v993_v19 = vld [vmem:[#allocation3 + $0x68] sm:$0xf0]  ;;  %v1099_v20 = vld [vmem:[#allocation3 + $0xe4] sm:$0xf] }
  0x39   : > { %v1056_v17 = vor.u32 %v1100_v15, %v1055_v14  ;;  %690 = vmatpush.bf16.msra.mxu3 %v1068_v12  ;;  %v996_v21 = vor.u32 %v1083_v18, %v993_v19  ;;  %v1057_v22 = vld [vmem:[#allocation3 + $0xe8] sm:$0xf0]  ;;  %v983_v23 = vld [vmem:[#allocation3 + $0x50] sm:$0xf]  ;;  %v1082_v24 = vld [vmem:[#allocation3 + $0x54] sm:$0xf0] }
  0x3a   : > { %v1060_v25 = vor.u32 %v1099_v20, %v1057_v22  ;;  %v1047_v26 = vld [vmem:[#allocation3 + $0xd0] sm:$0xf]  ;;  %v1098_v27 = vld [vmem:[#allocation3 + $0xd4] sm:$0xf0]  ;;  %v1081_v28 = vld [vmem:[#allocation3 + $0x54] sm:$0xf]  ;;  %v984_v29 = vor.u32 %v1082_v24, %v983_v23 }
  0x3b   : > { %652 = vmatpush.bf16.msra.mxu0 %v992_v16  ;;  %v985_v30 = vld [vmem:[#allocation3 + $0x58] sm:$0xf0]  ;;  %v1097_v31 = vld [vmem:[#allocation3 + $0xd4] sm:$0xf]  ;;  %v1048_v33 = vor.u32 %v1098_v27, %v1047_v26  ;;  %v975_v35 = vld [vmem:[#allocation3 + $0x40] sm:$0xf] }
  0x3c   : > { %v1049_v32 = vld [vmem:[#allocation3 + $0xd8] sm:$0xf0]  ;;  %665 = vmatpush.bf16.msra.mxu1 %v1056_v17  ;;  %678 = vmatpush.bf16.msra.mxu2 %v996_v21  ;;  %v988_v34 = vor.u32 %v1081_v28, %v985_v30  ;;  %v1080_v36 = vld [vmem:[#allocation3 + $0x44] sm:$0xf0]  ;;  %v1039_v37 = vld [vmem:[#allocation3 + $0xc0] sm:$0xf] }
  0x3d   : > { %691 = vmatpush.bf16.msra.mxu3 %v1060_v25  ;;  %v1052_v38 = vor.u32 %v1097_v31, %v1049_v32  ;;  %v1096_v39 = vld [vmem:[#allocation3 + $0xc4] sm:$0xf0]  ;;  %v1079_v40 = vld [vmem:[#allocation3 + $0x44] sm:$0xf]  ;;  %v977_v41 = vld [vmem:[#allocation3 + $0x48] sm:$0xf0]  ;;  %v976_v44 = vor.u32 %v1080_v36, %v975_v35 }
  0x3e   : > { %v1095_v42 = vld [vmem:[#allocation3 + $0xc4] sm:$0xf]  ;;  %v1041_v43 = vld [vmem:[#allocation3 + $0xc8] sm:$0xf0]  ;;  %s1627_s22 = smov (!%p402_p1, %s1350_s22), 1  ;;  %s1629_s27 = smov (!%p1527_p3, %s400_s27), 2  ;;  %v1040_v45 = vor.u32 %v1096_v39, %v1039_v37  ;;  %v980_v46 = vor.u32 %v1079_v40, %v977_v41 }
  0x3f   : > { %653 = vmatpush.bf16.msra.mxu0 %v984_v29  ;;  %v967_v47 = vld [vmem:[#allocation3 + $0x30] sm:$0xf]  ;;  %v1078_v48 = vld [vmem:[#allocation3 + $0x34] sm:$0xf0]  ;;  %v1044_v50 = vor.u32 %v1095_v42, %v1041_v43  ;;  %v1077_v52 = vld [vmem:[#allocation3 + $0x34] sm:$0xf] }
  0x40   : > { %666 = vmatpush.bf16.msra.mxu1 %v1048_v33  ;;  %679 = vmatpush.bf16.msra.mxu2 %v988_v34  ;;  %v1031_v49 = vld [vmem:[#allocation3 + $0xb0] sm:$0xf]  ;;  %v1094_v51 = vld [vmem:[#allocation3 + $0xb4] sm:$0xf0]  ;;  %v969_v53 = vld [vmem:[#allocation3 + $0x38] sm:$0xf0]  ;;  %v968_v56 = vor.u32 %v1078_v48, %v967_v47 }
  0x41   : > { %692 = vmatpush.bf16.msra.mxu3 %v1052_v38  ;;  %v1093_v54 = vld [vmem:[#allocation3 + $0xb4] sm:$0xf]  ;;  %v1033_v55 = vld [vmem:[#allocation3 + $0xb8] sm:$0xf0]  ;;  %s1103_s17 = smul.u32 6, %s1627_s22  ;;  %s935_s28 = sshll.u32 %s1629_s27, 1  ;;  %v1032_v57 = vor.u32 %v1094_v51, %v1031_v49  ;;  %v972_v58 = vor.u32 %v1077_v52, %v969_v53 }
  0x42   : > { %v959_v59 = vld [vmem:[#allocation3 + $0x20] sm:$0xf]  ;;  %v1076_v60 = vld [vmem:[#allocation3 + $0x24] sm:$0xf0]  ;;  %v1036_v62 = vor.u32 %v1093_v54, %v1033_v55  ;;  %v1075_v0 = vld [vmem:[#allocation3 + $0x24] sm:$0xf] }
  0x43   : > { %654 = vmatpush.bf16.msra.mxu0 %v976_v44  ;;  %v1023_v61 = vld [vmem:[#allocation3 + $0xa0] sm:$0xf]  ;;  %v1092_v63 = vld [vmem:[#allocation3 + $0xa4] sm:$0xf0]  ;;  %v961_v1 = vld [vmem:[#allocation3 + $0x28] sm:$0xf0]  ;;  %s411_s30 = sadd.s32 %s1103_s17, %s935_s28  ;;  %v960_v4 = vor.u32 %v1076_v60, %v959_v59 }
  0x44   : > { %667 = vmatpush.bf16.msra.mxu1 %v1040_v45  ;;  %680 = vmatpush.bf16.msra.mxu2 %v980_v46  ;;  %v1091_v2 = vld [vmem:[#allocation3 + $0xa4] sm:$0xf]  ;;  %v1025_v3 = vld [vmem:[#allocation3 + $0xa8] sm:$0xf0]  ;;  %v951_v5 = vld [vmem:[#allocation3 + $0x10] sm:$0xf]  ;;  %v1024_v6 = vor.u32 %v1092_v63, %v1023_v61  ;;  %v964_v7 = vor.u32 %v1075_v0, %v961_v1 }
  0x45   : > { %693 = vmatpush.bf16.msra.mxu3 %v1044_v50  ;;  %v1074_v8 = vld [vmem:[#allocation3 + $0x14] sm:$0xf0]  ;;  %v1015_v9 = vld [vmem:[#allocation3 + $0x90] sm:$0xf]  ;;  %v1028_v11 = vor.u32 %v1091_v2, %v1025_v3  ;;  %v1073_v12 = vld [vmem:[#allocation3 + $0x14] sm:$0xf] }
  0x46   : > { %v1090_v10 = vld [vmem:[#allocation3 + $0x94] sm:$0xf0]  ;;  %v953_v13 = vld [vmem:[#allocation3 + $0x18] sm:$0xf0]  ;;  %s936_s7 = sshll.u32 %s411_s30, 2  ;;  %v952_v16 = vor.u32 %v1074_v8, %v951_v5  ;;  %s937_s11 = sshll.u32 %s1627_s22, 1 }
  0x47   : > { %655 = vmatpush.bf16.msra.mxu0 %v968_v56  ;;  %v1089_v14 = vld [vmem:[#allocation3 + $0x94] sm:$0xf]  ;;  %v1017_v15 = vld [vmem:[#allocation3 + $0x98] sm:$0xf0]  ;;  %s413_s10 = scalar_lea.vmem %s1585_s0, %s936_s7  ;;  %v1016_v18 = vor.u32 %v1090_v10, %v1015_v9  ;;  %v956_v19 = vor.u32 %v1073_v12, %v953_v13  ;;  %v943_v20 = vld [vmem:[#allocation3] sm:$0xf] }
  0x48   : > { %668 = vmatpush.bf16.msra.mxu1 %v1032_v57  ;;  %681 = vmatpush.bf16.msra.mxu2 %v972_v58  ;;  %v451_v17 = vld [vmem:[%s413_s10] sm:$0xff]  ;;  %v1072_v21 = vld [vmem:[#allocation3 + $0x4] sm:$0xf0]  ;;  %v1020_v23 = vor.u32 %v1089_v14, %v1017_v15  ;;  %v945_v26 = vld [vmem:[#allocation3 + $0x8] sm:$0xf0]  ;;  %s1631_s21 = smov (!%p432_p4, %s1346_s21), 1 }
  0x49   : > { %694 = vmatpush.bf16.msra.mxu3 %v1036_v62  ;;  %v1007_v22 = vld [vmem:[#allocation3 + $0x80] sm:$0xf]  ;;  %v1088_v24 = vld [vmem:[#allocation3 + $0x84] sm:$0xf0]  ;;  %v1071_v25 = vld [vmem:[#allocation3 + $0x4] sm:$0xf]  ;;  %v485_v29 = vunpack.c.l.b16 %v451_v17  ;;  %v944_v30 = vor.u32 %v1072_v21, %v943_v20  ;;  %v486_v31 = vunpack.c.h.b16 %v451_v17 }
  0x4a   : > { %v1087_v27 = vld [vmem:[#allocation3 + $0x84] sm:$0xf]  ;;  %v1009_v28 = vld [vmem:[#allocation3 + $0x88] sm:$0xf0]  ;;  %v1008_v32 = vor.u32 %v1088_v24, %v1007_v22  ;;  %v948_v33 = vor.u32 %v1071_v25, %v945_v26  ;;  %s1608_s14 = sld [smem:[#allocation15_spill]]  ;;  %s938_s29 = sshll.u32 %s1631_s21, 1 }
  0x4b   : > { %656 = vmatpush.bf16.msra.mxu0 %v960_v4  ;;  %v1012_v34 = vor.u32 %v1087_v27, %v1009_v28  ;;  %v487_v35 = vpack.c.b16 %v485_v29, %v485_v29  ;;  %v488_v36 = vpack.c.b16 %v486_v31, %v486_v31  ;;  %v715_v37 = vld [vmem:[#allocation5] sm:$0x3]  ;;  %s939_s2 = sshll.u32 %s1627_s22, 2  ;;  %v710_v45 = vld [vmem:[%s342_s6] sm:$0xff]  ;;  %s1609_s16 = sld [smem:[#allocation16_spill]] }
  0x4c   : > { %669 = vmatpush.bf16.msra.mxu1 %v1024_v6  ;;  %682 = vmatpush.bf16.msra.mxu2 %v964_v7  ;;  %v717_v40 = vperm.slane %v715_v37, 0  ;;  %s439_s1 = sadd.s32 %s939_s2, %s938_s29  ;;  %v718_v48 = vperm.slane %v715_v37, 1  ;;  %v711_v56 = vld [vmem:[%s342_s6 + $0x8] sm:$0xff] }
  0x4d   : > { %695 = vmatpush.bf16.msra.mxu3 %v1028_v11  ;;  %s940_s4 = sshll.u32 %s439_s1, 3 }
  0x4f   : > { %657 = vmatpush.bf16.msra.mxu0 %v952_v16 }
  0x50   : > { %670 = vmatpush.bf16.msra.mxu1 %v1016_v18  ;;  %683 = vmatpush.bf16.msra.mxu2 %v956_v19  ;;  %s427_s15 = scalar_lea.vmem %s1608_s14, %s937_s11 }
  0x51   : > { %696 = vmatpush.bf16.msra.mxu3 %v1020_v23  ;;  %v712_v38 = vld [vmem:[%s427_s15] sm:$0x3]  ;;  %s441_s17 = scalar_lea.vmem %s1609_s16, %s940_s4 }
  0x52   : > { %v724_v43 = vperm.slane %v712_v38, 0  ;;  %v725_v53 = vperm.slane %v712_v38, 1 }
  0x53   : > { %658 = vmatpush.bf16.msra.mxu0 %v944_v30 }
  0x54   : > { %671 = vmatpush.bf16.msra.mxu1 %v1008_v32  ;;  %684 = vmatpush.bf16.msra.mxu2 %v948_v33 }
  0x55   : > { %697 = vmatpush.bf16.msra.mxu3 %v1012_v34 }
  0x56   : > { %659 = vmatmul.bf16.vlgmr.msra.gmra.mxu0 %v487_v35 }
  0x57   : > { %672 = vmatmul.bf16.vlgmr.msra.gmra.mxu1 %v488_v36  ;;  %685 = vmatmul.bf16.vlgmr.msra.gmra.mxu2 %v487_v35 }
  0x58   : > { %698 = vmatmul.bf16.vlgmr.msra.gmra.mxu3 %v488_v36 }
  0xd3   : > { %v660_v39 = vpop.f32.mrf.mxu0 }
  0xd4   : > { %v673_v41 = vpop.f32.mrf.mxu1 }
  0xd5   : > { %v674_v42 = vadd.f32 %v673_v41, %v660_v39 }
  0xd7   : > { %v721_v44 = vadd.f32 %v717_v40, %v674_v42 }
  0xd9   : > { %v728_v46 = vmul.f32 %v724_v43, %v721_v44 }
  0xda   : > { %v686_v47 = vpop.f32.mrf.mxu2 }
  0xdb   : > { %v730_v49 = vadd.f32 %v728_v46, %v710_v45  ;;  %v699_v50 = vpop.f32.mrf.mxu3  ;;  %v662_v51 = vpop.f32.mrf.mxu0 }
  0xdc   : > { %v700_v52 = vadd.f32 %v699_v50, %v686_v47  ;;  %v675_v54 = vpop.f32.mrf.mxu1 }
  0xdd   : > { %732 = vst [vmem:[%s441_s17] sm:$0xff] %v730_v49 }
  0xde   : > { %v722_v55 = vadd.f32 %v718_v48, %v700_v52 }
  0xe0   : > { %v729_v57 = vmul.f32 %v725_v53, %v722_v55 }
  0xe2   : > { %v731_v58 = vadd.f32 %v729_v57, %v711_v56  ;;  %v688_v59 = vpop.f32.mrf.mxu2 }
  0xe3   : > { %v701_v60 = vpop.f32.mrf.mxu3 }
  0xe4   : > { %733 = vst [vmem:[%s441_s17 + $0x8] sm:$0xff] %v731_v58 }
  0xe5 PF: > { %s17_s25 = sadd.s32 1, %s1362_s25   ;;  %s1610_s21 = smov %s1494_s18 }
  0xe6   : > { %p14_p5 = scmp.ge.s32.totalorder %s17_s25, 6   ;;  %s1611_s28 = sld [smem:[#allocation11_spill]] }
  0xe7   : > { %s1612_s30 = sld [smem:[#allocation12_spill]]  ;;  %s1613_s18 = smov %s1338_s19 }
  0xe8   : > { %s1614_s19 = smov %s1342_s20  ;;  %s1615_s20 = smov %s1610_s21 }
  0xe9   : > { %s1616_s21 = smov %s1354_s23  ;;  %s1617_s22 = smov %s1358_s24 }
  0xea   :  { %16 = sbr.rel (!%p14_p5) target bundleno = 10 (0xa), region = 103 }
  0xec   : > { %s1618_s23 = smov %s1611_s28 }
  0xed   : > { %s1619_s24 = smov %s1612_s30 }
  0xef   :  { %772 = vsyncpa [#allocation4], 1 }
  0xf0   :  { %774 = vsyncpa [#allocation4 + $0x1], 1 }
  0xf1   :  { %775 = vsyncpa [#allocation6], 1 }

// kernel: gated_flux_transformer_block.15
= control target key start
LH: loop header
LB: loop body
LE: loop exit
PB: predicated region body
PF: predicated region fallthrough
CT: control target
= control target key end

     0   :  { %s3736_s0 = inlined_call_operand.vmem [shape: f32[2,8,256], index: 0, kind: input, shape index: {}]   ;;  %s3737_s1 = inlined_call_operand.vmem [shape: f32[2,1,256], index: 1, kind: input, shape index: {}]   ;;  %s3738_s2 = inlined_call_operand.vmem [shape: f32[2,1,256], index: 2, kind: input, shape index: {}]   ;;  %s3739_s3 = inlined_call_operand.hbm [shape: bf16[256,1024], index: 3, kind: input, shape index: {}]   ;;  %s3740_s4 = inlined_call_operand.hbm [shape: f32[1,1024], index: 4, kind: input, shape index: {}]   ;;  %s3741_s5 = inlined_call_operand.hbm [shape: f32[1,1024], index: 5, kind: input, shape index: {}]   ;;  %s3742_s6 = inlined_call_operand.hbm [shape: bf16[1024,256], index: 6, kind: input, shape index: {}]   ;;  %s3743_s7 = inlined_call_operand.hbm [shape: f32[1,256], index: 7, kind: input, shape index: {}]   ;;  %s3744_s8 = inlined_call_operand.vmem [shape: f32[2,1,256], index: 8, kind: input, shape index: {}]   ;;  %s3745_s9 = inlined_call_operand.hbm [shape: f32[2,8,256], index: 9, kind: output, shape index: {}]  }
   0x1   :  { %3759 = sst [smem:[#allocation30_spill]] %s3736_s0 }
   0x2   :  { %3760 = sst [smem:[#allocation31_spill]] %s3737_s1 }
   0x3   :  { %3761 = sst [smem:[#allocation32_spill]] %s3738_s2 }
   0x4   :  { %3762 = sst [smem:[#allocation33_spill]] %s3739_s3 }
   0x5   :  { %3763 = sst [smem:[#allocation34_spill]] %s3740_s4 }
   0x6   :  { %3764 = sst [smem:[#allocation35_spill]] %s3743_s7 }
   0x7   :  { %3765 = sst [smem:[#allocation36_spill]] %s3744_s8 }
   0x8   :  { %3766 = sst [smem:[#allocation37_spill]] %s3745_s9 }
   0x9   :  { %14 = vsyncpa [#allocation4], 0 }
   0xa   :  { %16 = vsyncpa [#allocation4 + $0x1], 0 }
   0xb   :  { %17 = vsyncpa [#allocation7], 0 }
   0xc   :  { %19 = vsyncpa [#allocation7 + $0x1], 0 }
   0xd   :  { %20 = vsyncpa [#allocation10], 0 }
   0xe   :  { %22 = vsyncpa [#allocation10 + $0x1], 0 }
   0xf   :  { %23 = vsyncpa [#allocation5], 0 }
  0x10   :  { %25 = vsyncpa [#allocation5 + $0x1], 0  ;;  %s3135_s30 = smov 0   ;;  %s3137_s10 = smov 0  }
  0x11   :  { %s3139_s11 = smov 0   ;;  %s3141_s12 = smov 0  }
  0x12   :  { %s3143_s13 = smov 0   ;;  %s3145_s14 = smov 0  }
  0x13   :  { %s3147_s15 = smov 0   ;;  %s3149_s16 = smov 0  }
  0x14   :  { %s3151_s17 = smov 0   ;;  %s3153_s18 = smov 0  }
  0x15   :  { %s3155_s19 = smov 0  }
  0x16 LB: > { %3767 = sst [smem:[#allocation18_spill]] %s3035_s30  ;;  %s3189_s20 = sadd.s32 4294967295, %s3075_s19   ;;  %s3075_s19 = sphi %s3155_s19, %s31_s19   ;;  %s3071_s18 = sphi %s3153_s18, %s3812_s18   ;;  %s3067_s17 = sphi %s3151_s17, %s3819_s17   ;;  %s3063_s16 = sphi %s3149_s16, %s3810_s16   ;;  %s3059_s15 = sphi %s3147_s15, %s3818_s15   ;;  %s3055_s14 = sphi %s3145_s14, %s3817_s14   ;;  %s3051_s13 = sphi %s3143_s13, %s3816_s13   ;;  %s3047_s12 = sphi %s3141_s12, %s3815_s12   ;;  %s3043_s11 = sphi %s3139_s11, %s3807_s11   ;;  %s3039_s10 = sphi %s3137_s10, %s3814_s10   ;;  %s3035_s30 = sphi %s3135_s30, %s3813_s30  }
  0x17   : > { %3768 = sst [smem:[#allocation19_spill]] %s3043_s11  ;;  %s1965_s21 = sadd.s32 4294967294, %s3075_s19  }
  0x18   : > { %3769 = sst [smem:[#allocation20_spill]] %s3055_s14  ;;  %p150_p0 = scmp.ne.s32.totalorder %s3051_s13, %s3047_s12 }
  0x19   : > { %3770 = sst [smem:[#allocation21_spill]] %s3059_s15  ;;  %p151_p1 = scmp.eq.s32.totalorder %s3189_s20, 0 }
  0x1a   : > { %3771 = sst [smem:[#allocation22_spill]] %s3063_s16  ;;  %p300_p2 = scmp.ne.s32.totalorder %s3043_s11, %s3039_s10 }
  0x1b   : > { %3772 = sst [smem:[#allocation23_spill]] %s3071_s18  ;;  %p3199_p3 = por %p151_p1, %p150_p0 }
  0x1c   : > { %p301_p4 = scmp.eq.s32.totalorder %s3189_s20, 3  ;;  %p306_p5 = scmp.ne.s32.totalorder %s3039_s10, %s3035_s30 }
  0x1d   : > { %p307_p6 = scmp.eq.s32.totalorder %s1965_s21, 3  ;;  %p1966_p8 = scmp.ge.s32.totalorder %s3075_s19, 1 }
  0x1e   : > { %p3206_p7 = por %p301_p4, %p300_p2  ;;  %p314_p10 = scmp.lt.s32.totalorder %s3075_s19, 5 }
  0x1f   : > { %p3211_p9 = por %p307_p6, %p306_p5  ;;  %s3778_s7 = sld [smem:[#allocation35_spill]] }
  0x20   : > { %s3774_s24 = scalar_select %p3206_p7, 1, 0 }
  0x21   : > { %s3776_s25 = scalar_select %p3211_p9, 1, 0 }
  0x22   : > { %3775 = sst [smem:[#allocation24_spill]] %s3774_s24  ;;  %p3219_p11 = pnand %p1966_p8, %p314_p10 }
  0x23   : > { %3777 = sst [smem:[#allocation25_spill]] %s3776_s25  ;;  %s3077_s12 = smov [#allocation11]  }
  0x24   : > { %p2658_p12 = pneg %p3219_p11  ;;  %s328_s21 = sshll.u32 %s3077_s12, 4  ;;  %s329_s21 = int_to_ptr.vmem [resolvable:$true] %s328_s21 }
  0x25   : > { %s326_s28 = sshll.u32 %s3778_s7, 4  ;;  %s43_s26 = sadd.s32 1, %s3067_s17  ;;  %s327_s28 = int_to_ptr.hbm [resolvable:$true] %s326_s28 }
  0x26   : > { %p2659_p13 = pnand %p2658_p12, %p151_p1  ;;  %p44_p0 = scmp.ge.s32.totalorder %s43_s26, 2 }
  0x27   : > { %s50_s27 = sadd.s32 1, %s3071_s18  ;;  %s137_s22 = sadd.s32 1, %s3055_s14 }
  0x28   : > { %2661 = dma.hbm_to_vmem [thread:$0]  (!%p2659_p13), %s327_s28, 32, %s329_s21, [#allocation10]  }
  0x29   : > { %p144_p2 = scmp.ne.s32.totalorder %s3055_s14, %s3051_s13  ;;  %s3821_s26 = smov (%p44_p0, %s43_s26), 0 }
  0x2a   : > { %3780 = sst [smem:[#allocation26_spill]] %s3821_s26  ;;  %s3823_s27 = smov (!%p44_p0, %s50_s27), %s3071_s18 }
  0x2b   : > { %s134_s12 = ssub.s32 %s3067_s17, %s3821_s26  ;;  %p145_p4 = scmp.eq.s32.totalorder %s3075_s19, 0 }
  0x2c   : > { %p52_p5 = scmp.ge.s32.totalorder %s3823_s27, 2  ;;  %p135_p6 = scmp.eq.s32.totalorder %s134_s12, 0 }
  0x2d   : > { %p146_p8 = por %p145_p4, %p144_p2  ;;  %p2680_p10 = scmp.lt.s32.totalorder %s3075_s19, 4 }
  0x2e   : > { %s3825_s27 = smov (%p52_p5, %s3823_s27), 0  ;;  %s3247_s7 = sand.u32 1, %s3055_s14  }
  0x2f   : > { %3781 = sst [smem:[#allocation27_spill]] %s3825_s27  ;;  %s285_s21 = ssub.s32 %s3071_s18, %s3825_s27 }
  0x30   : > { %s3242_s28 = scalar_select %p135_p6, %s3055_s14, %s137_s22  }
  0x31   : > { %p288_p12 = scmp.eq.s32.totalorder %s285_s21, 0  ;;  %s1969_s26 = sshll.u32 %s3247_s7, 9 }
  0x32   : > { %3782 = sst [smem:[#allocation28_spill]] %s3242_s28  ;;  %p3250_p13 = pnand %p2680_p10, %p146_p8 }
  0x33   : > { %s3784_s12 = sadd.s32 1, %s3043_s11  ;;  %s369_s9 = scalar_lea.vmem [#allocation3], %s1969_s26 }
  0x34   : > { %s3257_s30 = scalar_select %p288_p12, %s3043_s11, %s3784_s12  }
  0x35   : > { %s377_s24 = sshll.u32 %s369_s9, 4  ;;  %s3756_s22 = sand.u32 1, %s3075_s19   ;;  %s378_s24 = int_to_ptr.vmem [resolvable:$true] %s377_s24 }
  0x36   : > { %3785 = sst [smem:[#allocation29_spill]] %s3257_s30  ;;  %s1972_s27 = sshll.u32 %s3247_s7, 2 }
  0x37   : > { %s1973_s18 = sshll.u32 %s3067_s17, 2  ;;  %s3786_s4 = sld [smem:[#allocation34_spill]] }
  0x38   : > { %s391_s8 = scalar_lea.vmem [#allocation6], %s1972_s27  ;;  %s388_s12 = scalar_lea.sflag [#allocation7], %s3756_s22 }
  0x39   : > { %s399_s2 = sshll.u32 %s391_s8, 4  ;;  %s414_s11 = scalar_lea.hbm %s3741_s5, %s1973_s18  ;;  %s400_s2 = int_to_ptr.vmem [resolvable:$true] %s399_s2 }
  0x3a   : > { %s429_s1 = scalar_lea.vmem [#allocation9], %s1969_s26  ;;  %s2511_s14 = sshll.u32 %s3067_s17, 4 }
  0x3b   : > { %s438_s0 = sshll.u32 %s429_s1, 4  ;;  %s3787_s3 = sld [smem:[#allocation33_spill]]  ;;  %s439_s0 = int_to_ptr.vmem [resolvable:$true] %s438_s0 }
  0x3c   : > { %s416_s22 = sshll.u32 %s414_s11, 4  ;;  %s366_s16 = scalar_lea.sflag [#allocation4], %s3247_s7  ;;  %s417_s22 = int_to_ptr.hbm [resolvable:$true] %s416_s22 }
  0x3d   : > { %s395_s21 = scalar_lea.hbm %s3786_s4, %s1973_s18  ;;  %s3080_s30 = smov 16  }
  0x3e   : > { %s397_s15 = sshll.u32 %s395_s21, 4  ;;  %s410_s1 = scalar_lea.vmem [#allocation8], %s1972_s27  ;;  %s398_s15 = int_to_ptr.hbm [resolvable:$true] %s397_s15 }
  0x3f   : > { %2668 = dma.hbm_to_vmem [thread:$0]  (!%p3250_p13), %s398_s15, 64, %s400_s2, %s388_s12  }
  0x40   : > { %s3078_s2 = smov 512   ;;  %s3079_s15 = smov 256  }
  0x41   : > { %s374_s8 = scalar_lea.hbm %s3787_s3, %s2511_s14  ;;  %s418_s18 = sshll.u32 %s410_s1, 4  ;;  %s419_s18 = int_to_ptr.vmem [resolvable:$true] %s418_s18 }
  0x42   : > { %s375_s4 = sshll.u32 %s374_s8, 4  ;;  %s2513_s26 = sshll.u32 %s3067_s17, 9  ;;  %s376_s4 = int_to_ptr.hbm [resolvable:$true] %s375_s4 }
  0x43   : > { %2665 = dma.hbm_to_vmem [thread:$0]  (!%p3250_p13), %s376_s4, 8192, %s378_s24, %s366_s16, %s3078_s2, %s3079_s15, %s3080_s30  }
  0x44   : > { %2671 = dma.hbm_to_vmem [thread:$0]  (!%p3250_p13), %s417_s22, 64, %s419_s18, %s388_s12  }
  0x45   : > { %s435_s28 = scalar_lea.hbm %s3742_s6, %s2513_s26  ;;  %s3788_s7 = sand.u32 1, %s3075_s19  }
  0x46   : > { %s436_s21 = sshll.u32 %s435_s28, 4  ;;  %s426_s11 = scalar_lea.sflag [#allocation10], %s3788_s7  ;;  %s437_s21 = int_to_ptr.hbm [resolvable:$true] %s436_s21 }
  0x47   : > { %s3081_s8 = smov 128   ;;  %s3082_s3 = smov 8  }
  0x48   : > { %2674 = dma.hbm_to_vmem [thread:$0]  (!%p3250_p13), %s437_s21, 8192, %s439_s0, %s426_s11, %s3081_s8, %s3081_s8, %s3082_s3  }
  0x49   : > { %457 = sbr.rel (%p3219_p11) target bundleno = 750 (0x2ee), region = 56  ;;  %s459_s4 = sand.u32 (!%p3219_p11), 1, %s3051_s13  }
  0x4a   : > { %s1981_s16 = sshll.u32 (!%p3219_p11), %s459_s4, 9  ;;  %s460_s24 = scalar_lea.sflag (!%p3219_p11), [#allocation4], %s459_s4 }
  0x4b   : > { %s3292_s27 = scalar_lea.vmem (!%p3219_p11), [#allocation3], %s1981_s16 }
  0x4e   : > { %3014 = dma.done.wait (%p3199_p3), %s460_s24, 8192  }
  0x4f   : > { %3016 = vsyncadd (%p3199_p3), %s460_s24, 4294959104  ;;  %s469_s22 = sand.u32 1, %s3189_s20   ;;  %s1982_s25 = sshll.u32 %s459_s4, 2 }
  0x50   : > { %s470_s0 = scalar_lea.sflag [#allocation7], %s469_s22  ;;  %s3299_s3 = scalar_lea.vmem [#allocation6], %s1982_s25 }
  0x51   : > { %3018 = dma.done.wait (%p3199_p3), %s470_s0, 128  }
  0x52   : > { %3020 = vsyncadd (%p3199_p3), %s470_s0, 4294967168  ;;  %s3305_s29 = scalar_lea.vmem [#allocation8], %s1982_s25  ;;  %s490_s12 = scalar_lea.sflag [#allocation10], %s469_s22 }
  0x53   : > { %s3307_s2 = scalar_lea.vmem [#allocation9], %s1981_s16 }
  0x54   : > { %3022 = dma.done.wait (%p3199_p3), %s490_s12, 8192  }
  0x55   : > { %3024 = vsyncadd (%p3199_p3), %s490_s12, 4294959104 }
  0x56   : > { %3026 = dma.done.wait (%p151_p1), [#allocation10], 32  }
  0x57   : > { %3028 = vsyncadd (%p151_p1), [#allocation10], 4294967264  ;;  %s3789_s15 = sld [smem:[#allocation22_spill]]  ;;  %s3758_s30 = sand.u32 1, %s3039_s10  }
  0x58   : > { %s1986_s1 = sshll.u32 %s3758_s30, 4  ;;  %s3790_s14 = sld [smem:[#allocation30_spill]] }
  0x59   : > { %s3791_s7 = sld [smem:[#allocation31_spill]] }
  0x5a   : > { %s3792_s16 = sld [smem:[#allocation32_spill]] }
  0x5b   : > { %s3793_s0 = sld [smem:[#allocation36_spill]] }
  0x5c   : > { %s3794_s30 = sld [smem:[#allocation21_spill]] }
  0x5d   : > { %p570_p11 = scmp.lt.s32.totalorder %s3789_s15, 1 }
  0x5f   : > { %s3827_s15 = smov (!%p570_p11, %s3789_s15), 1 }
  0x60   : > { %s2514_s18 = sshll.u32 %s3827_s15, 4  ;;  %s3322_s26 = sshll.u32 %s3827_s15, 1 }
  0x61   : > { %s578_s20 = scalar_lea.vmem %s3790_s14, %s2514_s18  ;;  %s582_s11 = scalar_lea.vmem %s3791_s7, %s3322_s26 }
  0x62   : > { %s586_s24 = scalar_lea.vmem %s3792_s16, %s3322_s26  ;;  %s594_s12 = scalar_lea.vmem %s3793_s0, %s3322_s26 }
  0x63   : > { %s3339_s15 = scalar_lea.vmem [#allocation12], %s1986_s1  ;;  %p1992_p1 = scmp.ne.s32.totalorder %s3794_s30, 0 }
  0x65   : > { %598 = sbr.rel (%p1992_p1) target bundleno = 109 (0x6d), region = 80 }
  0x6a   : > { %v3083_v0 = vmov 0.0  }
  0x6b   : > { %599 = vst [vmem:[#allocation2] sm:$0xff] %v3083_v0 }
  0x6c   : > { %600 = vst [vmem:[#allocation2 + $0x8] sm:$0xff] %v3083_v0 }
  0x6d PF: > { %v3342_v1 = vld [vmem:[%s578_s20] sm:$0xff]  ;;  %v3344_v2 = vld [vmem:[%s578_s20 + $0x8] sm:$0xff]  ;;  %v3084_v4 = vmov 256.0   ;;  %v2107_v8 = vld [vmem:[%s3292_s27 + $0xe0] sm:$0xf] }
  0x6e   : > { %v603_v3 = vadd.f32 %v3344_v2, %v3342_v1  ;;  %2779 = vrcp.f32 %v3084_v4  ;;  %v2545_v9 = vld [vmem:[%s3292_s27 + $0xec] sm:$0xf0]  ;;  %v2235_v10 = vld [vmem:[%s3292_s27 + $0x1e0] sm:$0xf]  ;;  %v2543_v13 = vld [vmem:[%s3292_s27 + $0xe4] sm:$0xf] }
  0x6f   : > { %v2108_v11 = vor.u32 %v2545_v9, %v2107_v8  ;;  %v2577_v12 = vld [vmem:[%s3292_s27 + $0x1ec] sm:$0xf0]  ;;  %v2109_v14 = vld [vmem:[%s3292_s27 + $0xf0] sm:$0xf0]  ;;  %v2575_v17 = vld [vmem:[%s3292_s27 + $0x1e4] sm:$0xf] }
  0x70   : > { %604 = vadd.xlane.f32.xlu0 %v603_v3  ;;  %v2236_v15 = vor.u32 %v2577_v12, %v2235_v10  ;;  %v2112_v16 = vor.u32 %v2543_v13, %v2109_v14  ;;  %v2237_v18 = vld [vmem:[%s3292_s27 + $0x1f0] sm:$0xf0]  ;;  %v2091_v19 = vld [vmem:[%s3292_s27 + $0xc0] sm:$0xf]  ;;  %v2541_v21 = vld [vmem:[%s3292_s27 + $0xcc] sm:$0xf0] }
  0x71   : > { %1048 = vmatpush.bf16.msra.mxu0 %v2108_v11  ;;  %v2240_v20 = vor.u32 %v2575_v17, %v2237_v18  ;;  %v2219_v22 = vld [vmem:[%s3292_s27 + $0x1c0] sm:$0xf]  ;;  %v2573_v23 = vld [vmem:[%s3292_s27 + $0x1cc] sm:$0xf0]  ;;  %v2092_v24 = vor.u32 %v2541_v21, %v2091_v19  ;;  %v2539_v26 = vld [vmem:[%s3292_s27 + $0xc4] sm:$0xf] }
  0x72   : > { %1061 = vmatpush.bf16.msra.mxu1 %v2236_v15  ;;  %1074 = vmatpush.bf16.msra.mxu2 %v2112_v16  ;;  %v2220_v25 = vor.u32 %v2573_v23, %v2219_v22  ;;  %v2093_v27 = vld [vmem:[%s3292_s27 + $0xd0] sm:$0xf0]  ;;  %v2571_v28 = vld [vmem:[%s3292_s27 + $0x1c4] sm:$0xf]  ;;  %v2075_v31 = vld [vmem:[%s3292_s27 + $0xa0] sm:$0xf] }
  0x73   : > { %1087 = vmatpush.bf16.msra.mxu3 %v2240_v20  ;;  %v2096_v29 = vor.u32 %v2539_v26, %v2093_v27  ;;  %v2221_v30 = vld [vmem:[%s3292_s27 + $0x1d0] sm:$0xf0]  ;;  %v2537_v32 = vld [vmem:[%s3292_s27 + $0xac] sm:$0xf0]  ;;  %v2203_v34 = vld [vmem:[%s3292_s27 + $0x1a0] sm:$0xf] }
  0x74   : > { %v3348_v5 = vpop.eup %2779  ;;  %v2224_v33 = vor.u32 %v2571_v28, %v2221_v30  ;;  %v2569_v35 = vld [vmem:[%s3292_s27 + $0x1ac] sm:$0xf0]  ;;  %v2535_v36 = vld [vmem:[%s3292_s27 + $0xa4] sm:$0xf]  ;;  %v2076_v37 = vor.u32 %v2537_v32, %v2075_v31  ;;  %v2077_v38 = vld [vmem:[%s3292_s27 + $0xb0] sm:$0xf0] }
  0x75   : > { %v607_v6 = vmul.f32 256.0, %v3348_v5  ;;  %1049 = vmatpush.bf16.msra.mxu0 %v2092_v24  ;;  %v2567_v39 = vld [vmem:[%s3292_s27 + $0x1a4] sm:$0xf]  ;;  %v2205_v40 = vld [vmem:[%s3292_s27 + $0x1b0] sm:$0xf0]  ;;  %v2204_v41 = vor.u32 %v2569_v35, %v2203_v34  ;;  %v2080_v42 = vor.u32 %v2535_v36, %v2077_v38  ;;  %vm611_vm0 = vweird.f32 %v3348_v5 }
  0x76   : > { %1062 = vmatpush.bf16.msra.mxu1 %v2220_v25  ;;  %1075 = vmatpush.bf16.msra.mxu2 %v2096_v29  ;;  %v2059_v43 = vld [vmem:[%s3292_s27 + $0x80] sm:$0xf]  ;;  %v2533_v44 = vld [vmem:[%s3292_s27 + $0x8c] sm:$0xf0]  ;;  %v2208_v46 = vor.u32 %v2567_v39, %v2205_v40  ;;  %v2531_v48 = vld [vmem:[%s3292_s27 + $0x84] sm:$0xf] }
  0x77   : > { %v608_v7 = vsub.f32 1.0, %v607_v6  ;;  %v2187_v45 = vld [vmem:[%s3292_s27 + $0x180] sm:$0xf]  ;;  %1088 = vmatpush.bf16.msra.mxu3 %v2224_v33  ;;  %v2565_v47 = vld [vmem:[%s3292_s27 + $0x18c] sm:$0xf0]  ;;  %v2060_v52 = vor.u32 %v2533_v44, %v2059_v43 }
  0x78   : > { %v2061_v49 = vld [vmem:[%s3292_s27 + $0x90] sm:$0xf0]  ;;  %v2563_v50 = vld [vmem:[%s3292_s27 + $0x184] sm:$0xf]  ;;  %v2188_v53 = vor.u32 %v2565_v47, %v2187_v45  ;;  %v2043_v4 = vld [vmem:[%s3292_s27 + $0x60] sm:$0xf] }
  0x79   : > { %v2189_v51 = vld [vmem:[%s3292_s27 + $0x190] sm:$0xf0]  ;;  %1050 = vmatpush.bf16.msra.mxu0 %v2076_v37  ;;  %v2064_v54 = vor.u32 %v2531_v48, %v2061_v49  ;;  %v609_v55 = vmul.f32 %v3348_v5, %v608_v7  ;;  %v2171_v6 = vld [vmem:[%s3292_s27 + $0x160] sm:$0xf]  ;;  %v2561_v8 = vld [vmem:[%s3292_s27 + $0x16c] sm:$0xf0] }
  0x7a   : > { %1063 = vmatpush.bf16.msra.mxu1 %v2204_v41  ;;  %1076 = vmatpush.bf16.msra.mxu2 %v2080_v42  ;;  %v2192_v56 = vor.u32 %v2563_v50, %v2189_v51  ;;  %v2527_v9 = vld [vmem:[%s3292_s27 + $0x64] sm:$0xf]  ;;  %v2045_v10 = vld [vmem:[%s3292_s27 + $0x70] sm:$0xf0]  ;;  %v2172_v11 = vor.u32 %v2561_v8, %v2171_v6  ;;  %v2027_v16 = vld [vmem:[%s3292_s27 + $0x40] sm:$0xf] }
  0x7b   : > { %1089 = vmatpush.bf16.msra.mxu3 %v2208_v46  ;;  %v610_v57 = vadd.f32 %v3348_v5, %v609_v55  ;;  %v2048_v12 = vor.u32 %v2527_v9, %v2045_v10  ;;  %v2559_v13 = vld [vmem:[%s3292_s27 + $0x164] sm:$0xf]  ;;  %v2173_v14 = vld [vmem:[%s3292_s27 + $0x170] sm:$0xf0]  ;;  %v2525_v17 = vld [vmem:[%s3292_s27 + $0x4c] sm:$0xf0] }
  0x7c   : > { %v2176_v15 = vor.u32 %v2559_v13, %v2173_v14  ;;  %v2155_v18 = vld [vmem:[%s3292_s27 + $0x140] sm:$0xf]  ;;  %v2028_v19 = vor.u32 %v2525_v17, %v2027_v16  ;;  %v2557_v20 = vld [vmem:[%s3292_s27 + $0x14c] sm:$0xf0]  ;;  %v2523_v21 = vld [vmem:[%s3292_s27 + $0x44] sm:$0xf] }
  0x7d   : > { %1051 = vmatpush.bf16.msra.mxu0 %v2060_v52  ;;  %v3387_v58 = vsel %vm611_vm0, %v3348_v5, %v610_v57  ;;  %v2529_v5 = vld [vmem:[%s3292_s27 + $0x6c] sm:$0xf0]  ;;  %v2029_v22 = vld [vmem:[%s3292_s27 + $0x50] sm:$0xf0]  ;;  %v2156_v23 = vor.u32 %v2557_v20, %v2155_v18  ;;  %v2555_v25 = vld [vmem:[%s3292_s27 + $0x144] sm:$0xf] }
  0x7e   : > { %1064 = vmatpush.bf16.msra.mxu1 %v2188_v53  ;;  %1077 = vmatpush.bf16.msra.mxu2 %v2064_v54  ;;  %v2044_v7 = vor.u32 %v2529_v5, %v2043_v4  ;;  %v2032_v24 = vor.u32 %v2523_v21, %v2029_v22  ;;  %v2157_v26 = vld [vmem:[%s3292_s27 + $0x150] sm:$0xf0]  ;;  %v2011_v28 = vld [vmem:[%s3292_s27 + $0x20] sm:$0xf]  ;;  %v2521_v29 = vld [vmem:[%s3292_s27 + $0x2c] sm:$0xf0] }
  0x7f   : > { %1090 = vmatpush.bf16.msra.mxu3 %v2192_v56  ;;  %v2160_v27 = vor.u32 %v2555_v25, %v2157_v26  ;;  %v2139_v30 = vld [vmem:[%s3292_s27 + $0x120] sm:$0xf]  ;;  %v2012_v31 = vor.u32 %v2521_v29, %v2011_v28  ;;  %v2553_v32 = vld [vmem:[%s3292_s27 + $0x12c] sm:$0xf0]  ;;  %v2519_v33 = vld [vmem:[%s3292_s27 + $0x24] sm:$0xf] }
  0x80   : > { %v2013_v34 = vld [vmem:[%s3292_s27 + $0x30] sm:$0xf0]  ;;  %v2140_v35 = vor.u32 %v2553_v32, %v2139_v30  ;;  %v2551_v37 = vld [vmem:[%s3292_s27 + $0x124] sm:$0xf]  ;;  %v1995_v40 = vld [vmem:[%s3292_s27] sm:$0xf] }
  0x81   : > { %1052 = vmatpush.bf16.msra.mxu0 %v2044_v7  ;;  %v2016_v36 = vor.u32 %v2519_v33, %v2013_v34  ;;  %v2141_v38 = vld [vmem:[%s3292_s27 + $0x130] sm:$0xf0]  ;;  %v2517_v41 = vld [vmem:[%s3292_s27 + $0xc] sm:$0xf0]  ;;  %v2123_v42 = vld [vmem:[%s3292_s27 + $0x100] sm:$0xf] }
  0x82   : > { %1065 = vmatpush.bf16.msra.mxu1 %v2172_v11  ;;  %1078 = vmatpush.bf16.msra.mxu2 %v2048_v12  ;;  %v2144_v39 = vor.u32 %v2551_v37, %v2141_v38  ;;  %v1996_v43 = vor.u32 %v2517_v41, %v1995_v40  ;;  %v2549_v44 = vld [vmem:[%s3292_s27 + $0x10c] sm:$0xf0]  ;;  %v2515_v45 = vld [vmem:[%s3292_s27 + $0x4] sm:$0xf]  ;;  %v1997_v46 = vld [vmem:[%s3292_s27 + $0x10] sm:$0xf0] }
  0x83   : > { %1091 = vmatpush.bf16.msra.mxu3 %v2176_v15  ;;  %v2124_v47 = vor.u32 %v2549_v44, %v2123_v42  ;;  %v2000_v48 = vor.u32 %v2515_v45, %v1997_v46  ;;  %v2547_v49 = vld [vmem:[%s3292_s27 + $0x104] sm:$0xf]  ;;  %v2125_v50 = vld [vmem:[%s3292_s27 + $0x110] sm:$0xf0]  ;;  %v2115_v51 = vld [vmem:[%s3292_s27 + $0xe8] sm:$0xf] }
  0x84   : > { %v2128_v52 = vor.u32 %v2547_v49, %v2125_v50  ;;  %v2546_v53 = vld [vmem:[%s3292_s27 + $0xf4] sm:$0xf0]  ;;  %v2243_v54 = vld [vmem:[%s3292_s27 + $0x1e8] sm:$0xf]  ;;  %v2540_v10 = vld [vmem:[%s3292_s27 + $0xcc] sm:$0xf] }
  0x85   : > { %1053 = vmatpush.bf16.msra.mxu0 %v2028_v19  ;;  %v2578_v55 = vld [vmem:[%s3292_s27 + $0x1f4] sm:$0xf0]  ;;  %v2116_v56 = vor.u32 %v2546_v53, %v2115_v51  ;;  %v2099_v4 = vld [vmem:[%s3292_s27 + $0xc8] sm:$0xf]  ;;  %v2101_v12 = vld [vmem:[%s3292_s27 + $0xd8] sm:$0xf0] }
  0x86   : > { %1066 = vmatpush.bf16.msra.mxu1 %v2156_v23  ;;  %1079 = vmatpush.bf16.msra.mxu2 %v2032_v24  ;;  %v2244_v57 = vor.u32 %v2578_v55, %v2243_v54  ;;  %v2542_v5 = vld [vmem:[%s3292_s27 + $0xd4] sm:$0xf0]  ;;  %v2227_v8 = vld [vmem:[%s3292_s27 + $0x1c8] sm:$0xf]  ;;  %v2572_v13 = vld [vmem:[%s3292_s27 + $0x1cc] sm:$0xf]  ;;  %v2104_v15 = vor.u32 %v2540_v10, %v2101_v12 }
  0x87   : > { %1092 = vmatpush.bf16.msra.mxu3 %v2160_v27  ;;  %v2100_v7 = vor.u32 %v2542_v5, %v2099_v4  ;;  %v2574_v9 = vld [vmem:[%s3292_s27 + $0x1d4] sm:$0xf0]  ;;  %v2229_v14 = vld [vmem:[%s3292_s27 + $0x1d8] sm:$0xf0]  ;;  %v2083_v17 = vld [vmem:[%s3292_s27 + $0xa8] sm:$0xf] }
  0x88   : > { %v2228_v11 = vor.u32 %v2574_v9, %v2227_v8  ;;  %v2232_v16 = vor.u32 %v2572_v13, %v2229_v14  ;;  %v2538_v18 = vld [vmem:[%s3292_s27 + $0xb4] sm:$0xf0]  ;;  %v2211_v19 = vld [vmem:[%s3292_s27 + $0x1a8] sm:$0xf]  ;;  %v2536_v22 = vld [vmem:[%s3292_s27 + $0xac] sm:$0xf] }
  0x89   : > { %1054 = vmatpush.bf16.msra.mxu0 %v2012_v31  ;;  %v2084_v20 = vor.u32 %v2538_v18, %v2083_v17  ;;  %v2570_v21 = vld [vmem:[%s3292_s27 + $0x1b4] sm:$0xf0]  ;;  %v2085_v23 = vld [vmem:[%s3292_s27 + $0xb8] sm:$0xf0]  ;;  %v2568_v26 = vld [vmem:[%s3292_s27 + $0x1ac] sm:$0xf] }
  0x8a   : > { %1067 = vmatpush.bf16.msra.mxu1 %v2140_v35  ;;  %1080 = vmatpush.bf16.msra.mxu2 %v2016_v36  ;;  %v2212_v24 = vor.u32 %v2570_v21, %v2211_v19  ;;  %v2088_v25 = vor.u32 %v2536_v22, %v2085_v23  ;;  %v2213_v27 = vld [vmem:[%s3292_s27 + $0x1b8] sm:$0xf0]  ;;  %v2067_v28 = vld [vmem:[%s3292_s27 + $0x88] sm:$0xf]  ;;  %v2534_v30 = vld [vmem:[%s3292_s27 + $0x94] sm:$0xf0] }
  0x8b   : > { %1093 = vmatpush.bf16.msra.mxu3 %v2144_v39  ;;  %v2216_v29 = vor.u32 %v2568_v26, %v2213_v27  ;;  %v2195_v31 = vld [vmem:[%s3292_s27 + $0x188] sm:$0xf]  ;;  %v2566_v32 = vld [vmem:[%s3292_s27 + $0x194] sm:$0xf0]  ;;  %v2532_v33 = vld [vmem:[%s3292_s27 + $0x8c] sm:$0xf]  ;;  %v2068_v36 = vor.u32 %v2534_v30, %v2067_v28 }
  0x8c   : > { %v2069_v34 = vld [vmem:[%s3292_s27 + $0x98] sm:$0xf0]  ;;  %v2564_v35 = vld [vmem:[%s3292_s27 + $0x18c] sm:$0xf]  ;;  %v2196_v37 = vor.u32 %v2566_v32, %v2195_v31  ;;  %v2051_v41 = vld [vmem:[%s3292_s27 + $0x68] sm:$0xf] }
  0x8d   : > { %1055 = vmatpush.bf16.msra.mxu0 %v1996_v43  ;;  %v2197_v38 = vld [vmem:[%s3292_s27 + $0x198] sm:$0xf0]  ;;  %v2072_v39 = vor.u32 %v2532_v33, %v2069_v34  ;;  %v2530_v42 = vld [vmem:[%s3292_s27 + $0x74] sm:$0xf0]  ;;  %v2179_v43 = vld [vmem:[%s3292_s27 + $0x168] sm:$0xf] }
  0x8e   : > { %1068 = vmatpush.bf16.msra.mxu1 %v2124_v47  ;;  %1081 = vmatpush.bf16.msra.mxu2 %v2000_v48  ;;  %v2200_v40 = vor.u32 %v2564_v35, %v2197_v38  ;;  %v2052_v44 = vor.u32 %v2530_v42, %v2051_v41  ;;  %v2562_v45 = vld [vmem:[%s3292_s27 + $0x174] sm:$0xf0]  ;;  %v2528_v46 = vld [vmem:[%s3292_s27 + $0x6c] sm:$0xf]  ;;  %v2053_v47 = vld [vmem:[%s3292_s27 + $0x78] sm:$0xf0] }
  0x8f   : > { %1094 = vmatpush.bf16.msra.mxu3 %v2128_v52  ;;  %v2180_v49 = vor.u32 %v2562_v45, %v2179_v43  ;;  %v2056_v50 = vor.u32 %v2528_v46, %v2053_v47  ;;  %v2560_v51 = vld [vmem:[%s3292_s27 + $0x16c] sm:$0xf]  ;;  %v2181_v52 = vld [vmem:[%s3292_s27 + $0x178] sm:$0xf0]  ;;  %v2035_v53 = vld [vmem:[%s3292_s27 + $0x48] sm:$0xf] }
  0x90   : > { %v2184_v55 = vor.u32 %v2560_v51, %v2181_v52  ;;  %v2556_v4 = vld [vmem:[%s3292_s27 + $0x14c] sm:$0xf]  ;;  %v2522_v9 = vld [vmem:[%s3292_s27 + $0x34] sm:$0xf0]  ;;  %v2147_v10 = vld [vmem:[%s3292_s27 + $0x128] sm:$0xf] }
  0x91   : > { %1100 = vmatpush.bf16.msrb.mxu0 %v2116_v56  ;;  %v2526_v56 = vld [vmem:[%s3292_s27 + $0x54] sm:$0xf0]  ;;  %v2520_v12 = vld [vmem:[%s3292_s27 + $0x2c] sm:$0xf]  ;;  %v2021_v13 = vld [vmem:[%s3292_s27 + $0x38] sm:$0xf0] }
  0x92   : > { %1113 = vmatpush.bf16.msrb.mxu1 %v2244_v57  ;;  %v2163_v57 = vld [vmem:[%s3292_s27 + $0x148] sm:$0xf]  ;;  %v2552_v14 = vld [vmem:[%s3292_s27 + $0x12c] sm:$0xf]  ;;  %v2149_v17 = vld [vmem:[%s3292_s27 + $0x138] sm:$0xf0]  ;;  %v2024_v19 = vor.u32 %v2520_v12, %v2021_v13 }
  0x93   : > { %v2003_v18 = vld [vmem:[%s3292_s27 + $0x8] sm:$0xf]  ;;  %v2550_v22 = vld [vmem:[%s3292_s27 + $0x114] sm:$0xf0]  ;;  %v2152_v23 = vor.u32 %v2552_v14, %v2149_v17  ;;  %v2548_v26 = vld [vmem:[%s3292_s27 + $0x10c] sm:$0xf] }
  0x94   : > { %v2131_v21 = vld [vmem:[%s3292_s27 + $0x108] sm:$0xf]  ;;  %v2133_v27 = vld [vmem:[%s3292_s27 + $0x118] sm:$0xf0]  ;;  %v635_v35 = vld [vmem:[%s586_s24] sm:$0x3] }
  0x95   : > { %1101 = vmatpush.bf16.msrb.mxu0 %v2100_v7  ;;  %v2019_v7 = vld [vmem:[%s3292_s27 + $0x28] sm:$0xf]  ;;  %v2136_v33 = vor.u32 %v2548_v26, %v2133_v27  ;;  %v2371_v52 = vld [vmem:[%s3307_s2 + $0xf0] sm:$0xf]  ;;  %v2624_v26 = vld [vmem:[%s3307_s2 + $0x164] sm:$0xf0] }
  0x96   : > { %1114 = vmatpush.bf16.msrb.mxu1 %v2228_v11  ;;  %v2554_v11 = vld [vmem:[%s3292_s27 + $0x134] sm:$0xf0]  ;;  %v2594_v51 = vld [vmem:[%s3307_s2 + $0x74] sm:$0xf0]  ;;  %v2275_v13 = vld [vmem:[%s3307_s2 + $0x30] sm:$0xf] }
  0x97   : > { %v2586_v14 = vld [vmem:[%s3307_s2 + $0x34] sm:$0xf0] }
  0x98   : > { %v2626_v17 = vld [vmem:[%s3307_s2 + $0x174] sm:$0xf0] }
  0x99   : > { %1102 = vmatpush.bf16.msrb.mxu0 %v2084_v20  ;;  %v2518_v20 = vld [vmem:[%s3292_s27 + $0x14] sm:$0xf0] }
  0x9a   : > { %1115 = vmatpush.bf16.msrb.mxu1 %v2212_v24  ;;  %v2516_v24 = vld [vmem:[%s3292_s27 + $0xc] sm:$0xf]  ;;  %v2004_v28 = vor.u32 %v2518_v20, %v2003_v18  ;;  %v2604_v20 = vld [vmem:[%s3307_s2 + $0xc4] sm:$0xf0] }
  0x9d   : > { %1103 = vmatpush.bf16.msrb.mxu0 %v2068_v36 }
  0x9e   : > { %1116 = vmatpush.bf16.msrb.mxu1 %v2196_v37  ;;  %v636_v37 = vadd.f32 1.0, %v635_v35  ;;  %v2582_v35 = vld [vmem:[%s3307_s2 + $0x14] sm:$0xf0] }
  0xa0   : > { %v638_v41 = vperm.slane %v636_v37, 0  ;;  %v639_v42 = vperm.slane %v636_v37, 1 }
  0xa1   : > { %1104 = vmatpush.bf16.msrb.mxu0 %v2052_v44 }
  0xa2   : > { %1117 = vmatpush.bf16.msrb.mxu1 %v2180_v49 }
  0xe3   : > { %v605_v59 = vpop.xlane.xlu0 %604 }
  0xe4   : > { %v613_v60 = vmul.f32 %v3387_v58, %v605_v59  ;;  %v2544_v59 = vld [vmem:[%s3292_s27 + $0xec] sm:$0xf] }
  0xe6   : > { %v3391_v61 = vsub.f32 %v3342_v1, %v613_v60  ;;  %v3394_v62 = vsub.f32 %v3344_v2, %v613_v60  ;;  %v2117_v60 = vld [vmem:[%s3292_s27 + $0xf8] sm:$0xf0] }
  0xe8   : > { %v616_v63 = vmul.f32 %v3391_v61, %v3391_v61  ;;  %v617_v0 = vmul.f32 %v3394_v62, %v3394_v62 }
  0xea   : > { %v618_v3 = vadd.f32 %v617_v0, %v616_v63  ;;  %v2576_v63 = vld [vmem:[%s3292_s27 + $0x1ec] sm:$0xf]  ;;  %v2120_v0 = vor.u32 %v2544_v59, %v2117_v60  ;;  %v2558_v59 = vld [vmem:[%s3292_s27 + $0x154] sm:$0xf0]  ;;  %v2036_v60 = vor.u32 %v2526_v56, %v2035_v53  ;;  %v2610_v53 = vld [vmem:[%s3307_s2 + $0xf4] sm:$0xf0] }
  0xec   : > { %619 = vadd.xlane.f32.xlu0 %v618_v3  ;;  %v2245_v3 = vld [vmem:[%s3292_s27 + $0x1f8] sm:$0xf0]  ;;  %1126 = vmatpush.bf16.msrb.mxu2 %v2120_v0  ;;  %v2524_v0 = vld [vmem:[%s3292_s27 + $0x4c] sm:$0xf] }
  0xed   : > { %v2248_v6 = vor.u32 %v2576_v63, %v2245_v3  ;;  %v2164_v63 = vor.u32 %v2558_v59, %v2163_v57  ;;  %v2037_v3 = vld [vmem:[%s3292_s27 + $0x58] sm:$0xf0]  ;;  %1105 = vmatpush.bf16.msrb.mxu0 %v2036_v60  ;;  %v2299_v59 = vld [vmem:[%s3307_s2 + $0x60] sm:$0xf]  ;;  %v2592_v60 = vld [vmem:[%s3307_s2 + $0x64] sm:$0xf0] }
  0xef   : > { %1139 = vmatpush.bf16.msrb.mxu3 %v2248_v6  ;;  %v2165_v6 = vld [vmem:[%s3292_s27 + $0x158] sm:$0xf0]  ;;  %1118 = vmatpush.bf16.msrb.mxu1 %v2164_v63  ;;  %v2363_v63 = vld [vmem:[%s3307_s2 + $0xe0] sm:$0xf] }
  0xf0   : > { %1127 = vmatpush.bf16.msrb.mxu2 %v2104_v15  ;;  %v2168_v8 = vor.u32 %v2556_v4, %v2165_v6  ;;  %v2020_v15 = vor.u32 %v2522_v9, %v2019_v7  ;;  %v2283_v7 = vld [vmem:[%s3307_s2 + $0x40] sm:$0xf] }
  0xf2   : > { %1106 = vmatpush.bf16.msrb.mxu0 %v2020_v15  ;;  %v2435_v15 = vld [vmem:[%s3307_s2 + $0x170] sm:$0xf] }
  0xf3   : > { %1140 = vmatpush.bf16.msrb.mxu3 %v2232_v16  ;;  %v2148_v16 = vor.u32 %v2554_v11, %v2147_v10  ;;  %v2355_v10 = vld [vmem:[%s3307_s2 + $0xd0] sm:$0xf]  ;;  %v2606_v11 = vld [vmem:[%s3307_s2 + $0xd4] sm:$0xf0]  ;;  %v2436_v18 = vor.u32 %v2626_v17, %v2435_v15  ;;  %v2616_v15 = vld [vmem:[%s3307_s2 + $0x124] sm:$0xf0] }
  0xf4   : > { %1128 = vmatpush.bf16.msrb.mxu2 %v2088_v25  ;;  %v2005_v25 = vld [vmem:[%s3292_s27 + $0x18] sm:$0xf0]  ;;  %v2356_v12 = vor.u32 %v2606_v11, %v2355_v10  ;;  %v2609_v10 = vld [vmem:[%s3307_s2 + $0xf4] sm:$0xf]  ;;  %v2373_v11 = vld [vmem:[%s3307_s2 + $0xf8] sm:$0xf0] }
  0xf5   : > { %1119 = vmatpush.bf16.msrb.mxu1 %v2148_v16  ;;  %v2008_v31 = vor.u32 %v2516_v24, %v2005_v25  ;;  %v2276_v16 = vor.u32 %v2586_v14, %v2275_v13  ;;  %v2427_v24 = vld [vmem:[%s3307_s2 + $0x160] sm:$0xf]  ;;  %v2376_v13 = vor.u32 %v2609_v10, %v2373_v11  ;;  %v2589_v17 = vld [vmem:[%s3307_s2 + $0x54] sm:$0xf]  ;;  %v2501_v11 = vld [vmem:[%s3307_s2 + $0x1f8] sm:$0xf0] }
  0xf6   : > { %1107 = vmatpush.bf16.msrb.mxu0 %v2004_v28  ;;  %v2428_v27 = vor.u32 %v2624_v26, %v2427_v24  ;;  %v2339_v28 = vld [vmem:[%s3307_s2 + $0xb0] sm:$0xf]  ;;  %v2395_v14 = vld [vmem:[%s3307_s2 + $0x120] sm:$0xf]  ;;  %v2365_v24 = vld [vmem:[%s3307_s2 + $0xe8] sm:$0xf0] }
  0xf7   : > { %1141 = vmatpush.bf16.msrb.mxu3 %v2216_v29  ;;  %v2132_v29 = vor.u32 %v2550_v22, %v2131_v21  ;;  %v2267_v22 = vld [vmem:[%s3307_s2 + $0x20] sm:$0xf]  ;;  %v2387_v26 = vld [vmem:[%s3307_s2 + $0x110] sm:$0xf] }
  0xf8   : > { %1129 = vmatpush.bf16.msrb.mxu2 %v2072_v39 }
  0xf9   : > { %1120 = vmatpush.bf16.msrb.mxu1 %v2132_v29  ;;  %v2602_v29 = vld [vmem:[%s3307_s2 + $0xb4] sm:$0xf0] }
  0xfb   : > { %1142 = vmatpush.bf16.msrb.mxu3 %v2200_v40  ;;  %v644_v40 = vld [vmem:[%s582_s11] sm:$0x3] }
  0xfc   : > { %1130 = vmatpush.bf16.msrb.mxu2 %v2056_v50  ;;  %v646_v46 = vperm.slane %v644_v40, 0  ;;  %v647_v47 = vperm.slane %v644_v40, 1  ;;  %v2307_v50 = vld [vmem:[%s3307_s2 + $0x70] sm:$0xf]  ;;  %v2331_v40 = vld [vmem:[%s3307_s2 + $0xa0] sm:$0xf] }
  0xff   : > { %1143 = vmatpush.bf16.msrb.mxu3 %v2184_v55 }
 0x103   : > { %1144 = vmatpush.bf16.msrb.mxu3 %v2168_v8  ;;  %v2588_v8 = vld [vmem:[%s3307_s2 + $0x44] sm:$0xf0] }
 0x104   : > { %v2284_v9 = vor.u32 %v2588_v8, %v2283_v7  ;;  %v2475_v7 = vld [vmem:[%s3307_s2 + $0x1c0] sm:$0xf] }
 0x107   : > { %1145 = vmatpush.bf16.msrb.mxu3 %v2152_v23  ;;  %v2584_v23 = vld [vmem:[%s3307_s2 + $0x24] sm:$0xf0] }
 0x108   : > { %v2268_v25 = vor.u32 %v2584_v23, %v2267_v22  ;;  %v2607_v23 = vld [vmem:[%s3307_s2 + $0xe4] sm:$0xf] }
 0x10b   : > { %1146 = vmatpush.bf16.msrb.mxu3 %v2136_v33 }
 0x15f   : > { %v620_v48 = vpop.xlane.xlu0 %619 }
 0x160   : > { %v621_v54 = vmul.f32 %v620_v48, %v3387_v58  ;;  %v2040_v58 = vor.u32 %v2524_v0, %v2037_v3  ;;  %v2608_v0 = vld [vmem:[%s3307_s2 + $0xe4] sm:$0xf0]  ;;  %v2300_v3 = vor.u32 %v2592_v60, %v2299_v59  ;;  %v2638_v59 = vld [vmem:[%s3307_s2 + $0x1d4] sm:$0xf0]  ;;  %v2403_v60 = vld [vmem:[%s3307_s2 + $0x130] sm:$0xf] }
 0x161   : > { %v2364_v4 = vor.u32 %v2608_v0, %v2363_v63  ;;  %v2618_v63 = vld [vmem:[%s3307_s2 + $0x134] sm:$0xf0] }
 0x162   : > { %v622_v5 = vadd.f32 1e-06, %v621_v54  ;;  %1131 = vmatpush.bf16.msrb.mxu2 %v2040_v58  ;;  %v2590_v58 = vld [vmem:[%s3307_s2 + $0x54] sm:$0xf0]  ;;  %v2404_v0 = vor.u32 %v2618_v63, %v2403_v60  ;;  %v2429_v63 = vld [vmem:[%s3307_s2 + $0x168] sm:$0xf0] }
 0x164   : > { %2781 = vrsqrt.f32 %v622_v5  ;;  %vm629_vm2 = vweird.f32 %v622_v5 }
 0x166   : > { %1132 = vmatpush.bf16.msrb.mxu2 %v2024_v19  ;;  %v2347_v19 = vld [vmem:[%s3307_s2 + $0xc0] sm:$0xf] }
 0x167   : > { %v2348_v21 = vor.u32 %v2604_v20, %v2347_v19  ;;  %v2467_v20 = vld [vmem:[%s3307_s2 + $0x1b0] sm:$0xf] }
 0x16a   : > { %v2782_v30 = vpop.eup %2781  ;;  %1133 = vmatpush.bf16.msrb.mxu2 %v2008_v31  ;;  %v2499_v31 = vld [vmem:[%s3307_s2 + $0x1f0] sm:$0xf] }
 0x16b   : > { %v624_v32 = vmul.f32 %v2782_v30, %v622_v5  ;;  %vm630_vm1 = vweird.f32 %v2782_v30  ;;  %v2291_v5 = vld [vmem:[%s3307_s2 + $0x50] sm:$0xf] }
 0x16c   : > { %vm631_vm3 = vmor %vm629_vm2, %vm630_vm1  ;;  %v2292_v6 = vor.u32 %v2590_v58, %v2291_v5  ;;  %v2315_v58 = vld [vmem:[%s3307_s2 + $0x80] sm:$0xf] }
 0x16d   : > { %v625_v34 = vmul.f32 %v2782_v30, %v624_v32  ;;  %v2642_v32 = vld [vmem:[%s3307_s2 + $0x1f4] sm:$0xf0] }
 0x16e   : > { %v2500_v33 = vor.u32 %v2642_v32, %v2499_v31  ;;  %v2285_v31 = vld [vmem:[%s3307_s2 + $0x48] sm:$0xf0] }
 0x16f   : > { %v626_v36 = vmul.f32 0.5, %v625_v34  ;;  %v2259_v34 = vld [vmem:[%s3307_s2 + $0x10] sm:$0xf] }
 0x170   : > { %v2260_v37 = vor.u32 %v2582_v35, %v2259_v34  ;;  %v2632_v34 = vld [vmem:[%s3307_s2 + $0x1a4] sm:$0xf0] }
 0x171   : > { %v627_v38 = vsub.f32 1.5, %v626_v36  ;;  %v2419_v36 = vld [vmem:[%s3307_s2 + $0x150] sm:$0xf] }
 0x173   : > { %v628_v39 = vmul.f32 %v2782_v30, %v627_v38  ;;  %v2622_v38 = vld [vmem:[%s3307_s2 + $0x154] sm:$0xf0] }
 0x175   : > { %v632_v43 = vsel %vm631_vm3, %v2782_v30, %v628_v39  ;;  %v2340_v30 = vor.u32 %v2602_v29, %v2339_v28  ;;  %v2420_v39 = vor.u32 %v2622_v38, %v2419_v36  ;;  %v3576_v28 = vld [vmem:[%s3299_s3] sm:$0xf]  ;;  %s3797_s3 = sld [smem:[#allocation21_spill]] }
 0x176   : > { %v633_v44 = vmul.f32 %v632_v43, %v3391_v61  ;;  %v634_v45 = vmul.f32 %v632_v43, %v3394_v62  ;;  %v2308_v61 = vor.u32 %v2594_v51, %v2307_v50  ;;  %v2372_v62 = vor.u32 %v2610_v53, %v2371_v52  ;;  %v2620_v50 = vld [vmem:[%s3307_s2 + $0x144] sm:$0xf0]  ;;  %v2593_v51 = vld [vmem:[%s3307_s2 + $0x74] sm:$0xf]  ;;  %v2309_v52 = vld [vmem:[%s3307_s2 + $0x78] sm:$0xf0] }
 0x177   : > { %v2605_v36 = vld [vmem:[%s3307_s2 + $0xd4] sm:$0xf]  ;;  %v720_v38 = vperm.slane %v3576_v28, 0 }
 0x178   : > { %v642_v48 = vmul.f32 %v638_v41, %v633_v44  ;;  %v643_v49 = vmul.f32 %v639_v42, %v634_v45  ;;  %v2600_v41 = vld [vmem:[%s3307_s2 + $0xa4] sm:$0xf0]  ;;  %v2491_v42 = vld [vmem:[%s3307_s2 + $0x1e0] sm:$0xf] }
 0x179   : > { %v2332_v43 = vor.u32 %v2600_v41, %v2331_v40  ;;  %v2640_v44 = vld [vmem:[%s3307_s2 + $0x1e4] sm:$0xf0]  ;;  %v2379_v40 = vld [vmem:[%s3307_s2 + $0x100] sm:$0xf] }
 0x17a   : > { %v650_v54 = vadd.f32 %v646_v46, %v642_v48  ;;  %v651_v55 = vadd.f32 %v647_v47, %v643_v49  ;;  %v2492_v45 = vor.u32 %v2640_v44, %v2491_v42  ;;  %v2251_v46 = vld [vmem:[%s3307_s2] sm:$0xf]  ;;  %v2580_v47 = vld [vmem:[%s3307_s2 + $0x4] sm:$0xf0]  ;;  %v2277_v44 = vld [vmem:[%s3307_s2 + $0x38] sm:$0xf0] }
 0x17b   : > { %v2411_v48 = vld [vmem:[%s3307_s2 + $0x140] sm:$0xf]  ;;  %v2252_v49 = vor.u32 %v2580_v47, %v2251_v46  ;;  %v2612_v41 = vld [vmem:[%s3307_s2 + $0x104] sm:$0xf0]  ;;  %v2437_v47 = vld [vmem:[%s3307_s2 + $0x178] sm:$0xf0] }
 0x17c   : > { %v652_v56 = vpack.c.bf16 %v650_v54, %v650_v54  ;;  %v653_v57 = vpack.c.bf16 %v651_v55, %v651_v55  ;;  %v2412_v53 = vor.u32 %v2620_v50, %v2411_v48  ;;  %v2312_v54 = vor.u32 %v2593_v51, %v2309_v52  ;;  %v2323_v55 = vld [vmem:[%s3307_s2 + $0x90] sm:$0xf]  ;;  %v2603_v52 = vld [vmem:[%s3307_s2 + $0xc4] sm:$0xf]  ;;  %p2505_p3 = scmp.ne.s32.totalorder %s3797_s3, 1 }
 0x17d   : > { %v2380_v42 = vor.u32 %v2612_v41, %v2379_v40  ;;  %v2451_v48 = vld [vmem:[%s3307_s2 + $0x190] sm:$0xf] }
 0x17e   : > { %1056 = vmatmul.bf16.vlgmr.msra.gmra.mxu0 %v652_v56  ;;  %1069 = vmatmul.bf16.vlgmr.msra.gmra.mxu1 %v653_v57 }
 0x17f   : > { %1082 = vmatmul.bf16.vlgmr.msra.gmra.mxu2 %v652_v56  ;;  %1095 = vmatmul.bf16.vlgmr.msra.gmra.mxu3 %v653_v57 }
 0x180   : > { %1592 = vmatpush.bf16.msra.mxu0 %v2308_v61  ;;  %1605 = vmatpush.bf16.msra.mxu1 %v2372_v62 }
 0x181   : > { %1618 = vmatpush.bf16.msra.mxu2 %v2436_v18  ;;  %1631 = vmatpush.bf16.msra.mxu3 %v2500_v33  ;;  %v2293_v18 = vld [vmem:[%s3307_s2 + $0x58] sm:$0xf0]  ;;  %v2459_v33 = vld [vmem:[%s3307_s2 + $0x1a0] sm:$0xf] }
 0x182   : > { %v2296_v19 = vor.u32 %v2589_v17, %v2293_v18  ;;  %v2460_v35 = vor.u32 %v2632_v34, %v2459_v33  ;;  %v2421_v17 = vld [vmem:[%s3307_s2 + $0x158] sm:$0xf0]  ;;  %v2253_v33 = vld [vmem:[%s3307_s2 + $0x8] sm:$0xf0] }
 0x184   : > { %1593 = vmatpush.bf16.msra.mxu0 %v2300_v3  ;;  %1606 = vmatpush.bf16.msra.mxu1 %v2364_v4  ;;  %v2591_v3 = vld [vmem:[%s3307_s2 + $0x64] sm:$0xf]  ;;  %v2301_v4 = vld [vmem:[%s3307_s2 + $0x68] sm:$0xf0] }
 0x185   : > { %1619 = vmatpush.bf16.msra.mxu2 %v2428_v27  ;;  %1632 = vmatpush.bf16.msra.mxu3 %v2492_v45  ;;  %v2304_v5 = vor.u32 %v2591_v3, %v2301_v4  ;;  %v2614_v27 = vld [vmem:[%s3307_s2 + $0x114] sm:$0xf0]  ;;  %v2625_v45 = vld [vmem:[%s3307_s2 + $0x174] sm:$0xf]  ;;  %v2628_v3 = vld [vmem:[%s3307_s2 + $0x184] sm:$0xf0] }
 0x186   : > { %v2388_v29 = vor.u32 %v2614_v27, %v2387_v26  ;;  %v2440_v50 = vor.u32 %v2625_v45, %v2437_v47 }
 0x188   : > { %1594 = vmatpush.bf16.msra.mxu0 %v2292_v6  ;;  %1607 = vmatpush.bf16.msra.mxu1 %v2356_v12  ;;  %v2596_v6 = vld [vmem:[%s3307_s2 + $0x84] sm:$0xf0] }
 0x189   : > { %1620 = vmatpush.bf16.msra.mxu2 %v2420_v39  ;;  %v2316_v8 = vor.u32 %v2596_v6, %v2315_v58  ;;  %v2601_v6 = vld [vmem:[%s3307_s2 + $0xb4] sm:$0xf] }
 0x18c   : > { %1595 = vmatpush.bf16.msra.mxu0 %v2284_v9  ;;  %1608 = vmatpush.bf16.msra.mxu1 %v2348_v21  ;;  %v2636_v9 = vld [vmem:[%s3307_s2 + $0x1c4] sm:$0xf0]  ;;  %v2634_v21 = vld [vmem:[%s3307_s2 + $0x1b4] sm:$0xf0] }
 0x18d   : > { %1621 = vmatpush.bf16.msra.mxu2 %v2412_v53  ;;  %v2476_v12 = vor.u32 %v2636_v9, %v2475_v7  ;;  %v2468_v22 = vor.u32 %v2634_v21, %v2467_v20  ;;  %v2349_v53 = vld [vmem:[%s3307_s2 + $0xc8] sm:$0xf0]  ;;  %v2341_v7 = vld [vmem:[%s3307_s2 + $0xb8] sm:$0xf0]  ;;  %v721_v9 = vperm.slane %v3576_v28, 1 }
 0x18e   : > { %1108 = vmatmul.bf16.vlgmr.msrb.gmra.mxu0 %v652_v56  ;;  %1121 = vmatmul.bf16.vlgmr.msrb.gmra.mxu1 %v653_v57  ;;  %v2344_v10 = vor.u32 %v2601_v6, %v2341_v7 }
 0x18f   : > { %1134 = vmatmul.bf16.vlgmr.msrb.gmra.mxu2 %v652_v56  ;;  %1147 = vmatmul.bf16.vlgmr.msrb.gmra.mxu3 %v653_v57  ;;  %v2598_v56 = vld [vmem:[%s3307_s2 + $0x94] sm:$0xf0]  ;;  %v2483_v57 = vld [vmem:[%s3307_s2 + $0x1d0] sm:$0xf] }
 0x190   : > { %1596 = vmatpush.bf16.msra.mxu0 %v2276_v16  ;;  %1609 = vmatpush.bf16.msra.mxu1 %v2340_v30  ;;  %v2324_v61 = vor.u32 %v2598_v56, %v2323_v55  ;;  %v2484_v62 = vor.u32 %v2638_v59, %v2483_v57  ;;  %v2396_v16 = vor.u32 %v2616_v15, %v2395_v14  ;;  %v2587_v30 = vld [vmem:[%s3307_s2 + $0x44] sm:$0xf]  ;;  %v2269_v59 = vld [vmem:[%s3307_s2 + $0x28] sm:$0xf0]  ;;  %v2581_v14 = vld [vmem:[%s3307_s2 + $0x14] sm:$0xf] }
 0x191   : > { %1622 = vmatpush.bf16.msra.mxu2 %v2404_v0  ;;  %v2288_v32 = vor.u32 %v2587_v30, %v2285_v31  ;;  %v2352_v56 = vor.u32 %v2603_v52, %v2349_v53  ;;  %v2443_v0 = vld [vmem:[%s3307_s2 + $0x180] sm:$0xf]  ;;  %v2261_v15 = vld [vmem:[%s3307_s2 + $0x18] sm:$0xf0]  ;;  %v2493_v31 = vld [vmem:[%s3307_s2 + $0x1e8] sm:$0xf0] }
 0x192   : > { %1633 = vmatpush.bf16.msra.mxu3 %v2484_v62  ;;  %v2623_v62 = vld [vmem:[%s3307_s2 + $0x164] sm:$0xf]  ;;  %v2444_v58 = vor.u32 %v2628_v3, %v2443_v0  ;;  %v2264_v21 = vor.u32 %v2581_v14, %v2261_v15  ;;  %v2405_v52 = vld [vmem:[%s3307_s2 + $0x138] sm:$0xf0]  ;;  %v2397_v0 = vld [vmem:[%s3307_s2 + $0x128] sm:$0xf0] }
 0x193   : > { %v723_v15 = vperm.slane %v3576_v28, 3 }
 0x194   : > { %1597 = vmatpush.bf16.msra.mxu0 %v2268_v25  ;;  %1610 = vmatpush.bf16.msra.mxu1 %v2332_v43  ;;  %v2368_v25 = vor.u32 %v2607_v23, %v2365_v24  ;;  %v2585_v43 = vld [vmem:[%s3307_s2 + $0x34] sm:$0xf]  ;;  %v2599_v23 = vld [vmem:[%s3307_s2 + $0xa4] sm:$0xf]  ;;  %v2333_v24 = vld [vmem:[%s3307_s2 + $0xa8] sm:$0xf0] }
 0x195   : > { %1623 = vmatpush.bf16.msra.mxu2 %v2396_v16  ;;  %v2280_v46 = vor.u32 %v2585_v43, %v2277_v44  ;;  %v2621_v16 = vld [vmem:[%s3307_s2 + $0x154] sm:$0xf]  ;;  %v2336_v30 = vor.u32 %v2599_v23, %v2333_v24  ;;  %v2485_v44 = vld [vmem:[%s3307_s2 + $0x1d8] sm:$0xf0]  ;;  %v2631_v24 = vld [vmem:[%s3307_s2 + $0x1a4] sm:$0xf] }
 0x196   : > { %1634 = vmatpush.bf16.msra.mxu3 %v2476_v12  ;;  %v2637_v43 = vld [vmem:[%s3307_s2 + $0x1d4] sm:$0xf]  ;;  %v2389_v23 = vld [vmem:[%s3307_s2 + $0x118] sm:$0xf0] }
 0x197   : > { %v2488_v47 = vor.u32 %v2637_v43, %v2485_v44 }
 0x198   : > { %1598 = vmatpush.bf16.msra.mxu0 %v2260_v37  ;;  %1611 = vmatpush.bf16.msra.mxu1 %v2324_v61  ;;  %v2357_v37 = vld [vmem:[%s3307_s2 + $0xd8] sm:$0xf0]  ;;  %v2583_v61 = vld [vmem:[%s3307_s2 + $0x24] sm:$0xf] }
 0x199   : > { %1624 = vmatpush.bf16.msra.mxu2 %v2388_v29  ;;  %v2360_v39 = vor.u32 %v2605_v36, %v2357_v37  ;;  %v2272_v60 = vor.u32 %v2583_v61, %v2269_v59  ;;  %v2619_v37 = vld [vmem:[%s3307_s2 + $0x144] sm:$0xf] }
 0x19a   : > { %1635 = vmatpush.bf16.msra.mxu3 %v2468_v22  ;;  %v2424_v22 = vor.u32 %v2621_v16, %v2421_v17 }
 0x19c   : > { %1599 = vmatpush.bf16.msra.mxu0 %v2252_v49  ;;  %1612 = vmatpush.bf16.msra.mxu1 %v2316_v8  ;;  %v2630_v49 = vld [vmem:[%s3307_s2 + $0x194] sm:$0xf0]  ;;  %v2641_v8 = vld [vmem:[%s3307_s2 + $0x1f4] sm:$0xf] }
 0x19d   : > { %v2452_v51 = vor.u32 %v2630_v49, %v2451_v48  ;;  %1625 = vmatpush.bf16.msra.mxu2 %v2380_v42  ;;  %v2325_v42 = vld [vmem:[%s3307_s2 + $0x98] sm:$0xf0]  ;;  %v722_v49 = vperm.slane %v3576_v28, 2 }
 0x19e   : > { %1636 = vmatpush.bf16.msra.mxu3 %v2460_v35 }
 0x1a0   : > { %1644 = vmatpush.bf16.msrb.mxu0 %v2312_v54  ;;  %1657 = vmatpush.bf16.msrb.mxu1 %v2376_v13  ;;  %v2504_v13 = vor.u32 %v2641_v8, %v2501_v11 }
 0x1a1   : > { %1670 = vmatpush.bf16.msrb.mxu2 %v2440_v50 }
 0x1a2   : > { %1637 = vmatpush.bf16.msra.mxu3 %v2452_v51  ;;  %v2617_v51 = vld [vmem:[%s3307_s2 + $0x134] sm:$0xf] }
 0x1a4   : > { %1645 = vmatpush.bf16.msrb.mxu0 %v2304_v5  ;;  %1658 = vmatpush.bf16.msrb.mxu1 %v2368_v25  ;;  %v2432_v5 = vor.u32 %v2623_v62, %v2429_v63  ;;  %v2639_v25 = vld [vmem:[%s3307_s2 + $0x1e4] sm:$0xf] }
 0x1a5   : > { %v2496_v35 = vor.u32 %v2639_v25, %v2493_v31  ;;  %v2615_v63 = vld [vmem:[%s3307_s2 + $0x124] sm:$0xf]  ;;  %v2381_v31 = vld [vmem:[%s3307_s2 + $0x108] sm:$0xf0] }
 0x1a6   : > { %1671 = vmatpush.bf16.msrb.mxu2 %v2432_v5  ;;  %1638 = vmatpush.bf16.msra.mxu3 %v2444_v58  ;;  %v2400_v8 = vor.u32 %v2615_v63, %v2397_v0 }
 0x1a8   : > { %1646 = vmatpush.bf16.msrb.mxu0 %v2296_v19  ;;  %1659 = vmatpush.bf16.msrb.mxu1 %v2360_v39  ;;  %v2597_v39 = vld [vmem:[%s3307_s2 + $0x94] sm:$0xf] }
 0x1aa   : > { %1683 = vmatpush.bf16.msrb.mxu3 %v2504_v13  ;;  %1672 = vmatpush.bf16.msrb.mxu2 %v2424_v22  ;;  %v2469_v13 = vld [vmem:[%s3307_s2 + $0x1b8] sm:$0xf0] }
 0x1ac   : > { %1647 = vmatpush.bf16.msrb.mxu0 %v2288_v32  ;;  %1660 = vmatpush.bf16.msrb.mxu1 %v2352_v56  ;;  %v2579_v32 = vld [vmem:[%s3307_s2 + $0x4] sm:$0xf]  ;;  %v2317_v56 = vld [vmem:[%s3307_s2 + $0x88] sm:$0xf0] }
 0x1ad   : > { %v2256_v36 = vor.u32 %v2579_v32, %v2253_v33 }
 0x1ae   : > { %1684 = vmatpush.bf16.msrb.mxu3 %v2496_v35 }
 0x1b0   : > { %1648 = vmatpush.bf16.msrb.mxu0 %v2280_v46  ;;  %1661 = vmatpush.bf16.msrb.mxu1 %v2344_v10  ;;  %v2328_v46 = vor.u32 %v2597_v39, %v2325_v42  ;;  %v3644_v10 = vld [vmem:[%s3305_s29] sm:$0xf] }
 0x1b2   : > { %1685 = vmatpush.bf16.msrb.mxu3 %v2488_v47 }
 0x1b4   : > { %1649 = vmatpush.bf16.msrb.mxu0 %v2272_v60  ;;  %1662 = vmatpush.bf16.msrb.mxu1 %v2336_v30  ;;  %v2477_v60 = vld [vmem:[%s3307_s2 + $0x1c8] sm:$0xf0]  ;;  %v2611_v30 = vld [vmem:[%s3307_s2 + $0x104] sm:$0xf] }
 0x1b5   : > { %v2384_v39 = vor.u32 %v2611_v30, %v2381_v31 }
 0x1b8   : > { %1650 = vmatpush.bf16.msrb.mxu0 %v2264_v21  ;;  %1663 = vmatpush.bf16.msrb.mxu1 %v2328_v46 }
 0x1bc   : > { %1651 = vmatpush.bf16.msrb.mxu0 %v2256_v36  ;;  %v2629_v36 = vld [vmem:[%s3307_s2 + $0x194] sm:$0xf] }
 0x1fb   : > { %v1057_v54 = vpop.f32.mrf.mxu0  ;;  %v1070_v55 = vpop.f32.mrf.mxu1 }
 0x1fc   : > { %v1058_v57 = vadd.f32 %v1057_v54, %v720_v38  ;;  %v2413_v38 = vld [vmem:[%s3307_s2 + $0x148] sm:$0xf0]  ;;  %v2408_v54 = vor.u32 %v2617_v51, %v2405_v52  ;;  %v1191_v51 = vperm.slane %v3644_v10, 1 }
 0x1fd   : > { %v2416_v41 = vor.u32 %v2619_v37, %v2413_v38  ;;  %v2453_v37 = vld [vmem:[%s3307_s2 + $0x198] sm:$0xf0] }
 0x1fe   : > { %v3601_v4 = vadd.f32 %v1070_v55, %v1058_v57  ;;  %v2595_v55 = vld [vmem:[%s3307_s2 + $0x84] sm:$0xf]  ;;  %v2456_v44 = vor.u32 %v2629_v36, %v2453_v37 }
 0x1ff   : > { %1673 = vmatpush.bf16.msrb.mxu2 %v2416_v41  ;;  %v2635_v57 = vld [vmem:[%s3307_s2 + $0x1c4] sm:$0xf]  ;;  %v2320_v62 = vor.u32 %v2595_v55, %v2317_v56 }
 0x200   : > { %v1156_v12 = vmul.f32 0.044715, %v3601_v4  ;;  %v2480_v6 = vor.u32 %v2635_v57, %v2477_v60  ;;  %v1152_v21 = vmul.f32 0.5, %v3601_v4 }
 0x201   : > { %1664 = vmatpush.bf16.msrb.mxu1 %v2320_v62 }
 0x202   : > { %v1160_v18 = vmul.f32 %v1156_v12, %v3601_v4  ;;  %v1083_v19 = vpop.f32.mrf.mxu2  ;;  %v1096_v20 = vpop.f32.mrf.mxu3  ;;  %1686 = vmatpush.bf16.msrb.mxu3 %v2480_v6  ;;  %v2633_v12 = vld [vmem:[%s3307_s2 + $0x1b4] sm:$0xf] }
 0x203   : > { %v1084_v26 = vadd.f32 %v1083_v19, %v721_v9  ;;  %v1059_v27 = vpop.f32.mrf.mxu0  ;;  %v1072_v29 = vpop.f32.mrf.mxu1  ;;  %1674 = vmatpush.bf16.msrb.mxu2 %v2408_v54  ;;  %v2472_v16 = vor.u32 %v2633_v12, %v2469_v13  ;;  %v1190_v19 = vperm.slane %v3644_v10, 0  ;;  %v2445_v54 = vld [vmem:[%s3307_s2 + $0x188] sm:$0xf0] }
 0x204   : > { %v1164_v34 = vmul.f32 %v1160_v18, %v3601_v4  ;;  %v2461_v29 = vld [vmem:[%s3307_s2 + $0x1a8] sm:$0xf0] }
 0x205   : > { %v3624_v40 = vadd.f32 %v1096_v20, %v1084_v26  ;;  %v2613_v20 = vld [vmem:[%s3307_s2 + $0x114] sm:$0xf] }
 0x206   : > { %v1168_v45 = vadd.f32 %v1164_v34, %v3601_v4  ;;  %1687 = vmatpush.bf16.msrb.mxu3 %v2472_v16  ;;  %v2392_v27 = vor.u32 %v2613_v20, %v2389_v23  ;;  %v2464_v4 = vor.u32 %v2631_v24, %v2461_v29 }
 0x207   : > { %v1157_v48 = vmul.f32 0.044715, %v3624_v40  ;;  %1675 = vmatpush.bf16.msrb.mxu2 %v2400_v8 }
 0x208   : > { %v1172_v50 = vmul.f32 0.7978846, %v1168_v45 }
 0x209   : > { %v1161_v53 = vmul.f32 %v1157_v48, %v3624_v40 }
 0x20a   : > { %v1085_v61 = vpop.f32.mrf.mxu2  ;;  %v1098_v59 = vpop.f32.mrf.mxu3  ;;  %2783 = vtanh.f32 %v1172_v50  ;;  %1688 = vmatpush.bf16.msrb.mxu3 %v2464_v4  ;;  %v1203_v4 = vld [vmem:[#allocation2 + $0x8] sm:$0xff] }
 0x20b   : > { %v1165_v3 = vmul.f32 %v1161_v53, %v3624_v40  ;;  %v1109_v5 = vpop.f32.mrf.mxu0  ;;  %v1122_v58 = vpop.f32.mrf.mxu1  ;;  %1676 = vmatpush.bf16.msrb.mxu2 %v2392_v27  ;;  %v2627_v53 = vld [vmem:[%s3307_s2 + $0x184] sm:$0xf] }
 0x20c   : > { %v1110_v7 = vadd.f32 %v1109_v5, %v722_v49  ;;  %v1153_v49 = vmul.f32 0.5, %v3624_v40  ;;  %v2448_v61 = vor.u32 %v2627_v53, %v2445_v54 }
 0x20d   : > { %v1169_v9 = vadd.f32 %v1165_v3, %v3624_v40 }
 0x20e   : > { %v3646_v11 = vadd.f32 %v1122_v58, %v1110_v7  ;;  %1689 = vmatpush.bf16.msrb.mxu3 %v2456_v44  ;;  %v1192_v58 = vperm.slane %v3644_v10, 2 }
 0x20f   : > { %v1173_v14 = vmul.f32 0.7978846, %v1169_v9  ;;  %1677 = vmatpush.bf16.msrb.mxu2 %v2384_v39 }
 0x210   : > { %v2784_v17 = vpop.eup %2783  ;;  %v1158_v18 = vmul.f32 0.044715, %v3646_v11  ;;  %v1154_v3 = vmul.f32 0.5, %v3646_v11 }
 0x211   : > { %v1180_v22 = vadd.f32 1.0, %v2784_v17  ;;  %2785 = vtanh.f32 %v1173_v14  ;;  %v1193_v14 = vperm.slane %v3644_v10, 3  ;;  %v1202_v10 = vld [vmem:[#allocation2] sm:$0xff] }
 0x212   : > { %v1162_v28 = vmul.f32 %v1158_v18, %v3646_v11  ;;  %v1135_v25 = vpop.f32.mrf.mxu2  ;;  %v1148_v26 = vpop.f32.mrf.mxu3  ;;  %1690 = vmatpush.bf16.msrb.mxu3 %v2448_v61 }
 0x213   : > { %v1136_v32 = vadd.f32 %v1135_v25, %v723_v15  ;;  %v1111_v33 = vpop.f32.mrf.mxu0  ;;  %v1124_v34 = vpop.f32.mrf.mxu1  ;;  %v1184_v35 = vmul.f32 %v1180_v22, %v1152_v21 }
 0x214   : > { %v1166_v38 = vmul.f32 %v1162_v28, %v3646_v11 }
 0x215   : > { %v1149_v41 = vadd.f32 %v1148_v26, %v1136_v32  ;;  %v1198_v42 = vmul.f32 %v1190_v19, %v1184_v35 }
 0x216   : > { %v1170_v43 = vadd.f32 %v1166_v38, %v3646_v11 }
 0x217   : > { %v2786_v45 = vpop.eup %2785  ;;  %v1159_v46 = vmul.f32 0.044715, %v1149_v41  ;;  %v1204_v47 = vpack.c.bf16 %v1198_v42, %v1198_v42  ;;  %v1155_v12 = vmul.f32 0.5, %v1149_v41 }
 0x218   : > { %v1174_v48 = vmul.f32 0.7978846, %v1170_v43  ;;  %v1181_v50 = vadd.f32 1.0, %v2786_v45 }
 0x219   : > { %v1163_v52 = vmul.f32 %v1159_v46, %v1149_v41  ;;  %1600 = vmatmul.bf16.vlgmr.msra.gmra.mxu0 %v1204_v47 }
 0x21a   : > { %v1137_v55 = vpop.f32.mrf.mxu2  ;;  %v1150_v56 = vpop.f32.mrf.mxu3  ;;  %v1185_v57 = vmul.f32 %v1181_v50, %v1153_v49  ;;  %2787 = vtanh.f32 %v1174_v48 }
 0x21b   : > { %v1167_v59 = vmul.f32 %v1163_v52, %v1149_v41 }
 0x21c   : > { %v1199_v62 = vmul.f32 %v1191_v51, %v1185_v57 }
 0x21d   : > { %v1171_v60 = vadd.f32 %v1167_v59, %v1149_v41 }
 0x21e   : > { %v1205_v63 = vpack.c.bf16 %v1199_v62, %v1199_v62 }
 0x21f   : > { %v1175_v40 = vmul.f32 0.7978846, %v1171_v60 }
 0x220   : > { %v2788_v0 = vpop.eup %2787  ;;  %1613 = vmatmul.bf16.vlgmr.msra.gmra.mxu1 %v1205_v63 }
 0x221   : > { %v1182_v5 = vadd.f32 1.0, %v2788_v0  ;;  %2789 = vtanh.f32 %v1175_v40 }
 0x223   : > { %v1186_v6 = vmul.f32 %v1182_v5, %v1154_v3 }
 0x225   : > { %v1200_v7 = vmul.f32 %v1192_v58, %v1186_v6 }
 0x227   : > { %v2790_v8 = vpop.eup %2789  ;;  %v1206_v9 = vpack.c.bf16 %v1200_v7, %v1200_v7 }
 0x228   : > { %v1183_v13 = vadd.f32 1.0, %v2790_v8 }
 0x229   : > { %1626 = vmatmul.bf16.vlgmr.msra.gmra.mxu2 %v1206_v9  ;;  %1652 = vmatmul.bf16.vlgmr.msrb.gmra.mxu0 %v1204_v47 }
 0x22a   : > { %v1187_v15 = vmul.f32 %v1183_v13, %v1155_v12 }
 0x22c   : > { %v1201_v16 = vmul.f32 %v1193_v14, %v1187_v15 }
 0x22e   : > { %v1207_v17 = vpack.c.bf16 %v1201_v16, %v1201_v16 }
 0x230   : > { %1639 = vmatmul.bf16.vlgmr.msra.gmra.mxu3 %v1207_v17  ;;  %1665 = vmatmul.bf16.vlgmr.msrb.gmra.mxu1 %v1205_v63 }
 0x239   : > { %1678 = vmatmul.bf16.vlgmr.msrb.gmra.mxu2 %v1206_v9 }
 0x240   : > { %1691 = vmatmul.bf16.vlgmr.msrb.gmra.mxu3 %v1207_v17 }
 0x296   : > { %v1601_v11 = vpop.f32.mrf.mxu0 }
 0x29d   : > { %v1614_v18 = vpop.f32.mrf.mxu1 }
 0x29e   : > { %v1603_v19 = vpop.f32.mrf.mxu0  ;;  %v1615_v28 = vadd.f32 %v1614_v18, %v1601_v11 }
 0x2a5   : > { %v1616_v20 = vpop.f32.mrf.mxu1 }
 0x2a6   : > { %v1653_v21 = vpop.f32.mrf.mxu0 }
 0x2ac   : > { %v1627_v22 = vpop.f32.mrf.mxu2 }
 0x2ad   : > { %v1666_v23 = vpop.f32.mrf.mxu1  ;;  %v1628_v25 = vadd.f32 %v1627_v22, %v1615_v28 }
 0x2ae   : > { %v1655_v24 = vpop.f32.mrf.mxu0  ;;  %v1667_v34 = vadd.f32 %v1666_v23, %v1653_v21 }
 0x2b3   : > { %v1640_v26 = vpop.f32.mrf.mxu3 }
 0x2b4   : > { %v1641_v27 = vadd.f32 %v1640_v26, %v1628_v25  ;;  %v1629_v29 = vpop.f32.mrf.mxu2 }
 0x2b5   : > { %v1668_v30 = vpop.f32.mrf.mxu1 }
 0x2b6   : > { %v1696_v31 = vadd.f32 %v1641_v27, %v1202_v10 }
 0x2b8   : > { %1698 = vst [vmem:[#allocation2] sm:$0xff] %v1696_v31 }
 0x2bb   : > { %v1642_v32 = vpop.f32.mrf.mxu3 }
 0x2bc   : > { %v1679_v33 = vpop.f32.mrf.mxu2 }
 0x2bd   : > { %v1680_v35 = vadd.f32 %v1679_v33, %v1667_v34 }
 0x2c3   : > { %v1692_v36 = vpop.f32.mrf.mxu3 }
 0x2c4   : > { %v1693_v37 = vadd.f32 %v1692_v36, %v1680_v35  ;;  %v1681_v38 = vpop.f32.mrf.mxu2 }
 0x2c6   : > { %v1697_v39 = vadd.f32 %v1693_v37, %v1203_v4 }
 0x2c7   : > { %1703 = sbr.rel (%p2505_p3) target bundleno = 729 (0x2d9), region = 84 }
 0x2c8   : > { %1699 = vst [vmem:[#allocation2 + $0x8] sm:$0xff] %v1697_v39 }
 0x2cb   : > { %v1694_v41 = vpop.f32.mrf.mxu3 }
 0x2cc   : > { %v1704_v42 = vld [vmem:[%s594_s12] sm:$0x3] }
 0x2cd   : > { %v1705_v43 = vld [vmem:[#allocation2] sm:$0xff]  ;;  %v1716_v46 = vperm.slane %v1704_v42, 0  ;;  %v1717_v49 = vperm.slane %v1704_v42, 1 }
 0x2ce   : > { %v1707_v44 = vld [vmem:[#allocation11] sm:$0x3] }
 0x2cf   : > { %v1709_v45 = vperm.slane %v1707_v44, 0  ;;  %v1706_v47 = vld [vmem:[#allocation2 + $0x8] sm:$0xff]  ;;  %v1710_v48 = vperm.slane %v1707_v44, 1 }
 0x2d1   : > { %v1713_v50 = vadd.f32 %v1709_v45, %v1705_v43  ;;  %v1714_v51 = vadd.f32 %v1710_v48, %v1706_v47 }
 0x2d3   : > { %v1720_v52 = vmul.f32 %v1716_v46, %v1713_v50  ;;  %v1721_v53 = vmul.f32 %v1717_v49, %v1714_v51 }
 0x2d5   : > { %v1722_v54 = vadd.f32 %v1720_v52, %v3342_v1  ;;  %v1723_v55 = vadd.f32 %v1721_v53, %v3344_v2 }
 0x2d7   : > { %1724 = vst [vmem:[%s3339_s15] sm:$0xff] %v1722_v54 }
 0x2d8   : > { %1725 = vst [vmem:[%s3339_s15 + $0x8] sm:$0xff] %v1723_v55 }
 0x2d9 PF: > { %s3799_s26 = sld [smem:[#allocation22_spill]]  ;;  %s1742_s16 = sshll.u32 %s3339_s15, 4  ;;  %s1743_s16 = int_to_ptr.vmem [resolvable:$true] %s1742_s16 }
 0x2da   : > { %s3801_s11 = sld [smem:[#allocation37_spill]]  ;;  %s3803_s22 = sand.u32 1, %s3039_s10  }
 0x2db   : > { %s1727_s25 = scalar_lea.sflag [#allocation5], %s3803_s22 }
 0x2df   : > { %s2643_s28 = sshll.u32 %s3799_s26, 4 }
 0x2e0   : > { %s3802_s8 = smov %s3801_s11  ;;  %s1740_s4 = scalar_lea.hbm %s3801_s11, %s2643_s28 }
 0x2e1   : > { %s1744_s24 = sshll.u32 %s1740_s4, 4  ;;  %s2961_s18 = scalar_lea.hbm %s3802_s8, 32  ;;  %s1745_s24 = int_to_ptr.hbm [resolvable:$true] %s1744_s24 }
 0x2e2   : > { %s2955_s0 = sshra.s32 %s1745_s24, 4  ;;  %s2956_s0 = int_to_ptr.hbm [resolvable:$true] %s2955_s0 }
 0x2e3   : > { %s2957_s12 = scalar_lea.hbm %s2956_s0, 16  ;;  %p2962_p5 = scmp.lt.s32.totalorder %s2956_s0, %s3802_s8 }
 0x2e4   : > { %p2958_p0 = scmp.ne.s32.totalorder %s2956_s0, %s2957_s12  ;;  %p2963_p6 = scmp.lt.s32.totalorder %s2961_s18, %s2957_s12 }
 0x2e6   : > { %p2959_p2 = pnand %p2958_p0, %p3206_p7  ;;  %p2964_p8 = por %p2963_p6, %p2962_p5 }
 0x2e8   : > { %p2960_p4 = pneg %p2959_p2 }
 0x2ea   : > { %p2965_p10 = pnand %p2964_p8, %p2960_p4 }
 0x2ec   : > { %2968 = shalt.err (!%p2965_p10)
}
 0x2ed   : > { %2656 = dma.vmem_to_hbm [thread:$0]  (%p3206_p7), %s1743_s16, 256, %s1745_s24, %s1727_s25  }
 0x2ee PF: > { %s3804_s15 = sld [smem:[#allocation18_spill]]  ;;  %p2682_p12 = scmp.ge.s32.totalorder %s3075_s19, 2 }
 0x2f0   : > { %p2676_p13 = pnand %p2682_p12, %p3211_p9 }
 0x2f2   : > { %p2677_p11 = pneg %p2676_p13 }
 0x2f4   : > { %s1756_s3 = sand.u32 1, %s3804_s15  }
 0x2f5   : > { %s1757_s29 = scalar_lea.sflag [#allocation5], %s1756_s3 }
 0x2f6   : > { %3030 = dma.done.wait (%p2677_p11), %s1757_s29, 256  }
 0x2f7   : > { %3032 = vsyncadd (%p2677_p11), %s1757_s29, 4294967040  ;;  %s31_s19 = sadd.s32 1, %s3075_s19   ;;  %s3806_s2 = sld [smem:[#allocation19_spill]] }
 0x2f8   : > { %p28_p1 = scmp.ge.s32.totalorder %s31_s19, 6   ;;  %s3807_s11 = sld [smem:[#allocation29_spill]] }
 0x2f9   : > { %s3808_s14 = sld [smem:[#allocation20_spill]]  ;;  %s3813_s30 = smov %s3039_s10 }
 0x2fa   : > { %s3809_s26 = sld [smem:[#allocation28_spill]]  ;;  %s3815_s12 = smov %s3051_s13 }
 0x2fb   : > { %s3810_s16 = sld [smem:[#allocation23_spill]]  ;;  %s3818_s15 = smov %s3067_s17 }
 0x2fc   : > { %s3811_s20 = sld [smem:[#allocation26_spill]] }
 0x2fd   : > { %s3812_s18 = sld [smem:[#allocation27_spill]]  ;;  %s3814_s10 = smov %s3806_s2 }
 0x2fe   :  { %30 = sbr.rel (!%p28_p1) target bundleno = 22 (0x16), region = 162 }
 0x2ff   : > { %s3816_s13 = smov %s3808_s14 }
 0x300   : > { %s3817_s14 = smov %s3809_s26 }
 0x302   : > { %s3819_s17 = smov %s3811_s20 }
 0x303   :  { %1763 = vsyncpa [#allocation4], 1 }
 0x304   :  { %1765 = vsyncpa [#allocation4 + $0x1], 1 }
 0x305   :  { %1766 = vsyncpa [#allocation7], 1 }
 0x306   :  { %1768 = vsyncpa [#allocation7 + $0x1], 1 }
 0x307   :  { %1769 = vsyncpa [#allocation10], 1 }
 0x308   :  { %1771 = vsyncpa [#allocation10 + $0x1], 1 }
 0x309   :  { %1772 = vsyncpa [#allocation5], 1 }
 0x30a   :  { %1774 = vsyncpa [#allocation5 + $0x1], 1 }

// kernel: gated_flux_transformer_block.14
= control target key start
LH: loop header
LB: loop body
LE: loop exit
PB: predicated region body
PF: predicated region fallthrough
CT: control target
= control target key end

     0   :  { %s3931_s0 = inlined_call_operand.vmem [shape: f32[2,16,256], index: 0, kind: input, shape index: {}]   ;;  %s3932_s1 = inlined_call_operand.vmem [shape: f32[2,1,256], index: 1, kind: input, shape index: {}]   ;;  %s3933_s2 = inlined_call_operand.vmem [shape: f32[2,1,256], index: 2, kind: input, shape index: {}]   ;;  %s3934_s3 = inlined_call_operand.hbm [shape: bf16[256,1024], index: 3, kind: input, shape index: {}]   ;;  %s3935_s4 = inlined_call_operand.hbm [shape: f32[1,1024], index: 4, kind: input, shape index: {}]   ;;  %s3936_s5 = inlined_call_operand.hbm [shape: f32[1,1024], index: 5, kind: input, shape index: {}]   ;;  %s3937_s6 = inlined_call_operand.hbm [shape: bf16[1024,256], index: 6, kind: input, shape index: {}]   ;;  %s3938_s7 = inlined_call_operand.hbm [shape: f32[1,256], index: 7, kind: input, shape index: {}]   ;;  %s3939_s8 = inlined_call_operand.vmem [shape: f32[2,1,256], index: 8, kind: input, shape index: {}]   ;;  %s3940_s9 = inlined_call_operand.hbm [shape: f32[2,16,256], index: 9, kind: output, shape index: {}]  }
   0x1   :  { %3954 = sst [smem:[#allocation30_spill]] %s3931_s0 }
   0x2   :  { %3955 = sst [smem:[#allocation31_spill]] %s3932_s1 }
   0x3   :  { %3956 = sst [smem:[#allocation32_spill]] %s3933_s2 }
   0x4   :  { %3957 = sst [smem:[#allocation33_spill]] %s3934_s3 }
   0x5   :  { %3958 = sst [smem:[#allocation34_spill]] %s3935_s4 }
   0x6   :  { %3959 = sst [smem:[#allocation35_spill]] %s3938_s7 }
   0x7   :  { %3960 = sst [smem:[#allocation36_spill]] %s3939_s8 }
   0x8   :  { %3961 = sst [smem:[#allocation37_spill]] %s3940_s9 }
   0x9   :  { %14 = vsyncpa [#allocation4], 0 }
   0xa   :  { %16 = vsyncpa [#allocation4 + $0x1], 0 }
   0xb   :  { %17 = vsyncpa [#allocation7], 0 }
   0xc   :  { %19 = vsyncpa [#allocation7 + $0x1], 0 }
   0xd   :  { %20 = vsyncpa [#allocation10], 0 }
   0xe   :  { %22 = vsyncpa [#allocation10 + $0x1], 0 }
   0xf   :  { %23 = vsyncpa [#allocation5], 0 }
  0x10   :  { %25 = vsyncpa [#allocation5 + $0x1], 0  ;;  %s3263_s30 = smov 0   ;;  %s3265_s10 = smov 0  }
  0x11   :  { %s3267_s11 = smov 0   ;;  %s3269_s12 = smov 0  }
  0x12   :  { %s3271_s13 = smov 0   ;;  %s3273_s14 = smov 0  }
  0x13   :  { %s3275_s15 = smov 0   ;;  %s3277_s16 = smov 0  }
  0x14   :  { %s3279_s17 = smov 0   ;;  %s3281_s18 = smov 0  }
  0x15   :  { %s3283_s19 = smov 0  }
  0x16 LB: > { %3962 = sst [smem:[#allocation18_spill]] %s3161_s30  ;;  %s3317_s20 = sadd.s32 4294967295, %s3201_s19   ;;  %s3201_s19 = sphi %s3283_s19, %s31_s19   ;;  %s3197_s18 = sphi %s3281_s18, %s4007_s18   ;;  %s3193_s17 = sphi %s3279_s17, %s4013_s17   ;;  %s3189_s16 = sphi %s3277_s16, %s4005_s16   ;;  %s3185_s15 = sphi %s3275_s15, %s4012_s15   ;;  %s3181_s14 = sphi %s3273_s14, %s4004_s14   ;;  %s3177_s13 = sphi %s3271_s13, %s4011_s13   ;;  %s3173_s12 = sphi %s3269_s12, %s4010_s12   ;;  %s3169_s11 = sphi %s3267_s11, %s4002_s11   ;;  %s3165_s10 = sphi %s3265_s10, %s4009_s10   ;;  %s3161_s30 = sphi %s3263_s30, %s4008_s30  }
  0x17   : > { %3963 = sst [smem:[#allocation19_spill]] %s3169_s11  ;;  %s2079_s21 = sadd.s32 4294967294, %s3201_s19  }
  0x18   : > { %3964 = sst [smem:[#allocation20_spill]] %s3181_s14  ;;  %p150_p0 = scmp.ne.s32.totalorder %s3177_s13, %s3173_s12 }
  0x19   : > { %3965 = sst [smem:[#allocation21_spill]] %s3185_s15  ;;  %p151_p1 = scmp.eq.s32.totalorder %s3317_s20, 0 }
  0x1a   : > { %3966 = sst [smem:[#allocation22_spill]] %s3189_s16  ;;  %p300_p2 = scmp.ne.s32.totalorder %s3169_s11, %s3165_s10 }
  0x1b   : > { %3967 = sst [smem:[#allocation23_spill]] %s3197_s18  ;;  %p3327_p3 = por %p151_p1, %p150_p0 }
  0x1c   : > { %p301_p4 = scmp.eq.s32.totalorder %s3317_s20, 3  ;;  %p306_p5 = scmp.ne.s32.totalorder %s3165_s10, %s3161_s30 }
  0x1d   : > { %p307_p6 = scmp.eq.s32.totalorder %s2079_s21, 3  ;;  %p2080_p8 = scmp.ge.s32.totalorder %s3201_s19, 1 }
  0x1e   : > { %p3334_p7 = por %p301_p4, %p300_p2  ;;  %p314_p10 = scmp.lt.s32.totalorder %s3201_s19, 5 }
  0x1f   : > { %p3339_p9 = por %p307_p6, %p306_p5  ;;  %s3973_s7 = sld [smem:[#allocation35_spill]] }
  0x20   : > { %s3969_s24 = scalar_select %p3334_p7, 1, 0 }
  0x21   : > { %s3971_s25 = scalar_select %p3339_p9, 1, 0 }
  0x22   : > { %3970 = sst [smem:[#allocation24_spill]] %s3969_s24  ;;  %p3347_p11 = pnand %p2080_p8, %p314_p10 }
  0x23   : > { %3972 = sst [smem:[#allocation25_spill]] %s3971_s25  ;;  %s3203_s12 = smov [#allocation11]  }
  0x24   : > { %p2772_p12 = pneg %p3347_p11  ;;  %s328_s21 = sshll.u32 %s3203_s12, 4  ;;  %s329_s21 = int_to_ptr.vmem [resolvable:$true] %s328_s21 }
  0x25   : > { %s326_s28 = sshll.u32 %s3973_s7, 4  ;;  %s43_s26 = sadd.s32 1, %s3193_s17  ;;  %s327_s28 = int_to_ptr.hbm [resolvable:$true] %s326_s28 }
  0x26   : > { %p2773_p13 = pnand %p2772_p12, %p151_p1  ;;  %p44_p0 = scmp.ge.s32.totalorder %s43_s26, 2 }
  0x27   : > { %s50_s27 = sadd.s32 1, %s3197_s18  ;;  %s137_s22 = sadd.s32 1, %s3181_s14 }
  0x28   : > { %2775 = dma.hbm_to_vmem [thread:$0]  (!%p2773_p13), %s327_s28, 32, %s329_s21, [#allocation10]  }
  0x29   : > { %p144_p2 = scmp.ne.s32.totalorder %s3181_s14, %s3177_s13  ;;  %s4015_s26 = smov (%p44_p0, %s43_s26), 0 }
  0x2a   : > { %3975 = sst [smem:[#allocation26_spill]] %s4015_s26  ;;  %s4017_s27 = smov (!%p44_p0, %s50_s27), %s3197_s18 }
  0x2b   : > { %s134_s12 = ssub.s32 %s3193_s17, %s4015_s26  ;;  %p145_p4 = scmp.eq.s32.totalorder %s3201_s19, 0 }
  0x2c   : > { %p52_p5 = scmp.ge.s32.totalorder %s4017_s27, 2  ;;  %p135_p6 = scmp.eq.s32.totalorder %s134_s12, 0 }
  0x2d   : > { %p146_p8 = por %p145_p4, %p144_p2  ;;  %p2794_p10 = scmp.lt.s32.totalorder %s3201_s19, 4 }
  0x2e   : > { %s4019_s27 = smov (%p52_p5, %s4017_s27), 0  ;;  %s3375_s7 = sand.u32 1, %s3181_s14  }
  0x2f   : > { %3976 = sst [smem:[#allocation27_spill]] %s4019_s27  ;;  %s285_s21 = ssub.s32 %s3197_s18, %s4019_s27 }
  0x30   : > { %s3370_s28 = scalar_select %p135_p6, %s3181_s14, %s137_s22  }
  0x31   : > { %p288_p12 = scmp.eq.s32.totalorder %s285_s21, 0  ;;  %s2083_s26 = sshll.u32 %s3375_s7, 9 }
  0x32   : > { %3977 = sst [smem:[#allocation28_spill]] %s3370_s28  ;;  %p3378_p13 = pnand %p2794_p10, %p146_p8 }
  0x33   : > { %s3979_s12 = sadd.s32 1, %s3169_s11  ;;  %s371_s9 = scalar_lea.vmem [#allocation3], %s2083_s26 }
  0x34   : > { %s3385_s30 = scalar_select %p288_p12, %s3169_s11, %s3979_s12  }
  0x35   : > { %s379_s24 = sshll.u32 %s371_s9, 4  ;;  %s3951_s22 = sand.u32 1, %s3201_s19   ;;  %s380_s24 = int_to_ptr.vmem [resolvable:$true] %s379_s24 }
  0x36   : > { %3980 = sst [smem:[#allocation29_spill]] %s3385_s30  ;;  %s2086_s27 = sshll.u32 %s3375_s7, 2 }
  0x37   : > { %s2087_s18 = sshll.u32 %s3193_s17, 2  ;;  %s3981_s4 = sld [smem:[#allocation34_spill]] }
  0x38   : > { %s393_s8 = scalar_lea.vmem [#allocation6], %s2086_s27  ;;  %s390_s12 = scalar_lea.sflag [#allocation7], %s3951_s22 }
  0x39   : > { %s401_s2 = sshll.u32 %s393_s8, 4  ;;  %s416_s11 = scalar_lea.hbm %s3936_s5, %s2087_s18  ;;  %s402_s2 = int_to_ptr.vmem [resolvable:$true] %s401_s2 }
  0x3a   : > { %s431_s1 = scalar_lea.vmem [#allocation9], %s2083_s26  ;;  %s2625_s14 = sshll.u32 %s3193_s17, 4 }
  0x3b   : > { %s440_s0 = sshll.u32 %s431_s1, 4  ;;  %s3982_s3 = sld [smem:[#allocation33_spill]]  ;;  %s441_s0 = int_to_ptr.vmem [resolvable:$true] %s440_s0 }
  0x3c   : > { %s418_s22 = sshll.u32 %s416_s11, 4  ;;  %s368_s16 = scalar_lea.sflag [#allocation4], %s3375_s7  ;;  %s419_s22 = int_to_ptr.hbm [resolvable:$true] %s418_s22 }
  0x3d   : > { %s397_s21 = scalar_lea.hbm %s3981_s4, %s2087_s18  ;;  %s3206_s30 = smov 16  }
  0x3e   : > { %s399_s15 = sshll.u32 %s397_s21, 4  ;;  %s412_s1 = scalar_lea.vmem [#allocation8], %s2086_s27  ;;  %s400_s15 = int_to_ptr.hbm [resolvable:$true] %s399_s15 }
  0x3f   : > { %2782 = dma.hbm_to_vmem [thread:$0]  (!%p3378_p13), %s400_s15, 64, %s402_s2, %s390_s12  }
  0x40   : > { %s3204_s2 = smov 512   ;;  %s3205_s15 = smov 256  }
  0x41   : > { %s376_s8 = scalar_lea.hbm %s3982_s3, %s2625_s14  ;;  %s420_s18 = sshll.u32 %s412_s1, 4  ;;  %s421_s18 = int_to_ptr.vmem [resolvable:$true] %s420_s18 }
  0x42   : > { %s377_s4 = sshll.u32 %s376_s8, 4  ;;  %s2627_s26 = sshll.u32 %s3193_s17, 9  ;;  %s378_s4 = int_to_ptr.hbm [resolvable:$true] %s377_s4 }
  0x43   : > { %2779 = dma.hbm_to_vmem [thread:$0]  (!%p3378_p13), %s378_s4, 8192, %s380_s24, %s368_s16, %s3204_s2, %s3205_s15, %s3206_s30  }
  0x44   : > { %2785 = dma.hbm_to_vmem [thread:$0]  (!%p3378_p13), %s419_s22, 64, %s421_s18, %s390_s12  }
  0x45   : > { %s437_s28 = scalar_lea.hbm %s3937_s6, %s2627_s26  ;;  %s3983_s7 = sand.u32 1, %s3201_s19  }
  0x46   : > { %s438_s21 = sshll.u32 %s437_s28, 4  ;;  %s428_s11 = scalar_lea.sflag [#allocation10], %s3983_s7  ;;  %s439_s21 = int_to_ptr.hbm [resolvable:$true] %s438_s21 }
  0x47   : > { %s3207_s8 = smov 128   ;;  %s3208_s3 = smov 8  }
  0x48   : > { %2788 = dma.hbm_to_vmem [thread:$0]  (!%p3378_p13), %s439_s21, 8192, %s441_s0, %s428_s11, %s3207_s8, %s3207_s8, %s3208_s3  }
  0x49   : > { %459 = sbr.rel (%p3347_p11) target bundleno = 775 (0x307), region = 56  ;;  %s461_s4 = sand.u32 (!%p3347_p11), 1, %s3177_s13  }
  0x4a   : > { %s2095_s16 = sshll.u32 (!%p3347_p11), %s461_s4, 9  ;;  %s462_s24 = scalar_lea.sflag (!%p3347_p11), [#allocation4], %s461_s4 }
  0x4b   : > { %s3420_s27 = scalar_lea.vmem (!%p3347_p11), [#allocation3], %s2095_s16 }
  0x4e   : > { %3140 = dma.done.wait (%p3327_p3), %s462_s24, 8192  }
  0x4f   : > { %3142 = vsyncadd (%p3327_p3), %s462_s24, 4294959104  ;;  %s471_s22 = sand.u32 1, %s3317_s20   ;;  %s2096_s25 = sshll.u32 %s461_s4, 2 }
  0x50   : > { %s472_s0 = scalar_lea.sflag [#allocation7], %s471_s22  ;;  %s3427_s3 = scalar_lea.vmem [#allocation6], %s2096_s25 }
  0x51   : > { %3144 = dma.done.wait (%p3327_p3), %s472_s0, 128  }
  0x52   : > { %3146 = vsyncadd (%p3327_p3), %s472_s0, 4294967168  ;;  %s3433_s29 = scalar_lea.vmem [#allocation8], %s2096_s25  ;;  %s492_s12 = scalar_lea.sflag [#allocation10], %s471_s22 }
  0x53   : > { %s3435_s2 = scalar_lea.vmem [#allocation9], %s2095_s16 }
  0x54   : > { %3148 = dma.done.wait (%p3327_p3), %s492_s12, 8192  }
  0x55   : > { %3150 = vsyncadd (%p3327_p3), %s492_s12, 4294959104 }
  0x56   : > { %3152 = dma.done.wait (%p151_p1), [#allocation10], 32  }
  0x57   : > { %3154 = vsyncadd (%p151_p1), [#allocation10], 4294967264  ;;  %s3984_s15 = sld [smem:[#allocation22_spill]]  ;;  %s3953_s30 = sand.u32 1, %s3165_s10  }
  0x58   : > { %s2100_s1 = sshll.u32 %s3953_s30, 5  ;;  %s3985_s14 = sld [smem:[#allocation30_spill]] }
  0x59   : > { %s3986_s7 = sld [smem:[#allocation31_spill]] }
  0x5a   : > { %s3987_s16 = sld [smem:[#allocation32_spill]] }
  0x5b   : > { %s3988_s0 = sld [smem:[#allocation36_spill]] }
  0x5c   : > { %s3989_s30 = sld [smem:[#allocation21_spill]] }
  0x5d   : > { %p574_p11 = scmp.lt.s32.totalorder %s3984_s15, 1 }
  0x5f   : > { %s4021_s15 = smov (!%p574_p11, %s3984_s15), 1 }
  0x60   : > { %s2628_s18 = sshll.u32 %s4021_s15, 5  ;;  %s3450_s26 = sshll.u32 %s4021_s15, 1 }
  0x61   : > { %s582_s20 = scalar_lea.vmem %s3985_s14, %s2628_s18  ;;  %s587_s11 = scalar_lea.vmem %s3986_s7, %s3450_s26 }
  0x62   : > { %s591_s24 = scalar_lea.vmem %s3987_s16, %s3450_s26  ;;  %s599_s12 = scalar_lea.vmem %s3988_s0, %s3450_s26 }
  0x63   : > { %s3467_s15 = scalar_lea.vmem [#allocation12], %s2100_s1  ;;  %p2106_p1 = scmp.ne.s32.totalorder %s3989_s30, 0 }
  0x65   : > { %604 = sbr.rel (%p2106_p1) target bundleno = 111 (0x6f), region = 80 }
  0x6a   : > { %v3209_v0 = vmov 0.0  }
  0x6b   : > { %605 = vst [vmem:[#allocation2 + $0x10] sm:$0xff] %v3209_v0 }
  0x6c   : > { %606 = vst [vmem:[#allocation2] sm:$0xff] %v3209_v0 }
  0x6d   : > { %607 = vst [vmem:[#allocation2 + $0x18] sm:$0xff] %v3209_v0 }
  0x6e   : > { %608 = vst [vmem:[#allocation2 + $0x8] sm:$0xff] %v3209_v0 }
  0x6f PF: > { %v3470_v1 = vld [vmem:[%s582_s20] sm:$0xff]  ;;  %v3472_v2 = vld [vmem:[%s582_s20 + $0x8] sm:$0xff]  ;;  %v3476_v4 = vld [vmem:[%s582_s20 + $0x10] sm:$0xff]  ;;  %v3210_v7 = vmov 256.0  }
  0x70   : > { %v613_v3 = vadd.f32 %v3472_v2, %v3470_v1  ;;  %v3478_v5 = vld [vmem:[%s582_s20 + $0x18] sm:$0xff]  ;;  %2895 = vrcp.f32 %v3210_v7  ;;  %v2221_v11 = vld [vmem:[%s3420_s27 + $0xe0] sm:$0xf]  ;;  %v2659_v12 = vld [vmem:[%s3420_s27 + $0xec] sm:$0xf0] }
  0x71   : > { %v616_v6 = vadd.f32 %v3478_v5, %v3476_v4  ;;  %v2349_v13 = vld [vmem:[%s3420_s27 + $0x1e0] sm:$0xf]  ;;  %v2222_v14 = vor.u32 %v2659_v12, %v2221_v11  ;;  %v2691_v15 = vld [vmem:[%s3420_s27 + $0x1ec] sm:$0xf0]  ;;  %v2657_v16 = vld [vmem:[%s3420_s27 + $0xe4] sm:$0xf] }
  0x72   : > { %614 = vadd.xlane.f32.xlu0 %v613_v3  ;;  %v2223_v17 = vld [vmem:[%s3420_s27 + $0xf0] sm:$0xf0]  ;;  %v2350_v18 = vor.u32 %v2691_v15, %v2349_v13  ;;  %v2689_v20 = vld [vmem:[%s3420_s27 + $0x1e4] sm:$0xf]  ;;  %v2205_v22 = vld [vmem:[%s3420_s27 + $0xc0] sm:$0xf] }
  0x73   : > { %v2226_v19 = vor.u32 %v2657_v16, %v2223_v17  ;;  %v2351_v21 = vld [vmem:[%s3420_s27 + $0x1f0] sm:$0xf0]  ;;  %1087 = vmatpush.bf16.msra.mxu0 %v2222_v14  ;;  %v2655_v24 = vld [vmem:[%s3420_s27 + $0xcc] sm:$0xf0]  ;;  %v2333_v25 = vld [vmem:[%s3420_s27 + $0x1c0] sm:$0xf] }
  0x74   : > { %v2354_v23 = vor.u32 %v2689_v20, %v2351_v21  ;;  %v2687_v26 = vld [vmem:[%s3420_s27 + $0x1cc] sm:$0xf0]  ;;  %1101 = vmatpush.bf16.msra.mxu1 %v2350_v18  ;;  %v2206_v27 = vor.u32 %v2655_v24, %v2205_v22  ;;  %v2653_v29 = vld [vmem:[%s3420_s27 + $0xc4] sm:$0xf]  ;;  %v2207_v30 = vld [vmem:[%s3420_s27 + $0xd0] sm:$0xf0] }
  0x75   : > { %1115 = vmatpush.bf16.msra.mxu2 %v2226_v19  ;;  %v2334_v28 = vor.u32 %v2687_v26, %v2333_v25  ;;  %v2685_v31 = vld [vmem:[%s3420_s27 + $0x1c4] sm:$0xf]  ;;  %v2210_v33 = vor.u32 %v2653_v29, %v2207_v30  ;;  %v2335_v34 = vld [vmem:[%s3420_s27 + $0x1d0] sm:$0xf0]  ;;  %v2189_v52 = vld [vmem:[%s3420_s27 + $0xa0] sm:$0xf] }
  0x76   : > { %v2896_v8 = vpop.eup %2895  ;;  %1129 = vmatpush.bf16.msra.mxu3 %v2354_v23  ;;  %v2338_v35 = vor.u32 %v2685_v31, %v2335_v34  ;;  %v2651_v53 = vld [vmem:[%s3420_s27 + $0xac] sm:$0xf0]  ;;  %v2317_v54 = vld [vmem:[%s3420_s27 + $0x1a0] sm:$0xf]  ;;  %v2649_v57 = vld [vmem:[%s3420_s27 + $0xa4] sm:$0xf] }
  0x77   : > { %v620_v9 = vmul.f32 256.0, %v2896_v8  ;;  %1088 = vmatpush.bf16.msra.mxu0 %v2206_v27  ;;  %vm624_vm0 = vweird.f32 %v2896_v8  ;;  %v2190_v55 = vor.u32 %v2651_v53, %v2189_v52  ;;  %v2683_v56 = vld [vmem:[%s3420_s27 + $0x1ac] sm:$0xf0]  ;;  %v2191_v58 = vld [vmem:[%s3420_s27 + $0xb0] sm:$0xf0] }
  0x78   : > { %1102 = vmatpush.bf16.msra.mxu1 %v2334_v28  ;;  %v2318_v59 = vor.u32 %v2683_v56, %v2317_v54  ;;  %v2194_v60 = vor.u32 %v2649_v57, %v2191_v58  ;;  %v2681_v61 = vld [vmem:[%s3420_s27 + $0x1a4] sm:$0xf]  ;;  %v2319_v62 = vld [vmem:[%s3420_s27 + $0x1b0] sm:$0xf0]  ;;  %v2173_v0 = vld [vmem:[%s3420_s27 + $0x80] sm:$0xf] }
  0x79   : > { %v621_v10 = vsub.f32 1.0, %v620_v9  ;;  %1116 = vmatpush.bf16.msra.mxu2 %v2210_v33  ;;  %v2322_v63 = vor.u32 %v2681_v61, %v2319_v62  ;;  %v2647_v3 = vld [vmem:[%s3420_s27 + $0x8c] sm:$0xf0]  ;;  %v2645_v9 = vld [vmem:[%s3420_s27 + $0x84] sm:$0xf] }
  0x7a   : > { %617 = vadd.xlane.f32.xlu0 %v616_v6  ;;  %1130 = vmatpush.bf16.msra.mxu3 %v2338_v35  ;;  %v2301_v6 = vld [vmem:[%s3420_s27 + $0x180] sm:$0xf]  ;;  %v2174_v7 = vor.u32 %v2647_v3, %v2173_v0  ;;  %v2677_v13 = vld [vmem:[%s3420_s27 + $0x184] sm:$0xf]  ;;  %v2303_v14 = vld [vmem:[%s3420_s27 + $0x190] sm:$0xf0] }
  0x7b   : > { %v622_v32 = vmul.f32 %v2896_v8, %v621_v10  ;;  %1089 = vmatpush.bf16.msra.mxu0 %v2190_v55  ;;  %v2175_v10 = vld [vmem:[%s3420_s27 + $0x90] sm:$0xf0]  ;;  %v2306_v15 = vor.u32 %v2677_v13, %v2303_v14  ;;  %v2157_v16 = vld [vmem:[%s3420_s27 + $0x60] sm:$0xf]  ;;  %v2643_v17 = vld [vmem:[%s3420_s27 + $0x6c] sm:$0xf0] }
  0x7c   : > { %1103 = vmatpush.bf16.msra.mxu1 %v2318_v59  ;;  %v2178_v12 = vor.u32 %v2645_v9, %v2175_v10  ;;  %v2285_v18 = vld [vmem:[%s3420_s27 + $0x160] sm:$0xf]  ;;  %v2158_v19 = vor.u32 %v2643_v17, %v2157_v16  ;;  %v2675_v20 = vld [vmem:[%s3420_s27 + $0x16c] sm:$0xf0]  ;;  %v2641_v21 = vld [vmem:[%s3420_s27 + $0x64] sm:$0xf] }
  0x7d   : > { %v623_v36 = vadd.f32 %v2896_v8, %v622_v32  ;;  %1117 = vmatpush.bf16.msra.mxu2 %v2194_v60  ;;  %v2159_v22 = vld [vmem:[%s3420_s27 + $0x70] sm:$0xf0]  ;;  %v2286_v23 = vor.u32 %v2675_v20, %v2285_v18  ;;  %v2673_v25 = vld [vmem:[%s3420_s27 + $0x164] sm:$0xf]  ;;  %v2141_v28 = vld [vmem:[%s3420_s27 + $0x40] sm:$0xf] }
  0x7e   : > { %1131 = vmatpush.bf16.msra.mxu3 %v2322_v63  ;;  %v2162_v24 = vor.u32 %v2641_v21, %v2159_v22  ;;  %v2287_v26 = vld [vmem:[%s3420_s27 + $0x170] sm:$0xf0]  ;;  %v2639_v29 = vld [vmem:[%s3420_s27 + $0x4c] sm:$0xf0]  ;;  %v2269_v30 = vld [vmem:[%s3420_s27 + $0x140] sm:$0xf] }
  0x7f   : > { %v3498_v37 = vsel %vm624_vm0, %v2896_v8, %v623_v36  ;;  %v2679_v8 = vld [vmem:[%s3420_s27 + $0x18c] sm:$0xf0]  ;;  %1090 = vmatpush.bf16.msra.mxu0 %v2174_v7  ;;  %v2290_v27 = vor.u32 %v2673_v25, %v2287_v26  ;;  %v2142_v31 = vor.u32 %v2639_v29, %v2141_v28  ;;  %v2637_v33 = vld [vmem:[%s3420_s27 + $0x44] sm:$0xf]  ;;  %v2143_v34 = vld [vmem:[%s3420_s27 + $0x50] sm:$0xf0] }
  0x80   : > { %v2302_v11 = vor.u32 %v2679_v8, %v2301_v6  ;;  %v2671_v32 = vld [vmem:[%s3420_s27 + $0x14c] sm:$0xf0]  ;;  %v2146_v36 = vor.u32 %v2637_v33, %v2143_v34  ;;  %v2665_v54 = vld [vmem:[%s3420_s27 + $0x124] sm:$0xf]  ;;  %v2255_v55 = vld [vmem:[%s3420_s27 + $0x130] sm:$0xf0] }
  0x81   : > { %1118 = vmatpush.bf16.msra.mxu2 %v2178_v12  ;;  %v2270_v35 = vor.u32 %v2671_v32, %v2269_v30  ;;  %v2258_v56 = vor.u32 %v2665_v54, %v2255_v55  ;;  %v2109_v57 = vld [vmem:[%s3420_s27] sm:$0xf]  ;;  %v2631_v58 = vld [vmem:[%s3420_s27 + $0xc] sm:$0xf0]  ;;  %v2629_v62 = vld [vmem:[%s3420_s27 + $0x4] sm:$0xf] }
  0x82   : > { %1104 = vmatpush.bf16.msra.mxu1 %v2302_v11  ;;  %1132 = vmatpush.bf16.msra.mxu3 %v2306_v15  ;;  %v2237_v59 = vld [vmem:[%s3420_s27 + $0x100] sm:$0xf]  ;;  %v2110_v60 = vor.u32 %v2631_v58, %v2109_v57  ;;  %v2663_v61 = vld [vmem:[%s3420_s27 + $0x10c] sm:$0xf0]  ;;  %v2111_v63 = vld [vmem:[%s3420_s27 + $0x10] sm:$0xf0] }
  0x83   : > { %1091 = vmatpush.bf16.msra.mxu0 %v2158_v19  ;;  %v2238_v0 = vor.u32 %v2663_v61, %v2237_v59  ;;  %v2114_v3 = vor.u32 %v2629_v62, %v2111_v63  ;;  %v2661_v6 = vld [vmem:[%s3420_s27 + $0x104] sm:$0xf]  ;;  %v2239_v7 = vld [vmem:[%s3420_s27 + $0x110] sm:$0xf0]  ;;  %v2229_v8 = vld [vmem:[%s3420_s27 + $0xe8] sm:$0xf] }
  0x84   : > { %v2242_v9 = vor.u32 %v2661_v6, %v2239_v7  ;;  %v2660_v10 = vld [vmem:[%s3420_s27 + $0xf4] sm:$0xf0]  ;;  %v2357_v11 = vld [vmem:[%s3420_s27 + $0x1e8] sm:$0xf]  ;;  %v2658_v15 = vld [vmem:[%s3420_s27 + $0xec] sm:$0xf] }
  0x85   : > { %1119 = vmatpush.bf16.msra.mxu2 %v2162_v24  ;;  %v2692_v12 = vld [vmem:[%s3420_s27 + $0x1f4] sm:$0xf0]  ;;  %v2230_v13 = vor.u32 %v2660_v10, %v2229_v8  ;;  %v2231_v16 = vld [vmem:[%s3420_s27 + $0xf8] sm:$0xf0]  ;;  %v2690_v17 = vld [vmem:[%s3420_s27 + $0x1ec] sm:$0xf] }
  0x86   : > { %1105 = vmatpush.bf16.msra.mxu1 %v2286_v23  ;;  %1133 = vmatpush.bf16.msra.mxu3 %v2290_v27  ;;  %v2358_v14 = vor.u32 %v2692_v12, %v2357_v11  ;;  %v2234_v18 = vor.u32 %v2658_v15, %v2231_v16  ;;  %v2359_v19 = vld [vmem:[%s3420_s27 + $0x1f8] sm:$0xf0]  ;;  %v2213_v20 = vld [vmem:[%s3420_s27 + $0xc8] sm:$0xf]  ;;  %v2656_v21 = vld [vmem:[%s3420_s27 + $0xd4] sm:$0xf0] }
  0x87   : > { %1092 = vmatpush.bf16.msra.mxu0 %v2142_v31  ;;  %v2362_v22 = vor.u32 %v2690_v17, %v2359_v19  ;;  %v2214_v23 = vor.u32 %v2656_v21, %v2213_v20  ;;  %v2341_v24 = vld [vmem:[%s3420_s27 + $0x1c8] sm:$0xf]  ;;  %v2688_v25 = vld [vmem:[%s3420_s27 + $0x1d4] sm:$0xf0]  ;;  %v2654_v26 = vld [vmem:[%s3420_s27 + $0xcc] sm:$0xf] }
  0x88   : > { %v2342_v27 = vor.u32 %v2688_v25, %v2341_v24  ;;  %v2215_v28 = vld [vmem:[%s3420_s27 + $0xd8] sm:$0xf0]  ;;  %v2686_v29 = vld [vmem:[%s3420_s27 + $0x1cc] sm:$0xf]  ;;  %v2197_v33 = vld [vmem:[%s3420_s27 + $0xa8] sm:$0xf] }
  0x89   : > { %1120 = vmatpush.bf16.msra.mxu2 %v2146_v36  ;;  %v2343_v30 = vld [vmem:[%s3420_s27 + $0x1d8] sm:$0xf0]  ;;  %v2218_v31 = vor.u32 %v2654_v26, %v2215_v28  ;;  %v2652_v34 = vld [vmem:[%s3420_s27 + $0xb4] sm:$0xf0]  ;;  %v2678_v58 = vld [vmem:[%s3420_s27 + $0x18c] sm:$0xf] }
  0x8a   : > { %1106 = vmatpush.bf16.msra.mxu1 %v2270_v35  ;;  %v2346_v32 = vor.u32 %v2686_v29, %v2343_v30  ;;  %v2325_v35 = vld [vmem:[%s3420_s27 + $0x1a8] sm:$0xf]  ;;  %v2198_v36 = vor.u32 %v2652_v34, %v2197_v33  ;;  %v2680_v54 = vld [vmem:[%s3420_s27 + $0x194] sm:$0xf0]  ;;  %v2183_v57 = vld [vmem:[%s3420_s27 + $0x98] sm:$0xf0] }
  0x8b   : > { %v2311_v61 = vld [vmem:[%s3420_s27 + $0x198] sm:$0xf0]  ;;  %v2644_v6 = vld [vmem:[%s3420_s27 + $0x74] sm:$0xf0]  ;;  %v2293_v7 = vld [vmem:[%s3420_s27 + $0x168] sm:$0xf] }
  0x8c   : > { %v2642_v10 = vld [vmem:[%s3420_s27 + $0x6c] sm:$0xf]  ;;  %v2167_v11 = vld [vmem:[%s3420_s27 + $0x78] sm:$0xf0]  ;;  %v2149_v17 = vld [vmem:[%s3420_s27 + $0x48] sm:$0xf] }
  0x8d   : > { %v2674_v15 = vld [vmem:[%s3420_s27 + $0x16c] sm:$0xf]  ;;  %v2295_v16 = vld [vmem:[%s3420_s27 + $0x178] sm:$0xf0]  ;;  %v2640_v20 = vld [vmem:[%s3420_s27 + $0x54] sm:$0xf0] }
  0x8e   : > { %v2298_v19 = vor.u32 %v2674_v15, %v2295_v16  ;;  %v2277_v21 = vld [vmem:[%s3420_s27 + $0x148] sm:$0xf]  ;;  %v2638_v25 = vld [vmem:[%s3420_s27 + $0x4c] sm:$0xf]  ;;  %v2151_v26 = vld [vmem:[%s3420_s27 + $0x58] sm:$0xf0] }
  0x8f   : > { %v2154_v29 = vor.u32 %v2638_v25, %v2151_v26  ;;  %v2279_v30 = vld [vmem:[%s3420_s27 + $0x158] sm:$0xf0]  ;;  %v2636_v34 = vld [vmem:[%s3420_s27 + $0x34] sm:$0xf0] }
  0xe5   : > { %v615_v38 = vpop.xlane.xlu0 %614 }
  0xe6   : > { %v626_v39 = vmul.f32 %v3498_v37, %v615_v38  ;;  %v2669_v38 = vld [vmem:[%s3420_s27 + $0x144] sm:$0xf] }
  0xe8   : > { %v3502_v40 = vsub.f32 %v3470_v1, %v626_v39  ;;  %v3505_v41 = vsub.f32 %v3472_v2, %v626_v39  ;;  %v2271_v39 = vld [vmem:[%s3420_s27 + $0x150] sm:$0xf0] }
  0xea   : > { %v632_v42 = vmul.f32 %v3502_v40, %v3502_v40  ;;  %v633_v43 = vmul.f32 %v3505_v41, %v3505_v41 }
  0xec   : > { %v636_v44 = vadd.f32 %v633_v43, %v632_v42  ;;  %v2274_v42 = vor.u32 %v2669_v38, %v2271_v39  ;;  %v2125_v43 = vld [vmem:[%s3420_s27 + $0x20] sm:$0xf]  ;;  %v2684_v38 = vld [vmem:[%s3420_s27 + $0x1b4] sm:$0xf0]  ;;  %v2650_v39 = vld [vmem:[%s3420_s27 + $0xac] sm:$0xf] }
  0xed   : > { %v618_v45 = vpop.xlane.xlu0 %617 }
  0xee   : > { %v627_v46 = vmul.f32 %v3498_v37, %v618_v45  ;;  %637 = vadd.xlane.f32.xlu1 %v636_v44  ;;  %v2635_v44 = vld [vmem:[%s3420_s27 + $0x2c] sm:$0xf0]  ;;  %v2253_v45 = vld [vmem:[%s3420_s27 + $0x120] sm:$0xf]  ;;  %1134 = vmatpush.bf16.msra.mxu3 %v2274_v42  ;;  %v2199_v42 = vld [vmem:[%s3420_s27 + $0xb8] sm:$0xf0] }
  0xf0   : > { %v3513_v47 = vsub.f32 %v3476_v4, %v627_v46  ;;  %v3516_v48 = vsub.f32 %v3478_v5, %v627_v46  ;;  %v2126_v46 = vor.u32 %v2635_v44, %v2125_v43  ;;  %v2326_v43 = vor.u32 %v2684_v38, %v2325_v35  ;;  %v2261_v35 = vld [vmem:[%s3420_s27 + $0x128] sm:$0xf]  ;;  %v2634_v38 = vld [vmem:[%s3420_s27 + $0x2c] sm:$0xf] }
  0xf1   : > { %v2202_v44 = vor.u32 %v2650_v39, %v2199_v42  ;;  %v2135_v39 = vld [vmem:[%s3420_s27 + $0x38] sm:$0xf0] }
  0xf2   : > { %v634_v49 = vmul.f32 %v3513_v47, %v3513_v47  ;;  %v635_v50 = vmul.f32 %v3516_v48, %v3516_v48  ;;  %1093 = vmatpush.bf16.msra.mxu0 %v2126_v46  ;;  %1135 = vmatpush.bf16.msra.mxu3 %v2258_v56  ;;  %v2327_v46 = vld [vmem:[%s3420_s27 + $0x1b8] sm:$0xf0]  ;;  %v2646_v56 = vld [vmem:[%s3420_s27 + $0x8c] sm:$0xf] }
  0xf3   : > { %v2186_v63 = vor.u32 %v2646_v56, %v2183_v57  ;;  %v2630_v56 = vld [vmem:[%s3420_s27 + $0xc] sm:$0xf]  ;;  %v2119_v57 = vld [vmem:[%s3420_s27 + $0x18] sm:$0xf0] }
  0xf4   : > { %v639_v51 = vadd.f32 %v635_v50, %v634_v49  ;;  %v2667_v49 = vld [vmem:[%s3420_s27 + $0x12c] sm:$0xf0]  ;;  %v2633_v50 = vld [vmem:[%s3420_s27 + $0x24] sm:$0xf] }
  0xf5   : > { %v2254_v52 = vor.u32 %v2667_v49, %v2253_v45  ;;  %v2682_v45 = vld [vmem:[%s3420_s27 + $0x1ac] sm:$0xf]  ;;  %v2181_v49 = vld [vmem:[%s3420_s27 + $0x88] sm:$0xf] }
  0xf6   : > { %640 = vadd.xlane.f32.xlu1 %v639_v51  ;;  %v2127_v51 = vld [vmem:[%s3420_s27 + $0x30] sm:$0xf0]  ;;  %1094 = vmatpush.bf16.msra.mxu0 %v2110_v60 }
  0xf7   : > { %v2130_v53 = vor.u32 %v2633_v50, %v2127_v51  ;;  %1107 = vmatpush.bf16.msra.mxu1 %v2254_v52  ;;  %1136 = vmatpush.bf16.msra.mxu3 %v2242_v9  ;;  %v2330_v51 = vor.u32 %v2682_v45, %v2327_v46  ;;  %v2648_v52 = vld [vmem:[%s3420_s27 + $0x94] sm:$0xf0]  ;;  %v2666_v45 = vld [vmem:[%s3420_s27 + $0x12c] sm:$0xf]  ;;  %v2263_v46 = vld [vmem:[%s3420_s27 + $0x138] sm:$0xf0] }
  0xf8   : > { %v2182_v59 = vor.u32 %v2648_v52, %v2181_v49  ;;  %v2676_v9 = vld [vmem:[%s3420_s27 + $0x174] sm:$0xf0]  ;;  %v2117_v49 = vld [vmem:[%s3420_s27 + $0x8] sm:$0xf] }
  0xf9   : > { %1121 = vmatpush.bf16.msra.mxu2 %v2130_v53  ;;  %v2309_v53 = vld [vmem:[%s3420_s27 + $0x188] sm:$0xf] }
  0xfa   : > { %1143 = vmatpush.bf16.msrb.mxu0 %v2230_v13  ;;  %v2310_v60 = vor.u32 %v2680_v54, %v2309_v53  ;;  %v2294_v13 = vor.u32 %v2676_v9, %v2293_v7  ;;  %v2245_v52 = vld [vmem:[%s3420_s27 + $0x108] sm:$0xf]  ;;  %v2664_v53 = vld [vmem:[%s3420_s27 + $0x114] sm:$0xf0] }
  0xfb   : > { %1108 = vmatpush.bf16.msra.mxu1 %v2238_v0  ;;  %1185 = vmatpush.bf16.msrb.mxu3 %v2362_v22  ;;  %v2314_v0 = vor.u32 %v2678_v58, %v2311_v61  ;;  %v2672_v22 = vld [vmem:[%s3420_s27 + $0x154] sm:$0xf0]  ;;  %v2662_v58 = vld [vmem:[%s3420_s27 + $0x10c] sm:$0xf] }
  0xfc   : > { %v2278_v24 = vor.u32 %v2672_v22, %v2277_v21 }
  0xfd   : > { %1122 = vmatpush.bf16.msra.mxu2 %v2114_v3  ;;  %v2165_v3 = vld [vmem:[%s3420_s27 + $0x68] sm:$0xf] }
  0xfe   : > { %1144 = vmatpush.bf16.msrb.mxu0 %v2214_v23  ;;  %v2166_v8 = vor.u32 %v2644_v6, %v2165_v3  ;;  %v2150_v23 = vor.u32 %v2640_v20, %v2149_v17  ;;  %v2122_v3 = vor.u32 %v2630_v56, %v2119_v57  ;;  %v2389_v56 = vld [vmem:[%s3435_s2 + $0x30] sm:$0xf]  ;;  %v2700_v57 = vld [vmem:[%s3435_s2 + $0x34] sm:$0xf0] }
  0xff   : > { %1157 = vmatpush.bf16.msrb.mxu1 %v2358_v14  ;;  %1186 = vmatpush.bf16.msrb.mxu3 %v2346_v32  ;;  %v2170_v14 = vor.u32 %v2642_v10, %v2167_v11 }
 0x101   : > { %1171 = vmatpush.bf16.msrb.mxu2 %v2234_v18 }
 0x102   : > { %1145 = vmatpush.bf16.msrb.mxu0 %v2198_v36  ;;  %v2668_v36 = vld [vmem:[%s3420_s27 + $0x134] sm:$0xf0] }
 0x103   : > { %1158 = vmatpush.bf16.msrb.mxu1 %v2342_v27  ;;  %1187 = vmatpush.bf16.msrb.mxu3 %v2330_v51  ;;  %v2670_v27 = vld [vmem:[%s3420_s27 + $0x14c] sm:$0xf]  ;;  %v2632_v51 = vld [vmem:[%s3420_s27 + $0x14] sm:$0xf0] }
 0x104   : > { %v2282_v33 = vor.u32 %v2670_v27, %v2279_v30  ;;  %v2118_v61 = vor.u32 %v2632_v51, %v2117_v49  ;;  %v2421_v27 = vld [vmem:[%s3435_s2 + $0x70] sm:$0xf]  ;;  %v2702_v51 = vld [vmem:[%s3435_s2 + $0x44] sm:$0xf0] }
 0x105   : > { %1172 = vmatpush.bf16.msrb.mxu2 %v2218_v31  ;;  %v2133_v31 = vld [vmem:[%s3420_s27 + $0x28] sm:$0xf] }
 0x106   : > { %1146 = vmatpush.bf16.msrb.mxu0 %v2182_v59  ;;  %v2247_v59 = vld [vmem:[%s3420_s27 + $0x118] sm:$0xf0] }
 0x107   : > { %1159 = vmatpush.bf16.msrb.mxu1 %v2326_v43  ;;  %1188 = vmatpush.bf16.msrb.mxu3 %v2314_v0  ;;  %v2134_v43 = vor.u32 %v2636_v34, %v2133_v31  ;;  %v2250_v9 = vor.u32 %v2662_v58, %v2247_v59  ;;  %v2549_v58 = vld [vmem:[%s3435_s2 + $0x170] sm:$0xf]  ;;  %v2390_v59 = vor.u32 %v2700_v57, %v2389_v56  ;;  %v2723_v56 = vld [vmem:[%s3435_s2 + $0xf4] sm:$0xf]  ;;  %v2487_v57 = vld [vmem:[%s3435_s2 + $0xf8] sm:$0xf0] }
 0x109   : > { %1173 = vmatpush.bf16.msrb.mxu2 %v2202_v44  ;;  %v2262_v44 = vor.u32 %v2668_v36, %v2261_v35  ;;  %v2413_v35 = vld [vmem:[%s3435_s2 + $0x60] sm:$0xf]  ;;  %v2485_v36 = vld [vmem:[%s3435_s2 + $0xf0] sm:$0xf] }
 0x10a   : > { %1147 = vmatpush.bf16.msrb.mxu0 %v2166_v8  ;;  %v670_v8 = vld [vmem:[%s591_s24] sm:$0x3] }
 0x10b   : > { %1160 = vmatpush.bf16.msrb.mxu1 %v2310_v60  ;;  %1189 = vmatpush.bf16.msrb.mxu3 %v2298_v19  ;;  %v671_v11 = vadd.f32 1.0, %v670_v8  ;;  %v2541_v8 = vld [vmem:[%s3435_s2 + $0x160] sm:$0xf] }
 0x10d   : > { %1174 = vmatpush.bf16.msrb.mxu2 %v2186_v63  ;;  %v2246_v63 = vor.u32 %v2664_v53, %v2245_v52  ;;  %v673_v17 = vperm.slane %v671_v11, 0  ;;  %v2469_v53 = vld [vmem:[%s3435_s2 + $0xd0] sm:$0xf] }
 0x10e   : > { %1148 = vmatpush.bf16.msrb.mxu0 %v2150_v23 }
 0x10f   : > { %1161 = vmatpush.bf16.msrb.mxu1 %v2294_v13  ;;  %1190 = vmatpush.bf16.msrb.mxu3 %v2282_v33 }
 0x111   : > { %1175 = vmatpush.bf16.msrb.mxu2 %v2170_v14 }
 0x112   : > { %1149 = vmatpush.bf16.msrb.mxu0 %v2134_v43  ;;  %v2704_v43 = vld [vmem:[%s3435_s2 + $0x54] sm:$0xf0] }
 0x113   : > { %1162 = vmatpush.bf16.msrb.mxu1 %v2278_v24 }
 0x115   : > { %1176 = vmatpush.bf16.msrb.mxu2 %v2154_v29 }
 0x116   : > { %1150 = vmatpush.bf16.msrb.mxu0 %v2118_v61 }
 0x117   : > { %1163 = vmatpush.bf16.msrb.mxu1 %v2262_v44 }
 0x11b   : > { %1164 = vmatpush.bf16.msrb.mxu1 %v2246_v63  ;;  %v2461_v63 = vld [vmem:[%s3435_s2 + $0xc0] sm:$0xf] }
 0x161   : > { %v638_v50 = vpop.xlane.xlu1 %637 }
 0x162   : > { %v642_v55 = vmul.f32 %v638_v50, %v3498_v37  ;;  %v2138_v50 = vor.u32 %v2634_v38, %v2135_v39  ;;  %v2724_v38 = vld [vmem:[%s3435_s2 + $0xf4] sm:$0xf0] }
 0x163   : > { %v2486_v39 = vor.u32 %v2724_v38, %v2485_v36  ;;  %v2597_v36 = vld [vmem:[%s3435_s2 + $0x1d0] sm:$0xf]  ;;  %v2752_v38 = vld [vmem:[%s3435_s2 + $0x1d4] sm:$0xf0] }
 0x164   : > { %v3603_v62 = vadd.f32 1e-06, %v642_v55  ;;  %v2266_v55 = vor.u32 %v2666_v45, %v2263_v46  ;;  %1177 = vmatpush.bf16.msrb.mxu2 %v2138_v50  ;;  %v2477_v45 = vld [vmem:[%s3435_s2 + $0xe0] sm:$0xf]  ;;  %v2722_v46 = vld [vmem:[%s3435_s2 + $0xe4] sm:$0xf0] }
 0x165   : > { %v2478_v49 = vor.u32 %v2722_v46, %v2477_v45  ;;  %v2397_v50 = vld [vmem:[%s3435_s2 + $0x40] sm:$0xf]  ;;  %v2705_v46 = vld [vmem:[%s3435_s2 + $0x64] sm:$0xf] }
 0x166   : > { %2897 = vrsqrt.f32 %v3603_v62  ;;  %1191 = vmatpush.bf16.msrb.mxu3 %v2266_v55  ;;  %vm652_vm2 = vweird.f32 %v3603_v62  ;;  %v2398_v52 = vor.u32 %v2702_v51, %v2397_v50  ;;  %v2429_v51 = vld [vmem:[%s3435_s2 + $0x80] sm:$0xf] }
 0x168   : > { %1178 = vmatpush.bf16.msrb.mxu2 %v2122_v3 }
 0x169   : > { %v641_v12 = vpop.xlane.xlu1 %640 }
 0x16a   : > { %v643_v18 = vmul.f32 %v641_v12, %v3498_v37  ;;  %1192 = vmatpush.bf16.msrb.mxu3 %v2250_v9 }
 0x16c   : > { %v2898_v28 = vpop.eup %2897  ;;  %v3622_v37 = vadd.f32 1e-06, %v643_v18  ;;  %v674_v18 = vperm.slane %v671_v11, 1 }
 0x16d   : > { %v647_v32 = vmul.f32 %v2898_v28, %v3603_v62  ;;  %vm653_vm1 = vweird.f32 %v2898_v28  ;;  %v681_v62 = vld [vmem:[%s587_s11] sm:$0x3] }
 0x16e   : > { %2899 = vrsqrt.f32 %v3622_v37  ;;  %vm654_vm3 = vmor %vm652_vm2, %vm653_vm1  ;;  %vm662_vm5 = vweird.f32 %v3622_v37  ;;  %v683_v21 = vperm.slane %v681_v62, 0  ;;  %v684_v22 = vperm.slane %v681_v62, 1  ;;  %v2373_v62 = vld [vmem:[%s3435_s2 + $0x10] sm:$0xf] }
 0x16f   : > { %v648_v42 = vmul.f32 %v2898_v28, %v647_v32 }
 0x171   : > { %v649_v54 = vmul.f32 0.5, %v648_v42  ;;  %v2405_v42 = vld [vmem:[%s3435_s2 + $0x50] sm:$0xf] }
 0x172   : > { %v2406_v44 = vor.u32 %v2704_v43, %v2405_v42  ;;  %v2517_v42 = vld [vmem:[%s3435_s2 + $0x130] sm:$0xf]  ;;  %v2732_v43 = vld [vmem:[%s3435_s2 + $0x134] sm:$0xf0] }
 0x173   : > { %v650_v60 = vsub.f32 1.5, %v649_v54  ;;  %v2720_v54 = vld [vmem:[%s3435_s2 + $0xd4] sm:$0xf0]  ;;  %v2518_v45 = vor.u32 %v2732_v43, %v2517_v42  ;;  %v2717_v43 = vld [vmem:[%s3435_s2 + $0xc4] sm:$0xf] }
 0x174   : > { %v2900_v0 = vpop.eup %2899  ;;  %v2470_v55 = vor.u32 %v2720_v54, %v2469_v53  ;;  %v2589_v53 = vld [vmem:[%s3435_s2 + $0x1c0] sm:$0xf]  ;;  %v2744_v42 = vld [vmem:[%s3435_s2 + $0x194] sm:$0xf0] }
 0x175   : > { %v651_v6 = vmul.f32 %v2898_v28, %v650_v60  ;;  %v657_v7 = vmul.f32 %v2900_v0, %v3622_v37  ;;  %vm663_vm4 = vweird.f32 %v2900_v0  ;;  %v2740_v60 = vld [vmem:[%s3435_s2 + $0x174] sm:$0xf0] }
 0x176   : > { %vm664_vm6 = vmor %vm662_vm5, %vm663_vm4  ;;  %v2550_v61 = vor.u32 %v2740_v60, %v2549_v58  ;;  %v2509_v60 = vld [vmem:[%s3435_s2 + $0x120] sm:$0xf] }
 0x177   : > { %v658_v10 = vmul.f32 %v2900_v0, %v657_v7  ;;  %v655_v12 = vsel %vm654_vm3, %v2898_v28, %v651_v6  ;;  %v2708_v28 = vld [vmem:[%s3435_s2 + $0x74] sm:$0xf0]  ;;  %v2381_v6 = vld [vmem:[%s3435_s2 + $0x20] sm:$0xf]  ;;  %v2698_v7 = vld [vmem:[%s3435_s2 + $0x24] sm:$0xf0] }
 0x178   : > { %v666_v15 = vmul.f32 %v655_v12, %v3502_v40  ;;  %v667_v16 = vmul.f32 %v655_v12, %v3505_v41  ;;  %v2422_v34 = vor.u32 %v2708_v28, %v2421_v27  ;;  %v2382_v9 = vor.u32 %v2698_v7, %v2381_v6  ;;  %v2453_v12 = vld [vmem:[%s3435_s2 + $0xb0] sm:$0xf]  ;;  %v2365_v27 = vld [vmem:[%s3435_s2] sm:$0xf]  ;;  %v2694_v28 = vld [vmem:[%s3435_s2 + $0x4] sm:$0xf0] }
 0x179   : > { %v659_v13 = vmul.f32 0.5, %v658_v10  ;;  %v2738_v10 = vld [vmem:[%s3435_s2 + $0x164] sm:$0xf0]  ;;  %v2407_v6 = vld [vmem:[%s3435_s2 + $0x58] sm:$0xf0] }
 0x17a   : > { %v677_v23 = vmul.f32 %v673_v17, %v666_v15  ;;  %v678_v24 = vmul.f32 %v674_v18, %v667_v16  ;;  %v2542_v11 = vor.u32 %v2738_v10, %v2541_v8  ;;  %v2756_v16 = vld [vmem:[%s3435_s2 + $0x1f4] sm:$0xf0]  ;;  %v2581_v8 = vld [vmem:[%s3435_s2 + $0x1b0] sm:$0xf] }
 0x17b   : > { %v660_v14 = vsub.f32 1.5, %v659_v13  ;;  %v2716_v13 = vld [vmem:[%s3435_s2 + $0xb4] sm:$0xf0] }
 0x17c   : > { %v687_v29 = vadd.f32 %v683_v21, %v677_v23  ;;  %v688_v31 = vadd.f32 %v684_v22, %v678_v24  ;;  %v2454_v15 = vor.u32 %v2716_v13, %v2453_v12  ;;  %v2605_v23 = vld [vmem:[%s3435_s2 + $0x1e0] sm:$0xf]  ;;  %v2479_v12 = vld [vmem:[%s3435_s2 + $0xe8] sm:$0xf0] }
 0x17d   : > { %v661_v19 = vmul.f32 %v2900_v0, %v660_v14  ;;  %v2613_v14 = vld [vmem:[%s3435_s2 + $0x1f0] sm:$0xf] }
 0x17f   : > { %v665_v20 = vsel %vm664_vm6, %v2900_v0, %v661_v19  ;;  %v2718_v0 = vld [vmem:[%s3435_s2 + $0xc4] sm:$0xf0] }
 0x180   : > { %v668_v40 = vmul.f32 %v665_v20, %v3513_v47  ;;  %v669_v41 = vmul.f32 %v665_v20, %v3516_v48  ;;  %v2706_v47 = vld [vmem:[%s3435_s2 + $0x64] sm:$0xf0]  ;;  %v2462_v3 = vor.u32 %v2718_v0, %v2461_v63  ;;  %v2533_v20 = vld [vmem:[%s3435_s2 + $0x150] sm:$0xf] }
 0x181   : > { %v2414_v48 = vor.u32 %v2706_v47, %v2413_v35  ;;  %v2437_v35 = vld [vmem:[%s3435_s2 + $0x90] sm:$0xf]  ;;  %v2712_v47 = vld [vmem:[%s3435_s2 + $0x94] sm:$0xf0] }
 0x182   : > { %v679_v25 = vmul.f32 %v673_v17, %v668_v40  ;;  %v680_v26 = vmul.f32 %v674_v18, %v669_v41  ;;  %v2614_v17 = vor.u32 %v2756_v16, %v2613_v14  ;;  %v2696_v18 = vld [vmem:[%s3435_s2 + $0x14] sm:$0xf0]  ;;  %v2445_v40 = vld [vmem:[%s3435_s2 + $0xa0] sm:$0xf]  ;;  %v2714_v41 = vld [vmem:[%s3435_s2 + $0xa4] sm:$0xf0] }
 0x183   : > { %v2374_v19 = vor.u32 %v2696_v18, %v2373_v62  ;;  %v2446_v24 = vor.u32 %v2714_v41, %v2445_v40  ;;  %v2501_v16 = vld [vmem:[%s3435_s2 + $0x110] sm:$0xf]  ;;  %v2746_v40 = vld [vmem:[%s3435_s2 + $0x1a4] sm:$0xf0] }
 0x184   : > { %v689_v30 = vadd.f32 %v683_v21, %v679_v25  ;;  %v690_v37 = vadd.f32 %v684_v22, %v680_v26  ;;  %v2736_v21 = vld [vmem:[%s3435_s2 + $0x154] sm:$0xf0]  ;;  %v2754_v25 = vld [vmem:[%s3435_s2 + $0x1e4] sm:$0xf0] }
 0x185   : > { %v2534_v22 = vor.u32 %v2736_v21, %v2533_v20  ;;  %v2606_v26 = vor.u32 %v2754_v25, %v2605_v23  ;;  %v2399_v20 = vld [vmem:[%s3435_s2 + $0x48] sm:$0xf0]  ;;  %v2471_v25 = vld [vmem:[%s3435_s2 + $0xd8] sm:$0xf0] }
 0x186   : > { %v691_v32 = vpack.c.bf16 %v689_v30, %v687_v29  ;;  %v692_v33 = vpack.c.bf16 %v690_v37, %v688_v31  ;;  %v2525_v29 = vld [vmem:[%s3435_s2 + $0x140] sm:$0xf]  ;;  %v2366_v30 = vor.u32 %v2694_v28, %v2365_v27  ;;  %v2734_v31 = vld [vmem:[%s3435_s2 + $0x144] sm:$0xf0]  ;;  %v2707_v37 = vld [vmem:[%s3435_s2 + $0x74] sm:$0xf] }
 0x187   : > { %v2493_v28 = vld [vmem:[%s3435_s2 + $0x100] sm:$0xf] }
 0x188   : > { %1095 = vmatmul.bf16.vlgmr.msra.gmra.mxu0 %v691_v32  ;;  %1109 = vmatmul.bf16.vlgmr.msra.gmra.mxu1 %v692_v33 }
 0x189   : > { %1123 = vmatmul.bf16.vlgmr.msra.gmra.mxu2 %v691_v32  ;;  %1137 = vmatmul.bf16.vlgmr.msra.gmra.mxu3 %v692_v33 }
 0x18a   : > { %1681 = vmatpush.bf16.msra.mxu0 %v2422_v34  ;;  %1695 = vmatpush.bf16.msra.mxu1 %v2486_v39  ;;  %v2598_v39 = vor.u32 %v2752_v38, %v2597_v36 }
 0x18b   : > { %1709 = vmatpush.bf16.msra.mxu2 %v2550_v61  ;;  %1723 = vmatpush.bf16.msra.mxu3 %v2614_v17  ;;  %v2730_v61 = vld [vmem:[%s3435_s2 + $0x124] sm:$0xf0]  ;;  %v2728_v17 = vld [vmem:[%s3435_s2 + $0x114] sm:$0xf0] }
 0x18c   : > { %v2510_v0 = vor.u32 %v2730_v61, %v2509_v60  ;;  %v2502_v18 = vor.u32 %v2728_v17, %v2501_v16  ;;  %v2543_v60 = vld [vmem:[%s3435_s2 + $0x168] sm:$0xf0]  ;;  %v2557_v61 = vld [vmem:[%s3435_s2 + $0x180] sm:$0xf] }
 0x18e   : > { %1682 = vmatpush.bf16.msra.mxu0 %v2414_v48  ;;  %1696 = vmatpush.bf16.msra.mxu1 %v2478_v49  ;;  %v2438_v48 = vor.u32 %v2712_v47, %v2437_v35  ;;  %v2415_v49 = vld [vmem:[%s3435_s2 + $0x68] sm:$0xf0] }
 0x18f   : > { %1710 = vmatpush.bf16.msra.mxu2 %v2542_v11  ;;  %1724 = vmatpush.bf16.msra.mxu3 %v2606_v26  ;;  %v2418_v50 = vor.u32 %v2705_v46, %v2415_v49  ;;  %v2721_v11 = vld [vmem:[%s3435_s2 + $0xe4] sm:$0xf] }
 0x192   : > { %1683 = vmatpush.bf16.msra.mxu0 %v2406_v44  ;;  %1697 = vmatpush.bf16.msra.mxu1 %v2470_v55  ;;  %v3709_v44 = vld [vmem:[%s3427_s3] sm:$0xf]  ;;  %v2750_v55 = vld [vmem:[%s3435_s2 + $0x1c4] sm:$0xf0]  ;;  %s3992_s3 = sld [smem:[#allocation21_spill]] }
 0x193   : > { %1711 = vmatpush.bf16.msra.mxu2 %v2534_v22  ;;  %1725 = vmatpush.bf16.msra.mxu3 %v2598_v39  ;;  %v2590_v58 = vor.u32 %v2750_v55, %v2589_v53  ;;  %v759_v63 = vperm.slane %v3709_v44, 0  ;;  %v2573_v22 = vld [vmem:[%s3435_s2 + $0x1a0] sm:$0xf]  ;;  %v760_v26 = vperm.slane %v3709_v44, 1  ;;  %v2565_v39 = vld [vmem:[%s3435_s2 + $0x190] sm:$0xf] }
 0x194   : > { %v2574_v23 = vor.u32 %v2746_v40, %v2573_v22  ;;  %v2697_v55 = vld [vmem:[%s3435_s2 + $0x24] sm:$0xf]  ;;  %v761_v16 = vperm.slane %v3709_v44, 2 }
 0x196   : > { %1684 = vmatpush.bf16.msra.mxu0 %v2398_v52  ;;  %1698 = vmatpush.bf16.msra.mxu1 %v2462_v3  ;;  %v2710_v52 = vld [vmem:[%s3435_s2 + $0x84] sm:$0xf0]  ;;  %v2703_v3 = vld [vmem:[%s3435_s2 + $0x54] sm:$0xf] }
 0x197   : > { %v2430_v54 = vor.u32 %v2710_v52, %v2429_v51  ;;  %1726 = vmatpush.bf16.msra.mxu3 %v2590_v58  ;;  %v2410_v7 = vor.u32 %v2703_v3, %v2407_v6  ;;  %v2463_v51 = vld [vmem:[%s3435_s2 + $0xc8] sm:$0xf0] }
 0x198   : > { %1151 = vmatmul.bf16.vlgmr.msrb.gmra.mxu0 %v691_v32  ;;  %1165 = vmatmul.bf16.vlgmr.msrb.gmra.mxu1 %v692_v33  ;;  %p2619_p3 = scmp.ne.s32.totalorder %s3992_s3, 1 }
 0x199   : > { %1179 = vmatmul.bf16.vlgmr.msrb.gmra.mxu2 %v691_v32  ;;  %1193 = vmatmul.bf16.vlgmr.msrb.gmra.mxu3 %v692_v33  ;;  %v2423_v32 = vld [vmem:[%s3435_s2 + $0x78] sm:$0xf0]  ;;  %v2526_v33 = vor.u32 %v2734_v31, %v2525_v29  ;;  %v2726_v29 = vld [vmem:[%s3435_s2 + $0x104] sm:$0xf0] }
 0x19a   : > { %1685 = vmatpush.bf16.msra.mxu0 %v2390_v59  ;;  %1699 = vmatpush.bf16.msra.mxu1 %v2454_v15  ;;  %v2426_v34 = vor.u32 %v2707_v37, %v2423_v32  ;;  %v2490_v59 = vor.u32 %v2723_v56, %v2487_v57  ;;  %v2482_v15 = vor.u32 %v2721_v11, %v2479_v12  ;;  %v2699_v37 = vld [vmem:[%s3435_s2 + $0x34] sm:$0xf]  ;;  %v2391_v32 = vld [vmem:[%s3435_s2 + $0x38] sm:$0xf0]  ;;  %v2383_v56 = vld [vmem:[%s3435_s2 + $0x28] sm:$0xf0] }
 0x19b   : > { %1712 = vmatpush.bf16.msra.mxu2 %v2526_v33  ;;  %v2494_v31 = vor.u32 %v2726_v29, %v2493_v28  ;;  %v2739_v33 = vld [vmem:[%s3435_s2 + $0x174] sm:$0xf]  ;;  %v2394_v36 = vor.u32 %v2699_v37, %v2391_v32  ;;  %v2737_v57 = vld [vmem:[%s3435_s2 + $0x164] sm:$0xf] }
 0x19c   : > { %v2546_v6 = vor.u32 %v2737_v57, %v2543_v60 }
 0x19e   : > { %1686 = vmatpush.bf16.msra.mxu0 %v2382_v9  ;;  %1700 = vmatpush.bf16.msra.mxu1 %v2446_v24  ;;  %v2748_v9 = vld [vmem:[%s3435_s2 + $0x1b4] sm:$0xf0]  ;;  %v2719_v24 = vld [vmem:[%s3435_s2 + $0xd4] sm:$0xf] }
 0x19f   : > { %1713 = vmatpush.bf16.msra.mxu2 %v2518_v45  ;;  %v2582_v10 = vor.u32 %v2748_v9, %v2581_v8  ;;  %v2474_v27 = vor.u32 %v2719_v24, %v2471_v25  ;;  %v2715_v8 = vld [vmem:[%s3435_s2 + $0xb4] sm:$0xf]  ;;  %v2455_v9 = vld [vmem:[%s3435_s2 + $0xb8] sm:$0xf0]  ;;  %v2713_v25 = vld [vmem:[%s3435_s2 + $0xa4] sm:$0xf] }
 0x1a0   : > { %v2458_v12 = vor.u32 %v2715_v8, %v2455_v9  ;;  %v2535_v24 = vld [vmem:[%s3435_s2 + $0x158] sm:$0xf0] }
 0x1a1   : > { %1727 = vmatpush.bf16.msra.mxu3 %v2582_v10  ;;  %v2755_v10 = vld [vmem:[%s3435_s2 + $0x1f4] sm:$0xf]  ;;  %v2519_v8 = vld [vmem:[%s3435_s2 + $0x138] sm:$0xf0] }
 0x1a2   : > { %1687 = vmatpush.bf16.msra.mxu0 %v2374_v19  ;;  %1701 = vmatpush.bf16.msra.mxu1 %v2438_v48  ;;  %v2701_v19 = vld [vmem:[%s3435_s2 + $0x44] sm:$0xf] }
 0x1a3   : > { %1714 = vmatpush.bf16.msra.mxu2 %v2510_v0  ;;  %v2402_v21 = vor.u32 %v2701_v19, %v2399_v20  ;;  %v2742_v0 = vld [vmem:[%s3435_s2 + $0x184] sm:$0xf0]  ;;  %v2375_v19 = vld [vmem:[%s3435_s2 + $0x18] sm:$0xf0]  ;;  %v2735_v20 = vld [vmem:[%s3435_s2 + $0x154] sm:$0xf] }
 0x1a4   : > { %v2538_v37 = vor.u32 %v2735_v20, %v2535_v24  ;;  %v2591_v20 = vld [vmem:[%s3435_s2 + $0x1c8] sm:$0xf0] }
 0x1a5   : > { %1728 = vmatpush.bf16.msra.mxu3 %v2574_v23 }
 0x1a6   : > { %1688 = vmatpush.bf16.msra.mxu0 %v2366_v30  ;;  %1702 = vmatpush.bf16.msra.mxu1 %v2430_v54  ;;  %v2466_v54 = vor.u32 %v2717_v43, %v2463_v51  ;;  %v2751_v51 = vld [vmem:[%s3435_s2 + $0x1d4] sm:$0xf] }
 0x1a7   : > { %1715 = vmatpush.bf16.msra.mxu2 %v2502_v18  ;;  %v2695_v18 = vld [vmem:[%s3435_s2 + $0x14] sm:$0xf] }
 0x1a8   : > { %v2378_v23 = vor.u32 %v2695_v18, %v2375_v19 }
 0x1aa   : > { %1737 = vmatpush.bf16.msrb.mxu0 %v2426_v34  ;;  %1751 = vmatpush.bf16.msrb.mxu1 %v2490_v59  ;;  %v2551_v34 = vld [vmem:[%s3435_s2 + $0x178] sm:$0xf0]  ;;  %v2386_v59 = vor.u32 %v2697_v55, %v2383_v56 }
 0x1ab   : > { %v2554_v38 = vor.u32 %v2739_v33, %v2551_v34  ;;  %1716 = vmatpush.bf16.msra.mxu2 %v2494_v31  ;;  %v2753_v33 = vld [vmem:[%s3435_s2 + $0x1e4] sm:$0xf]  ;;  %v2607_v34 = vld [vmem:[%s3435_s2 + $0x1e8] sm:$0xf0]  ;;  %v2599_v55 = vld [vmem:[%s3435_s2 + $0x1d8] sm:$0xf0] }
 0x1ac   : > { %v2602_v60 = vor.u32 %v2751_v51, %v2599_v55  ;;  %v2503_v51 = vld [vmem:[%s3435_s2 + $0x118] sm:$0xf0] }
 0x1ae   : > { %1738 = vmatpush.bf16.msrb.mxu0 %v2418_v50  ;;  %1752 = vmatpush.bf16.msrb.mxu1 %v2482_v15  ;;  %v2566_v50 = vor.u32 %v2744_v42, %v2565_v39  ;;  %v2527_v39 = vld [vmem:[%s3435_s2 + $0x148] sm:$0xf0] }
 0x1af   : > { %1765 = vmatpush.bf16.msrb.mxu2 %v2554_v38  ;;  %v2367_v38 = vld [vmem:[%s3435_s2 + $0x8] sm:$0xf0] }
 0x1b0   : > { %1729 = vmatpush.bf16.msra.mxu3 %v2566_v50  ;;  %v2439_v50 = vld [vmem:[%s3435_s2 + $0x98] sm:$0xf0] }
 0x1b2   : > { %1739 = vmatpush.bf16.msrb.mxu0 %v2410_v7  ;;  %1753 = vmatpush.bf16.msrb.mxu1 %v2474_v27  ;;  %v2558_v7 = vor.u32 %v2742_v0, %v2557_v61  ;;  %v2447_v27 = vld [vmem:[%s3435_s2 + $0xa8] sm:$0xf0] }
 0x1b3   : > { %1766 = vmatpush.bf16.msrb.mxu2 %v2546_v6  ;;  %v2450_v32 = vor.u32 %v2713_v25, %v2447_v27 }
 0x1b4   : > { %1730 = vmatpush.bf16.msra.mxu3 %v2558_v7  ;;  %v2731_v7 = vld [vmem:[%s3435_s2 + $0x134] sm:$0xf] }
 0x1b6   : > { %1740 = vmatpush.bf16.msrb.mxu0 %v2402_v21  ;;  %1754 = vmatpush.bf16.msrb.mxu1 %v2466_v54 }
 0x1b7   : > { %1767 = vmatpush.bf16.msrb.mxu2 %v2538_v37 }
 0x1ba   : > { %1741 = vmatpush.bf16.msrb.mxu0 %v2394_v36  ;;  %1755 = vmatpush.bf16.msrb.mxu1 %v2458_v12  ;;  %v2610_v36 = vor.u32 %v2753_v33, %v2607_v34  ;;  %v2522_v12 = vor.u32 %v2731_v7, %v2519_v8  ;;  %v2583_v34 = vld [vmem:[%s3435_s2 + $0x1b8] sm:$0xf0]  ;;  %v2743_v7 = vld [vmem:[%s3435_s2 + $0x194] sm:$0xf] }
 0x1bb   : > { %v2567_v8 = vld [vmem:[%s3435_s2 + $0x198] sm:$0xf0] }
 0x1be   : > { %1742 = vmatpush.bf16.msrb.mxu0 %v2386_v59  ;;  %1756 = vmatpush.bf16.msrb.mxu1 %v2450_v32  ;;  %v762_v59 = vperm.slane %v3709_v44, 3 }
 0x1c2   : > { %1743 = vmatpush.bf16.msrb.mxu0 %v2378_v23 }
 0x205   : > { %v1096_v13 = vpop.f32.mrf.mxu0  ;;  %v1110_v14 = vpop.f32.mrf.mxu1 }
 0x206   : > { %v1097_v62 = vadd.f32 %v1096_v13, %v759_v63  ;;  %v2615_v13 = vld [vmem:[%s3435_s2 + $0x1f8] sm:$0xf0] }
 0x207   : > { %v2618_v17 = vor.u32 %v2755_v10, %v2615_v13  ;;  %v2709_v13 = vld [vmem:[%s3435_s2 + $0x84] sm:$0xf] }
 0x208   : > { %v3734_v41 = vadd.f32 %v1110_v14, %v1097_v62 }
 0x209   : > { %1779 = vmatpush.bf16.msrb.mxu3 %v2618_v17 }
 0x20a   : > { %v1207_v30 = vmul.f32 0.044715, %v3734_v41  ;;  %v1199_v37 = vmul.f32 0.5, %v3734_v41 }
 0x20c   : > { %v1215_v35 = vmul.f32 %v1207_v30, %v3734_v41  ;;  %v1124_v47 = vpop.f32.mrf.mxu2  ;;  %v1138_v48 = vpop.f32.mrf.mxu3 }
 0x20d   : > { %v1125_v45 = vadd.f32 %v1124_v47, %v760_v26  ;;  %v1098_v46 = vpop.f32.mrf.mxu0  ;;  %v1112_v49 = vpop.f32.mrf.mxu1  ;;  %1780 = vmatpush.bf16.msrb.mxu3 %v2610_v36 }
 0x20e   : > { %v1223_v52 = vmul.f32 %v1215_v35, %v3734_v41  ;;  %v1099_v53 = vadd.f32 %v1098_v46, %v759_v63  ;;  %v2693_v35 = vld [vmem:[%s3435_s2 + $0x4] sm:$0xf] }
 0x20f   : > { %v3757_v58 = vadd.f32 %v1138_v48, %v1125_v45  ;;  %v2370_v45 = vor.u32 %v2693_v35, %v2367_v38 }
 0x210   : > { %v1231_v3 = vadd.f32 %v1223_v52, %v3734_v41  ;;  %v3763_v63 = vadd.f32 %v1112_v49, %v1099_v53  ;;  %v2711_v49 = vld [vmem:[%s3435_s2 + $0x94] sm:$0xf] }
 0x211   : > { %v1208_v11 = vmul.f32 0.044715, %v3757_v58  ;;  %v2442_v54 = vor.u32 %v2711_v49, %v2439_v50  ;;  %1744 = vmatpush.bf16.msrb.mxu0 %v2370_v45  ;;  %1781 = vmatpush.bf16.msrb.mxu3 %v2602_v60  ;;  %v2727_v50 = vld [vmem:[%s3435_s2 + $0x114] sm:$0xf]  ;;  %v2725_v60 = vld [vmem:[%s3435_s2 + $0x104] sm:$0xf] }
 0x212   : > { %v1239_v14 = vmul.f32 0.7978846, %v1231_v3  ;;  %v1211_v15 = vmul.f32 0.044715, %v3763_v63  ;;  %v1203_v45 = vmul.f32 0.5, %v3763_v63  ;;  %v2506_v55 = vor.u32 %v2727_v50, %v2503_v51 }
 0x213   : > { %v1216_v62 = vmul.f32 %v1208_v11, %v3757_v58  ;;  %1757 = vmatpush.bf16.msrb.mxu1 %v2442_v54  ;;  %v1200_v44 = vmul.f32 0.5, %v3757_v58 }
 0x214   : > { %2901 = vtanh.f32 %v1239_v14  ;;  %v1219_v21 = vmul.f32 %v1211_v15, %v3763_v63  ;;  %v1126_v22 = vpop.f32.mrf.mxu2  ;;  %v1140_v40 = vpop.f32.mrf.mxu3  ;;  %v2431_v14 = vld [vmem:[%s3435_s2 + $0x88] sm:$0xf0]  ;;  %v2749_v15 = vld [vmem:[%s3435_s2 + $0x1c4] sm:$0xf] }
 0x215   : > { %v1224_v28 = vmul.f32 %v1216_v62, %v3757_v58  ;;  %v1127_v29 = vadd.f32 %v1126_v22, %v760_v26  ;;  %v1152_v30 = vpop.f32.mrf.mxu0  ;;  %v1166_v31 = vpop.f32.mrf.mxu1  ;;  %v2733_v26 = vld [vmem:[%s3435_s2 + $0x144] sm:$0xf]  ;;  %v2434_v19 = vor.u32 %v2709_v13, %v2431_v14  ;;  %v2511_v22 = vld [vmem:[%s3435_s2 + $0x128] sm:$0xf0]  ;;  %v2594_v25 = vor.u32 %v2749_v15, %v2591_v20 }
 0x216   : > { %v1227_v47 = vmul.f32 %v1219_v21, %v3763_v63  ;;  %v1153_v48 = vadd.f32 %v1152_v30, %v761_v16  ;;  %v2530_v46 = vor.u32 %v2733_v26, %v2527_v39  ;;  %v2729_v21 = vld [vmem:[%s3435_s2 + $0x124] sm:$0xf]  ;;  %v3825_v30 = vld [vmem:[%s3433_s29] sm:$0xf] }
 0x217   : > { %v1232_v42 = vadd.f32 %v1224_v28, %v3757_v58  ;;  %v3793_v43 = vadd.f32 %v1140_v40, %v1127_v29  ;;  %1758 = vmatpush.bf16.msrb.mxu1 %v2434_v19  ;;  %1782 = vmatpush.bf16.msrb.mxu3 %v2594_v25  ;;  %v1273_v39 = vperm.slane %v3825_v30, 0  ;;  %v2741_v58 = vld [vmem:[%s3435_s2 + $0x184] sm:$0xf] }
 0x218   : > { %v1235_v52 = vadd.f32 %v1227_v47, %v3763_v63  ;;  %v3799_v53 = vadd.f32 %v1166_v31, %v1153_v48  ;;  %1768 = vmatpush.bf16.msrb.mxu2 %v2530_v46  ;;  %v2514_v31 = vor.u32 %v2729_v21, %v2511_v22  ;;  %v1274_v22 = vperm.slane %v3825_v30, 1 }
 0x219   : > { %v1240_v56 = vmul.f32 0.7978846, %v1232_v42  ;;  %v1212_v57 = vmul.f32 0.044715, %v3793_v43 }
 0x21a   : > { %v2902_v61 = vpop.eup %2901  ;;  %v1243_v0 = vmul.f32 0.7978846, %v1235_v52  ;;  %v1209_v3 = vmul.f32 0.044715, %v3799_v53 }
 0x21b   : > { %v1220_v6 = vmul.f32 %v1212_v57, %v3793_v43  ;;  %v1255_v24 = vadd.f32 1.0, %v2902_v61  ;;  %v2575_v57 = vld [vmem:[%s3435_s2 + $0x1a8] sm:$0xf0] }
 0x21c   : > { %2903 = vtanh.f32 %v1243_v0  ;;  %v1217_v9 = vmul.f32 %v1209_v3, %v3799_v53  ;;  %v1180_v10 = vpop.f32.mrf.mxu2  ;;  %v1194_v11 = vpop.f32.mrf.mxu3  ;;  %1769 = vmatpush.bf16.msrb.mxu2 %v2522_v12 }
 0x21d   : > { %2905 = vtanh.f32 %v1240_v56  ;;  %v1228_v17 = vmul.f32 %v1220_v6, %v3793_v43  ;;  %v1181_v62 = vadd.f32 %v1180_v10, %v762_v59  ;;  %v1154_v18 = vpop.f32.mrf.mxu0  ;;  %v1168_v29 = vpop.f32.mrf.mxu1  ;;  %v1263_v41 = vmul.f32 %v1255_v24, %v1199_v37  ;;  %v2745_v56 = vld [vmem:[%s3435_s2 + $0x1a4] sm:$0xf]  ;;  %v2495_v6 = vld [vmem:[%s3435_s2 + $0x108] sm:$0xf0] }
 0x21e   : > { %v1225_v40 = vmul.f32 %v1217_v9, %v3799_v53  ;;  %v1155_v23 = vadd.f32 %v1154_v18, %v761_v16  ;;  %v2747_v16 = vld [vmem:[%s3435_s2 + $0x1b4] sm:$0xf]  ;;  %v2578_v3 = vor.u32 %v2745_v56, %v2575_v57 }
 0x21f   : > { %v1236_v27 = vadd.f32 %v1228_v17, %v3793_v43  ;;  %v3822_v28 = vadd.f32 %v1194_v11, %v1181_v62  ;;  %v2586_v48 = vor.u32 %v2747_v16, %v2583_v34  ;;  %v1281_v11 = vmul.f32 %v1273_v39, %v1263_v41 }
 0x220   : > { %v1233_v32 = vadd.f32 %v1225_v40, %v3799_v53  ;;  %v3829_v33 = vadd.f32 %v1168_v29, %v1155_v23  ;;  %1770 = vmatpush.bf16.msrb.mxu2 %v2514_v31  ;;  %v2498_v17 = vor.u32 %v2725_v60, %v2495_v6  ;;  %v2570_v62 = vor.u32 %v2743_v7, %v2567_v8  ;;  %v2559_v29 = vld [vmem:[%s3435_s2 + $0x188] sm:$0xf0] }
 0x221   : > { %v1244_v35 = vmul.f32 0.7978846, %v1236_v27  ;;  %v1210_v47 = vmul.f32 0.044715, %v3822_v28  ;;  %1783 = vmatpush.bf16.msrb.mxu3 %v2586_v48  ;;  %v1204_v40 = vmul.f32 0.5, %v3793_v43  ;;  %v1275_v41 = vperm.slane %v3825_v30, 2 }
 0x222   : > { %v2904_v36 = vpop.eup %2903  ;;  %v1241_v38 = vmul.f32 0.7978846, %v1233_v32  ;;  %v1213_v26 = vmul.f32 0.044715, %v3829_v33  ;;  %v2562_v32 = vor.u32 %v2741_v58, %v2559_v29 }
 0x223   : > { %v2906_v42 = vpop.eup %2905  ;;  %2907 = vtanh.f32 %v1244_v35  ;;  %v1218_v46 = vmul.f32 %v1210_v47, %v3822_v28  ;;  %v1259_v49 = vadd.f32 1.0, %v2904_v36  ;;  %v1201_v36 = vmul.f32 0.5, %v3799_v53 }
 0x224   : > { %v1221_v52 = vmul.f32 %v1213_v26, %v3829_v33  ;;  %v1182_v54 = vpop.f32.mrf.mxu2  ;;  %2909 = vtanh.f32 %v1241_v38  ;;  %v1196_v10 = vpop.f32.mrf.mxu3  ;;  %v1256_v12 = vadd.f32 1.0, %v2906_v42  ;;  %1771 = vmatpush.bf16.msrb.mxu2 %v2506_v55  ;;  %v1205_v42 = vmul.f32 0.5, %v3829_v33 }
 0x225   : > { %v1226_v63 = vmul.f32 %v1218_v46, %v3822_v28  ;;  %v1183_v61 = vadd.f32 %v1182_v54, %v762_v59  ;;  %v1267_v0 = vmul.f32 %v1259_v49, %v1203_v45  ;;  %1784 = vmatpush.bf16.msrb.mxu3 %v2578_v3  ;;  %v1202_v54 = vmul.f32 0.5, %v3822_v28 }
 0x226   : > { %v1229_v9 = vmul.f32 %v1221_v52, %v3829_v33  ;;  %v1264_v25 = vmul.f32 %v1256_v12, %v1200_v44  ;;  %v1289_v12 = vld [vmem:[#allocation2 + $0x10] sm:$0xff] }
 0x227   : > { %v1234_v13 = vadd.f32 %v1226_v63, %v3822_v28  ;;  %v1197_v14 = vadd.f32 %v1196_v10, %v1183_v61  ;;  %v1285_v15 = vmul.f32 %v1273_v39, %v1267_v0  ;;  %v1276_v63 = vperm.slane %v3825_v30, 3 }
 0x228   : > { %v1237_v59 = vadd.f32 %v1229_v9, %v3829_v33  ;;  %1772 = vmatpush.bf16.msrb.mxu2 %v2498_v17  ;;  %v1282_v34 = vmul.f32 %v1274_v22, %v1264_v25 }
 0x229   : > { %v2908_v18 = vpop.eup %2907  ;;  %v1242_v19 = vmul.f32 0.7978846, %v1234_v13  ;;  %v1214_v20 = vmul.f32 0.044715, %v1197_v14  ;;  %v1293_v21 = vpack.c.bf16 %v1285_v15, %v1281_v11  ;;  %1785 = vmatpush.bf16.msrb.mxu3 %v2570_v62  ;;  %v1206_v53 = vmul.f32 0.5, %v1197_v14  ;;  %v1291_v62 = vld [vmem:[#allocation2 + $0x18] sm:$0xff] }
 0x22a   : > { %v1245_v23 = vmul.f32 0.7978846, %v1237_v59  ;;  %v1260_v24 = vadd.f32 1.0, %v2908_v18  ;;  %v2910_v31 = vpop.eup %2909 }
 0x22b   : > { %v1222_v27 = vmul.f32 %v1214_v20, %v1197_v14  ;;  %1689 = vmatmul.bf16.vlgmr.msra.gmra.mxu0 %v1293_v21  ;;  %v1257_v48 = vadd.f32 1.0, %v2910_v31 }
 0x22c   : > { %2911 = vtanh.f32 %v1245_v23  ;;  %v1268_v37 = vmul.f32 %v1260_v24, %v1204_v40  ;;  %v1290_v24 = vld [vmem:[#allocation2] sm:$0xff] }
 0x22d   : > { %2913 = vtanh.f32 %v1242_v19  ;;  %v1230_v16 = vmul.f32 %v1222_v27, %v1197_v14  ;;  %1786 = vmatpush.bf16.msrb.mxu3 %v2562_v32  ;;  %v1265_v46 = vmul.f32 %v1257_v48, %v1201_v36 }
 0x22e   : > { %v1286_v35 = vmul.f32 %v1274_v22, %v1268_v37 }
 0x22f   : > { %v1238_v47 = vadd.f32 %v1230_v16, %v1197_v14  ;;  %v1283_v51 = vmul.f32 %v1275_v41, %v1265_v46 }
 0x230   : > { %v1294_v43 = vpack.c.bf16 %v1286_v35, %v1282_v34  ;;  %v1292_v34 = vld [vmem:[#allocation2 + $0x8] sm:$0xff] }
 0x231   : > { %v1246_v38 = vmul.f32 0.7978846, %v1238_v47 }
 0x232   : > { %v2912_v26 = vpop.eup %2911  ;;  %1703 = vmatmul.bf16.vlgmr.msra.gmra.mxu1 %v1294_v43 }
 0x233   : > { %v2914_v39 = vpop.eup %2913  ;;  %2915 = vtanh.f32 %v1246_v38  ;;  %v1261_v45 = vadd.f32 1.0, %v2912_v26 }
 0x234   : > { %v1258_v50 = vadd.f32 1.0, %v2914_v39 }
 0x235   : > { %v1269_v49 = vmul.f32 %v1261_v45, %v1205_v42 }
 0x236   : > { %v1266_v60 = vmul.f32 %v1258_v50, %v1202_v54 }
 0x237   : > { %v1287_v52 = vmul.f32 %v1275_v41, %v1269_v49 }
 0x238   : > { %v1284_v33 = vmul.f32 %v1276_v63, %v1266_v60 }
 0x239   : > { %v2916_v55 = vpop.eup %2915  ;;  %v1295_v56 = vpack.c.bf16 %v1287_v52, %v1283_v51 }
 0x23a   : > { %v1262_v57 = vadd.f32 1.0, %v2916_v55 }
 0x23b   : > { %1717 = vmatmul.bf16.vlgmr.msra.gmra.mxu2 %v1295_v56  ;;  %1745 = vmatmul.bf16.vlgmr.msrb.gmra.mxu0 %v1293_v21 }
 0x23c   : > { %v1270_v61 = vmul.f32 %v1262_v57, %v1206_v53 }
 0x23e   : > { %v1288_v0 = vmul.f32 %v1276_v63, %v1270_v61 }
 0x240   : > { %v1296_v3 = vpack.c.bf16 %v1288_v0, %v1284_v33 }
 0x242   : > { %1731 = vmatmul.bf16.vlgmr.msra.gmra.mxu3 %v1296_v3  ;;  %1759 = vmatmul.bf16.vlgmr.msrb.gmra.mxu1 %v1294_v43 }
 0x24b   : > { %1773 = vmatmul.bf16.vlgmr.msrb.gmra.mxu2 %v1295_v56 }
 0x252   : > { %1787 = vmatmul.bf16.vlgmr.msrb.gmra.mxu3 %v1296_v3 }
 0x2a8   : > { %v1690_v7 = vpop.f32.mrf.mxu0 }
 0x2af   : > { %v1704_v6 = vpop.f32.mrf.mxu1 }
 0x2b0   : > { %v1705_v8 = vadd.f32 %v1704_v6, %v1690_v7  ;;  %v1692_v11 = vpop.f32.mrf.mxu0 }
 0x2b7   : > { %v1706_v9 = vpop.f32.mrf.mxu1 }
 0x2b8   : > { %v1707_v17 = vadd.f32 %v1706_v9, %v1692_v11  ;;  %v1746_v20 = vpop.f32.mrf.mxu0 }
 0x2be   : > { %v1718_v28 = vpop.f32.mrf.mxu2 }
 0x2bf   : > { %v1719_v10 = vadd.f32 %v1718_v28, %v1705_v8  ;;  %v1760_v59 = vpop.f32.mrf.mxu1 }
 0x2c0   : > { %v1761_v40 = vadd.f32 %v1760_v59, %v1746_v20  ;;  %v1748_v31 = vpop.f32.mrf.mxu0 }
 0x2c5   : > { %v1732_v13 = vpop.f32.mrf.mxu3 }
 0x2c6   : > { %v1733_v30 = vadd.f32 %v1732_v13, %v1719_v10  ;;  %v1720_v14 = vpop.f32.mrf.mxu2 }
 0x2c7   : > { %v1721_v44 = vadd.f32 %v1720_v14, %v1707_v17  ;;  %v1762_v58 = vpop.f32.mrf.mxu1 }
 0x2c8   : > { %v1793_v15 = vadd.f32 %v1733_v30, %v1289_v12  ;;  %v1763_v32 = vadd.f32 %v1762_v58, %v1748_v31 }
 0x2ca   : > { %1797 = vst [vmem:[#allocation2 + $0x10] sm:$0xff] %v1793_v15 }
 0x2cd   : > { %v1734_v18 = vpop.f32.mrf.mxu3 }
 0x2ce   : > { %v1735_v19 = vadd.f32 %v1734_v18, %v1721_v44  ;;  %v1774_v21 = vpop.f32.mrf.mxu2 }
 0x2cf   : > { %v1775_v23 = vadd.f32 %v1774_v21, %v1761_v40 }
 0x2d0   : > { %v1795_v22 = vadd.f32 %v1735_v19, %v1291_v62 }
 0x2d2   : > { %1799 = vst [vmem:[#allocation2 + $0x18] sm:$0xff] %v1795_v22 }
 0x2d5   : > { %v1788_v25 = vpop.f32.mrf.mxu3 }
 0x2d6   : > { %v1789_v27 = vadd.f32 %v1788_v25, %v1775_v23  ;;  %v1776_v37 = vpop.f32.mrf.mxu2 }
 0x2d7   : > { %v1777_v16 = vadd.f32 %v1776_v37, %v1763_v32 }
 0x2d8   : > { %v1794_v29 = vadd.f32 %v1789_v27, %v1290_v24 }
 0x2da   : > { %1798 = vst [vmem:[#allocation2] sm:$0xff] %v1794_v29 }
 0x2dd   : > { %v1790_v35 = vpop.f32.mrf.mxu3 }
 0x2de   : > { %v1791_v47 = vadd.f32 %v1790_v35, %v1777_v16  ;;  %1804 = sbr.rel (%p2619_p3) target bundleno = 753 (0x2f1), region = 84 }
 0x2e0   : > { %v1796_v48 = vadd.f32 %v1791_v47, %v1292_v34 }
 0x2e2   : > { %1800 = vst [vmem:[#allocation2 + $0x8] sm:$0xff] %v1796_v48 }
 0x2e3   : > { %v1805_v43 = vld [vmem:[%s599_s12] sm:$0x3]  ;;  %v1806_v36 = vld [vmem:[#allocation2 + $0x10] sm:$0xff]  ;;  %v1808_v46 = vld [vmem:[#allocation2 + $0x18] sm:$0xff] }
 0x2e4   : > { %v1810_v38 = vld [vmem:[#allocation11] sm:$0x3]  ;;  %v1821_v41 = vperm.slane %v1805_v43, 0  ;;  %v1807_v39 = vld [vmem:[#allocation2] sm:$0xff]  ;;  %v1822_v45 = vperm.slane %v1805_v43, 1 }
 0x2e5   : > { %v1812_v26 = vperm.slane %v1810_v38, 0  ;;  %v1813_v42 = vperm.slane %v1810_v38, 1 }
 0x2e7   : > { %v1816_v50 = vadd.f32 %v1812_v26, %v1806_v36  ;;  %v1817_v51 = vadd.f32 %v1813_v42, %v1807_v39  ;;  %v1818_v52 = vadd.f32 %v1812_v26, %v1808_v46 }
 0x2e9   : > { %v1809_v49 = vld [vmem:[#allocation2 + $0x8] sm:$0xff]  ;;  %v1825_v55 = vmul.f32 %v1821_v41, %v1816_v50  ;;  %v1826_v56 = vmul.f32 %v1822_v45, %v1817_v51  ;;  %v1827_v53 = vmul.f32 %v1821_v41, %v1818_v52 }
 0x2ea   : > { %v1819_v54 = vadd.f32 %v1813_v42, %v1809_v49 }
 0x2eb   : > { %v1829_v60 = vadd.f32 %v1825_v55, %v3470_v1  ;;  %v1830_v63 = vadd.f32 %v1826_v56, %v3472_v2  ;;  %v1831_v61 = vadd.f32 %v1827_v53, %v3476_v4 }
 0x2ec   : > { %v1828_v57 = vmul.f32 %v1822_v45, %v1819_v54 }
 0x2ed   : > { %1833 = vst [vmem:[%s3467_s15] sm:$0xff] %v1829_v60 }
 0x2ee   : > { %v1832_v33 = vadd.f32 %v1828_v57, %v3478_v5  ;;  %1834 = vst [vmem:[%s3467_s15 + $0x8] sm:$0xff] %v1830_v63 }
 0x2ef   : > { %1835 = vst [vmem:[%s3467_s15 + $0x10] sm:$0xff] %v1831_v61 }
 0x2f0   : > { %1836 = vst [vmem:[%s3467_s15 + $0x18] sm:$0xff] %v1832_v33 }
 0x2f1 PF: > { %s3994_s26 = sld [smem:[#allocation22_spill]]  ;;  %s1853_s16 = sshll.u32 %s3467_s15, 4  ;;  %s1854_s16 = int_to_ptr.vmem [resolvable:$true] %s1853_s16 }
 0x2f2   : > { %s3996_s11 = sld [smem:[#allocation37_spill]]  ;;  %s3998_s22 = sand.u32 1, %s3165_s10  }
 0x2f3   : > { %s1838_s25 = scalar_lea.sflag [#allocation5], %s3998_s22 }
 0x2f7   : > { %s2757_s28 = sshll.u32 %s3994_s26, 5 }
 0x2f8   : > { %s3997_s8 = smov %s3996_s11  ;;  %s1852_s4 = scalar_lea.hbm %s3996_s11, %s2757_s28 }
 0x2f9   : > { %s1855_s24 = sshll.u32 %s1852_s4, 4  ;;  %s3087_s18 = scalar_lea.hbm %s3997_s8, 64  ;;  %s1856_s24 = int_to_ptr.hbm [resolvable:$true] %s1855_s24 }
 0x2fa   : > { %s3081_s0 = sshra.s32 %s1856_s24, 4  ;;  %s3082_s0 = int_to_ptr.hbm [resolvable:$true] %s3081_s0 }
 0x2fb   : > { %s3083_s12 = scalar_lea.hbm %s3082_s0, 32  ;;  %p3088_p5 = scmp.lt.s32.totalorder %s3082_s0, %s3997_s8 }
 0x2fc   : > { %p3084_p0 = scmp.ne.s32.totalorder %s3082_s0, %s3083_s12  ;;  %p3089_p6 = scmp.lt.s32.totalorder %s3087_s18, %s3083_s12 }
 0x2fe   : > { %p3085_p2 = pnand %p3084_p0, %p3334_p7  ;;  %p3090_p8 = por %p3089_p6, %p3088_p5 }
 0x300   : > { %p3086_p4 = pneg %p3085_p2 }
 0x302   : > { %p3091_p10 = pnand %p3090_p8, %p3086_p4 }
 0x304   : > { %3094 = shalt.err (!%p3091_p10)
}
 0x305   : > { %s3211_s15 = smov 256   ;;  %s3212_s9 = smov 16  }
 0x306   : > { %2770 = dma.vmem_to_hbm [thread:$0]  (%p3334_p7), %s1854_s16, 512, %s1856_s24, %s1838_s25, %s3211_s15, %s3211_s15, %s3212_s9  }
 0x307 PF: > { %s3999_s3 = sld [smem:[#allocation18_spill]]  ;;  %p2796_p12 = scmp.ge.s32.totalorder %s3201_s19, 2 }
 0x309   : > { %p2790_p13 = pnand %p2796_p12, %p3339_p9 }
 0x30b   : > { %p2791_p11 = pneg %p2790_p13 }
 0x30d   : > { %s1870_s2 = sand.u32 1, %s3999_s3  }
 0x30e   : > { %s1871_s14 = scalar_lea.sflag [#allocation5], %s1870_s2 }
 0x30f   : > { %3156 = dma.done.wait (%p2791_p11), %s1871_s14, 512  }
 0x310   : > { %3158 = vsyncadd (%p2791_p11), %s1871_s14, 4294966784  ;;  %s31_s19 = sadd.s32 1, %s3201_s19   ;;  %s4001_s26 = sld [smem:[#allocation19_spill]] }
 0x311   : > { %p28_p1 = scmp.ge.s32.totalorder %s31_s19, 6   ;;  %s4002_s11 = sld [smem:[#allocation29_spill]] }
 0x312   : > { %s4003_s20 = sld [smem:[#allocation20_spill]]  ;;  %s4008_s30 = smov %s3165_s10 }
 0x313   : > { %s4004_s14 = sld [smem:[#allocation28_spill]]  ;;  %s4010_s12 = smov %s3177_s13 }
 0x314   : > { %s4005_s16 = sld [smem:[#allocation23_spill]]  ;;  %s4012_s15 = smov %s3193_s17 }
 0x315   : > { %s4006_s28 = sld [smem:[#allocation26_spill]] }
 0x316   : > { %s4007_s18 = sld [smem:[#allocation27_spill]]  ;;  %s4009_s10 = smov %s4001_s26 }
 0x317   :  { %30 = sbr.rel (!%p28_p1) target bundleno = 22 (0x16), region = 162 }
 0x318   : > { %s4011_s13 = smov %s4003_s20 }
 0x31b   : > { %s4013_s17 = smov %s4006_s28 }
 0x31c   :  { %1877 = vsyncpa [#allocation4], 1 }
 0x31d   :  { %1879 = vsyncpa [#allocation4 + $0x1], 1 }
 0x31e   :  { %1880 = vsyncpa [#allocation7], 1 }
 0x31f   :  { %1882 = vsyncpa [#allocation7 + $0x1], 1 }
 0x320   :  { %1883 = vsyncpa [#allocation10], 1 }
 0x321   :  { %1885 = vsyncpa [#allocation10 + $0x1], 1 }
 0x322   :  { %1886 = vsyncpa [#allocation5], 1 }
 0x323   :  { %1888 = vsyncpa [#allocation5 + $0x1], 1 }

</bundles_post_ra>
